<compile_context>
chip_gen: v6e
topology: v6e:2x2x1
jax: 0.10.0
libtpu: 0.0.40
codegen_flags: <defaults>
</compile_context>

<pallas_src>
import functools

import jax
import jax.numpy as jnp
import numpy as np
from jax.experimental import pallas as pl
from jax.experimental.pallas import tpu as pltpu

# Sublane-window offsets (7*a + b) used to build conv taps in-kernel.
_C1_OFFS = (0, 1, 7, 8)                       # a, b in {0,1}
_C2_OFFS = (0, 1, 2, 7, 8, 9, 14, 15, 16)     # a, b in {0,1,2}
_FC1_CHUNK = 64                               # per-position fc1 output chunk (>= 50)


def _placement_conv1():
    """T1[g, kh, kw, off_idx, plane]: tap placement for the packed conv1 matrix."""
    t = np.zeros((16, 5, 5, 4, 16), np.float32)
    for d1y in range(2):
        for d1x in range(2):
            for rho in range(2):
                for sig in range(2):
                    g = (2 * d1y + d1x) * 4 + (2 * rho + sig)
                    for kh in range(5):
                        for kw in range(5):
                            ah, bh = divmod(2 * rho + d1y + kh, 4)
                            aw, bw = divmod(2 * sig + d1x + kw, 4)
                            t[g, kh, kw, 2 * ah + aw, 4 * bh + bw] = 1.0
    return t


def _placement_conv2():
    """T2[g, kh, kw, off_idx, plane]: tap placement for the packed conv2 matrix."""
    t = np.zeros((4, 5, 5, 9, 4), np.float32)
    for d2y in range(2):
        for d2x in range(2):
            g = 2 * d2y + d2x
            for kh in range(5):
                for kw in range(5):
                    ah, rho = divmod(d2y + kh, 2)
                    aw, sig = divmod(d2x + kw, 2)
                    t[g, kh, kw, 3 * ah + aw, 2 * rho + sig] = 1.0
    return t


_T1 = _placement_conv1()
_T2 = _placement_conv2()


# ----------------------------------------------------------------------------
# Fused Pallas kernel: whole CNNMnist forward for one batch block.
# ----------------------------------------------------------------------------
def _cnn_fused_kernel(xq_ref, w1p_ref, b1_ref, w2p_ref, b2_ref,
                      wcat_ref, fb1_ref, wf2_ref, fb2_ref, out_ref):
    f32 = jnp.float32
    bf16 = jnp.bfloat16
    tb = xq_ref.shape[0]
    cl = xq_ref.shape[2]                                   # 16*C lanes

    # ---- conv1 + 2x2 max-pool + bias + ReLU (free dim = tb*48) --------------
    xq = xq_ref[...].astype(bf16)                          # (tb, 56, 16C)
    w1p = w1p_ref[...]                                     # (4, 16C, 160) bf16
    c1 = None
    for o_idx, off in enumerate(_C1_OFFS):
        win = xq[:, off:off + 48, :].reshape(tb * 48, cl)  # leading-dim collapse
        d = jnp.dot(win, w1p[o_idx], preferred_element_type=f32)
        c1 = d if c1 is None else c1 + d                   # (tb*48, 160)
    # lane blocks of 40 = the four 2x2 pool-window taps -> elementwise max.
    m1 = jnp.maximum(jnp.maximum(c1[:, 0:40], c1[:, 40:80]),
                     jnp.maximum(c1[:, 80:120], c1[:, 120:160]))
    y1 = jnp.maximum(m1 + b1_ref[...], 0.0)                # (tb*48, 40) f32
    y1 = y1.astype(bf16).reshape(tb, 48, 40)

    # ---- conv2 (Dropout2d = identity in eval) + pool + bias + ReLU ----------
    w2p = w2p_ref[...]                                     # (9, 40, 80) bf16
    c2 = None
    for o_idx, off in enumerate(_C2_OFFS):
        win = y1[:, off:off + 32, :].reshape(tb * 32, 40)
        d = jnp.dot(win, w2p[o_idx], preferred_element_type=f32)
        c2 = d if c2 is None else c2 + d                   # (tb*32, 80)
    m2 = jnp.maximum(jnp.maximum(c2[:, 0:20], c2[:, 20:40]),
                     jnp.maximum(c2[:, 40:60], c2[:, 60:80]))
    y2 = jnp.maximum(m2 + b2_ref[...], 0.0).astype(bf16)   # (tb*32, 20)

    # ---- fc1: ONE matmul over channels, then 16 static slice-adds over the
    #      valid spatial slots (position-dependent weights live in the columns).
    z = jnp.dot(y2, wcat_ref[...], preferred_element_type=f32)   # (tb*32, 1024)
    z = z.reshape(tb, 32, 16 * _FC1_CHUNK)
    h = None
    for qv in range(16):
        qi, qj = divmod(qv, 4)
        piece = z[:, 7 * qi + qj, qv * _FC1_CHUNK:(qv + 1) * _FC1_CHUNK]
        h = piece if h is None else h + piece              # (tb, 64)
    h = jnp.maximum(h + fb1_ref[...], 0.0).astype(bf16)
    # TODO(synk): F.dropout(training=True) would need pltpu.prng_* masking;
    # eval-mode semantics (identity) are implemented.

    # ---- fc2, 128 output lanes (lane-dense store; host slices to num_classes)
    out_ref[...] = jnp.dot(h, wf2_ref[...], preferred_element_type=f32) + fb2_ref[...]


# ----------------------------------------------------------------------------
# One-time host-side weight packing (hoisted out of the forward pass).
# ----------------------------------------------------------------------------
def prepare_params(params):
    (w1, b1, w2, b2, fw1, fb1, fw2, fb2) = params
    O1, C = int(w1.shape[0]), int(w1.shape[1])
    O2 = int(w2.shape[0])
    NC = int(fw2.shape[0])
    assert (O1, O2) == (10, 20) and fw1.shape == (50, 320) and NC <= 128
    f32, bf16 = jnp.float32, jnp.bfloat16

    # conv1: placement einsum, split by tap-offset block, transposed for (x @ W).
    w1_all = jnp.einsum('gklof,nckl->gnofc', _T1, w1.astype(f32))
    w1_all = w1_all.reshape(16 * O1, 4 * 16 * C)
    w1p = w1_all.reshape(16 * O1, 4, 16 * C).transpose(1, 2, 0).astype(bf16)  # (4,16C,160)
    b1r = jnp.tile(b1.astype(f32), 4).reshape(1, 4 * O1)                      # (1,40)

    # conv2: same, 9 offset blocks of K=40 each.
    w2_all = jnp.einsum('gklof,nckl->gnofc', _T2, w2.astype(f32))
    w2_all = w2_all.reshape(4 * O2, 9 * 4 * O1)
    w2p = w2_all.reshape(4 * O2, 9, 4 * O1).transpose(1, 2, 0).astype(bf16)   # (9,40,80)
    b2r = b2.astype(f32).reshape(1, O2)                                       # (1,20)

    # fc1: columns = (valid 4x4 spatial slot qv, feature f padded 50->64).
    wcat = fw1.astype(f32).reshape(50, 20, 16).transpose(1, 2, 0)             # (ch,qv,f)
    wcat = jnp.pad(wcat, ((0, 0), (0, 0), (0, _FC1_CHUNK - 50)))
    wcat = wcat.reshape(20, 16 * _FC1_CHUNK).astype(bf16)                     # (20,1024)
    fb1p = jnp.pad(fb1.astype(f32), (0, _FC1_CHUNK - 50)).reshape(1, _FC1_CHUNK)

    # fc2: zero-padded to 128 output lanes (and padded contraction rows).
    wf2p = jnp.pad(fw2.astype(f32).T,
                   ((0, _FC1_CHUNK - 50), (0, 128 - NC))).astype(bf16)        # (64,128)
    fb2p = jnp.pad(fb2.astype(f32), (0, 128 - NC)).reshape(1, 128)
    return (w1p, b1r, w2p, b2r, wcat, fb1p, wf2p, fb2p)


def _round_up(n, m):
    return ((n + m - 1) // m) * m


# ----------------------------------------------------------------------------
# Wrapper: host-side parity layout of the image + pallas_call.
# ----------------------------------------------------------------------------
def cnn_mnist_forward(x, packed, *, num_classes, block_b=64):
    """Forward pass equivalent to CNNMnist.forward (eval mode). x is NCHW f32."""
    (w1p, b1r, w2p, b2r, wcat, fb1p, wf2p, fb2p) = packed
    B, C, H, W = x.shape
    assert (H, W) == (28, 28), "CNNMnist (fc1=320) pins 28x28 inputs"
    assert w1p.shape == (4, 16 * C, 160), "packed conv1 weights mismatch input channels"
    assert num_classes <= 128

    block_b = max(8, min(int(block_b), _round_up(B, 8)))
    assert block_b % 8 == 0
    bp = _round_up(B, block_b)

    x = x.astype(jnp.float32)
    if bp != B:
        x = jnp.pad(x, ((0, bp - B), (0, 0), (0, 0), (0, 0)))

    # mod-4 spatial parity split (pure permutation, positions on sublanes):
    #   xq[b, 7*i + j, (4*bh + bw)*C + c] = x[b, c, 4*i + bh, 4*j + bw]
    xq = x.reshape(bp, C, 7, 4, 7, 4).transpose(0, 2, 4, 3, 5, 1)
    xq = xq.reshape(bp, 49, 16 * C)
    xq = jnp.pad(xq, ((0, 0), (0, 7), (0, 0)))              # 49 -> 56 positions

    out = pl.pallas_call(
        _cnn_fused_kernel,
        out_shape=jax.ShapeDtypeStruct((bp, 128), jnp.float32),
        grid=(bp // block_b,),
        in_specs=[
            pl.BlockSpec((block_b, 56, 16 * C), lambda i: (i, 0, 0)),
            pl.BlockSpec((4, 16 * C, 160), lambda i: (0, 0, 0)),
            pl.BlockSpec((1, 40), lambda i: (0, 0)),
            pl.BlockSpec((9, 40, 80), lambda i: (0, 0, 0)),
            pl.BlockSpec((1, 20), lambda i: (0, 0)),
            pl.BlockSpec((20, 16 * _FC1_CHUNK), lambda i: (0, 0)),
            pl.BlockSpec((1, _FC1_CHUNK), lambda i: (0, 0)),
            pl.BlockSpec((_FC1_CHUNK, 128), lambda i: (0, 0)),
            pl.BlockSpec((1, 128), lambda i: (0, 0)),
        ],
        out_specs=pl.BlockSpec((block_b, 128), lambda i: (i, 0)),
        compiler_params=pltpu.CompilerParams(
            dimension_semantics=("parallel",),
            vmem_limit_bytes=48 * 1024 * 1024),
    )(xq, w1p, b1r, w2p, b2r, wcat, fb1p, wf2p, fb2p)
    return out[:B, :num_classes]


# ----------------------------------------------------------------------------
# Pure-JAX reference (matches PyTorch eval-mode semantics)
# ----------------------------------------------------------------------------
def ref_forward(x, params):
    (w1, b1, w2, b2, fw1, fb1, fw2, fb2) = params
    dn = ("NCHW", "OIHW", "NCHW")
    hi = jax.lax.Precision.HIGHEST

    y = jax.lax.conv_general_dilated(x, w1, (1, 1), "VALID",
                                     dimension_numbers=dn, precision=hi)
    y = y + b1[None, :, None, None]
    y = jax.lax.reduce_window(y, -jnp.inf, jax.lax.max, (1, 1, 2, 2), (1, 1, 2, 2), "VALID")
    y = jnp.maximum(y, 0.0)

    y = jax.lax.conv_general_dilated(y, w2, (1, 1), "VALID",
                                     dimension_numbers=dn, precision=hi)
    y = y + b2[None, :, None, None]
    y = jax.lax.reduce_window(y, -jnp.inf, jax.lax.max, (1, 1, 2, 2), (1, 1, 2, 2), "VALID")
    y = jnp.maximum(y, 0.0)

    y = y.reshape(y.shape[0], -1)
    y = jnp.maximum(jnp.dot(y, fw1.T, precision=hi) + fb1, 0.0)
    return jnp.dot(y, fw2.T, precision=hi) + fb2


# ----------------------------------------------------------------------------
# Deterministic parameter init (PyTorch-default-style uniform bounds)
# ----------------------------------------------------------------------------
def init_params(key, num_channels=1, num_classes=10):
    ks = jax.random.split(key, 8)

    def u(k, shape, fan_in):
        bound = 1.0 / np.sqrt(fan_in)
        return jax.random.uniform(k, shape, jnp.float32, -bound, bound)

    w1 = u(ks[0], (10, num_channels, 5, 5), num_channels * 25)
    b1 = u(ks[1], (10,), num_channels * 25)
    w2 = u(ks[2], (20, 10, 5, 5), 10 * 25)
    b2 = u(ks[3], (20,), 10 * 25)
    fw1 = u(ks[4], (50, 320), 320)
    fb1 = u(ks[5], (50,), 320)
    fw2 = u(ks[6], (num_classes, 50), 50)
    fb2 = u(ks[7], (num_classes,), 50)
    return (w1, b1, w2, b2, fw1, fb1, fw2, fb2)


def _run_case(key, batch, num_channels, num_classes, block_b):
    kx, kp = jax.random.split(key)
    x = jax.random.normal(kx, (batch, num_channels, 28, 28), jnp.float32)
    params = init_params(kp, num_channels=num_channels, num_classes=num_classes)
    packed = prepare_params(params)                 # one-time packing, hoisted

    fwd = jax.jit(functools.partial(cnn_mnist_forward,
                                    num_classes=num_classes, block_b=block_b))
    out = jax.block_until_ready(fwd(x, packed))
    assert out.shape == (batch, num_classes), out.shape

    ref = jax.block_until_ready(ref_forward(x, params))
    # bf16 matmul operands (f32 accumulate) -> looser tolerance than pure f32.
    np.testing.assert_allclose(np.asarray(out), np.asarray(ref), rtol=3e-2, atol=3e-2)


if __name__ == "__main__":
    key = jax.random.PRNGKey(0)
    k1, k2 = jax.random.split(key)

    # Primary case from the spec: MNIST-like, batch=2, 1 channel, 10 classes.
    _run_case(k1, batch=2, num_channels=1, num_classes=10, block_b=64)
    # Exercise multi-step grid, batch padding, C>1 and num_classes != 10.
    _run_case(k2, batch=70, num_channels=2, num_classes=7, block_b=32)

    print("KERNEL_OK")
</pallas_src>

<mosaic_0001>
module attributes {stable_mosaic.version = 11 : i64} {
  func.func @_cnn_fused_kernel(%arg0: i32, %arg1: memref<8x56x16xf32, #tpu.memory_space<vmem>>, %arg2: memref<4x16x160xbf16, #tpu.memory_space<vmem>>, %arg3: memref<1x40xf32, #tpu.memory_space<vmem>>, %arg4: memref<9x40x80xbf16, #tpu.memory_space<vmem>>, %arg5: memref<1x20xf32, #tpu.memory_space<vmem>>, %arg6: memref<20x1024xbf16, #tpu.memory_space<vmem>>, %arg7: memref<1x64xf32, #tpu.memory_space<vmem>>, %arg8: memref<64x128xbf16, #tpu.memory_space<vmem>>, %arg9: memref<1x128xf32, #tpu.memory_space<vmem>>, %arg10: memref<8x128xf32, #tpu.memory_space<vmem>>) attributes {dimension_semantics = [#tpu.dimension_semantics<parallel>], iteration_bounds = array<i64: 1>, scalar_prefetch = 0 : i64, scratch_operands = 0 : i64, tpu.core_type = #tpu.core_type<tc>, window_params = [{transform_indices = @transform_0, window_bounds = array<i64: 8, 56, 16>}, {pipeline_mode = #tpu.pipeline_mode<synchronous>, transform_indices = @transform_1, window_bounds = array<i64: 4, 16, 160>}, {pipeline_mode = #tpu.pipeline_mode<synchronous>, transform_indices = @transform_2, window_bounds = array<i64: 1, 40>}, {pipeline_mode = #tpu.pipeline_mode<synchronous>, transform_indices = @transform_3, window_bounds = array<i64: 9, 40, 80>}, {pipeline_mode = #tpu.pipeline_mode<synchronous>, transform_indices = @transform_4, window_bounds = array<i64: 1, 20>}, {pipeline_mode = #tpu.pipeline_mode<synchronous>, transform_indices = @transform_5, window_bounds = array<i64: 20, 1024>}, {pipeline_mode = #tpu.pipeline_mode<synchronous>, transform_indices = @transform_6, window_bounds = array<i64: 1, 64>}, {pipeline_mode = #tpu.pipeline_mode<synchronous>, transform_indices = @transform_7, window_bounds = array<i64: 64, 128>}, {pipeline_mode = #tpu.pipeline_mode<synchronous>, transform_indices = @transform_8, window_bounds = array<i64: 1, 128>}, {transform_indices = @transform_9, window_bounds = array<i64: 8, 128>}]} {
    %c0 = arith.constant 0 : index
    %c0_0 = arith.constant 0 : index
    %c0_1 = arith.constant 0 : index
    %0 = vector.load %arg1[%c0, %c0_0, %c0_1] : memref<8x56x16xf32, #tpu.memory_space<vmem>>, vector<8x56x16xf32>
    %1 = arith.truncf %0 : vector<8x56x16xf32> to vector<8x56x16xbf16>
    %c0_2 = arith.constant 0 : index
    %c0_3 = arith.constant 0 : index
    %c0_4 = arith.constant 0 : index
    %2 = vector.load %arg2[%c0_2, %c0_3, %c0_4] : memref<4x16x160xbf16, #tpu.memory_space<vmem>>, vector<4x16x160xbf16>
    %3 = vector.extract_strided_slice %1 {offsets = [0, 0, 0], sizes = [8, 48, 16], strides = [1, 1, 1]} : vector<8x56x16xbf16> to vector<8x48x16xbf16>
    %4 = vector.shape_cast %3 : vector<8x48x16xbf16> to vector<384x16xbf16>
    %5 = vector.extract_strided_slice %2 {offsets = [0, 0, 0], sizes = [1, 16, 160], strides = [1, 1, 1]} : vector<4x16x160xbf16> to vector<1x16x160xbf16>
    %6 = vector.shape_cast %5 : vector<1x16x160xbf16> to vector<16x160xbf16>
    %cst = arith.constant dense<0.000000e+00> : vector<384x160xf32>
    %7 = tpu.matmul %4, %6, %cst {dimension_numbers = #tpu.dot_dimension_numbers<[1], [0], [0], [1], [0, 0, 1, 1], [], []>} : vector<384x16xbf16>, vector<16x160xbf16>, vector<384x160xf32> -> vector<384x160xf32>
    %8 = vector.extract_strided_slice %1 {offsets = [0, 1, 0], sizes = [8, 48, 16], strides = [1, 1, 1]} : vector<8x56x16xbf16> to vector<8x48x16xbf16>
    %9 = vector.shape_cast %8 : vector<8x48x16xbf16> to vector<384x16xbf16>
    %10 = vector.extract_strided_slice %2 {offsets = [1, 0, 0], sizes = [1, 16, 160], strides = [1, 1, 1]} : vector<4x16x160xbf16> to vector<1x16x160xbf16>
    %11 = vector.shape_cast %10 : vector<1x16x160xbf16> to vector<16x160xbf16>
    %cst_5 = arith.constant dense<0.000000e+00> : vector<384x160xf32>
    %12 = tpu.matmul %9, %11, %cst_5 {dimension_numbers = #tpu.dot_dimension_numbers<[1], [0], [0], [1], [0, 0, 1, 1], [], []>} : vector<384x16xbf16>, vector<16x160xbf16>, vector<384x160xf32> -> vector<384x160xf32>
    %13 = arith.addf %7, %12 : vector<384x160xf32>
    %14 = vector.extract_strided_slice %1 {offsets = [0, 7, 0], sizes = [8, 48, 16], strides = [1, 1, 1]} : vector<8x56x16xbf16> to vector<8x48x16xbf16>
    %15 = vector.shape_cast %14 : vector<8x48x16xbf16> to vector<384x16xbf16>
    %16 = vector.extract_strided_slice %2 {offsets = [2, 0, 0], sizes = [1, 16, 160], strides = [1, 1, 1]} : vector<4x16x160xbf16> to vector<1x16x160xbf16>
    %17 = vector.shape_cast %16 : vector<1x16x160xbf16> to vector<16x160xbf16>
    %cst_6 = arith.constant dense<0.000000e+00> : vector<384x160xf32>
    %18 = tpu.matmul %15, %17, %cst_6 {dimension_numbers = #tpu.dot_dimension_numbers<[1], [0], [0], [1], [0, 0, 1, 1], [], []>} : vector<384x16xbf16>, vector<16x160xbf16>, vector<384x160xf32> -> vector<384x160xf32>
    %19 = arith.addf %13, %18 : vector<384x160xf32>
    %20 = vector.extract_strided_slice %1 {offsets = [0, 8, 0], sizes = [8, 48, 16], strides = [1, 1, 1]} : vector<8x56x16xbf16> to vector<8x48x16xbf16>
    %21 = vector.shape_cast %20 : vector<8x48x16xbf16> to vector<384x16xbf16>
    %22 = vector.extract_strided_slice %2 {offsets = [3, 0, 0], sizes = [1, 16, 160], strides = [1, 1, 1]} : vector<4x16x160xbf16> to vector<1x16x160xbf16>
    %23 = vector.shape_cast %22 : vector<1x16x160xbf16> to vector<16x160xbf16>
    %cst_7 = arith.constant dense<0.000000e+00> : vector<384x160xf32>
    %24 = tpu.matmul %21, %23, %cst_7 {dimension_numbers = #tpu.dot_dimension_numbers<[1], [0], [0], [1], [0, 0, 1, 1], [], []>} : vector<384x16xbf16>, vector<16x160xbf16>, vector<384x160xf32> -> vector<384x160xf32>
    %25 = arith.addf %19, %24 : vector<384x160xf32>
    %26 = vector.extract_strided_slice %25 {offsets = [0, 0], sizes = [384, 40], strides = [1, 1]} : vector<384x160xf32> to vector<384x40xf32>
    %27 = vector.extract_strided_slice %25 {offsets = [0, 40], sizes = [384, 40], strides = [1, 1]} : vector<384x160xf32> to vector<384x40xf32>
    %28 = arith.maximumf %26, %27 : vector<384x40xf32>
    %29 = vector.extract_strided_slice %25 {offsets = [0, 80], sizes = [384, 40], strides = [1, 1]} : vector<384x160xf32> to vector<384x40xf32>
    %30 = vector.extract_strided_slice %25 {offsets = [0, 120], sizes = [384, 40], strides = [1, 1]} : vector<384x160xf32> to vector<384x40xf32>
    %31 = arith.maximumf %29, %30 : vector<384x40xf32>
    %32 = arith.maximumf %28, %31 : vector<384x40xf32>
    %c0_8 = arith.constant 0 : index
    %c0_9 = arith.constant 0 : index
    %33 = vector.load %arg3[%c0_8, %c0_9] : memref<1x40xf32, #tpu.memory_space<vmem>>, vector<1x40xf32>
    %34 = vector.broadcast %33 : vector<1x40xf32> to vector<384x40xf32>
    %35 = arith.addf %32, %34 : vector<384x40xf32>
    %cst_10 = arith.constant 0.000000e+00 : f32
    %36 = vector.broadcast %cst_10 : f32 to vector<384x40xf32>
    %37 = arith.maximumf %35, %36 : vector<384x40xf32>
    %38 = arith.truncf %37 : vector<384x40xf32> to vector<384x40xbf16>
    %39 = vector.shape_cast %38 : vector<384x40xbf16> to vector<8x48x40xbf16>
    %c0_11 = arith.constant 0 : index
    %c0_12 = arith.constant 0 : index
    %c0_13 = arith.constant 0 : index
    %40 = vector.load %arg4[%c0_11, %c0_12, %c0_13] : memref<9x40x80xbf16, #tpu.memory_space<vmem>>, vector<9x40x80xbf16>
    %41 = vector.extract_strided_slice %39 {offsets = [0, 0, 0], sizes = [8, 32, 40], strides = [1, 1, 1]} : vector<8x48x40xbf16> to vector<8x32x40xbf16>
    %42 = vector.shape_cast %41 : vector<8x32x40xbf16> to vector<256x40xbf16>
    %43 = vector.extract_strided_slice %40 {offsets = [0, 0, 0], sizes = [1, 40, 80], strides = [1, 1, 1]} : vector<9x40x80xbf16> to vector<1x40x80xbf16>
    %44 = vector.shape_cast %43 : vector<1x40x80xbf16> to vector<40x80xbf16>
    %cst_14 = arith.constant dense<0.000000e+00> : vector<256x80xf32>
    %45 = tpu.matmul %42, %44, %cst_14 {dimension_numbers = #tpu.dot_dimension_numbers<[1], [0], [0], [1], [0, 0, 1, 1], [], []>} : vector<256x40xbf16>, vector<40x80xbf16>, vector<256x80xf32> -> vector<256x80xf32>
    %46 = vector.extract_strided_slice %39 {offsets = [0, 1, 0], sizes = [8, 32, 40], strides = [1, 1, 1]} : vector<8x48x40xbf16> to vector<8x32x40xbf16>
    %47 = vector.shape_cast %46 : vector<8x32x40xbf16> to vector<256x40xbf16>
    %48 = vector.extract_strided_slice %40 {offsets = [1, 0, 0], sizes = [1, 40, 80], strides = [1, 1, 1]} : vector<9x40x80xbf16> to vector<1x40x80xbf16>
    %49 = vector.shape_cast %48 : vector<1x40x80xbf16> to vector<40x80xbf16>
    %cst_15 = arith.constant dense<0.000000e+00> : vector<256x80xf32>
    %50 = tpu.matmul %47, %49, %cst_15 {dimension_numbers = #tpu.dot_dimension_numbers<[1], [0], [0], [1], [0, 0, 1, 1], [], []>} : vector<256x40xbf16>, vector<40x80xbf16>, vector<256x80xf32> -> vector<256x80xf32>
    %51 = arith.addf %45, %50 : vector<256x80xf32>
    %52 = vector.extract_strided_slice %39 {offsets = [0, 2, 0], sizes = [8, 32, 40], strides = [1, 1, 1]} : vector<8x48x40xbf16> to vector<8x32x40xbf16>
    %53 = vector.shape_cast %52 : vector<8x32x40xbf16> to vector<256x40xbf16>
    %54 = vector.extract_strided_slice %40 {offsets = [2, 0, 0], sizes = [1, 40, 80], strides = [1, 1, 1]} : vector<9x40x80xbf16> to vector<1x40x80xbf16>
    %55 = vector.shape_cast %54 : vector<1x40x80xbf16> to vector<40x80xbf16>
    %cst_16 = arith.constant dense<0.000000e+00> : vector<256x80xf32>
    %56 = tpu.matmul %53, %55, %cst_16 {dimension_numbers = #tpu.dot_dimension_numbers<[1], [0], [0], [1], [0, 0, 1, 1], [], []>} : vector<256x40xbf16>, vector<40x80xbf16>, vector<256x80xf32> -> vector<256x80xf32>
    %57 = arith.addf %51, %56 : vector<256x80xf32>
    %58 = vector.extract_strided_slice %39 {offsets = [0, 7, 0], sizes = [8, 32, 40], strides = [1, 1, 1]} : vector<8x48x40xbf16> to vector<8x32x40xbf16>
    %59 = vector.shape_cast %58 : vector<8x32x40xbf16> to vector<256x40xbf16>
    %60 = vector.extract_strided_slice %40 {offsets = [3, 0, 0], sizes = [1, 40, 80], strides = [1, 1, 1]} : vector<9x40x80xbf16> to vector<1x40x80xbf16>
    %61 = vector.shape_cast %60 : vector<1x40x80xbf16> to vector<40x80xbf16>
    %cst_17 = arith.constant dense<0.000000e+00> : vector<256x80xf32>
    %62 = tpu.matmul %59, %61, %cst_17 {dimension_numbers = #tpu.dot_dimension_numbers<[1], [0], [0], [1], [0, 0, 1, 1], [], []>} : vector<256x40xbf16>, vector<40x80xbf16>, vector<256x80xf32> -> vector<256x80xf32>
    %63 = arith.addf %57, %62 : vector<256x80xf32>
    %64 = vector.extract_strided_slice %39 {offsets = [0, 8, 0], sizes = [8, 32, 40], strides = [1, 1, 1]} : vector<8x48x40xbf16> to vector<8x32x40xbf16>
    %65 = vector.shape_cast %64 : vector<8x32x40xbf16> to vector<256x40xbf16>
    %66 = vector.extract_strided_slice %40 {offsets = [4, 0, 0], sizes = [1, 40, 80], strides = [1, 1, 1]} : vector<9x40x80xbf16> to vector<1x40x80xbf16>
    %67 = vector.shape_cast %66 : vector<1x40x80xbf16> to vector<40x80xbf16>
    %cst_18 = arith.constant dense<0.000000e+00> : vector<256x80xf32>
    %68 = tpu.matmul %65, %67, %cst_18 {dimension_numbers = #tpu.dot_dimension_numbers<[1], [0], [0], [1], [0, 0, 1, 1], [], []>} : vector<256x40xbf16>, vector<40x80xbf16>, vector<256x80xf32> -> vector<256x80xf32>
    %69 = arith.addf %63, %68 : vector<256x80xf32>
    %70 = vector.extract_strided_slice %39 {offsets = [0, 9, 0], sizes = [8, 32, 40], strides = [1, 1, 1]} : vector<8x48x40xbf16> to vector<8x32x40xbf16>
    %71 = vector.shape_cast %70 : vector<8x32x40xbf16> to vector<256x40xbf16>
    %72 = vector.extract_strided_slice %40 {offsets = [5, 0, 0], sizes = [1, 40, 80], strides = [1, 1, 1]} : vector<9x40x80xbf16> to vector<1x40x80xbf16>
    %73 = vector.shape_cast %72 : vector<1x40x80xbf16> to vector<40x80xbf16>
    %cst_19 = arith.constant dense<0.000000e+00> : vector<256x80xf32>
    %74 = tpu.matmul %71, %73, %cst_19 {dimension_numbers = #tpu.dot_dimension_numbers<[1], [0], [0], [1], [0, 0, 1, 1], [], []>} : vector<256x40xbf16>, vector<40x80xbf16>, vector<256x80xf32> -> vector<256x80xf32>
    %75 = arith.addf %69, %74 : vector<256x80xf32>
    %76 = vector.extract_strided_slice %39 {offsets = [0, 14, 0], sizes = [8, 32, 40], strides = [1, 1, 1]} : vector<8x48x40xbf16> to vector<8x32x40xbf16>
    %77 = vector.shape_cast %76 : vector<8x32x40xbf16> to vector<256x40xbf16>
    %78 = vector.extract_strided_slice %40 {offsets = [6, 0, 0], sizes = [1, 40, 80], strides = [1, 1, 1]} : vector<9x40x80xbf16> to vector<1x40x80xbf16>
    %79 = vector.shape_cast %78 : vector<1x40x80xbf16> to vector<40x80xbf16>
    %cst_20 = arith.constant dense<0.000000e+00> : vector<256x80xf32>
    %80 = tpu.matmul %77, %79, %cst_20 {dimension_numbers = #tpu.dot_dimension_numbers<[1], [0], [0], [1], [0, 0, 1, 1], [], []>} : vector<256x40xbf16>, vector<40x80xbf16>, vector<256x80xf32> -> vector<256x80xf32>
    %81 = arith.addf %75, %80 : vector<256x80xf32>
    %82 = vector.extract_strided_slice %39 {offsets = [0, 15, 0], sizes = [8, 32, 40], strides = [1, 1, 1]} : vector<8x48x40xbf16> to vector<8x32x40xbf16>
    %83 = vector.shape_cast %82 : vector<8x32x40xbf16> to vector<256x40xbf16>
    %84 = vector.extract_strided_slice %40 {offsets = [7, 0, 0], sizes = [1, 40, 80], strides = [1, 1, 1]} : vector<9x40x80xbf16> to vector<1x40x80xbf16>
    %85 = vector.shape_cast %84 : vector<1x40x80xbf16> to vector<40x80xbf16>
    %cst_21 = arith.constant dense<0.000000e+00> : vector<256x80xf32>
    %86 = tpu.matmul %83, %85, %cst_21 {dimension_numbers = #tpu.dot_dimension_numbers<[1], [0], [0], [1], [0, 0, 1, 1], [], []>} : vector<256x40xbf16>, vector<40x80xbf16>, vector<256x80xf32> -> vector<256x80xf32>
    %87 = arith.addf %81, %86 : vector<256x80xf32>
    %88 = vector.extract_strided_slice %39 {offsets = [0, 16, 0], sizes = [8, 32, 40], strides = [1, 1, 1]} : vector<8x48x40xbf16> to vector<8x32x40xbf16>
    %89 = vector.shape_cast %88 : vector<8x32x40xbf16> to vector<256x40xbf16>
    %90 = vector.extract_strided_slice %40 {offsets = [8, 0, 0], sizes = [1, 40, 80], strides = [1, 1, 1]} : vector<9x40x80xbf16> to vector<1x40x80xbf16>
    %91 = vector.shape_cast %90 : vector<1x40x80xbf16> to vector<40x80xbf16>
    %cst_22 = arith.constant dense<0.000000e+00> : vector<256x80xf32>
    %92 = tpu.matmul %89, %91, %cst_22 {dimension_numbers = #tpu.dot_dimension_numbers<[1], [0], [0], [1], [0, 0, 1, 1], [], []>} : vector<256x40xbf16>, vector<40x80xbf16>, vector<256x80xf32> -> vector<256x80xf32>
    %93 = arith.addf %87, %92 : vector<256x80xf32>
    %94 = vector.extract_strided_slice %93 {offsets = [0, 0], sizes = [256, 20], strides = [1, 1]} : vector<256x80xf32> to vector<256x20xf32>
    %95 = vector.extract_strided_slice %93 {offsets = [0, 20], sizes = [256, 20], strides = [1, 1]} : vector<256x80xf32> to vector<256x20xf32>
    %96 = arith.maximumf %94, %95 : vector<256x20xf32>
    %97 = vector.extract_strided_slice %93 {offsets = [0, 40], sizes = [256, 20], strides = [1, 1]} : vector<256x80xf32> to vector<256x20xf32>
    %98 = vector.extract_strided_slice %93 {offsets = [0, 60], sizes = [256, 20], strides = [1, 1]} : vector<256x80xf32> to vector<256x20xf32>
    %99 = arith.maximumf %97, %98 : vector<256x20xf32>
    %100 = arith.maximumf %96, %99 : vector<256x20xf32>
    %c0_23 = arith.constant 0 : index
    %c0_24 = arith.constant 0 : index
    %101 = vector.load %arg5[%c0_23, %c0_24] : memref<1x20xf32, #tpu.memory_space<vmem>>, vector<1x20xf32>
    %102 = vector.broadcast %101 : vector<1x20xf32> to vector<256x20xf32>
    %103 = arith.addf %100, %102 : vector<256x20xf32>
    %cst_25 = arith.constant 0.000000e+00 : f32
    %104 = vector.broadcast %cst_25 : f32 to vector<256x20xf32>
    %105 = arith.maximumf %103, %104 : vector<256x20xf32>
    %106 = arith.truncf %105 : vector<256x20xf32> to vector<256x20xbf16>
    %c0_26 = arith.constant 0 : index
    %c0_27 = arith.constant 0 : index
    %107 = vector.load %arg6[%c0_26, %c0_27] : memref<20x1024xbf16, #tpu.memory_space<vmem>>, vector<20x1024xbf16>
    %cst_28 = arith.constant dense<0.000000e+00> : vector<256x1024xf32>
    %108 = tpu.matmul %106, %107, %cst_28 {dimension_numbers = #tpu.dot_dimension_numbers<[1], [0], [0], [1], [0, 0, 1, 1], [], []>} : vector<256x20xbf16>, vector<20x1024xbf16>, vector<256x1024xf32> -> vector<256x1024xf32>
    %109 = vector.shape_cast %108 : vector<256x1024xf32> to vector<8x32x1024xf32>
    %110 = vector.extract_strided_slice %109 {offsets = [0, 0, 0], sizes = [8, 1, 64], strides = [1, 1, 1]} : vector<8x32x1024xf32> to vector<8x1x64xf32>
    %111 = vector.shape_cast %110 : vector<8x1x64xf32> to vector<8x64xf32>
    %112 = vector.extract_strided_slice %109 {offsets = [0, 1, 64], sizes = [8, 1, 64], strides = [1, 1, 1]} : vector<8x32x1024xf32> to vector<8x1x64xf32>
    %113 = vector.shape_cast %112 : vector<8x1x64xf32> to vector<8x64xf32>
    %114 = arith.addf %111, %113 : vector<8x64xf32>
    %115 = vector.extract_strided_slice %109 {offsets = [0, 2, 128], sizes = [8, 1, 64], strides = [1, 1, 1]} : vector<8x32x1024xf32> to vector<8x1x64xf32>
    %116 = vector.shape_cast %115 : vector<8x1x64xf32> to vector<8x64xf32>
    %117 = arith.addf %114, %116 : vector<8x64xf32>
    %118 = vector.extract_strided_slice %109 {offsets = [0, 3, 192], sizes = [8, 1, 64], strides = [1, 1, 1]} : vector<8x32x1024xf32> to vector<8x1x64xf32>
    %119 = vector.shape_cast %118 : vector<8x1x64xf32> to vector<8x64xf32>
    %120 = arith.addf %117, %119 : vector<8x64xf32>
    %121 = vector.extract_strided_slice %109 {offsets = [0, 7, 256], sizes = [8, 1, 64], strides = [1, 1, 1]} : vector<8x32x1024xf32> to vector<8x1x64xf32>
    %122 = vector.shape_cast %121 : vector<8x1x64xf32> to vector<8x64xf32>
    %123 = arith.addf %120, %122 : vector<8x64xf32>
    %124 = vector.extract_strided_slice %109 {offsets = [0, 8, 320], sizes = [8, 1, 64], strides = [1, 1, 1]} : vector<8x32x1024xf32> to vector<8x1x64xf32>
    %125 = vector.shape_cast %124 : vector<8x1x64xf32> to vector<8x64xf32>
    %126 = arith.addf %123, %125 : vector<8x64xf32>
    %127 = vector.extract_strided_slice %109 {offsets = [0, 9, 384], sizes = [8, 1, 64], strides = [1, 1, 1]} : vector<8x32x1024xf32> to vector<8x1x64xf32>
    %128 = vector.shape_cast %127 : vector<8x1x64xf32> to vector<8x64xf32>
    %129 = arith.addf %126, %128 : vector<8x64xf32>
    %130 = vector.extract_strided_slice %109 {offsets = [0, 10, 448], sizes = [8, 1, 64], strides = [1, 1, 1]} : vector<8x32x1024xf32> to vector<8x1x64xf32>
    %131 = vector.shape_cast %130 : vector<8x1x64xf32> to vector<8x64xf32>
    %132 = arith.addf %129, %131 : vector<8x64xf32>
    %133 = vector.extract_strided_slice %109 {offsets = [0, 14, 512], sizes = [8, 1, 64], strides = [1, 1, 1]} : vector<8x32x1024xf32> to vector<8x1x64xf32>
    %134 = vector.shape_cast %133 : vector<8x1x64xf32> to vector<8x64xf32>
    %135 = arith.addf %132, %134 : vector<8x64xf32>
    %136 = vector.extract_strided_slice %109 {offsets = [0, 15, 576], sizes = [8, 1, 64], strides = [1, 1, 1]} : vector<8x32x1024xf32> to vector<8x1x64xf32>
    %137 = vector.shape_cast %136 : vector<8x1x64xf32> to vector<8x64xf32>
    %138 = arith.addf %135, %137 : vector<8x64xf32>
    %139 = vector.extract_strided_slice %109 {offsets = [0, 16, 640], sizes = [8, 1, 64], strides = [1, 1, 1]} : vector<8x32x1024xf32> to vector<8x1x64xf32>
    %140 = vector.shape_cast %139 : vector<8x1x64xf32> to vector<8x64xf32>
    %141 = arith.addf %138, %140 : vector<8x64xf32>
    %142 = vector.extract_strided_slice %109 {offsets = [0, 17, 704], sizes = [8, 1, 64], strides = [1, 1, 1]} : vector<8x32x1024xf32> to vector<8x1x64xf32>
    %143 = vector.shape_cast %142 : vector<8x1x64xf32> to vector<8x64xf32>
    %144 = arith.addf %141, %143 : vector<8x64xf32>
    %145 = vector.extract_strided_slice %109 {offsets = [0, 21, 768], sizes = [8, 1, 64], strides = [1, 1, 1]} : vector<8x32x1024xf32> to vector<8x1x64xf32>
    %146 = vector.shape_cast %145 : vector<8x1x64xf32> to vector<8x64xf32>
    %147 = arith.addf %144, %146 : vector<8x64xf32>
    %148 = vector.extract_strided_slice %109 {offsets = [0, 22, 832], sizes = [8, 1, 64], strides = [1, 1, 1]} : vector<8x32x1024xf32> to vector<8x1x64xf32>
    %149 = vector.shape_cast %148 : vector<8x1x64xf32> to vector<8x64xf32>
    %150 = arith.addf %147, %149 : vector<8x64xf32>
    %151 = vector.extract_strided_slice %109 {offsets = [0, 23, 896], sizes = [8, 1, 64], strides = [1, 1, 1]} : vector<8x32x1024xf32> to vector<8x1x64xf32>
    %152 = vector.shape_cast %151 : vector<8x1x64xf32> to vector<8x64xf32>
    %153 = arith.addf %150, %152 : vector<8x64xf32>
    %154 = vector.extract_strided_slice %109 {offsets = [0, 24, 960], sizes = [8, 1, 64], strides = [1, 1, 1]} : vector<8x32x1024xf32> to vector<8x1x64xf32>
    %155 = vector.shape_cast %154 : vector<8x1x64xf32> to vector<8x64xf32>
    %156 = arith.addf %153, %155 : vector<8x64xf32>
    %c0_29 = arith.constant 0 : index
    %c0_30 = arith.constant 0 : index
    %157 = vector.load %arg7[%c0_29, %c0_30] : memref<1x64xf32, #tpu.memory_space<vmem>>, vector<1x64xf32>
    %158 = vector.broadcast %157 : vector<1x64xf32> to vector<8x64xf32>
    %159 = arith.addf %156, %158 : vector<8x64xf32>
    %cst_31 = arith.constant 0.000000e+00 : f32
    %160 = vector.broadcast %cst_31 : f32 to vector<8x64xf32>
    %161 = arith.maximumf %159, %160 : vector<8x64xf32>
    %162 = arith.truncf %161 : vector<8x64xf32> to vector<8x64xbf16>
    %c0_32 = arith.constant 0 : index
    %c0_33 = arith.constant 0 : index
    %163 = vector.load %arg8[%c0_32, %c0_33] : memref<64x128xbf16, #tpu.memory_space<vmem>>, vector<64x128xbf16>
    %cst_34 = arith.constant dense<0.000000e+00> : vector<8x128xf32>
    %164 = tpu.matmul %162, %163, %cst_34 {dimension_numbers = #tpu.dot_dimension_numbers<[1], [0], [0], [1], [0, 0, 1, 1], [], []>} : vector<8x64xbf16>, vector<64x128xbf16>, vector<8x128xf32> -> vector<8x128xf32>
    %c0_35 = arith.constant 0 : index
    %c0_36 = arith.constant 0 : index
    %165 = vector.load %arg9[%c0_35, %c0_36] : memref<1x128xf32, #tpu.memory_space<vmem>>, vector<1x128xf32>
    %166 = vector.broadcast %165 : vector<1x128xf32> to vector<8x128xf32>
    %167 = arith.addf %164, %166 : vector<8x128xf32>
    %c0_37 = arith.constant 0 : index
    %c0_38 = arith.constant 0 : index
    %168 = vector.load %arg10[%c0_37, %c0_38] : memref<8x128xf32, #tpu.memory_space<vmem>>, vector<8x128xf32>
    tpu.vector_store %arg10[%c0_37, %c0_38], %167 {strides = array<i32>} : memref<8x128xf32, #tpu.memory_space<vmem>>, vector<8x128xf32>,
    return
  }
  func.func @transform_0(%arg0: i32) -> (i32, i32, i32) {
    %c0_i32 = arith.constant 0 : i32
    %c0_i32_0 = arith.constant 0 : i32
    %c0_i32_1 = arith.constant 0 : i32
    return %arg0, %c0_i32, %c0_i32_0 : i32, i32, i32
  }
  func.func @transform_1(%arg0: i32) -> (i32, i32, i32) {
    %c0_i32 = arith.constant 0 : i32
    %c0_i32_0 = arith.constant 0 : i32
    %c0_i32_1 = arith.constant 0 : i32
    %c0_i32_2 = arith.constant 0 : i32
    return %c0_i32, %c0_i32_0, %c0_i32_1 : i32, i32, i32
  }
  func.func @transform_2(%arg0: i32) -> (i32, i32) {
    %c0_i32 = arith.constant 0 : i32
    %c0_i32_0 = arith.constant 0 : i32
    %c0_i32_1 = arith.constant 0 : i32
    return %c0_i32, %c0_i32_0 : i32, i32
  }
  func.func @transform_3(%arg0: i32) -> (i32, i32, i32) {
    %c0_i32 = arith.constant 0 : i32
    %c0_i32_0 = arith.constant 0 : i32
    %c0_i32_1 = arith.constant 0 : i32
    %c0_i32_2 = arith.constant 0 : i32
    return %c0_i32, %c0_i32_0, %c0_i32_1 : i32, i32, i32
  }
  func.func @transform_4(%arg0: i32) -> (i32, i32) {
    %c0_i32 = arith.constant 0 : i32
    %c0_i32_0 = arith.constant 0 : i32
    %c0_i32_1 = arith.constant 0 : i32
    return %c0_i32, %c0_i32_0 : i32, i32
  }
  func.func @transform_5(%arg0: i32) -> (i32, i32) {
    %c0_i32 = arith.constant 0 : i32
    %c0_i32_0 = arith.constant 0 : i32
    %c0_i32_1 = arith.constant 0 : i32
    return %c0_i32, %c0_i32_0 : i32, i32
  }
  func.func @transform_6(%arg0: i32) -> (i32, i32) {
    %c0_i32 = arith.constant 0 : i32
    %c0_i32_0 = arith.constant 0 : i32
    %c0_i32_1 = arith.constant 0 : i32
    return %c0_i32, %c0_i32_0 : i32, i32
  }
  func.func @transform_7(%arg0: i32) -> (i32, i32) {
    %c0_i32 = arith.constant 0 : i32
    %c0_i32_0 = arith.constant 0 : i32
    %c0_i32_1 = arith.constant 0 : i32
    return %c0_i32, %c0_i32_0 : i32, i32
  }
  func.func @transform_8(%arg0: i32) -> (i32, i32) {
    %c0_i32 = arith.constant 0 : i32
    %c0_i32_0 = arith.constant 0 : i32
    %c0_i32_1 = arith.constant 0 : i32
    return %c0_i32, %c0_i32_0 : i32, i32
  }
  func.func @transform_9(%arg0: i32) -> (i32, i32) {
    %c0_i32 = arith.constant 0 : i32
    %c0_i32_0 = arith.constant 0 : i32
    return %arg0, %c0_i32 : i32, i32
  }
}

</mosaic_0001>

<bundles_post_ra>
// kernel: cnn_mnist_forward.1
= control target key start
LH: loop header
LB: loop body
LE: loop exit
PB: predicated region body
PF: predicated region fallthrough
CT: control target
= control target key end

     0   :  { %v13401_v1 = vmov 0   ;;  %vm129_vm0 = vsmask.f32 7424  ;;  %vm364_vm1 = vcmask 130048   ;;  %vm1041_vm2 = vsmask.f32 4352  ;;  %s13370_s1 = inlined_call_operand.vmem [shape: bf16[4,16,160], index: 1, kind: input, shape index: {}]   ;;  %s13371_s0 = inlined_call_operand.vmem [shape: f32[8,56,16], index: 0, kind: input, shape index: {}]   ;;  %s13372_s3 = inlined_call_operand.vmem [shape: bf16[9,40,80], index: 3, kind: input, shape index: {}]   ;;  %s13373_s2 = inlined_call_operand.vmem [shape: f32[1,40], index: 2, kind: input, shape index: {}]   ;;  %s13374_s5 = inlined_call_operand.vmem [shape: bf16[20,1024], index: 5, kind: input, shape index: {}]   ;;  %s13375_s4 = inlined_call_operand.vmem [shape: f32[1,20], index: 4, kind: input, shape index: {}]   ;;  %s13376_s7 = inlined_call_operand.vmem [shape: bf16[64,128], index: 7, kind: input, shape index: {}]   ;;  %s13377_s6 = inlined_call_operand.vmem [shape: f32[1,64], index: 6, kind: input, shape index: {}]   ;;  %s13378_s8 = inlined_call_operand.vmem [shape: f32[1,128], index: 8, kind: input, shape index: {}]   ;;  %s13379_s9 = inlined_call_operand.vmem [shape: f32[8,128], index: 9, kind: output, shape index: {}]  }
   0x1   :  { %v8645_v0 = vld [vmem:[%s13370_s1 + $0x14] ss:$8 sps:$4 sm:$0xff]   ;;  %469 = vmatprep.mubr.bf16.mxu0 %v13401_v1  ;;  %679 = vmatprep.mubr.bf16.mxu1 %v13401_v1  ;;  %v8647_v2 = vld [vmem:[%s13370_s1 + $0x10] ss:$8 sps:$4 sm:$0xff]   ;;  %v8650_v3 = vld [vmem:[%s13370_s1 + $0x4] ss:$8 sps:$4 sm:$0xff]  }
   0x2   :  { %8627 = vmatprep.subr.bf16.mxu1 %v8645_v0  ;;  %451 = vmatprep.subr.bf16.mxu0 %v8645_v0  ;;  %v33_v4 = vld [vmem:[%s13371_s0] sm:$0xff]  ;;  %v34_v5 = vld [vmem:[%s13371_s0 + $0x8] sm:$0xff]  ;;  %v35_v6 = vld [vmem:[%s13371_s0 + $0x10] sm:$0xff]  ;;  %vm1661_vm3 = vcmask 1043456   ;;  %vm2553_vm4 = vcmask 719872   ;;  %s8699_s11 = smov 48  }
   0x3   :  { %8628 = vmatpush1.bf16.msra.mxu1 %v8647_v2  ;;  %452 = vmatpush1.bf16.msra.mxu0 %v8647_v2  ;;  %v36_v7 = vld [vmem:[%s13371_s0 + $0x18] sm:$0xff]  ;;  %v8777_v8 = vpack.c.bf16 %v34_v5, %v33_v4  ;;  %v82_v10 = vld [vmem:[%s13371_s0 + $0x188] sm:$0xff]  ;;  %v83_v11 = vld [vmem:[%s13371_s0 + $0x190] sm:$0xff]  ;;  %vm3285_vm5 = vcmask 326656   ;;  %vm4696_vm6 = vsmask.f32 3328 }
   0x4   :  { %782 = vmatprep.subr.bf16.mxu1 %v8650_v3  ;;  %v8779_v9 = vpack.c.bf16 %v36_v7, %v35_v6  ;;  %v84_v12 = vld [vmem:[%s13371_s0 + $0x198] sm:$0xff]  ;;  %v85_v13 = vld [vmem:[%s13371_s0 + $0x1a0] sm:$0xff]  ;;  %v8793_v14 = vpack.c.bf16 %v83_v11, %v82_v10  ;;  %v38_v16 = vld [vmem:[%s13371_s0 + $0x28] sm:$0xff]  ;;  %vm5344_vm7 = vsmask.f32 256  ;;  %vm3734_vm8 = vcmask 1046528  }
   0x5   :  { %v37_v15 = vld [vmem:[%s13371_s0 + $0x20] sm:$0xff]  ;;  %v131_v17 = vshrl.u32 %v8777_v8, 16  ;;  %v133_v18 = vshll.u32 %v8777_v8, 16  ;;  %v8804_v20 = vpack.c.bf16 %v85_v13, %v84_v12  ;;  %v86_v26 = vld [vmem:[%s13371_s0 + $0x1a8] sm:$0xff]  ;;  %v87_v27 = vld [vmem:[%s13371_s0 + $0x1b0] sm:$0xff]  ;;  %vm5044_vm9 = vcmask 1040384  }
   0x6   :  { %13513 = vst [vmem:[#allocation2_spill] sm:$0xff] %v8793_v14  ;;  %v138_v19 = vshll.u32 %v8779_v9, 16  ;;  %v13390_v21 = vshrl.u32 %v8793_v14, 16  ;;  %v13387_v22 = vshll.u32 %v8793_v14, 16  ;;  %v8808_v23 = vpack.c.bf16 %v38_v16, %v37_v15  ;;  %v8648_v33 = vld [vmem:[%s13370_s1] ss:$8 sps:$4 sm:$0xff]  }
   0x7   :  { %13514 = vst [vmem:[#allocation3_spill] sm:$0xff] %v8804_v20  ;;  %v135_v24 = vrot.slane %v133_v18, 1  ;;  %v13389_v29 = vshll.u32 %v8804_v20, 16  ;;  %v142_v31 = vshrl.u32 %v8779_v9, 16  ;;  %v8834_v36 = vpack.c.bf16 %v87_v27, %v86_v26  ;;  %v39_v37 = vld [vmem:[%s13371_s0 + $0x30] sm:$0xff]  ;;  %v88_v38 = vld [vmem:[%s13371_s0 + $0x1b8] sm:$0xff] }
   0x8   :  { %v140_v25 = vrot.slane %v138_v19, 1  ;;  %v331_v28 = vrot.slane %v13387_v22, 1  ;;  %v146_v32 = vshll.u32 %v8808_v23, 16  ;;  %v13388_v40 = vshrl.u32 %v8804_v20, 16  ;;  %v8653_v41 = vld [vmem:[%s13370_s1 + $0x34] ss:$8 sps:$4 sm:$0xff]  }
   0x9   :  { %v136_v30 = vor.u32 %v135_v24, %v131_v17  ;;  %v336_v35 = vrot.slane %v13389_v29, 1  ;;  %13515 = vst [vmem:[#allocation4_spill] sm:$0xff] %v8834_v36  ;;  %v13382_v43 = vshll.u32 %v8834_v36, 16  ;;  %v8654_v44 = vld [vmem:[%s13370_s1 + $0x20] ss:$8 sps:$4 sm:$0xff]   ;;  %v8862_v48 = vpack.c.bf16 %v39_v37, %v39_v37  ;;  %v40_v52 = vld [vmem:[%s13371_s0 + $0x38] sm:$0xff] }
   0xa   :  { %v332_v34 = vor.u32 %v331_v28, %v13390_v21  ;;  %v8656_v45 = vld [vmem:[%s13370_s1 + $0x24] ss:$8 sps:$4 sm:$0xff]   ;;  %v144_v46 = vor.u32 %v142_v31, %v140_v25  ;;  %v148_v47 = vrot.slane %v146_v32, 1  ;;  %v8869_v51 = vpack.c.bf16 %v88_v38, %v88_v38  ;;  %v43_v62 = vld [vmem:[%s13371_s0 + $0x50] sm:$0xff]  ;;  %v44_v13 = vld [vmem:[%s13371_s0 + $0x58] sm:$0xff] }
   0xb   :  { %v141_v39 = vsel %vm129_vm0, %v136_v30, %v140_v25  ;;  %v340_v49 = vor.u32 %v13388_v40, %v336_v35  ;;  %v344_v50 = vrot.slane %v13382_v43, 1  ;;  %v41_v53 = vld [vmem:[%s13371_s0 + $0x40] sm:$0xff]  ;;  %1274 = vmatprep.subr.bf16.mxu0 %v8656_v45  ;;  %v150_v55 = vshrl.u32 %v8808_v23, 16  ;;  %v42_v61 = vld [vmem:[%s13371_s0 + $0x48] sm:$0xff]  ;;  %v8651_v30 = vld [vmem:[%s13370_s1 + $0x30] ss:$8 sps:$4 sm:$0xff]  }
   0xc   :  { %7731 = vmatmul.mubr.msk.bf16.vlgmr.msra.gmra.mxu0 %vm364_vm1, %v141_v39  ;;  %v337_v42 = vsel %vm129_vm0, %v332_v34, %v336_v35  ;;  %13516 = vst [vmem:[#allocation5_spill] sm:$0xff] %v8869_v51  ;;  %v149_v54 = vsel %vm129_vm0, %v144_v46, %v148_v47  ;;  %v154_v56 = vshll.u32 %v8862_v48, 16  ;;  %v8880_v57 = vpack.c.bf16 %v41_v53, %v40_v52  ;;  %v45_v15 = vld [vmem:[%s13371_s0 + $0x60] sm:$0xff]  ;;  %v47_v38 = vld [vmem:[%s13371_s0 + $0x70] sm:$0xff]  ;;  %v48_v39 = vld [vmem:[%s13371_s0 + $0x78] sm:$0xff] }
   0xd   :  { %7752 = vmatmul.mubr.msk.bf16.vlgmr.msra.gmra.mxu1 %vm364_vm1, %v337_v42  ;;  %479 = vmatprep.mubr.bf16.mxu0 %v13401_v1  ;;  %v345_v58 = vsel %vm129_vm0, %v340_v49, %v344_v50  ;;  %v13381_v59 = vshrl.u32 %v8834_v36, 16  ;;  %v13380_v60 = vshll.u32 %v8869_v51, 16  ;;  %v152_v63 = vor.u32 %v150_v55, %v148_v47  ;;  %v49_v46 = vld [vmem:[%s13371_s0 + $0x80] sm:$0xff]  ;;  %v50_v47 = vld [vmem:[%s13371_s0 + $0x88] sm:$0xff] }
   0xe   :  { %783 = vmatpush1.bf16.msra.mxu1 %v8648_v33  ;;  %689 = vmatprep.mubr.bf16.mxu1 %v13401_v1  ;;  %v156_v0 = vrot.slane %v154_v56, 1  ;;  %v8898_v2 = vpack.c.bf16 %v43_v62, %v42_v61  ;;  %v161_v3 = vshll.u32 %v8880_v57, 16  ;;  %v159_v7 = vshrl.u32 %v8880_v57, 16  ;;  %v46_v33 = vld [vmem:[%s13371_s0 + $0x68] sm:$0xff] }
   0xf   :  { %1814 = vmatprep.subr.bf16.mxu1 %v8653_v41  ;;  %1275 = vmatpush1.bf16.msra.mxu0 %v8654_v44  ;;  %v348_v4 = vor.u32 %v13381_v59, %v344_v50  ;;  %v352_v5 = vrot.slane %v13380_v60, 1  ;;  %v8925_v25 = vpack.c.bf16 %v45_v15, %v44_v13  ;;  %v8945_v37 = vpack.c.bf16 %v46_v33, %v46_v33  ;;  %v53_v33 = vld [vmem:[%s13371_s0 + $0xa0] sm:$0xff] }
  0x10   :  { %v157_v6 = vsel %vm129_vm0, %v152_v63, %v156_v0  ;;  %v163_v10 = vrot.slane %v161_v3, 1  ;;  %v166_v11 = vshll.u32 %v8898_v2, 16  ;;  %v170_v27 = vshrl.u32 %v8898_v2, 16  ;;  %v51_v63 = vld [vmem:[%s13371_s0 + $0x90] sm:$0xff]  ;;  %v52_v0 = vld [vmem:[%s13371_s0 + $0x98] sm:$0xff] }
  0x11   :  { %v353_v12 = vsel %vm129_vm0, %v348_v4, %v352_v5  ;;  %v174_v28 = vshll.u32 %v8925_v25, 16  ;;  %v178_v42 = vshrl.u32 %v8925_v25, 16  ;;  %v13391_v44 = vshll.u32 %v8945_v37, 16 }
  0x12   :  { %v164_v16 = vor.u32 %v163_v10, %v159_v7  ;;  %v168_v24 = vrot.slane %v166_v11, 1  ;;  %v8957_v45 = vpack.c.bf16 %v48_v39, %v47_v38  ;;  %v8973_v52 = vpack.c.bf16 %v50_v47, %v49_v46  ;;  %v54_v39 = vld [vmem:[%s13371_s0 + $0xa8] sm:$0xff] }
  0x13   :  { %v176_v35 = vrot.slane %v174_v28, 1  ;;  %v184_v50 = vrot.slane %v13391_v44, 1  ;;  %v1042_v4 = vrot.slane %v131_v17, 3  ;;  %v1043_v5 = vrot.slane %v133_v18, 4  ;;  %v77_v44 = vld [vmem:[%s13371_s0 + $0x160] sm:$0xff] }
  0x14   :  { %7732 = vmatmul.mubr.msk.bf16.gmra.mxu0 %vm364_vm1, %v149_v54  ;;  %v169_v26 = vsel %vm129_vm0, %v164_v16, %v168_v24  ;;  %v172_v34 = vor.u32 %v170_v27, %v168_v24  ;;  %v13385_v53 = vshll.u32 %v8957_v45, 16  ;;  %v13383_v62 = vshll.u32 %v8973_v52, 16 }
  0x15   :  { %7753 = vmatmul.mubr.msk.bf16.gmra.mxu1 %vm364_vm1, %v345_v58  ;;  %489 = vmatprep.mubr.bf16.mxu0 %v13401_v1  ;;  %v180_v49 = vor.u32 %v178_v42, %v176_v35  ;;  %v13386_v58 = vshrl.u32 %v8957_v45, 16  ;;  %v1045_v10 = vrot.slane %v142_v31, 3  ;;  %v9004_v18 = vpack.c.bf16 %v52_v0, %v51_v63  ;;  %v56_v0 = vld [vmem:[%s13371_s0 + $0xb8] sm:$0xff] }
  0x16   :  { %699 = vmatprep.mubr.bf16.mxu1 %v13401_v1  ;;  %v177_v41 = vsel %vm129_vm0, %v172_v34, %v176_v35  ;;  %v191_v61 = vrot.slane %v13385_v53, 1  ;;  %v196_v17 = vrot.slane %v13383_v62, 1  ;;  %v1049_v13 = vrot.slane %v150_v55, 3  ;;  %v70_v62 = vld [vmem:[%s13371_s0 + $0x128] sm:$0xff] }
  0x17   :  { %v185_v54 = vsel %vm129_vm0, %v180_v49, %v184_v50  ;;  %v1050_v15 = vrot.slane %v146_v32, 4  ;;  %v13384_v24 = vshrl.u32 %v8973_v52, 16  ;;  %v9031_v38 = vpack.c.bf16 %v53_v33, %v53_v33 }
  0x18   :  { %v1053_v46 = vshrl.u32 %v8862_v48, 16  ;;  %v1056_v49 = vrot.slane %v154_v56, 4  ;;  %vm6415_vm10 = vcmask 1041408   ;;  %vm6366_vm11 = vcmask 162816  }
  0x19   :  { %v1051_v34 = vor.u32 %v1050_v15, %v1049_v13  ;;  %v200_v32 = vor.u32 %v13384_v24, %v196_v17  ;;  %v1062_v13 = vrot.slane %v170_v27, 3  ;;  %v1063_v15 = vrot.slane %v166_v11, 4  ;;  %v71_v24 = vld [vmem:[%s13371_s0 + $0x130] sm:$0xff] }
  0x1a   :  { %v1055_v47 = vrot.slane %v1053_v46, 3  ;;  %vm8703_vm12 = vmmov 0   ;;  %vm7635_vm13 = vcmask 1041409   ;;  %vm7638_vm14 = vcmask 1042434  }
  0x1b   :  { %vm7641_vm15 = vcmask 1043459  }
  0x1c   :  { %7733 = vmatmul.mubr.msk.bf16.gmra.mxu0 %vm364_vm1, %v157_v6  ;;  %v1046_v6 = vrot.slane %v138_v19, 4  ;;  %v1044_v19 = vor.u32 %v1043_v5, %v1042_v4  ;;  %v57_v4 = vld [vmem:[%s13371_s0 + $0xc0] sm:$0xff]  ;;  %v1057_v5 = vor.u32 %v1056_v49, %v1055_v47  ;;  %v1066_v47 = vrot.slane %v178_v42, 3 }
  0x1d   :  { %7754 = vmatmul.mubr.msk.bf16.gmra.mxu1 %vm364_vm1, %v353_v12  ;;  %499 = vmatprep.mubr.bf16.mxu0 %v13401_v1  ;;  %v192_v12 = vor.u32 %v191_v61, %v13386_v58  ;;  %v210_v61 = vshll.u32 %v9031_v38, 16  ;;  %v1067_v49 = vrot.slane %v174_v28, 4 }
  0x1e   :  { %800 = vmatprep.mubr.bf16.mxu1 %v13401_v1  ;;  %v1047_v31 = vor.u32 %v1046_v6, %v1045_v10  ;;  %v9056_v56 = vsel %vm1041_vm2, %v1051_v34, %v1057_v5  ;;  %v60_v5 = vld [vmem:[%s13371_s0 + $0xd8] sm:$0xff] }
  0x1f   :  { %v197_v16 = vsel %vm129_vm0, %v192_v12, %v196_v17  ;;  %v212_v10 = vrot.slane %v210_v61, 1  ;;  %v9065_v12 = vpack.c.bf16 %v57_v4, %v56_v0 }
  0x20   :  { %v9022_v55 = vsel %vm1041_vm2, %v1047_v31, %v1051_v34 }
  0x21   :  { %v226_v0 = vshrl.u32 %v9065_v12, 16 }
  0x24   :  { %7734 = vmatmul.mubr.msk.bf16.gmra.mxu0 %vm364_vm1, %v169_v26  ;;  %v202_v26 = vshll.u32 %v9004_v18, 16 }
  0x25   :  { %7757 = vmatmul.mubr.msk.bf16.vlgmr.msra.gmra.mxu1 %vm364_vm1, %v8777_v8  ;;  %509 = vmatprep.mubr.bf16.mxu0 %v13401_v1 }
  0x26   :  { %1815 = vmatpush1.bf16.msra.mxu1 %v8651_v30  ;;  %810 = vmatprep.mubr.bf16.mxu1 %v13401_v1  ;;  %v9015_v30 = vsel %vm1041_vm2, %v1044_v19, %v1047_v31  ;;  %v204_v35 = vrot.slane %v202_v26, 1  ;;  %v1059_v19 = vrot.slane %v159_v7, 3  ;;  %v1060_v31 = vrot.slane %v161_v3, 4  ;;  %v58_v7 = vld [vmem:[%s13371_s0 + $0xc8] sm:$0xff]  ;;  %v59_v3 = vld [vmem:[%s13371_s0 + $0xd0] sm:$0xff] }
  0x27   :  { %v9099_v46 = vpack.c.bf16 %v59_v3, %v58_v7  ;;  %v63_v3 = vld [vmem:[%s13371_s0 + $0xf0] sm:$0xff] }
  0x28   :  { %v205_v50 = vsel %vm129_vm0, %v200_v32, %v204_v35  ;;  %v222_v32 = vshll.u32 %v9065_v12, 16  ;;  %v1061_v27 = vor.u32 %v1060_v31, %v1059_v19  ;;  %v9126_v19 = vpack.c.bf16 %v60_v5, %v60_v5  ;;  %v61_v31 = vld [vmem:[%s13371_s0 + $0xe0] sm:$0xff] }
  0x29   :  { %v230_v4 = vshll.u32 %v9099_v46, 16 }
  0x2c   :  { %7735 = vmatmul.mubr.msk.bf16.gmra.mxu0 %vm364_vm1, %v177_v41  ;;  %v55_v41 = vld [vmem:[%s13371_s0 + $0xb0] sm:$0xff] }
  0x2d   :  { %7758 = vmatmul.mubr.msk.bf16.gmra.mxu1 %vm364_vm1, %v8779_v9  ;;  %519 = vmatprep.mubr.bf16.mxu0 %v13401_v1  ;;  %v9046_v63 = vpack.c.bf16 %v55_v41, %v54_v39  ;;  %v224_v41 = vrot.slane %v222_v32, 1 }
  0x2e   :  { %820 = vmatprep.mubr.bf16.mxu1 %v13401_v1 }
  0x2f   :  { %v217_v17 = vshll.u32 %v9046_v63, 16  ;;  %v215_v33 = vshrl.u32 %v9046_v63, 16  ;;  %v228_v28 = vor.u32 %v226_v0, %v224_v41 }
  0x31   :  { %v219_v34 = vrot.slane %v217_v17, 1 }
  0x33   :  { %v220_v39 = vor.u32 %v219_v34, %v215_v33  ;;  %v238_v34 = vshll.u32 %v9126_v19, 16 }
  0x34   :  { %7736 = vmatmul.mubr.msk.bf16.gmra.mxu0 %vm364_vm1, %v185_v54  ;;  %v206_v54 = vshrl.u32 %v9004_v18, 16 }
  0x35   :  { %7759 = vmatmul.mubr.msk.bf16.gmra.mxu1 %vm364_vm1, %v8808_v23  ;;  %529 = vmatprep.mubr.bf16.mxu0 %v13401_v1 }
  0x36   :  { %830 = vmatprep.mubr.bf16.mxu1 %v13401_v1  ;;  %v208_v6 = vor.u32 %v206_v54, %v204_v35  ;;  %v1064_v35 = vor.u32 %v1063_v15, %v1062_v13  ;;  %v62_v13 = vld [vmem:[%s13371_s0 + $0xe8] sm:$0xff] }
  0x37   :  { %v9138_v7 = vpack.c.bf16 %v62_v13, %v61_v31  ;;  %v66_v31 = vld [vmem:[%s13371_s0 + $0x108] sm:$0xff] }
  0x38   :  { %v9090_v11 = vsel %vm1041_vm2, %v1061_v27, %v1064_v35  ;;  %v64_v27 = vld [vmem:[%s13371_s0 + $0xf8] sm:$0xff] }
  0x3c   :  { %7737 = vmatmul.mubr.msk.bf16.gmra.mxu0 %vm364_vm1, %v197_v16  ;;  %v213_v16 = vsel %vm129_vm0, %v208_v6, %v212_v10  ;;  %v9112_v6 = vor.u32 %v1067_v49, %v1066_v47  ;;  %v232_v10 = vrot.slane %v230_v4, 1  ;;  %v245_v47 = vshll.u32 %v9138_v7, 16 }
  0x3d   :  { %7760 = vmatmul.mubr.msk.bf16.gmra.mxu1 %vm364_vm1, %v8880_v57  ;;  %539 = vmatprep.mubr.bf16.mxu0 %v13401_v1 }
  0x3e   :  { %840 = vmatprep.mubr.bf16.mxu1 %v13401_v1  ;;  %v9117_v42 = vsel %vm1041_vm2, %v1064_v35, %v9112_v6  ;;  %v233_v15 = vsel %vm129_vm0, %v228_v28, %v232_v10  ;;  %v247_v5 = vrot.slane %v245_v47, 1 }
  0x44   :  { %7738 = vmatmul.mubr.msk.bf16.gmra.mxu0 %vm364_vm1, %v205_v50  ;;  %v225_v50 = vsel %vm129_vm0, %v220_v39, %v224_v41  ;;  %v240_v39 = vrot.slane %v238_v34, 1  ;;  %v9154_v41 = vpack.c.bf16 %v64_v27, %v63_v3  ;;  %v1084_v27 = vrot.slane %v202_v26, 4 }
  0x45   :  { %7761 = vmatmul.mubr.msk.bf16.gmra.mxu1 %vm364_vm1, %v8898_v2  ;;  %549 = vmatprep.mubr.bf16.mxu0 %v13401_v1 }
  0x46   :  { %850 = vmatprep.mubr.bf16.mxu1 %v13401_v1  ;;  %v250_v28 = vshll.u32 %v9154_v41, 16 }
  0x4c   :  { %7739 = vmatmul.mubr.msk.bf16.gmra.mxu0 %vm364_vm1, %v213_v16  ;;  %v234_v16 = vshrl.u32 %v9099_v46, 16 }
  0x4d   :  { %7762 = vmatmul.mubr.msk.bf16.gmra.mxu1 %vm364_vm1, %v8925_v25  ;;  %559 = vmatprep.mubr.bf16.mxu0 %v13401_v1 }
  0x4e   :  { %860 = vmatprep.mubr.bf16.mxu1 %v13401_v1  ;;  %v236_v35 = vor.u32 %v234_v16, %v232_v10  ;;  %v65_v10 = vld [vmem:[%s13371_s0 + $0x100] sm:$0xff] }
  0x4f   :  { %v9177_v3 = vpack.c.bf16 %v66_v31, %v65_v10 }
  0x50   :  { %v241_v49 = vsel %vm129_vm0, %v236_v35, %v240_v39  ;;  %v1083_v35 = vrot.slane %v206_v54, 3 }
  0x51   :  { %v258_v60 = vshll.u32 %v9177_v3, 16 }
  0x52   :  { %v9190_v10 = vor.u32 %v1084_v27, %v1083_v35  ;;  %v68_v27 = vld [vmem:[%s13371_s0 + $0x118] sm:$0xff]  ;;  %v69_v35 = vld [vmem:[%s13371_s0 + $0x120] sm:$0xff] }
  0x53   :  { %v260_v54 = vrot.slane %v258_v60, 1 }
  0x54   :  { %7740 = vmatmul.mubr.msk.bf16.gmra.mxu0 %vm364_vm1, %v225_v50  ;;  %v243_v50 = vshrl.u32 %v9138_v7, 16 }
  0x55   :  { %7763 = vmatmul.mubr.msk.bf16.gmra.mxu1 %vm364_vm1, %v8957_v45  ;;  %569 = vmatprep.mubr.bf16.mxu0 %v13401_v1 }
  0x56   :  { %870 = vmatprep.mubr.bf16.mxu1 %v13401_v1  ;;  %v248_v13 = vor.u32 %v247_v5, %v243_v50  ;;  %v67_v5 = vld [vmem:[%s13371_s0 + $0x110] sm:$0xff] }
  0x57   :  { %v9200_v31 = vpack.c.bf16 %v67_v5, %v67_v5  ;;  %v262_v5 = vshrl.u32 %v9177_v3, 16 }
  0x59   :  { %v266_v43 = vshll.u32 %v9200_v31, 16 }
  0x5c   :  { %7741 = vmatmul.mubr.msk.bf16.gmra.mxu0 %vm364_vm1, %v233_v15  ;;  %v252_v15 = vrot.slane %v250_v28, 1 }
  0x5d   :  { %7764 = vmatmul.mubr.msk.bf16.gmra.mxu1 %vm364_vm1, %v8973_v52  ;;  %579 = vmatprep.mubr.bf16.mxu0 %v13401_v1 }
  0x5e   :  { %880 = vmatprep.mubr.bf16.mxu1 %v13401_v1  ;;  %v253_v39 = vsel %vm129_vm0, %v248_v13, %v252_v15  ;;  %v1090_v13 = vrot.slane %v210_v61, 4  ;;  %v9215_v61 = vpack.c.bf16 %v69_v35, %v68_v27  ;;  %v264_v27 = vor.u32 %v262_v5, %v260_v54 }
  0x5f   :  { %v268_v35 = vrot.slane %v266_v43, 1 }
  0x60   :  { %13517 = vst [vmem:[#allocation6_spill] sm:$0xff] %v9215_v61 }
  0x61   :  { %v269_v58 = vsel %vm129_vm0, %v264_v27, %v268_v35 }
  0x64   :  { %7742 = vmatmul.mubr.msk.bf16.gmra.mxu0 %vm364_vm1, %v241_v49  ;;  %v254_v49 = vshrl.u32 %v9154_v41, 16 }
  0x65   :  { %7765 = vmatmul.mubr.msk.bf16.gmra.mxu1 %vm364_vm1, %v9004_v18  ;;  %589 = vmatprep.mubr.bf16.mxu0 %v13401_v1 }
  0x66   :  { %890 = vmatprep.mubr.bf16.mxu1 %v13401_v1  ;;  %v256_v26 = vor.u32 %v254_v49, %v252_v15  ;;  %v1087_v15 = vshrl.u32 %v9031_v38, 16 }
  0x68   :  { %v261_v59 = vsel %vm129_vm0, %v256_v26, %v260_v54  ;;  %v1094_v54 = vrot.slane %v217_v17, 4 }
  0x6c   :  { %7743 = vmatmul.mubr.msk.bf16.gmra.mxu0 %vm364_vm1, %v253_v39  ;;  %v1089_v39 = vrot.slane %v1087_v15, 3  ;;  %v9235_v15 = vpack.c.bf16 %v71_v24, %v70_v62  ;;  %v271_v62 = vshrl.u32 %v9215_v61, 16 }
  0x6d   :  { %7766 = vmatmul.mubr.msk.bf16.gmra.mxu1 %vm364_vm1, %v9046_v63  ;;  %599 = vmatprep.mubr.bf16.mxu0 %v13401_v1 }
  0x6e   :  { %900 = vmatprep.mubr.bf16.mxu1 %v13401_v1  ;;  %v1091_v53 = vor.u32 %v1090_v13, %v1089_v39  ;;  %13518 = vst [vmem:[#allocation7_spill] sm:$0xff] %v9235_v15  ;;  %v13393_v13 = vshll.u32 %v9215_v61, 16  ;;  %v1096_v39 = vrot.slane %v226_v0, 3  ;;  %v73_v0 = vld [vmem:[%s13371_s0 + $0x140] sm:$0xff] }
  0x70   :  { %v9226_v26 = vsel %vm1041_vm2, %v9190_v10, %v1091_v53  ;;  %v1097_v53 = vrot.slane %v222_v32, 4  ;;  %v275_v24 = vrot.slane %v13393_v13, 1  ;;  %v72_v32 = vld [vmem:[%s13371_s0 + $0x138] sm:$0xff] }
  0x71   :  { %v9269_v29 = vpack.c.bf16 %v73_v0, %v72_v32 }
  0x72   :  { %v1098_v40 = vor.u32 %v1097_v53, %v1096_v39  ;;  %v276_v27 = vor.u32 %v275_v24, %v271_v62  ;;  %v282_v53 = vshrl.u32 %v9235_v15, 16 }
  0x73   :  { %13519 = vst [vmem:[#allocation8_spill] sm:$0xff] %v9269_v29  ;;  %v13392_v39 = vshll.u32 %v9269_v29, 16 }
  0x74   :  { %7744 = vmatmul.mubr.msk.bf16.gmra.mxu0 %vm364_vm1, %v261_v59  ;;  %v1093_v59 = vrot.slane %v215_v33, 3  ;;  %v278_v33 = vshll.u32 %v9235_v15, 16 }
  0x75   :  { %7767 = vmatmul.mubr.msk.bf16.gmra.mxu1 %vm364_vm1, %v9065_v12  ;;  %609 = vmatprep.mubr.bf16.mxu0 %v13401_v1  ;;  %v288_v32 = vrot.slane %v13392_v39, 1  ;;  %v78_v39 = vld [vmem:[%s13371_s0 + $0x168] sm:$0xff] }
  0x76   :  { %910 = vmatprep.mubr.bf16.mxu1 %v13401_v1  ;;  %v1095_v22 = vor.u32 %v1094_v54, %v1093_v59  ;;  %v280_v35 = vrot.slane %v278_v33, 1  ;;  %v1101_v59 = vrot.slane %v230_v4, 4  ;;  %v74_v54 = vld [vmem:[%s13371_s0 + $0x148] sm:$0xff] }
  0x77   :  { %v9293_v0 = vpack.c.bf16 %v74_v54, %v74_v54  ;;  %v13395_v54 = vshrl.u32 %v9269_v29, 16 }
  0x78   :  { %v9260_v17 = vsel %vm1041_vm2, %v1095_v22, %v1098_v40  ;;  %v1100_v22 = vrot.slane %v234_v16, 3  ;;  %v284_v16 = vor.u32 %v282_v53, %v280_v35 }
  0x79   :  { %13520 = vst [vmem:[#allocation9_spill] sm:$0xff] %v9293_v0  ;;  %v13394_v21 = vshll.u32 %v9293_v0, 16 }
  0x7a   :  { %v1102_v24 = vor.u32 %v1101_v59, %v1100_v22  ;;  %v76_v59 = vld [vmem:[%s13371_s0 + $0x158] sm:$0xff] }
  0x7c   :  { %7745 = vmatmul.mubr.msk.bf16.gmra.mxu0 %vm364_vm1, %v269_v58  ;;  %v281_v58 = vsel %vm129_vm0, %v276_v27, %v280_v35  ;;  %v9284_v4 = vsel %vm1041_vm2, %v1098_v40, %v1102_v24  ;;  %v1107_v27 = vrot.slane %v238_v34, 4  ;;  %v75_v40 = vld [vmem:[%s13371_s0 + $0x150] sm:$0xff]  ;;  %v1104_v35 = vshrl.u32 %v9126_v19, 16 }
  0x7d   :  { %7768 = vmatmul.mubr.msk.bf16.gmra.mxu1 %vm364_vm1, %v9099_v46  ;;  %619 = vmatprep.mubr.bf16.mxu0 %v13401_v1  ;;  %v9308_v34 = vpack.c.bf16 %v76_v59, %v75_v40  ;;  %v296_v40 = vrot.slane %v13394_v21, 1  ;;  %v9327_v59 = vpack.c.bf16 %v78_v39, %v77_v44 }
  0x7e   :  { %920 = vmatprep.mubr.bf16.mxu1 %v13401_v1  ;;  %v1106_v22 = vrot.slane %v1104_v35, 3 }
  0x7f   :  { %13521 = vst [vmem:[#allocation10_spill] sm:$0xff] %v9308_v34  ;;  %13522 = vst [vmem:[#allocation11_spill] sm:$0xff] %v9327_v59  ;;  %v13399_v44 = vshrl.u32 %v9308_v34, 16 }
  0x80   :  { %v1108_v13 = vor.u32 %v1107_v27, %v1106_v22  ;;  %v13396_v27 = vshll.u32 %v9308_v34, 16  ;;  %v1110_v22 = vrot.slane %v243_v50, 3  ;;  %v13397_v50 = vshll.u32 %v9327_v59, 16 }
  0x82   :  { %v9318_v35 = vsel %vm1041_vm2, %v1102_v24, %v1108_v13  ;;  %v1114_v13 = vrot.slane %v250_v28, 4  ;;  %v1113_v24 = vrot.slane %v254_v49, 3  ;;  %v303_v39 = vrot.slane %v13396_v27, 1  ;;  %v79_v28 = vld [vmem:[%s13371_s0 + $0x170] sm:$0xff]  ;;  %v80_v49 = vld [vmem:[%s13371_s0 + $0x178] sm:$0xff] }
  0x83   :  { %v9361_v27 = vpack.c.bf16 %v80_v49, %v79_v28 }
  0x84   :  { %7746 = vmatmul.mubr.msk.bf16.gmra.mxu0 %vm364_vm1, %v281_v58  ;;  %v289_v58 = vsel %vm129_vm0, %v284_v16, %v288_v32  ;;  %v292_v16 = vor.u32 %v13395_v54, %v288_v32  ;;  %v1111_v32 = vrot.slane %v245_v47, 4  ;;  %v1115_v54 = vor.u32 %v1114_v13, %v1113_v24 }
  0x85   :  { %7769 = vmatmul.mubr.msk.bf16.gmra.mxu1 %vm364_vm1, %v9138_v7  ;;  %629 = vmatprep.mubr.bf16.mxu0 %v13401_v1  ;;  %13523 = vst [vmem:[#allocation12_spill] sm:$0xff] %v9361_v27  ;;  %v310_v24 = vshrl.u32 %v9327_v59, 16 }
  0x86   :  { %930 = vmatprep.mubr.bf16.mxu1 %v13401_v1  ;;  %v1112_v21 = vor.u32 %v1111_v32, %v1110_v22  ;;  %v1118_v22 = vrot.slane %v258_v60, 4  ;;  %v13398_v32 = vshll.u32 %v9361_v27, 16 }
  0x88   :  { %v9352_v47 = vsel %vm1041_vm2, %v1112_v21, %v1115_v54  ;;  %v1117_v21 = vrot.slane %v262_v5, 3  ;;  %v316_v28 = vrot.slane %v13398_v32, 1 }
  0x8c   :  { %7747 = vmatmul.mubr.msk.bf16.gmra.mxu0 %vm364_vm1, %v289_v58  ;;  %v297_v58 = vsel %vm129_vm0, %v292_v16, %v296_v40  ;;  %v304_v16 = vor.u32 %v303_v39, %v13399_v44  ;;  %v308_v40 = vrot.slane %v13397_v50, 1  ;;  %v1119_v39 = vor.u32 %v1118_v22, %v1117_v21 }
  0x8d   :  { %7770 = vmatmul.mubr.msk.bf16.gmra.mxu1 %vm364_vm1, %v9154_v41  ;;  %639 = vmatprep.mubr.bf16.mxu0 %v13401_v1  ;;  %v1121_v22 = vshrl.u32 %v9200_v31, 16 }
  0x8e   :  { %940 = vmatprep.mubr.bf16.mxu1 %v13401_v1  ;;  %v309_v13 = vsel %vm129_vm0, %v304_v16, %v308_v40  ;;  %v9376_v60 = vsel %vm1041_vm2, %v1115_v54, %v1119_v39  ;;  %v312_v5 = vor.u32 %v310_v24, %v308_v40  ;;  %v1124_v16 = vrot.slane %v266_v43, 4 }
  0x8f   :  { %v1123_v54 = vrot.slane %v1121_v22, 3  ;;  %v1131_v22 = vrot.slane %v278_v33, 4 }
  0x90   :  { %v317_v21 = vsel %vm129_vm0, %v312_v5, %v316_v28  ;;  %v1127_v5 = vrot.slane %v271_v62, 3  ;;  %v13526_v62 = vshll.u32 %v9269_v29, 16 }
  0x91   :  { %v1125_v40 = vor.u32 %v1124_v16, %v1123_v54  ;;  %v1130_v16 = vrot.slane %v282_v53, 3  ;;  %v13527_v53 = vshrl.u32 %v9269_v29, 16 }
  0x92   :  { %v1135_v33 = vrot.slane %v13526_v62, 4  ;;  %v13530_v62 = vshll.u32 %v9327_v59, 16 }
  0x93   :  { %v1132_v44 = vor.u32 %v1131_v22, %v1130_v16  ;;  %v1138_v16 = vshrl.u32 %v9293_v0, 16 }
  0x94   :  { %7748 = vmatmul.mubr.msk.bf16.gmra.mxu0 %vm364_vm1, %v297_v58  ;;  %v81_v58 = vld [vmem:[%s13371_s0 + $0x180] sm:$0xff]  ;;  %s8698_s0 = smov 88  }
  0x95   :  { %7771 = vmatmul.mubr.msk.bf16.gmra.mxu1 %vm364_vm1, %v9177_v3  ;;  %649 = vmatprep.mubr.bf16.mxu0 %v13401_v1  ;;  %v9383_v49 = vpack.c.bf16 %v81_v58, %v81_v58  ;;  %v9394_v58 = vsel %vm1041_vm2, %v1119_v39, %v1125_v40  ;;  %v13525_v39 = vshll.u32 %v9215_v61, 16 }
  0x96   :  { %950 = vmatprep.mubr.bf16.mxu1 %v13401_v1 }
  0x97   :  { %13524 = vst [vmem:[#allocation13_spill] sm:$0xff] %v9383_v49  ;;  %v322_v50 = vshll.u32 %v9383_v49, 16  ;;  %v1128_v54 = vrot.slane %v13525_v39, 4  ;;  %v1134_v39 = vrot.slane %v13527_v53, 3  ;;  %v1147_v53 = vrot.slane %v310_v24, 3 }
  0x98   :  { %v13532_v24 = vshll.u32 %v9361_v27, 16 }
  0x99   :  { %v324_v32 = vrot.slane %v322_v50, 1  ;;  %v1129_v40 = vor.u32 %v1128_v54, %v1127_v5  ;;  %v13528_v5 = vshll.u32 %v9293_v0, 16  ;;  %v1140_v54 = vrot.slane %v1138_v16, 3 }
  0x9a   :  { %v1152_v16 = vrot.slane %v13532_v24, 4 }
  0x9b   :  { %v1141_v22 = vrot.slane %v13528_v5, 4 }
  0x9c   :  { %7749 = vmatmul.mubr.msk.bf16.gmra.mxu0 %vm364_vm1, %v309_v13  ;;  %v318_v13 = vshrl.u32 %v9361_v27, 16 }
  0x9d   :  { %7772 = vmatmul.mubr.msk.bf16.gmra.mxu1 %vm364_vm1, %v9215_v61  ;;  %659 = vmatprep.mubr.bf16.mxu0 %v13401_v1 }
  0x9e   :  { %960 = vmatprep.mubr.bf16.mxu1 %v13401_v1  ;;  %v320_v43 = vor.u32 %v318_v13, %v316_v28  ;;  %v9411_v28 = vsel %vm1041_vm2, %v1129_v40, %v1132_v44 }
  0xa4   :  { %7750 = vmatmul.mubr.msk.bf16.gmra.mxu0 %vm364_vm1, %v317_v21  ;;  %v325_v21 = vsel %vm129_vm0, %v320_v43, %v324_v32  ;;  %v1136_v32 = vor.u32 %v1135_v33, %v1134_v39  ;;  %v1148_v33 = vrot.slane %v13530_v62, 4  ;;  %v13531_v39 = vshll.u32 %v9308_v34, 16 }
  0xa5   :  { %7773 = vmatmul.mubr.msk.bf16.gmra.mxu1 %vm364_vm1, %v9235_v15  ;;  %669 = vmatprep.mubr.bf16.mxu0 %v13401_v1 }
  0xa6   :  { %970 = vmatprep.mubr.bf16.mxu1 %v13401_v1  ;;  %v9424_v43 = vsel %vm1041_vm2, %v1132_v44, %v1136_v32  ;;  %v13529_v44 = vshrl.u32 %v9308_v34, 16 }
  0xa8   :  { %v1144_v40 = vrot.slane %v13529_v44, 3 }
  0xac   :  { %7751 = vmatmul.mubr.msk.bf16.gmra.mxu0 %vm364_vm1, %v325_v21  ;;  %v1142_v21 = vor.u32 %v1141_v22, %v1140_v54  ;;  %v1151_v54 = vrot.slane %v318_v13, 3  ;;  %v1158_v13 = vrot.slane %v322_v50, 4 }
  0xad   :  { %7774 = vmatmul.mubr.msk.bf16.gmra.mxu1 %vm364_vm1, %v9269_v29  ;;  %1292 = vmatprep.mubr.bf16.mxu0 %v13401_v1 }
  0xae   :  { %980 = vmatprep.mubr.bf16.mxu1 %v13401_v1 }
  0xb4   :  { %7783 = vmatmul.mubr.msk.bf16.vlgmr.msra.gmra.mxu0 %vm364_vm1, %v9015_v30  ;;  %v9436_v30 = vsel %vm1041_vm2, %v1136_v32, %v1142_v21  ;;  %v1149_v32 = vor.u32 %v1148_v33, %v1147_v53  ;;  %v1153_v21 = vor.u32 %v1152_v16, %v1151_v54  ;;  %v1155_v53 = vshrl.u32 %v9383_v49, 16 }
  0xb5   :  { %7775 = vmatmul.mubr.msk.bf16.gmra.mxu1 %vm364_vm1, %v9308_v34  ;;  %1302 = vmatprep.mubr.bf16.mxu0 %v13401_v1  ;;  %v13548_v34 = vshrl.u32 %v8973_v52, 16 }
  0xb6   :  { %990 = vmatprep.mubr.bf16.mxu1 %v13401_v1  ;;  %v1157_v24 = vrot.slane %v1155_v53, 3  ;;  %v13539_v53 = vmov 0  }
  0xb7   :  { %v1079_v0 = vrot.slane %v13548_v34, 3 }
  0xb8   :  { %v1159_v50 = vor.u32 %v1158_v13, %v1157_v24  ;;  %v13540_v13 = vshrl.u32 %v8793_v14, 16  ;;  %v13541_v24 = vshll.u32 %v8804_v20, 16 }
  0xbc   :  { %7784 = vmatmul.mubr.msk.bf16.gmra.mxu0 %vm364_vm1, %v9022_v55  ;;  %v1145_v55 = vrot.slane %v13531_v39, 4 }
  0xbd   :  { %7776 = vmatmul.mubr.msk.bf16.gmra.mxu1 %vm364_vm1, %v9327_v59  ;;  %1312 = vmatprep.mubr.bf16.mxu0 %v13401_v1 }
  0xbe   :  { %1000 = vmatprep.mubr.bf16.mxu1 %v13401_v1  ;;  %v1146_v5 = vor.u32 %v1145_v55, %v1144_v40  ;;  %v9465_v40 = vsel %vm1041_vm2, %v1149_v32, %v1153_v21 }
  0xc0   :  { %v9451_v22 = vsel %vm1041_vm2, %v1146_v5, %v1149_v32  ;;  %v13535_v5 = vshll.u32 %v8945_v37, 16 }
  0xc2   :  { %v1073_v32 = vrot.slane %v13535_v5, 4  ;;  %v1161_v5 = vrot.slane %v13540_v13, 3 }
  0xc4   :  { %7785 = vmatmul.mubr.msk.bf16.gmra.mxu0 %vm364_vm1, %v9056_v56  ;;  %v1070_v56 = vshrl.u32 %v8945_v37, 16 }
  0xc5   :  { %7777 = vmatmul.mubr.msk.bf16.gmra.mxu1 %vm364_vm1, %v9361_v27  ;;  %1322 = vmatprep.mubr.bf16.mxu0 %v13401_v1 }
  0xc6   :  { %1010 = vmatprep.mubr.bf16.mxu1 %v13401_v1  ;;  %v1072_v55 = vrot.slane %v1070_v56, 3 }
  0xcc   :  { %v9459_v44 = vpop.f32.mrf.mxu0  ;;  %7786 = vmatmul.mubr.msk.bf16.gmra.mxu0 %vm364_vm1, %v9090_v11 }
  0xcd   :  { %v9467_v62 = vpop.f32.mrf.mxu1  ;;  %7778 = vmatmul.mubr.msk.bf16.gmra.mxu1 %vm364_vm1, %v8793_v14  ;;  %1332 = vmatprep.mubr.bf16.mxu0 %v13401_v1 }
  0xce   :  { %13533 = vst [vmem:[#allocation14_spill] sm:$0xff] %v9467_v62  ;;  %v9472_v33 = vpop.f32.mrf.mxu0  ;;  %1020 = vmatprep.mubr.bf16.mxu1 %v13401_v1  ;;  %v1074_v1 = vor.u32 %v1073_v32, %v1072_v55 }
  0xcf   :  { %v9476_v11 = vpop.f32.mrf.mxu1 }
  0xd0   :  { %13534 = vst [vmem:[#allocation15_spill] sm:$0xff] %v9476_v11  ;;  %v9478_v39 = vpop.f32.mrf.mxu0  ;;  %v9493_v11 = vsel %vm1041_vm2, %v1153_v21, %v1159_v50  ;;  %v1075_v50 = vsel %vm1041_vm2, %v9112_v6, %v1074_v1 }
  0xd1   :  { %v9482_v16 = vpop.f32.mrf.mxu1 }
  0xd2   :  { %13536 = vst [vmem:[#allocation16_spill] sm:$0xff] %v9482_v16  ;;  %v9484_v54 = vpop.f32.mrf.mxu0  ;;  %v13542_v16 = vshrl.u32 %v8804_v20, 16 }
  0xd3   :  { %v9486_v62 = vpop.f32.mrf.mxu1 }
  0xd4   :  { %13537 = vst [vmem:[#allocation17_spill] sm:$0xff] %v9486_v62  ;;  %v9488_v27 = vpop.f32.mrf.mxu0  ;;  %7787 = vmatmul.mubr.msk.bf16.gmra.mxu0 %vm364_vm1, %v9117_v42  ;;  %v1165_v62 = vrot.slane %v13541_v24, 4  ;;  %v1164_v42 = vrot.slane %v13542_v16, 3  ;;  %v13546_v24 = vshrl.u32 %v8957_v45, 16  ;;  %v13547_v16 = vshll.u32 %v8957_v45, 16 }
  0xd5   :  { %v9495_v56 = vpop.f32.mrf.mxu1  ;;  %7779 = vmatmul.mubr.msk.bf16.gmra.mxu1 %vm364_vm1, %v8804_v20  ;;  %1342 = vmatprep.mubr.bf16.mxu0 %v13539_v53 }
  0xd6   :  { %13538 = vst [vmem:[#allocation18_spill] sm:$0xff] %v9495_v56  ;;  %v9506_v55 = vpop.f32.mrf.mxu0  ;;  %1030 = vmatprep.mubr.bf16.mxu1 %v13539_v53  ;;  %v13544_v56 = vshll.u32 %v8793_v14, 16  ;;  %v1076_v20 = vrot.slane %v13546_v24, 3  ;;  %v1077_v59 = vrot.slane %v13547_v16, 4  ;;  %v1166_v6 = vor.u32 %v1165_v62, %v1164_v42 }
  0xd7   :  { %v9509_v21 = vpop.f32.mrf.mxu1  ;;  %v13553_v62 = vshll.u32 %v8834_v36, 16  ;;  %v13554_v42 = vshrl.u32 %v8834_v36, 16 }
  0xd8   :  { %13543 = vst [vmem:[#allocation19_spill] sm:$0xff] %v9509_v21  ;;  %v9511_v32 = vpop.f32.mrf.mxu0  ;;  %v1162_v13 = vrot.slane %v13544_v56, 4  ;;  %v13549_v21 = vshll.u32 %v8973_v52, 16  ;;  %v1078_v34 = vor.u32 %v1077_v59, %v1076_v20 }
  0xd9   :  { %v9517_v49 = vpop.f32.mrf.mxu1 }
  0xda   :  { %13545 = vst [vmem:[#allocation20_spill] sm:$0xff] %v9517_v49  ;;  %v1080_v29 = vrot.slane %v13549_v21, 4  ;;  %v9527_v15 = vpop.f32.mrf.mxu0  ;;  %v1163_v1 = vor.u32 %v1162_v13, %v1161_v5  ;;  %v1169_v5 = vrot.slane %v13553_v62, 4  ;;  %v1168_v13 = vrot.slane %v13554_v42, 3 }
  0xdb   :  { %v9529_v14 = vpop.f32.mrf.mxu1 }
  0xdc   :  { %13550 = vst [vmem:[#allocation21_spill] sm:$0xff] %v9529_v14  ;;  %v9531_v56 = vpop.f32.mrf.mxu0  ;;  %7788 = vmatmul.mubr.msk.bf16.gmra.mxu0 %vm364_vm1, %v1075_v50  ;;  %v9535_v24 = vsel %vm1041_vm2, %v1163_v1, %v1166_v6  ;;  %v1081_v21 = vor.u32 %v1080_v29, %v1079_v0  ;;  %v1662_v50 = vrot.slane %v8777_v8, 4  ;;  %v1663_v1 = vrot.slane %v8779_v9, 4 }
  0xdd   :  { %13551 = vst [vmem:[#allocation22_spill] sm:$0xff] %v9535_v24  ;;  %v9537_v16 = vpop.f32.mrf.mxu1  ;;  %7780 = vmatmul.mubr.msk.bf16.gmra.mxu1 %vm364_vm1, %v8834_v36  ;;  %1352 = vmatprep.mubr.bf16.mxu0 %v13539_v53  ;;  %v1170_v62 = vor.u32 %v1169_v5, %v1168_v13  ;;  %v1665_v13 = vrot.slane %v8808_v23, 4 }
  0xde   :  { %13552 = vst [vmem:[#allocation23_spill] sm:$0xff] %v9537_v16  ;;  %v9546_v14 = vpop.f32.mrf.mxu0  ;;  %1832 = vmatprep.mubr.bf16.mxu1 %v13539_v53  ;;  %v1082_v29 = vsel %vm1041_vm2, %v1078_v34, %v1081_v21  ;;  %v1664_v59 = vsel %vm1661_vm3, %v1662_v50, %v1663_v1  ;;  %v13559_v34 = vshll.u32 %v8869_v51, 16 }
  0xdf   :  { %v9551_v16 = vpop.f32.mrf.mxu1  ;;  %v9567_v8 = vsel %vm1041_vm2, %v1166_v6, %v1170_v62  ;;  %v1172_v6 = vshrl.u32 %v8869_v51, 16 }
  0xe0   :  { %13555 = vst [vmem:[#allocation24_spill] sm:$0xff] %v9551_v16  ;;  %v9553_v49 = vpop.f32.mrf.mxu0  ;;  %13558 = vst [vmem:[#allocation27_spill] sm:$0xff] %v9567_v8 }
  0xe1   :  { %v9555_v20 = vpop.f32.mrf.mxu1  ;;  %v1174_v16 = vrot.slane %v1172_v6, 3 }
  0xe2   :  { %13556 = vst [vmem:[#allocation25_spill] sm:$0xff] %v9555_v20  ;;  %v9558_v0 = vpop.f32.mrf.mxu0  ;;  %v1175_v20 = vrot.slane %v13559_v34, 4  ;;  %v1086_v34 = vsel %vm1041_vm2, %v1081_v21, %v9190_v10 }
  0xe3   :  { %v9561_v42 = vpop.f32.mrf.mxu1 }
  0xe4   :  { %13557 = vst [vmem:[#allocation26_spill] sm:$0xff] %v9561_v42  ;;  %v9563_v36 = vpop.f32.mrf.mxu0  ;;  %7789 = vmatmul.mubr.msk.bf16.gmra.mxu0 %vm364_vm1, %v1082_v29  ;;  %v1176_v24 = vor.u32 %v1175_v20, %v1174_v16 }
  0xe5   :  { %v802_v9 = vpop.f32.mrf.mxu1  ;;  %7809 = vmatmul.mubr.msk.bf16.vlgmr.msra.gmra.mxu1 %vm364_vm1, %v1664_v59  ;;  %1362 = vmatprep.mubr.bf16.mxu0 %v13539_v53 }
  0xe6   :  { %v9574_v50 = vadd.f32 %v802_v9, %v9459_v44  ;;  %v9576_v5 = vpop.f32.mrf.mxu0  ;;  %1842 = vmatprep.mubr.bf16.mxu1 %v13539_v53 }
  0xe7   :  { %v804_v29 = vpop.f32.mrf.mxu1 }
  0xe8   :  { %13560 = vst [vmem:[#allocation28_spill] sm:$0xff] %v9574_v50  ;;  %v9582_v42 = vadd.f32 %v804_v29, %v9472_v33  ;;  %v505_v59 = vpop.f32.mrf.mxu0  ;;  %v1666_v50 = vsel %vm1661_vm3, %v1663_v1, %v1665_v13  ;;  %v9595_v33 = vsel %vm1041_vm2, %v1170_v62, %v1176_v24 }
  0xe9   :  { %v806_v8 = vpop.f32.mrf.mxu1 }
  0xea   :  { %v9587_v44 = vadd.f32 %v806_v8, %v9478_v39  ;;  %v507_v9 = vpop.f32.mrf.mxu0 }
  0xeb   :  { %v808_v23 = vpop.f32.mrf.mxu1 }
  0xec   :  { %v9591_v51 = vadd.f32 %v808_v23, %v9484_v54  ;;  %v511_v61 = vpop.f32.mrf.mxu0  ;;  %7790 = vmatmul.mubr.msk.bf16.gmra.mxu0 %vm364_vm1, %v1086_v34  ;;  %v1667_v54 = vrot.slane %v8862_v48, 4 }
  0xed   :  { %v812_v6 = vpop.f32.mrf.mxu1  ;;  %7810 = vmatmul.mubr.msk.bf16.gmra.mxu1 %vm364_vm1, %v1666_v50  ;;  %1372 = vmatprep.mubr.bf16.mxu0 %v13539_v53 }
  0xee   :  { %v9600_v10 = vadd.f32 %v812_v6, %v9488_v27  ;;  %v513_v39 = vpop.f32.mrf.mxu0  ;;  %1852 = vmatprep.mubr.bf16.mxu1 %v13539_v53  ;;  %v1668_v8 = vsel %vm1661_vm3, %v1665_v13, %v1667_v54  ;;  %v1669_v13 = vrot.slane %v8880_v57, 4 }
  0xef   :  { %v814_v16 = vpop.f32.mrf.mxu1 }
  0xf0   :  { %v9605_v21 = vadd.f32 %v814_v16, %v9506_v55  ;;  %v515_v1 = vpop.f32.mrf.mxu0 }
  0xf1   :  { %v816_v24 = vpop.f32.mrf.mxu1 }
  0xf2   :  { %v9608_v20 = vadd.f32 %v816_v24, %v9511_v32  ;;  %v517_v62 = vpop.f32.mrf.mxu0 }
  0xf3   :  { %v818_v50 = vpop.f32.mrf.mxu1 }
  0xf4   :  { %v9612_v27 = vadd.f32 %v818_v50, %v9527_v15  ;;  %v521_v29 = vpop.f32.mrf.mxu0  ;;  %7791 = vmatmul.mubr.msk.bf16.gmra.mxu0 %vm364_vm1, %v9226_v26  ;;  %v1670_v15 = vrot.slane %v8898_v2, 4 }
  0xf5   :  { %v822_v48 = vpop.f32.mrf.mxu1  ;;  %7811 = vmatmul.mubr.msk.bf16.gmra.mxu1 %vm364_vm1, %v1668_v8  ;;  %1382 = vmatprep.mubr.bf16.mxu0 %v13539_v53 }
  0xf6   :  { %v9619_v55 = vadd.f32 %v822_v48, %v9531_v56  ;;  %v523_v32 = vpop.f32.mrf.mxu0  ;;  %1862 = vmatprep.mubr.bf16.mxu1 %v13539_v53  ;;  %v1671_v56 = vsel %vm1661_vm3, %v1669_v13, %v1670_v15 }
  0xf7   :  { %v824_v34 = vpop.f32.mrf.mxu1 }
  0xf8   :  { %v9625_v23 = vadd.f32 %v824_v34, %v9546_v14  ;;  %v525_v26 = vpop.f32.mrf.mxu0 }
  0xf9   :  { %v826_v6 = vpop.f32.mrf.mxu1 }
  0xfa   :  { %v9628_v54 = vadd.f32 %v826_v6, %v9553_v49  ;;  %v527_v16 = vpop.f32.mrf.mxu0  ;;  %v1672_v49 = vrot.slane %v8925_v25, 4 }
  0xfb   :  { %v828_v24 = vpop.f32.mrf.mxu1 }
  0xfc   :  { %v9632_v8 = vadd.f32 %v828_v24, %v9558_v0  ;;  %v531_v50 = vpop.f32.mrf.mxu0  ;;  %7792 = vmatmul.mubr.msk.bf16.gmra.mxu0 %vm364_vm1, %v9260_v17 }
  0xfd   :  { %v832_v57 = vpop.f32.mrf.mxu1  ;;  %7812 = vmatmul.mubr.msk.bf16.gmra.mxu1 %vm364_vm1, %v1671_v56  ;;  %1392 = vmatprep.mubr.bf16.mxu0 %v13539_v53  ;;  %v1673_v56 = vsel %vm1661_vm3, %v1670_v15, %v1672_v49 }
  0xfe   :  { %13561 = vst [vmem:[#allocation29_spill] sm:$0xff] %v9632_v8  ;;  %v9639_v14 = vadd.f32 %v832_v57, %v9563_v36  ;;  %v533_v2 = vpop.f32.mrf.mxu0  ;;  %1872 = vmatprep.mubr.bf16.mxu1 %v13539_v53 }
  0xff   :  { %v834_v48 = vpop.f32.mrf.mxu1 }
 0x100   :  { %v9644_v0 = vadd.f32 %v834_v48, %v9576_v5  ;;  %v535_v13 = vpop.f32.mrf.mxu0 }
 0x101   :  { %v836_v34 = vpop.f32.mrf.mxu1 }
 0x102   :  { %v9646_v17 = vadd.f32 %v836_v34, %v505_v59  ;;  %v537_v6 = vpop.f32.mrf.mxu0  ;;  %v1674_v59 = vrot.slane %v8945_v37, 4 }
 0x103   :  { %v838_v24 = vpop.f32.mrf.mxu1 }
 0x104   :  { %13562 = vst [vmem:[#allocation30_spill] sm:$0xff] %v9646_v17  ;;  %v9649_v8 = vadd.f32 %v838_v24, %v507_v9  ;;  %v541_v36 = vpop.f32.mrf.mxu0  ;;  %7793 = vmatmul.mubr.msk.bf16.gmra.mxu0 %vm364_vm1, %v9284_v4 }
 0x105   :  { %v842_v57 = vpop.f32.mrf.mxu1  ;;  %7813 = vmatmul.mubr.msk.bf16.gmra.mxu1 %vm364_vm1, %v1673_v56  ;;  %1402 = vmatprep.mubr.bf16.mxu0 %v13539_v53 }
 0x106   :  { %13563 = vst [vmem:[#allocation31_spill] sm:$0xff] %v9649_v8  ;;  %v9655_v25 = vadd.f32 %v842_v57, %v511_v61  ;;  %v543_v5 = vpop.f32.mrf.mxu0  ;;  %1882 = vmatprep.mubr.bf16.mxu1 %v13539_v53  ;;  %v1675_v8 = vsel %vm1661_vm3, %v1672_v49, %v1674_v59  ;;  %v1677_v49 = vrot.slane %v8973_v52, 4 }
 0x107   :  { %v844_v15 = vpop.f32.mrf.mxu1 }
 0x108   :  { %v9659_v48 = vadd.f32 %v844_v15, %v513_v39  ;;  %v545_v9 = vpop.f32.mrf.mxu0 }
 0x109   :  { %v846_v34 = vpop.f32.mrf.mxu1 }
 0x10a   :  { %v9661_v24 = vadd.f32 %v846_v34, %v515_v1  ;;  %v547_v4 = vpop.f32.mrf.mxu0  ;;  %v1676_v1 = vrot.slane %v8957_v45, 4 }
 0x10b   :  { %v848_v56 = vpop.f32.mrf.mxu1 }
 0x10c   :  { %v9664_v17 = vadd.f32 %v848_v56, %v517_v62  ;;  %v551_v61 = vpop.f32.mrf.mxu0  ;;  %7794 = vmatmul.mubr.msk.bf16.gmra.mxu0 %vm364_vm1, %v9318_v35 }
 0x10d   :  { %v852_v57 = vpop.f32.mrf.mxu1  ;;  %7814 = vmatmul.mubr.msk.bf16.gmra.mxu1 %vm364_vm1, %v1675_v8  ;;  %1412 = vmatprep.mubr.bf16.mxu0 %v13539_v53  ;;  %v1678_v8 = vsel %vm1661_vm3, %v1676_v1, %v1677_v49 }
 0x10e   :  { %13564 = vst [vmem:[#allocation32_spill] sm:$0xff] %v9664_v17  ;;  %v9670_v37 = vadd.f32 %v852_v57, %v521_v29  ;;  %v553_v39 = vpop.f32.mrf.mxu0  ;;  %1892 = vmatprep.mubr.bf16.mxu1 %v13539_v53 }
 0x10f   :  { %v854_v62 = vpop.f32.mrf.mxu1 }
 0x110   :  { %v9675_v59 = vadd.f32 %v854_v62, %v523_v32  ;;  %v555_v15 = vpop.f32.mrf.mxu0 }
 0x111   :  { %v856_v34 = vpop.f32.mrf.mxu1 }
 0x112   :  { %v9677_v35 = vadd.f32 %v856_v34, %v525_v26  ;;  %v557_v56 = vpop.f32.mrf.mxu0  ;;  %v1679_v26 = vrot.slane %v9004_v18, 4 }
 0x113   :  { %v858_v17 = vpop.f32.mrf.mxu1 }
 0x114   :  { %13565 = vst [vmem:[#allocation33_spill] sm:$0xff] %v9677_v35  ;;  %v9680_v29 = vadd.f32 %v858_v17, %v527_v16  ;;  %v561_v57 = vpop.f32.mrf.mxu0  ;;  %7795 = vmatmul.mubr.msk.bf16.gmra.mxu0 %vm364_vm1, %v9352_v47 }
 0x115   :  { %v862_v45 = vpop.f32.mrf.mxu1  ;;  %7815 = vmatmul.mubr.msk.bf16.gmra.mxu1 %vm364_vm1, %v1678_v8  ;;  %1422 = vmatprep.mubr.bf16.mxu0 %v13539_v53 }
 0x116   :  { %13566 = vst [vmem:[#allocation34_spill] sm:$0xff] %v9680_v29  ;;  %v9686_v52 = vadd.f32 %v862_v45, %v531_v50  ;;  %v563_v32 = vpop.f32.mrf.mxu0  ;;  %1902 = vmatprep.mubr.bf16.mxu1 %v13539_v53  ;;  %v1680_v29 = vsel %vm1661_vm3, %v1677_v49, %v1679_v26 }
 0x117   :  { %v864_v1 = vpop.f32.mrf.mxu1 }
 0x118   :  { %v9690_v62 = vadd.f32 %v864_v1, %v533_v2  ;;  %v565_v16 = vpop.f32.mrf.mxu0 }
 0x119   :  { %v866_v17 = vpop.f32.mrf.mxu1 }
 0x11a   :  { %v9692_v34 = vadd.f32 %v866_v17, %v535_v13  ;;  %v567_v47 = vpop.f32.mrf.mxu0  ;;  %v1681_v13 = vrot.slane %v9031_v38, 4 }
 0x11b   :  { %v868_v8 = vpop.f32.mrf.mxu1 }
 0x11c   :  { %13567 = vst [vmem:[#allocation35_spill] sm:$0xff] %v9692_v34  ;;  %v9695_v35 = vadd.f32 %v868_v8, %v537_v6  ;;  %v571_v50 = vpop.f32.mrf.mxu0  ;;  %7796 = vmatmul.mubr.msk.bf16.gmra.mxu0 %vm364_vm1, %v9376_v60 }
 0x11d   :  { %v872_v45 = vpop.f32.mrf.mxu1  ;;  %7816 = vmatmul.mubr.msk.bf16.gmra.mxu1 %vm364_vm1, %v1680_v29  ;;  %1432 = vmatprep.mubr.bf16.mxu0 %v13539_v53 }
 0x11e   :  { %13568 = vst [vmem:[#allocation36_spill] sm:$0xff] %v9695_v35  ;;  %v9701_v18 = vadd.f32 %v872_v45, %v541_v36  ;;  %v573_v2 = vpop.f32.mrf.mxu0  ;;  %1912 = vmatprep.mubr.bf16.mxu1 %v13539_v53  ;;  %v1682_v35 = vsel %vm1661_vm3, %v1679_v26, %v1681_v13  ;;  %v1684_v26 = vrot.slane %v9065_v12, 4 }
 0x11f   :  { %v874_v49 = vpop.f32.mrf.mxu1 }
 0x120   :  { %v9705_v1 = vadd.f32 %v874_v49, %v543_v5  ;;  %v575_v6 = vpop.f32.mrf.mxu0 }
 0x121   :  { %v876_v17 = vpop.f32.mrf.mxu1 }
 0x122   :  { %v9707_v8 = vadd.f32 %v876_v17, %v545_v9  ;;  %v577_v60 = vpop.f32.mrf.mxu0  ;;  %v1683_v9 = vrot.slane %v9046_v63, 4 }
 0x123   :  { %v878_v29 = vpop.f32.mrf.mxu1 }
 0x124   :  { %v9710_v34 = vadd.f32 %v878_v29, %v547_v4  ;;  %v581_v36 = vpop.f32.mrf.mxu0  ;;  %7797 = vmatmul.mubr.msk.bf16.gmra.mxu0 %vm364_vm1, %v9394_v58 }
 0x125   :  { %v882_v45 = vpop.f32.mrf.mxu1  ;;  %7817 = vmatmul.mubr.msk.bf16.gmra.mxu1 %vm364_vm1, %v1682_v35  ;;  %1442 = vmatprep.mubr.bf16.mxu0 %v13539_v53  ;;  %v1685_v35 = vsel %vm1661_vm3, %v1683_v9, %v1684_v26 }
 0x126   :  { %13569 = vst [vmem:[#allocation37_spill] sm:$0xff] %v9710_v34  ;;  %v9716_v38 = vadd.f32 %v882_v45, %v551_v61  ;;  %v583_v5 = vpop.f32.mrf.mxu0  ;;  %1922 = vmatprep.mubr.bf16.mxu1 %v13539_v53 }
 0x127   :  { %v884_v4 = vpop.f32.mrf.mxu1 }
 0x128   :  { %v9721_v13 = vadd.f32 %v884_v4, %v553_v39  ;;  %v585_v49 = vpop.f32.mrf.mxu0 }
 0x129   :  { %v886_v17 = vpop.f32.mrf.mxu1 }
 0x12a   :  { %v9723_v58 = vadd.f32 %v886_v17, %v555_v15  ;;  %v587_v29 = vpop.f32.mrf.mxu0  ;;  %v1686_v15 = vrot.slane %v9099_v46, 4 }
 0x12b   :  { %v888_v34 = vpop.f32.mrf.mxu1 }
 0x12c   :  { %13570 = vst [vmem:[#allocation38_spill] sm:$0xff] %v9723_v58  ;;  %v9726_v61 = vadd.f32 %v888_v34, %v557_v56  ;;  %v591_v45 = vpop.f32.mrf.mxu0  ;;  %7798 = vmatmul.mubr.msk.bf16.gmra.mxu0 %vm364_vm1, %v9411_v28 }
 0x12d   :  { %v892_v63 = vpop.f32.mrf.mxu1  ;;  %7818 = vmatmul.mubr.msk.bf16.gmra.mxu1 %vm364_vm1, %v1685_v35  ;;  %1452 = vmatprep.mubr.bf16.mxu0 %v13539_v53 }
 0x12e   :  { %13571 = vst [vmem:[#allocation39_spill] sm:$0xff] %v9726_v61  ;;  %v9732_v12 = vadd.f32 %v892_v63, %v561_v57  ;;  %v593_v39 = vpop.f32.mrf.mxu0  ;;  %1932 = vmatprep.mubr.bf16.mxu1 %v13539_v53  ;;  %v1687_v61 = vsel %vm1661_vm3, %v1684_v26, %v1686_v15 }
 0x12f   :  { %v894_v9 = vpop.f32.mrf.mxu1 }
 0x130   :  { %v9736_v4 = vadd.f32 %v894_v9, %v563_v32  ;;  %v595_v56 = vpop.f32.mrf.mxu0 }
 0x131   :  { %v896_v34 = vpop.f32.mrf.mxu1 }
 0x132   :  { %v9738_v17 = vadd.f32 %v896_v34, %v565_v16  ;;  %v597_v28 = vpop.f32.mrf.mxu0  ;;  %v1688_v16 = vrot.slane %v9126_v19, 4 }
 0x133   :  { %v898_v35 = vpop.f32.mrf.mxu1 }
 0x134   :  { %13572 = vst [vmem:[#allocation40_spill] sm:$0xff] %v9738_v17  ;;  %v9741_v58 = vadd.f32 %v898_v35, %v567_v47  ;;  %v601_v57 = vpop.f32.mrf.mxu0  ;;  %7799 = vmatmul.mubr.msk.bf16.gmra.mxu0 %vm364_vm1, %v9424_v43 }
 0x135   :  { %v902_v63 = vpop.f32.mrf.mxu1  ;;  %7819 = vmatmul.mubr.msk.bf16.gmra.mxu1 %vm364_vm1, %v1687_v61  ;;  %1462 = vmatprep.mubr.bf16.mxu0 %v13539_v53 }
 0x136   :  { %13573 = vst [vmem:[#allocation41_spill] sm:$0xff] %v9741_v58  ;;  %v9747_v46 = vadd.f32 %v902_v63, %v571_v50  ;;  %v603_v32 = vpop.f32.mrf.mxu0  ;;  %1942 = vmatprep.mubr.bf16.mxu1 %v13539_v53  ;;  %v1689_v58 = vsel %vm1661_vm3, %v1686_v15, %v1688_v16  ;;  %v1691_v15 = vrot.slane %v9154_v41, 4 }
 0x137   :  { %v904_v26 = vpop.f32.mrf.mxu1 }
 0x138   :  { %v9751_v9 = vadd.f32 %v904_v26, %v573_v2  ;;  %v605_v47 = vpop.f32.mrf.mxu0 }
 0x139   :  { %v906_v34 = vpop.f32.mrf.mxu1 }
 0x13a   :  { %v9753_v35 = vadd.f32 %v906_v34, %v575_v6  ;;  %v607_v43 = vpop.f32.mrf.mxu0  ;;  %v1690_v6 = vrot.slane %v9138_v7, 4 }
 0x13b   :  { %v908_v61 = vpop.f32.mrf.mxu1 }
 0x13c   :  { %v9756_v17 = vadd.f32 %v908_v61, %v577_v60  ;;  %v611_v50 = vpop.f32.mrf.mxu0  ;;  %7800 = vmatmul.mubr.msk.bf16.gmra.mxu0 %vm364_vm1, %v9436_v30 }
 0x13d   :  { %v912_v63 = vpop.f32.mrf.mxu1  ;;  %7820 = vmatmul.mubr.msk.bf16.gmra.mxu1 %vm364_vm1, %v1689_v58  ;;  %1472 = vmatprep.mubr.bf16.mxu0 %v13539_v53  ;;  %v1692_v58 = vsel %vm1661_vm3, %v1690_v6, %v1691_v15 }
 0x13e   :  { %13574 = vst [vmem:[#allocation42_spill] sm:$0xff] %v9756_v17  ;;  %v9762_v19 = vadd.f32 %v912_v63, %v581_v36  ;;  %v613_v2 = vpop.f32.mrf.mxu0  ;;  %1952 = vmatprep.mubr.bf16.mxu1 %v13539_v53 }
 0x13f   :  { %v914_v60 = vpop.f32.mrf.mxu1 }
 0x140   :  { %13575 = vst [vmem:[#allocation43_spill] sm:$0xff] %v9762_v19  ;;  %v9767_v16 = vadd.f32 %v914_v60, %v583_v5  ;;  %v615_v26 = vpop.f32.mrf.mxu0 }
 0x141   :  { %v916_v34 = vpop.f32.mrf.mxu1 }
 0x142   :  { %13576 = vst [vmem:[#allocation44_spill] sm:$0xff] %v9767_v16  ;;  %v9769_v30 = vadd.f32 %v916_v34, %v585_v49  ;;  %v617_v61 = vpop.f32.mrf.mxu0  ;;  %v1693_v49 = vrot.slane %v9177_v3, 4 }
 0x143   :  { %v918_v17 = vpop.f32.mrf.mxu1 }
 0x144   :  { %13577 = vst [vmem:[#allocation45_spill] sm:$0xff] %v9769_v30  ;;  %v9772_v36 = vadd.f32 %v918_v17, %v587_v29  ;;  %v621_v63 = vpop.f32.mrf.mxu0  ;;  %7801 = vmatmul.mubr.msk.bf16.gmra.mxu0 %vm364_vm1, %v9451_v22 }
 0x145   :  { %v922_v7 = vpop.f32.mrf.mxu1  ;;  %7821 = vmatmul.mubr.msk.bf16.gmra.mxu1 %vm364_vm1, %v1692_v58  ;;  %1482 = vmatprep.mubr.bf16.mxu0 %v13539_v53 }
 0x146   :  { %13578 = vst [vmem:[#allocation46_spill] sm:$0xff] %v9772_v36  ;;  %v9778_v41 = vadd.f32 %v922_v7, %v591_v45  ;;  %v623_v5 = vpop.f32.mrf.mxu0  ;;  %1962 = vmatprep.mubr.bf16.mxu1 %v13539_v53  ;;  %v1694_v36 = vsel %vm1661_vm3, %v1691_v15, %v1693_v49 }
 0x147   :  { %v924_v6 = vpop.f32.mrf.mxu1 }
 0x148   :  { %13579 = vst [vmem:[#allocation47_spill] sm:$0xff] %v9778_v41  ;;  %v9782_v60 = vadd.f32 %v924_v6, %v593_v39  ;;  %v625_v29 = vpop.f32.mrf.mxu0 }
 0x149   :  { %v926_v17 = vpop.f32.mrf.mxu1 }
 0x14a   :  { %13580 = vst [vmem:[#allocation48_spill] sm:$0xff] %v9782_v60  ;;  %v9784_v34 = vadd.f32 %v926_v17, %v595_v56  ;;  %v627_v22 = vpop.f32.mrf.mxu0  ;;  %v1695_v56 = vrot.slane %v9200_v31, 4 }
 0x14b   :  { %v928_v58 = vpop.f32.mrf.mxu1 }
 0x14c   :  { %13581 = vst [vmem:[#allocation49_spill] sm:$0xff] %v9784_v34  ;;  %v9787_v30 = vadd.f32 %v928_v58, %v597_v28  ;;  %v631_v45 = vpop.f32.mrf.mxu0  ;;  %7802 = vmatmul.mubr.msk.bf16.gmra.mxu0 %vm364_vm1, %v9465_v40 }
 0x14d   :  { %v932_v7 = vpop.f32.mrf.mxu1  ;;  %7822 = vmatmul.mubr.msk.bf16.gmra.mxu1 %vm364_vm1, %v1694_v36  ;;  %1492 = vmatprep.mubr.bf16.mxu0 %v13539_v53 }
 0x14e   :  { %13582 = vst [vmem:[#allocation50_spill] sm:$0xff] %v9787_v30  ;;  %v9793_v3 = vadd.f32 %v932_v7, %v601_v57  ;;  %v633_v39 = vpop.f32.mrf.mxu0  ;;  %1972 = vmatprep.mubr.bf16.mxu1 %v13539_v53  ;;  %v1696_v30 = vsel %vm1661_vm3, %v1693_v49, %v1695_v56  ;;  %v13589_v49 = vld [vmem:[#allocation7_spill] sm:$0xff] }
 0x14f   :  { %v934_v15 = vpop.f32.mrf.mxu1  ;;  %v1698_v56 = vrot.slane %v13589_v49, 4 }
 0x150   :  { %13583 = vst [vmem:[#allocation51_spill] sm:$0xff] %v9793_v3  ;;  %v9797_v6 = vadd.f32 %v934_v15, %v603_v32  ;;  %v635_v28 = vpop.f32.mrf.mxu0 }
 0x151   :  { %v936_v17 = vpop.f32.mrf.mxu1 }
 0x152   :  { %13584 = vst [vmem:[#allocation52_spill] sm:$0xff] %v9797_v6  ;;  %v9799_v58 = vadd.f32 %v936_v17, %v605_v47  ;;  %v637_v40 = vpop.f32.mrf.mxu0  ;;  %v13588_v47 = vld [vmem:[#allocation6_spill] sm:$0xff] }
 0x153   :  { %v938_v36 = vpop.f32.mrf.mxu1  ;;  %v1697_v15 = vrot.slane %v13588_v47, 4  ;;  %v13594_v6 = vld [vmem:[#allocation22_spill] sm:$0xff] }
 0x154   :  { %13585 = vst [vmem:[#allocation53_spill] sm:$0xff] %v9799_v58  ;;  %v9802_v34 = vadd.f32 %v938_v36, %v607_v43  ;;  %v641_v57 = vpop.f32.mrf.mxu0  ;;  %7803 = vmatmul.mubr.msk.bf16.gmra.mxu0 %vm364_vm1, %v9493_v11 }
 0x155   :  { %v942_v7 = vpop.f32.mrf.mxu1  ;;  %7823 = vmatmul.mubr.msk.bf16.gmra.mxu1 %vm364_vm1, %v1696_v30  ;;  %1502 = vmatprep.mubr.bf16.mxu0 %v13539_v53  ;;  %v1699_v30 = vsel %vm1661_vm3, %v1697_v15, %v1698_v56 }
 0x156   :  { %13586 = vst [vmem:[#allocation54_spill] sm:$0xff] %v9802_v34  ;;  %v9808_v31 = vadd.f32 %v942_v7, %v611_v50  ;;  %v643_v32 = vpop.f32.mrf.mxu0  ;;  %1982 = vmatprep.mubr.bf16.mxu1 %v13539_v53 }
 0x157   :  { %v944_v43 = vpop.f32.mrf.mxu1 }
 0x158   :  { %13587 = vst [vmem:[#allocation55_spill] sm:$0xff] %v9808_v31  ;;  %v9813_v17 = vadd.f32 %v944_v43, %v613_v2  ;;  %v645_v36 = vpop.f32.mrf.mxu0 }
 0x159   :  { %v946_v34 = vpop.f32.mrf.mxu1 }
 0x15a   :  { %13590 = vst [vmem:[#allocation6_spill] sm:$0xff] %v9813_v17  ;;  %v9815_v11 = vadd.f32 %v946_v34, %v615_v26  ;;  %v9817_v58 = vpop.f32.mrf.mxu0  ;;  %v13596_v34 = vld [vmem:[#allocation8_spill] sm:$0xff] }
 0x15b   :  { %13592 = vst [vmem:[#allocation56_spill] sm:$0xff] %v9817_v58  ;;  %v948_v50 = vpop.f32.mrf.mxu1  ;;  %v1700_v49 = vrot.slane %v13596_v34, 4  ;;  %v13603_v34 = vld [vmem:[#allocation9_spill] sm:$0xff] }
 0x15c   :  { %13591 = vst [vmem:[#allocation7_spill] sm:$0xff] %v9815_v11  ;;  %v9820_v7 = vadd.f32 %v948_v50, %v617_v61  ;;  %v651_v31 = vpop.f32.mrf.mxu0  ;;  %7804 = vmatmul.mubr.msk.bf16.gmra.mxu0 %vm364_vm1, %v13594_v6 }
 0x15d   :  { %v952_v47 = vpop.f32.mrf.mxu1  ;;  %7824 = vmatmul.mubr.msk.bf16.gmra.mxu1 %vm364_vm1, %v1699_v30  ;;  %1512 = vmatprep.mubr.bf16.mxu0 %v13539_v53  ;;  %v1701_v30 = vsel %vm1661_vm3, %v1698_v56, %v1700_v49 }
 0x15e   :  { %13593 = vst [vmem:[#allocation57_spill] sm:$0xff] %v9820_v7  ;;  %v9826_v2 = vadd.f32 %v952_v47, %v621_v63  ;;  %v653_v26 = vpop.f32.mrf.mxu0  ;;  %1992 = vmatprep.mubr.bf16.mxu1 %v13539_v53  ;;  %v13601_v47 = vld [vmem:[#allocation27_spill] sm:$0xff] }
 0x15f   :  { %v954_v15 = vpop.f32.mrf.mxu1 }
 0x160   :  { %13595 = vst [vmem:[#allocation22_spill] sm:$0xff] %v9826_v2  ;;  %v9830_v43 = vadd.f32 %v954_v15, %v623_v5  ;;  %v655_v61 = vpop.f32.mrf.mxu0  ;;  %v1702_v15 = vrot.slane %v13603_v34, 4 }
 0x161   :  { %v956_v50 = vpop.f32.mrf.mxu1 }
 0x162   :  { %13597 = vst [vmem:[#allocation8_spill] sm:$0xff] %v9830_v43  ;;  %v9832_v58 = vadd.f32 %v956_v50, %v625_v29  ;;  %v9834_v6 = vpop.f32.mrf.mxu0 }
 0x163   :  { %13599 = vst [vmem:[#allocation59_spill] sm:$0xff] %v9834_v6  ;;  %v958_v7 = vpop.f32.mrf.mxu1 }
 0x164   :  { %13598 = vst [vmem:[#allocation58_spill] sm:$0xff] %v9832_v58  ;;  %v9837_v11 = vadd.f32 %v958_v7, %v627_v22  ;;  %v661_v63 = vpop.f32.mrf.mxu0  ;;  %7805 = vmatmul.mubr.msk.bf16.gmra.mxu0 %vm364_vm1, %v13601_v47 }
 0x165   :  { %v962_v2 = vpop.f32.mrf.mxu1  ;;  %7825 = vmatmul.mubr.msk.bf16.gmra.mxu1 %vm364_vm1, %v1701_v30  ;;  %1522 = vmatprep.mubr.bf16.mxu0 %v13539_v53  ;;  %v1703_v30 = vsel %vm1661_vm3, %v1700_v49, %v1702_v15 }
 0x166   :  { %13600 = vst [vmem:[#allocation60_spill] sm:$0xff] %v9837_v11  ;;  %v9843_v5 = vadd.f32 %v962_v2, %v631_v45  ;;  %v663_v29 = vpop.f32.mrf.mxu0  ;;  %2002 = vmatprep.mubr.bf16.mxu1 %v13539_v53 }
 0x167   :  { %v964_v56 = vpop.f32.mrf.mxu1 }
 0x168   :  { %13602 = vst [vmem:[#allocation27_spill] sm:$0xff] %v9843_v5  ;;  %v9847_v50 = vadd.f32 %v964_v56, %v633_v39  ;;  %v665_v22 = vpop.f32.mrf.mxu0 }
 0x169   :  { %v966_v7 = vpop.f32.mrf.mxu1 }
 0x16a   :  { %13604 = vst [vmem:[#allocation9_spill] sm:$0xff] %v9847_v50  ;;  %v9849_v6 = vadd.f32 %v966_v7, %v635_v28  ;;  %v9851_v47 = vpop.f32.mrf.mxu0  ;;  %v13609_v28 = vld [vmem:[#allocation10_spill] sm:$0xff]  ;;  %v13610_v7 = vld [vmem:[#allocation11_spill] sm:$0xff] }
 0x16b   :  { %13606 = vst [vmem:[#allocation62_spill] sm:$0xff] %v9851_v47  ;;  %v968_v11 = vpop.f32.mrf.mxu1  ;;  %v1704_v56 = vrot.slane %v13609_v28, 4  ;;  %v1705_v47 = vrot.slane %v13610_v7, 4 }
 0x16c   :  { %13605 = vst [vmem:[#allocation61_spill] sm:$0xff] %v9849_v6  ;;  %v9854_v43 = vadd.f32 %v968_v11, %v637_v40  ;;  %v671_v45 = vpop.f32.mrf.mxu0  ;;  %7806 = vmatmul.mubr.msk.bf16.gmra.mxu0 %vm364_vm1, %v9595_v33 }
 0x16d   :  { %v972_v2 = vpop.f32.mrf.mxu1  ;;  %7826 = vmatmul.mubr.msk.bf16.gmra.mxu1 %vm364_vm1, %v1703_v30  ;;  %v1706_v30 = vsel %vm1661_vm3, %v1704_v56, %v1705_v47 }
 0x16e   :  { %13607 = vst [vmem:[#allocation63_spill] sm:$0xff] %v9854_v43  ;;  %v9859_v39 = vadd.f32 %v972_v2, %v641_v57  ;;  %v673_v34 = vpop.f32.mrf.mxu0  ;;  %2012 = vmatprep.mubr.bf16.mxu1 %v13539_v53 }
 0x16f   :  { %v974_v49 = vpop.f32.mrf.mxu1 }
 0x170   :  { %13608 = vst [vmem:[#allocation64_spill] sm:$0xff] %v9859_v39  ;;  %v9864_v15 = vadd.f32 %v974_v49, %v643_v32  ;;  %v675_v40 = vpop.f32.mrf.mxu0  ;;  %v13616_v32 = vld [vmem:[#allocation12_spill] sm:$0xff] }
 0x171   :  { %v976_v11 = vpop.f32.mrf.mxu1 }
 0x172   :  { %13611 = vst [vmem:[#allocation10_spill] sm:$0xff] %v9864_v15  ;;  %v9866_v43 = vadd.f32 %v976_v11, %v645_v36  ;;  %v9868_v33 = vpop.f32.mrf.mxu0  ;;  %v1707_v36 = vrot.slane %v13616_v32, 4 }
 0x173   :  { %13613 = vst [vmem:[#allocation65_spill] sm:$0xff] %v9868_v33  ;;  %v9871_v57 = vpop.f32.mrf.mxu1 }
 0x174   :  { %13612 = vst [vmem:[#allocation11_spill] sm:$0xff] %v9866_v43  ;;  %13614 = vst [vmem:[#allocation66_spill] sm:$0xff] %v9871_v57  ;;  %v9873_v2 = vpop.f32.mrf.mxu0 }
 0x175   :  { %v982_v39 = vpop.f32.mrf.mxu1  ;;  %7827 = vmatmul.mubr.msk.bf16.gmra.mxu1 %vm364_vm1, %v1706_v30  ;;  %v1708_v30 = vsel %vm1661_vm3, %v1705_v47, %v1707_v36 }
 0x176   :  { %v9876_v28 = vadd.f32 %v982_v39, %v651_v31  ;;  %v9878_v7 = vpop.f32.mrf.mxu0  ;;  %2022 = vmatprep.mubr.bf16.mxu1 %v13539_v53 }
 0x177   :  { %v984_v49 = vpop.f32.mrf.mxu1 }
 0x178   :  { %13615 = vst [vmem:[#allocation67_spill] sm:$0xff] %v9876_v28  ;;  %v9882_v11 = vadd.f32 %v984_v49, %v653_v26  ;;  %v9884_v33 = vpop.f32.mrf.mxu0  ;;  %v13621_v49 = vld [vmem:[#allocation13_spill] sm:$0xff] }
 0x179   :  { %v986_v56 = vpop.f32.mrf.mxu1 }
 0x17a   :  { %13617 = vst [vmem:[#allocation12_spill] sm:$0xff] %v9882_v11  ;;  %v9886_v57 = vadd.f32 %v986_v56, %v655_v61  ;;  %v9888_v15 = vpop.f32.mrf.mxu0  ;;  %v1709_v61 = vrot.slane %v13621_v49, 4 }
 0x17b   :  { %v9891_v31 = vpop.f32.mrf.mxu1 }
 0x17c   :  { %13618 = vst [vmem:[#allocation68_spill] sm:$0xff] %v9886_v57  ;;  %13619 = vst [vmem:[#allocation69_spill] sm:$0xff] %v9891_v31  ;;  %v9893_v39 = vpop.f32.mrf.mxu0 }
 0x17d   :  { %v992_v28 = vpop.f32.mrf.mxu1  ;;  %7828 = vmatmul.mubr.msk.bf16.gmra.mxu1 %vm364_vm1, %v1708_v30  ;;  %v1710_v30 = vsel %vm1661_vm3, %v1707_v36, %v1709_v61 }
 0x17e   :  { %v9896_v32 = vadd.f32 %v992_v28, %v661_v63  ;;  %v9898_v26 = vpop.f32.mrf.mxu0  ;;  %2032 = vmatprep.mubr.bf16.mxu1 %v13539_v53 }
 0x17f   :  { %v994_v56 = vpop.f32.mrf.mxu1 }
 0x180   :  { %13620 = vst [vmem:[#allocation70_spill] sm:$0xff] %v9896_v32  ;;  %v9902_v11 = vadd.f32 %v994_v56, %v663_v29  ;;  %v9904_v57 = vpop.f32.mrf.mxu0  ;;  %v13626_v56 = vld [vmem:[#allocation2_spill] sm:$0xff] }
 0x181   :  { %v996_v47 = vpop.f32.mrf.mxu1 }
 0x182   :  { %13622 = vst [vmem:[#allocation13_spill] sm:$0xff] %v9902_v11  ;;  %v9906_v31 = vadd.f32 %v996_v47, %v665_v22  ;;  %v9908_v43 = vpop.f32.mrf.mxu0  ;;  %v1711_v22 = vrot.slane %v13626_v56, 4  ;;  %v13627_v47 = vld [vmem:[#allocation3_spill] sm:$0xff] }
 0x183   :  { %v9911_v63 = vpop.f32.mrf.mxu1  ;;  %v1712_v11 = vrot.slane %v13627_v47, 4 }
 0x184   :  { %13623 = vst [vmem:[#allocation71_spill] sm:$0xff] %v9906_v31  ;;  %13624 = vst [vmem:[#allocation72_spill] sm:$0xff] %v9911_v63  ;;  %v9913_v28 = vpop.f32.mrf.mxu0 }
 0x185   :  { %v1002_v32 = vpop.f32.mrf.mxu1  ;;  %7829 = vmatmul.mubr.msk.bf16.gmra.mxu1 %vm364_vm1, %v1710_v30 }
 0x186   :  { %v9916_v49 = vadd.f32 %v1002_v32, %v671_v45  ;;  %v9918_v29 = vpop.f32.mrf.mxu0  ;;  %2042 = vmatprep.mubr.bf16.mxu1 %v13539_v53  ;;  %v1713_v45 = vsel %vm1661_vm3, %v1711_v22, %v1712_v11 }
 0x187   :  { %v1004_v31 = vpop.f32.mrf.mxu1 }
 0x188   :  { %13625 = vst [vmem:[#allocation73_spill] sm:$0xff] %v9916_v49  ;;  %v9923_v50 = vadd.f32 %v1004_v31, %v673_v34  ;;  %v9925_v36 = vpop.f32.mrf.mxu0  ;;  %v13632_v34 = vld [vmem:[#allocation4_spill] sm:$0xff] }
 0x189   :  { %v1006_v61 = vpop.f32.mrf.mxu1  ;;  %v1714_v31 = vrot.slane %v13632_v34, 4  ;;  %v13637_v34 = vld [vmem:[#allocation5_spill] sm:$0xff] }
 0x18a   :  { %13628 = vst [vmem:[#allocation2_spill] sm:$0xff] %v9923_v50  ;;  %v9927_v63 = vadd.f32 %v1006_v61, %v675_v40  ;;  %v9929_v6 = vpop.f32.mrf.mxu0 }
 0x18b   :  { %v9932_v32 = vpop.f32.mrf.mxu1 }
 0x18c   :  { %13629 = vst [vmem:[#allocation3_spill] sm:$0xff] %v9927_v63  ;;  %13630 = vst [vmem:[#allocation74_spill] sm:$0xff] %v9932_v32  ;;  %v9934_v30 = vpop.f32.mrf.mxu0  ;;  %v1715_v32 = vsel %vm1661_vm3, %v1712_v11, %v1714_v31 }
 0x18d   :  { %v9936_v49 = vpop.f32.mrf.mxu1  ;;  %7830 = vmatmul.mubr.msk.bf16.gmra.mxu1 %vm364_vm1, %v1713_v45 }
 0x18e   :  { %13631 = vst [vmem:[#allocation75_spill] sm:$0xff] %v9936_v49  ;;  %v9939_v56 = vpop.f32.mrf.mxu0  ;;  %2052 = vmatprep.mubr.bf16.mxu1 %v13539_v53 }
 0x18f   :  { %v9943_v40 = vpop.f32.mrf.mxu1 }
 0x190   :  { %13633 = vst [vmem:[#allocation4_spill] sm:$0xff] %v9943_v40  ;;  %v9945_v47 = vpop.f32.mrf.mxu0  ;;  %v1716_v40 = vrot.slane %v13637_v34, 4 }
 0x191   :  { %v9947_v61 = vpop.f32.mrf.mxu1 }
 0x192   :  { %13634 = vst [vmem:[#allocation76_spill] sm:$0xff] %v9947_v61  ;;  %v9949_v22 = vpop.f32.mrf.mxu0 }
 0x193   :  { %v9952_v50 = vpop.f32.mrf.mxu1 }
 0x194   :  { %13635 = vst [vmem:[#allocation77_spill] sm:$0xff] %v9952_v50  ;;  %v9954_v49 = vpop.f32.mrf.mxu0  ;;  %v1717_v50 = vsel %vm1661_vm3, %v1714_v31, %v1716_v40  ;;  %v13645_v31 = vld [vmem:[#allocation28_spill] sm:$0xff] }
 0x195   :  { %v9956_v45 = vpop.f32.mrf.mxu1  ;;  %7831 = vmatmul.mubr.msk.bf16.gmra.mxu1 %vm364_vm1, %v1715_v32  ;;  %v1533_v40 = vadd.f32 %v9873_v2, %v13645_v31 }
 0x196   :  { %13636 = vst [vmem:[#allocation78_spill] sm:$0xff] %v9956_v45  ;;  %v9959_v63 = vpop.f32.mrf.mxu0  ;;  %2062 = vmatprep.mubr.bf16.mxu1 %v13539_v53 }
 0x197   :  { %v9963_v5 = vpop.f32.mrf.mxu1 }
 0x198   :  { %13638 = vst [vmem:[#allocation5_spill] sm:$0xff] %v9963_v5  ;;  %v9965_v61 = vpop.f32.mrf.mxu0 }
 0x199   :  { %v9967_v58 = vpop.f32.mrf.mxu1 }
 0x19a   :  { %13639 = vst [vmem:[#allocation79_spill] sm:$0xff] %v9967_v58  ;;  %v9969_v11 = vpop.f32.mrf.mxu0 }
 0x19b   :  { %v9972_v17 = vpop.f32.mrf.mxu1 }
 0x19c   :  { %13640 = vst [vmem:[#allocation80_spill] sm:$0xff] %v9972_v17  ;;  %v9974_v45 = vpop.f32.mrf.mxu0 }
 0x19d   :  { %v9976_v32 = vpop.f32.mrf.mxu1  ;;  %7832 = vmatmul.mubr.msk.bf16.gmra.mxu1 %vm364_vm1, %v1717_v50  ;;  %v1534_v50 = vadd.f32 %v9878_v7, %v9582_v42  ;;  %vm7647_vm1 = vcmask 1045509  }
 0x19e   :  { %13641 = vst [vmem:[#allocation81_spill] sm:$0xff] %v9976_v32  ;;  %v9979_v53 = vpop.f32.mrf.mxu0 }
 0x19f   :  { %v9981_v34 = vpop.f32.mrf.mxu1 }
 0x1a0   :  { %13642 = vst [vmem:[#allocation82_spill] sm:$0xff] %v9981_v34  ;;  %v9983_v5 = vpop.f32.mrf.mxu0 }
 0x1a1   :  { %v9985_v3 = vpop.f32.mrf.mxu1 }
 0x1a2   :  { %13643 = vst [vmem:[#allocation83_spill] sm:$0xff] %v9985_v3  ;;  %v9987_v58 = vpop.f32.mrf.mxu0  ;;  %v1535_v3 = vadd.f32 %v9884_v33, %v9587_v44  ;;  %v1537_v44 = vadd.f32 %v9893_v39, %v9600_v10  ;;  %v1539_v10 = vadd.f32 %v9904_v57, %v9608_v20 }
 0x1a3   :  { %v9989_v60 = vpop.f32.mrf.mxu1 }
 0x1a4   :  { %13644 = vst [vmem:[#allocation84_spill] sm:$0xff] %v9989_v60  ;;  %v9993_v17 = vpop.f32.mrf.mxu0  ;;  %v1536_v60 = vadd.f32 %v9888_v15, %v9591_v51 }
 0x1a5   :  { %v1834_v32 = vpop.f32.mrf.mxu1 }
 0x1a6   :  { %v9997_v41 = vadd.f32 %v1834_v32, %v1533_v40  ;;  %v9999_v34 = vpop.f32.mrf.mxu0 }
 0x1a7   :  { %v1836_v16 = vpop.f32.mrf.mxu1 }
 0x1a8   :  { %v2074_v19 = vadd.f32 %v1836_v16, %v1534_v50  ;;  %2217 = vrot.lane.b32.xlu0 %v9997_v41, %s8698_s0  ;;  %v10005_v2 = vpop.f32.mrf.mxu0 }
 0x1a9   :  { %v1838_v31 = vpop.f32.mrf.mxu1 }
 0x1aa   :  { %v10009_v42 = vadd.f32 %v1838_v31, %v1535_v3  ;;  %2457 = vrot.lane.b32.xlu1 %v2074_v19, %s8698_s0  ;;  %v10012_v7 = vpop.f32.mrf.mxu0  ;;  %v1538_v3 = vadd.f32 %v9898_v26, %v9605_v21  ;;  %v1541_v21 = vadd.f32 %v9913_v28, %v9619_v55  ;;  %v1543_v55 = vadd.f32 %v9925_v36, %v9628_v54 }
 0x1ab   :  { %v1840_v32 = vpop.f32.mrf.mxu1  ;;  %v1545_v54 = vadd.f32 %v9934_v30, %v9639_v14 }
 0x1ac   :  { %v2076_v16 = vadd.f32 %v1840_v32, %v1536_v60  ;;  %2219 = vrot.lane.b32.xlu0 %v10009_v42, %s8698_s0  ;;  %v10018_v33 = vpop.f32.mrf.mxu0 }
 0x1ad   :  { %v1844_v40 = vpop.f32.mrf.mxu1 }
 0x1ae   :  { %v10020_v50 = vadd.f32 %v1844_v40, %v1537_v44  ;;  %2459 = vrot.lane.b32.xlu1 %v2076_v16, %s8698_s0  ;;  %v10023_v51 = vpop.f32.mrf.mxu0  ;;  %v1540_v16 = vadd.f32 %v9908_v43, %v9612_v27  ;;  %v1542_v27 = vadd.f32 %v9918_v29, %v9625_v23 }
 0x1af   :  { %v1846_v19 = vpop.f32.mrf.mxu1 }
 0x1b0   :  { %13646 = vst [vmem:[#allocation28_spill] sm:$0xff] %v10020_v50  ;;  %2221 = vrot.lane.b32.xlu0 %v10020_v50, %s8698_s0  ;;  %v10031_v60 = vpop.f32.mrf.mxu0  ;;  %v2078_v39 = vadd.f32 %v1846_v19, %v1538_v3 }
 0x1b1   :  { %v1848_v15 = vpop.f32.mrf.mxu1 }
 0x1b2   :  { %v10033_v31 = vadd.f32 %v1848_v15, %v1539_v10  ;;  %v10035_v32 = vpop.f32.mrf.mxu0 }
 0x1b3   :  { %v1850_v44 = vpop.f32.mrf.mxu1 }
 0x1b4   :  { %13647 = vst [vmem:[#allocation85_spill] sm:$0xff] %v10033_v31  ;;  %2461 = vrot.lane.b32.xlu0 %v2078_v39, %s8698_s0  ;;  %2223 = vrot.lane.b32.xlu1 %v10033_v31, %s8698_s0  ;;  %v10044_v20 = vpop.f32.mrf.mxu0  ;;  %v2080_v26 = vadd.f32 %v1850_v44, %v1540_v16  ;;  %v13649_v16 = vld [vmem:[#allocation29_spill] sm:$0xff] }
 0x1b5   :  { %v1854_v57 = vpop.f32.mrf.mxu1  ;;  %v1544_v23 = vadd.f32 %v9929_v6, %v13649_v16  ;;  %v1546_v6 = vadd.f32 %v9939_v56, %v9644_v0  ;;  %v1549_v56 = vadd.f32 %v9954_v49, %v9655_v25  ;;  %v1551_v25 = vadd.f32 %v9965_v61, %v9661_v24 }
 0x1b6   :  { %v10046_v40 = vadd.f32 %v1854_v57, %v1541_v21  ;;  %v10048_v19 = vpop.f32.mrf.mxu0  ;;  %v1553_v24 = vadd.f32 %v9974_v45, %v9670_v37 }
 0x1b7   :  { %v1856_v3 = vpop.f32.mrf.mxu1 }
 0x1b8   :  { %13648 = vst [vmem:[#allocation86_spill] sm:$0xff] %v10046_v40  ;;  %2463 = vrot.lane.b32.xlu1 %v2080_v26, %s8698_s0  ;;  %2225 = vrot.lane.b32.xlu0 %v10046_v40, %s8698_s0  ;;  %v10057_v43 = vpop.f32.mrf.mxu0  ;;  %v2082_v10 = vadd.f32 %v1856_v3, %v1542_v27  ;;  %v13651_v27 = vld [vmem:[#allocation30_spill] sm:$0xff] }
 0x1b9   :  { %v1858_v28 = vpop.f32.mrf.mxu1  ;;  %v1547_v14 = vadd.f32 %v9945_v47, %v13651_v27 }
 0x1ba   :  { %v10059_v15 = vadd.f32 %v1858_v28, %v1543_v55  ;;  %v10061_v39 = vpop.f32.mrf.mxu0 }
 0x1bb   :  { %v1860_v44 = vpop.f32.mrf.mxu1 }
 0x1bc   :  { %2465 = vrot.lane.b32.xlu0 %v2082_v10, %s8698_s0  ;;  %2227 = vrot.lane.b32.xlu1 %v10059_v15, %s8698_s0  ;;  %v10070_v29 = vpop.f32.mrf.mxu0  ;;  %v2084_v21 = vadd.f32 %v1860_v44, %v1544_v23  ;;  %v13652_v23 = vld [vmem:[#allocation31_spill] sm:$0xff] }
 0x1bd   :  { %v1864_v36 = vpop.f32.mrf.mxu1  ;;  %v1548_v0 = vadd.f32 %v9949_v22, %v13652_v23  ;;  %v1550_v22 = vadd.f32 %v9959_v63, %v9659_v48  ;;  %v13655_v23 = vld [vmem:[#allocation32_spill] sm:$0xff] }
 0x1be   :  { %v10072_v57 = vadd.f32 %v1864_v36, %v1545_v54  ;;  %v10074_v26 = vpop.f32.mrf.mxu0  ;;  %v1552_v48 = vadd.f32 %v9969_v11, %v13655_v23  ;;  %v1554_v11 = vadd.f32 %v9979_v53, %v9675_v59  ;;  %v13658_v23 = vld [vmem:[#allocation34_spill] sm:$0xff]  ;;  %v1557_v59 = vadd.f32 %v9993_v17, %v9686_v52 }
 0x1bf   :  { %v1866_v3 = vpop.f32.mrf.mxu1  ;;  %v1556_v53 = vadd.f32 %v9987_v58, %v13658_v23  ;;  %v1558_v58 = vadd.f32 %v9999_v34, %v9690_v62  ;;  %v13661_v23 = vld [vmem:[#allocation36_spill] sm:$0xff]  ;;  %v1561_v34 = vadd.f32 %v10018_v33, %v9701_v18  ;;  %v1563_v18 = vadd.f32 %v10031_v60, %v9707_v8 }
 0x1c0   :  { %13650 = vst [vmem:[#allocation29_spill] sm:$0xff] %v10072_v57  ;;  %2467 = vrot.lane.b32.xlu1 %v2084_v21, %s8698_s0  ;;  %2229 = vrot.lane.b32.xlu0 %v10072_v57, %s8698_s0  ;;  %v10083_v30 = vpop.f32.mrf.mxu0  ;;  %v2086_v28 = vadd.f32 %v1866_v3, %v1546_v6  ;;  %v1560_v62 = vadd.f32 %v10012_v7, %v13661_v23 }
 0x1c1   :  { %v1868_v55 = vpop.f32.mrf.mxu1  ;;  %v1562_v7 = vadd.f32 %v10023_v51, %v9705_v1  ;;  %v1565_v8 = vadd.f32 %v10044_v20, %v9716_v38 }
 0x1c2   :  { %v10085_v10 = vadd.f32 %v1868_v55, %v1547_v14  ;;  %v10087_v44 = vpop.f32.mrf.mxu0 }
 0x1c3   :  { %v1870_v16 = vpop.f32.mrf.mxu1 }
 0x1c4   :  { %2469 = vrot.lane.b32.xlu0 %v2086_v28, %s8698_s0  ;;  %2231 = vrot.lane.b32.xlu1 %v10085_v10, %s8698_s0  ;;  %v10096_v47 = vpop.f32.mrf.mxu0  ;;  %v2088_v36 = vadd.f32 %v1870_v16, %v1548_v0 }
 0x1c5   :  { %v1874_v54 = vpop.f32.mrf.mxu1 }
 0x1c6   :  { %v10098_v21 = vadd.f32 %v1874_v54, %v1549_v56  ;;  %v10100_v3 = vpop.f32.mrf.mxu0 }
 0x1c7   :  { %v1876_v6 = vpop.f32.mrf.mxu1 }
 0x1c8   :  { %13653 = vst [vmem:[#allocation30_spill] sm:$0xff] %v10098_v21  ;;  %2471 = vrot.lane.b32.xlu1 %v2088_v36, %s8698_s0  ;;  %2233 = vrot.lane.b32.xlu0 %v10098_v21, %s8698_s0  ;;  %v10109_v49 = vpop.f32.mrf.mxu0  ;;  %v2090_v14 = vadd.f32 %v1876_v6, %v1550_v22  ;;  %v13657_v6 = vld [vmem:[#allocation33_spill] sm:$0xff] }
 0x1c9   :  { %v1878_v27 = vpop.f32.mrf.mxu1  ;;  %v1555_v37 = vadd.f32 %v9983_v5, %v13657_v6 }
 0x1ca   :  { %v10111_v55 = vadd.f32 %v1878_v27, %v1551_v25  ;;  %v10113_v28 = vpop.f32.mrf.mxu0 }
 0x1cb   :  { %v1880_v16 = vpop.f32.mrf.mxu1 }
 0x1cc   :  { %13654 = vst [vmem:[#allocation31_spill] sm:$0xff] %v10111_v55  ;;  %2473 = vrot.lane.b32.xlu0 %v2090_v14, %s8698_s0  ;;  %2235 = vrot.lane.b32.xlu1 %v10111_v55, %s8698_s0  ;;  %v10122_v63 = vpop.f32.mrf.mxu0  ;;  %v2092_v0 = vadd.f32 %v1880_v16, %v1552_v48 }
 0x1cd   :  { %v1884_v61 = vpop.f32.mrf.mxu1 }
 0x1ce   :  { %v10124_v56 = vadd.f32 %v1884_v61, %v1553_v24  ;;  %v10126_v54 = vpop.f32.mrf.mxu0 }
 0x1cf   :  { %v1886_v36 = vpop.f32.mrf.mxu1 }
 0x1d0   :  { %13656 = vst [vmem:[#allocation32_spill] sm:$0xff] %v10124_v56  ;;  %2475 = vrot.lane.b32.xlu1 %v2092_v0, %s8698_s0  ;;  %2237 = vrot.lane.b32.xlu0 %v10124_v56, %s8698_s0  ;;  %v10135_v45 = vpop.f32.mrf.mxu0  ;;  %v2094_v25 = vadd.f32 %v1886_v36, %v1554_v11  ;;  %v13660_v11 = vld [vmem:[#allocation35_spill] sm:$0xff] }
 0x1d1   :  { %v1888_v22 = vpop.f32.mrf.mxu1  ;;  %v1559_v52 = vadd.f32 %v10005_v2, %v13660_v11 }
 0x1d2   :  { %v10137_v27 = vadd.f32 %v1888_v22, %v1555_v37  ;;  %v10139_v14 = vpop.f32.mrf.mxu0 }
 0x1d3   :  { %v1890_v16 = vpop.f32.mrf.mxu1 }
 0x1d4   :  { %2477 = vrot.lane.b32.xlu0 %v2094_v25, %s8698_s0  ;;  %2239 = vrot.lane.b32.xlu1 %v10137_v27, %s8698_s0  ;;  %v10148_v5 = vpop.f32.mrf.mxu0  ;;  %v2096_v24 = vadd.f32 %v1890_v16, %v1556_v53 }
 0x1d5   :  { %v1894_v48 = vpop.f32.mrf.mxu1 }
 0x1d6   :  { %v10150_v61 = vadd.f32 %v1894_v48, %v1557_v59  ;;  %v10152_v0 = vpop.f32.mrf.mxu0 }
 0x1d7   :  { %v1896_v36 = vpop.f32.mrf.mxu1 }
 0x1d8   :  { %13659 = vst [vmem:[#allocation33_spill] sm:$0xff] %v10150_v61  ;;  %2479 = vrot.lane.b32.xlu1 %v2096_v24, %s8698_s0  ;;  %2241 = vrot.lane.b32.xlu0 %v10150_v61, %s8698_s0  ;;  %v10161_v17 = vpop.f32.mrf.mxu0  ;;  %v2098_v37 = vadd.f32 %v1896_v36, %v1558_v58 }
 0x1d9   :  { %v1898_v6 = vpop.f32.mrf.mxu1 }
 0x1da   :  { %v10163_v22 = vadd.f32 %v1898_v6, %v1559_v52  ;;  %v10165_v25 = vpop.f32.mrf.mxu0 }
 0x1db   :  { %v1900_v16 = vpop.f32.mrf.mxu1 }
 0x1dc   :  { %2481 = vrot.lane.b32.xlu0 %v2098_v37, %s8698_s0  ;;  %2243 = vrot.lane.b32.xlu1 %v10163_v22, %s8698_s0  ;;  %v10174_v2 = vpop.f32.mrf.mxu0  ;;  %v2100_v59 = vadd.f32 %v1900_v16, %v1560_v62  ;;  %v13664_v16 = vld [vmem:[#allocation37_spill] sm:$0xff] }
 0x1dd   :  { %v1904_v53 = vpop.f32.mrf.mxu1  ;;  %v1564_v1 = vadd.f32 %v10035_v32, %v13664_v16 }
 0x1de   :  { %v10176_v48 = vadd.f32 %v1904_v53, %v1561_v34  ;;  %v10178_v24 = vpop.f32.mrf.mxu0  ;;  %v1566_v53 = vadd.f32 %v10048_v19, %v9721_v13  ;;  %v1569_v13 = vadd.f32 %v10070_v29, %v9732_v12 }
 0x1df   :  { %v1906_v36 = vpop.f32.mrf.mxu1 }
 0x1e0   :  { %13662 = vst [vmem:[#allocation34_spill] sm:$0xff] %v10176_v48  ;;  %2483 = vrot.lane.b32.xlu1 %v2100_v59, %s8698_s0  ;;  %2245 = vrot.lane.b32.xlu0 %v10176_v48, %s8698_s0  ;;  %v10187_v33 = vpop.f32.mrf.mxu0  ;;  %v2102_v11 = vadd.f32 %v1906_v36, %v1562_v7  ;;  %v13665_v59 = vld [vmem:[#allocation38_spill] sm:$0xff] }
 0x1e1   :  { %v1908_v58 = vpop.f32.mrf.mxu1  ;;  %v1567_v32 = vadd.f32 %v10057_v43, %v13665_v59  ;;  %v13668_v59 = vld [vmem:[#allocation41_spill] sm:$0xff] }
 0x1e2   :  { %v10189_v52 = vadd.f32 %v1908_v58, %v1563_v18  ;;  %v10191_v6 = vpop.f32.mrf.mxu0  ;;  %v13666_v58 = vld [vmem:[#allocation39_spill] sm:$0xff] }
 0x1e3   :  { %v1910_v37 = vpop.f32.mrf.mxu1 }
 0x1e4   :  { %13663 = vst [vmem:[#allocation35_spill] sm:$0xff] %v10189_v52  ;;  %2485 = vrot.lane.b32.xlu0 %v2102_v11, %s8698_s0  ;;  %2247 = vrot.lane.b32.xlu1 %v10189_v52, %s8698_s0  ;;  %v10200_v51 = vpop.f32.mrf.mxu0  ;;  %v2104_v23 = vadd.f32 %v1910_v37, %v1564_v1  ;;  %v1568_v11 = vadd.f32 %v10061_v39, %v13666_v58 }
 0x1e5   :  { %v1914_v60 = vpop.f32.mrf.mxu1  ;;  %v1574_v58 = vadd.f32 %v10100_v3, %v9751_v9 }
 0x1e6   :  { %v10202_v62 = vadd.f32 %v1914_v60, %v1565_v8  ;;  %v10211_v38 = vpop.f32.mrf.mxu0  ;;  %v1570_v8 = vadd.f32 %v10074_v26, %v9736_v4  ;;  %v13667_v60 = vld [vmem:[#allocation40_spill] sm:$0xff]  ;;  %v1573_v4 = vadd.f32 %v10096_v47, %v9747_v46 }
 0x1e7   :  { %v1916_v34 = vpop.f32.mrf.mxu1  ;;  %v1571_v39 = vadd.f32 %v10083_v30, %v13667_v60 }
 0x1e8   :  { %2487 = vrot.lane.b32.xlu1 %v2104_v23, %s8698_s0  ;;  %2249 = vrot.lane.b32.xlu0 %v10202_v62, %s8698_s0  ;;  %v2106_v36 = vadd.f32 %v1916_v34, %v1566_v53  ;;  %v10222_v19 = vpop.f32.mrf.mxu0 }
 0x1e9   :  { %v1918_v20 = vpop.f32.mrf.mxu1 }
 0x1ea   :  { %v10213_v7 = vadd.f32 %v1918_v20, %v1567_v32  ;;  %v10233_v12 = vpop.f32.mrf.mxu0  ;;  %v1572_v32 = vadd.f32 %v10087_v44, %v13668_v59  ;;  %v1575_v44 = vadd.f32 %v10109_v49, %v9753_v35 }
 0x1eb   :  { %v1920_v18 = vpop.f32.mrf.mxu1 }
 0x1ec   :  { %2489 = vrot.lane.b32.xlu0 %v2106_v36, %s8698_s0  ;;  %2251 = vrot.lane.b32.xlu1 %v10213_v7, %s8698_s0  ;;  %v2108_v37 = vadd.f32 %v1920_v18, %v1568_v11  ;;  %v10244_v26 = vpop.f32.mrf.mxu0 }
 0x1ed   :  { %v1924_v43 = vpop.f32.mrf.mxu1 }
 0x1ee   :  { %v10224_v16 = vadd.f32 %v1924_v43, %v1569_v13  ;;  %v10255_v46 = vpop.f32.mrf.mxu0 }
 0x1ef   :  { %v1926_v1 = vpop.f32.mrf.mxu1 }
 0x1f0   :  { %2491 = vrot.lane.b32.xlu1 %v2108_v37, %s8698_s0  ;;  %2253 = vrot.lane.b32.xlu0 %v10224_v16, %s8698_s0  ;;  %v2110_v23 = vadd.f32 %v1926_v1, %v1570_v8  ;;  %v13669_v37 = vld [vmem:[#allocation42_spill] sm:$0xff]  ;;  %v13670_v8 = vld [vmem:[#allocation43_spill] sm:$0xff]  ;;  %v10266_v35 = vpop.f32.mrf.mxu0 }
 0x1f1   :  { %v1928_v29 = vpop.f32.mrf.mxu1  ;;  %v1576_v1 = vadd.f32 %v10113_v28, %v13669_v37  ;;  %v1577_v9 = vadd.f32 %v10122_v63, %v13670_v8  ;;  %v13676_v8 = vld [vmem:[#allocation49_spill] sm:$0xff] }
 0x1f2   :  { %v10235_v34 = vadd.f32 %v1928_v29, %v1571_v39  ;;  %v13671_v29 = vld [vmem:[#allocation44_spill] sm:$0xff]  ;;  %v10277_v63 = vpop.f32.mrf.mxu0 }
 0x1f3   :  { %v1930_v53 = vpop.f32.mrf.mxu1 }
 0x1f4   :  { %2493 = vrot.lane.b32.xlu0 %v2110_v23, %s8698_s0  ;;  %2255 = vrot.lane.b32.xlu1 %v10235_v34, %s8698_s0  ;;  %v2112_v20 = vadd.f32 %v1930_v53, %v1572_v32  ;;  %v1578_v23 = vadd.f32 %v10126_v54, %v13671_v29  ;;  %v13672_v53 = vld [vmem:[#allocation45_spill] sm:$0xff] }
 0x1f5   :  { %v1934_v30 = vpop.f32.mrf.mxu1  ;;  %v1579_v28 = vadd.f32 %v10135_v45, %v13672_v53  ;;  %v10288_v45 = vpop.f32.mrf.mxu0  ;;  %v13677_v53 = vld [vmem:[#allocation50_spill] sm:$0xff] }
 0x1f6   :  { %v10246_v36 = vadd.f32 %v1934_v30, %v1573_v4 }
 0x1f7   :  { %v1936_v18 = vpop.f32.mrf.mxu1 }
 0x1f8   :  { %2495 = vrot.lane.b32.xlu1 %v2112_v20, %s8698_s0  ;;  %2257 = vrot.lane.b32.xlu0 %v10246_v36, %s8698_s0  ;;  %v2114_v11 = vadd.f32 %v1936_v18, %v1574_v58  ;;  %v13673_v20 = vld [vmem:[#allocation46_spill] sm:$0xff]  ;;  %v13674_v58 = vld [vmem:[#allocation47_spill] sm:$0xff] }
 0x1f9   :  { %v1938_v47 = vpop.f32.mrf.mxu1  ;;  %v1580_v18 = vadd.f32 %v10139_v14, %v13673_v20  ;;  %v1581_v54 = vadd.f32 %v10148_v5, %v13674_v58  ;;  %v13675_v5 = vld [vmem:[#allocation48_spill] sm:$0xff] }
 0x1fa   :  { %v10257_v13 = vadd.f32 %v1938_v47, %v1575_v44  ;;  %v8657_v47 = vld [vmem:[%s13372_s3 + $0x24] ss:$0 sps:$4 sm:$0xff]   ;;  %v13679_v58 = vld [vmem:[#allocation52_spill] sm:$0xff] }
 0x1fb   :  { %v1940_v43 = vpop.f32.mrf.mxu1  ;;  %8629 = vmatprep.subr.msk.bf16.mxu0 %vm1661_vm3, %v8657_v47  ;;  %v3336_v14 = vsel %vm1661_vm3, %v8657_v47, 0 }
 0x1fc   :  { %2497 = vrot.lane.b32.xlu0 %v2114_v11, %s8698_s0  ;;  %2259 = vrot.lane.b32.xlu1 %v10257_v13, %s8698_s0  ;;  %v2116_v49 = vadd.f32 %v1940_v43, %v1576_v1  ;;  %v1582_v1 = vadd.f32 %v10152_v0, %v13675_v5  ;;  %v13678_v0 = vld [vmem:[#allocation51_spill] sm:$0xff]  ;;  %v13681_v5 = vld [vmem:[#allocation54_spill] sm:$0xff] }
 0x1fd   :  { %v1944_v3 = vpop.f32.mrf.mxu1  ;;  %8274 = vmatpush3.bf16.msra.mxu0 %v3336_v14 }
 0x1fe   :  { %v10268_v60 = vadd.f32 %v1944_v3, %v1577_v9  ;;  %v1583_v9 = vadd.f32 %v10161_v17, %v13676_v8  ;;  %v10304_v3 = vpop.f32.mrf.mxu0  ;;  %v13682_v8 = vld [vmem:[#allocation55_spill] sm:$0xff] }
 0x1ff   :  { %v1946_v39 = vpop.f32.mrf.mxu1 }
 0x200   :  { %2499 = vrot.lane.b32.xlu1 %v2116_v49, %s8698_s0  ;;  %2261 = vrot.lane.b32.xlu0 %v10268_v60, %s8698_s0  ;;  %v2118_v32 = vadd.f32 %v1946_v39, %v1578_v23  ;;  %v10315_v17 = vpop.f32.mrf.mxu0 }
 0x201   :  { %v1948_v59 = vpop.f32.mrf.mxu1 }
 0x202   :  { %v10279_v4 = vadd.f32 %v1948_v59, %v1579_v28  ;;  %v1584_v28 = vadd.f32 %v10165_v25, %v13677_v53  ;;  %v1585_v59 = vadd.f32 %v10174_v2, %v13678_v0  ;;  %v10326_v2 = vpop.f32.mrf.mxu0  ;;  %v13683_v53 = vld [vmem:[#allocation6_spill] sm:$0xff]  ;;  %v13684_v0 = vld [vmem:[#allocation7_spill] sm:$0xff] }
 0x203   :  { %v1950_v30 = vpop.f32.mrf.mxu1 }
 0x204   :  { %2501 = vrot.lane.b32.xlu0 %v2118_v32, %s8698_s0  ;;  %2263 = vrot.lane.b32.xlu1 %v10279_v4, %s8698_s0  ;;  %v2120_v11 = vadd.f32 %v1950_v30, %v1580_v18 }
 0x205   :  { %v1954_v44 = vpop.f32.mrf.mxu1 }
 0x206   :  { %v10293_v43 = vadd.f32 %v1954_v44, %v1581_v54  ;;  %v1586_v54 = vadd.f32 %v10178_v24, %v13679_v58  ;;  %v13680_v44 = vld [vmem:[#allocation53_spill] sm:$0xff]  ;;  %v1589_v24 = vadd.f32 %v10200_v51, %v13682_v8 }
 0x207   :  { %v1956_v37 = vpop.f32.mrf.mxu1  ;;  %v1587_v25 = vadd.f32 %v10187_v33, %v13680_v44  ;;  %v10337_v33 = vpop.f32.mrf.mxu0  ;;  %v13687_v44 = vld [vmem:[#allocation22_spill] sm:$0xff] }
 0x208   :  { %2503 = vrot.lane.b32.xlu1 %v2120_v11, %s8698_s0  ;;  %2265 = vrot.lane.b32.xlu0 %v10293_v43, %s8698_s0  ;;  %v2122_v39 = vadd.f32 %v1956_v37, %v1582_v1  ;;  %v1588_v1 = vadd.f32 %v10191_v6, %v13681_v5  ;;  %v1591_v6 = vadd.f32 %v10222_v19, %v13684_v0 }
 0x209   :  { %v1958_v49 = vpop.f32.mrf.mxu1  ;;  %v10348_v51 = vpop.f32.mrf.mxu0  ;;  %v1593_v19 = vadd.f32 %v10244_v26, %v13687_v44  ;;  %v13689_v26 = vld [vmem:[#allocation58_spill] sm:$0xff] }
 0x20a   :  { %v10306_v29 = vadd.f32 %v1958_v49, %v1583_v9 }
 0x20b   :  { %v1960_v23 = vpop.f32.mrf.mxu1 }
 0x20c   :  { %2505 = vrot.lane.b32.xlu0 %v2122_v39, %s8698_s0  ;;  %2267 = vrot.lane.b32.xlu1 %v10306_v29, %s8698_s0  ;;  %v2124_v30 = vadd.f32 %v1960_v23, %v1584_v28  ;;  %v1590_v28 = vadd.f32 %v10211_v38, %v13683_v53  ;;  %v8658_v53 = vld [vmem:[%s13372_s3 + $0x10] ss:$0 sps:$4 sm:$0xff]  }
 0x20d   :  { %v1964_v32 = vpop.f32.mrf.mxu1  ;;  %8630 = vmatprep.subr.msk.bf16.mxu1 %vm1661_vm3, %v8658_v53 }
 0x20e   :  { %v10317_v20 = vadd.f32 %v1964_v32, %v1585_v59 }
 0x20f   :  { %v1966_v18 = vpop.f32.mrf.mxu1 }
 0x210   :  { %2507 = vrot.lane.b32.xlu1 %v2124_v30, %s8698_s0  ;;  %2269 = vrot.lane.b32.xlu0 %v10317_v20, %s8698_s0  ;;  %v2126_v11 = vadd.f32 %v1966_v18, %v1586_v54  ;;  %v13686_v54 = vld [vmem:[#allocation57_spill] sm:$0xff] }
 0x211   :  { %v1968_v47 = vpop.f32.mrf.mxu1  ;;  %v1592_v38 = vadd.f32 %v10233_v12, %v13686_v54 }
 0x212   :  { %v10328_v37 = vadd.f32 %v1968_v47, %v1587_v25  ;;  %v10361_v47 = vpop.f32.mrf.mxu0 }
 0x213   :  { %v1970_v14 = vpop.f32.mrf.mxu1 }
 0x214   :  { %2509 = vrot.lane.b32.xlu0 %v2126_v11, %s8698_s0  ;;  %2271 = vrot.lane.b32.xlu1 %v10328_v37, %s8698_s0  ;;  %v2128_v49 = vadd.f32 %v1970_v14, %v1588_v1 }
 0x215   :  { %v1974_v9 = vpop.f32.mrf.mxu1 }
 0x216   :  { %v10339_v39 = vadd.f32 %v1974_v9, %v1589_v24  ;;  %v1595_v24 = vadd.f32 %v10266_v35, %v13689_v26  ;;  %v13694_v26 = vld [vmem:[#allocation60_spill] sm:$0xff] }
 0x217   :  { %v1976_v23 = vpop.f32.mrf.mxu1 }
 0x218   :  { %2511 = vrot.lane.b32.xlu1 %v2128_v49, %s8698_s0  ;;  %2273 = vrot.lane.b32.xlu0 %v10339_v39, %s8698_s0  ;;  %v2130_v32 = vadd.f32 %v1976_v23, %v1590_v28  ;;  %v10374_v49 = vpop.f32.mrf.mxu0 }
 0x219   :  { %v1978_v59 = vpop.f32.mrf.mxu1 }
 0x21a   :  { %v10350_v30 = vadd.f32 %v1978_v59, %v1591_v6  ;;  %v10352_v18 = vpop.permute.xlu0 %2217 }
 0x21b   :  { %v1980_v58 = vpop.f32.mrf.mxu1 }
 0x21c   :  { %13685 = vst [vmem:[#allocation36_spill] sm:$0xff] %v10350_v30  ;;  %v2458_v25 = vpop.permute.xlu1 %2457  ;;  %2513 = vrot.lane.b32.xlu0 %v2130_v32, %s8698_s0  ;;  %2275 = vrot.lane.b32.xlu1 %v10350_v30, %s8698_s0  ;;  %v2132_v14 = vadd.f32 %v1980_v58, %v1592_v38  ;;  %v3547_v32 = vsel %vm1661_vm3, %v8658_v53, 0  ;;  %v13692_v58 = vld [vmem:[#allocation8_spill] sm:$0xff]  ;;  %v10393_v38 = vpop.f32.mrf.mxu0 }
 0x21d   :  { %v1984_v11 = vpop.f32.mrf.mxu1  ;;  %v2554_v12 = vsel %vm2553_vm4, %v10352_v18, %v2458_v25  ;;  %v1594_v54 = vadd.f32 %v10255_v46, %v13692_v58  ;;  %8312 = vmatpush3.bf16.msra.mxu1 %v3547_v32 }
 0x21e   :  { %v10363_v5 = vadd.f32 %v1984_v11, %v1593_v19  ;;  %v10365_v1 = vpop.permute.xlu0 %2219  ;;  %v2650_v28 = vmax.f32 %v9997_v41, %v2554_v12  ;;  %v8659_v19 = vld [vmem:[%s13372_s3 + $0x8] sm:$0xff]   ;;  %v10407_v53 = vpop.f32.mrf.mxu0 }
 0x21f   :  { %v1986_v8 = vpop.f32.mrf.mxu1  ;;  %8313 = vmatprep.subr.bf16.mxu1 %v8659_v19 }
 0x220   :  { %13688 = vst [vmem:[#allocation37_spill] sm:$0xff] %v10363_v5  ;;  %v2460_v9 = vpop.permute.xlu1 %2459  ;;  %2515 = vrot.lane.b32.xlu1 %v2132_v14, %s8698_s0  ;;  %2277 = vrot.lane.b32.xlu0 %v10363_v5, %s8698_s0  ;;  %v2134_v25 = vadd.f32 %v1986_v8, %v1594_v54  ;;  %v13704_v5 = vld [vmem:[#allocation64_spill] sm:$0xff] }
 0x221   :  { %v1988_v23 = vpop.f32.mrf.mxu1  ;;  %v2555_v35 = vsel %vm2553_vm4, %v10365_v1, %v2460_v9  ;;  %v13695_v9 = vld [vmem:[#allocation27_spill] sm:$0xff]  ;;  %8314 = vmatpush3.bf16.msra.mxu1 %v8659_v19  ;;  %v10423_v19 = vpop.f32.mrf.mxu0 }
 0x222   :  { %v10380_v0 = vadd.f32 %v1988_v23, %v1595_v24  ;;  %v10382_v6 = vpop.permute.xlu0 %2221  ;;  %v2651_v11 = vmax.f32 %v10009_v42, %v2555_v35  ;;  %v1596_v24 = vadd.f32 %v10277_v63, %v13694_v26  ;;  %v1597_v23 = vadd.f32 %v10288_v45, %v13695_v9 }
 0x223   :  { %13691 = vst [vmem:[#allocation39_spill] sm:$0xff] %v10382_v6  ;;  %v1990_v59 = vpop.f32.mrf.mxu1 }
 0x224   :  { %13690 = vst [vmem:[#allocation38_spill] sm:$0xff] %v10380_v0  ;;  %2746 = vrot.lane.b32.xlu0 %v2650_v28, %s8699_s11  ;;  %2279 = vrot.lane.b32.xlu1 %v10380_v0, %s8698_s0  ;;  %v8660_v28 = vld [vmem:[%s13372_s3] sm:$0xff]   ;;  %v2136_v35 = vadd.f32 %v1990_v59, %v1596_v24 }
 0x225   :  { %v1994_v44 = vpop.f32.mrf.mxu1  ;;  %8315 = vmatprep.subr.bf16.mxu1 %v8660_v28 }
 0x226   :  { %v2462_v14 = vpop.permute.xlu0 %2461  ;;  %v10399_v12 = vpop.permute.xlu1 %2223  ;;  %v10412_v32 = vadd.f32 %v1994_v44, %v1597_v23  ;;  %8316 = vmatpush3.bf16.msra.mxu1 %v8660_v28  ;;  %v13701_v23 = vld [vmem:[#allocation9_spill] sm:$0xff] }
 0x227   :  { %13693 = vst [vmem:[#allocation40_spill] sm:$0xff] %v10399_v12  ;;  %v1996_v46 = vpop.f32.mrf.mxu1  ;;  %v2556_v45 = vsel %vm2553_vm4, %v10382_v6, %v2462_v14  ;;  %v10437_v28 = vpop.f32.mrf.mxu0 }
 0x228   :  { %2517 = vrot.lane.b32.xlu0 %v2134_v25, %s8698_s0  ;;  %2748 = vrot.lane.b32.xlu1 %v2651_v11, %s8699_s11  ;;  %13696 = vst [vmem:[#allocation41_spill] sm:$0xff] %v10412_v32  ;;  %v13698_v25 = vld [vmem:[#allocation61_spill] sm:$0xff]  ;;  %v2652_v44 = vmax.f32 %v10020_v50, %v2556_v45 }
 0x229   :  { %v1998_v8 = vpop.f32.mrf.mxu1  ;;  %v1599_v11 = vadd.f32 %v10315_v17, %v13698_v25 }
 0x22a   :  { %v2464_v58 = vpop.permute.xlu1 %2463  ;;  %v10414_v63 = vpop.permute.xlu0 %2225 }
 0x22b   :  { %13697 = vst [vmem:[#allocation42_spill] sm:$0xff] %v10414_v63  ;;  %v2000_v54 = vpop.f32.mrf.mxu1  ;;  %v10426_v26 = vadd.f32 %v1998_v8, %v1599_v11  ;;  %v2557_v9 = vsel %vm2553_vm4, %v10399_v12, %v2464_v58  ;;  %v13703_v58 = vld [vmem:[#allocation63_spill] sm:$0xff] }
 0x22c   :  { %2519 = vrot.lane.b32.xlu1 %v2136_v35, %s8698_s0  ;;  %2281 = vrot.lane.b32.xlu0 %v10412_v32, %s8698_s0  ;;  %v1598_v35 = vadd.f32 %v10304_v3, %v13701_v23  ;;  %v2653_v25 = vmax.f32 %v10033_v31, %v2557_v9  ;;  %v1600_v12 = vadd.f32 %v10326_v2, %v13703_v58 }
 0x22d   :  { %v2004_v59 = vpop.f32.mrf.mxu1  ;;  %13699 = vst [vmem:[#allocation43_spill] sm:$0xff] %v10426_v26  ;;  %v1601_v3 = vadd.f32 %v10337_v33, %v13704_v5  ;;  %v8661_v33 = vld [vmem:[%s13372_s3 + $0x1c] sm:$0xff]   ;;  %v13707_v5 = vld [vmem:[#allocation11_spill] sm:$0xff] }
 0x22e   :  { %v2466_v24 = vpop.permute.xlu0 %2465  ;;  %v10428_v14 = vpop.permute.xlu1 %2227  ;;  %v2138_v8 = vadd.f32 %v1996_v46, %v1598_v35  ;;  %v2140_v46 = vadd.f32 %v2000_v54, %v1600_v12  ;;  %8275 = vmatprep.subr.bf16.mxu0 %v8661_v33 }
 0x22f   :  { %13700 = vst [vmem:[#allocation44_spill] sm:$0xff] %v10428_v14  ;;  %v2006_v17 = vpop.f32.mrf.mxu1  ;;  %v10450_v35 = vadd.f32 %v2004_v59, %v1601_v3  ;;  %v2558_v31 = vsel %vm2553_vm4, %v10414_v63, %v2466_v24  ;;  %8276 = vmatpush3.bf16.msra.mxu0 %v8661_v33  ;;  %v13710_v33 = vld [vmem:[#allocation56_spill] sm:$0xff] }
 0x230   :  { %2750 = vrot.lane.b32.xlu0 %v2652_v44, %s8699_s11  ;;  %2283 = vrot.lane.b32.xlu1 %v10426_v26, %s8698_s0  ;;  %v10448_v44 = vpop.f32.mrf.mxu0  ;;  %v2654_v59 = vmax.f32 %v10046_v40, %v2558_v31 }
 0x231   :  { %v2008_v45 = vpop.f32.mrf.mxu1  ;;  %13705 = vst [vmem:[#allocation46_spill] sm:$0xff] %v10450_v35 }
 0x232   :  { %v2468_v11 = vpop.permute.xlu1 %2467  ;;  %v10440_v32 = vpop.permute.xlu0 %2229 }
 0x233   :  { %13702 = vst [vmem:[#allocation45_spill] sm:$0xff] %v10440_v32  ;;  %v2010_v0 = vpop.f32.mrf.mxu1  ;;  %v10464_v12 = vpop.f32.mrf.mxu0 }
 0x234   :  { %2521 = vrot.lane.b32.xlu0 %v2138_v8, %s8698_s0  ;;  %2752 = vrot.lane.b32.xlu1 %v2653_v25, %s8699_s11  ;;  %v1603_v8 = vadd.f32 %v10361_v47, %v13707_v5  ;;  %v2559_v47 = vsel %vm2553_vm4, %v10428_v14, %v2468_v11  ;;  %v13709_v5 = vld [vmem:[#allocation10_spill] sm:$0xff] }
 0x235   :  { %v2014_v23 = vpop.f32.mrf.mxu1  ;;  %v1488_v31 = vpop.f32.mrf.mxu0  ;;  %v2655_v14 = vmax.f32 %v10059_v15, %v2559_v47 }
 0x236   :  { %v2470_v9 = vpop.permute.xlu0 %2469  ;;  %v10452_v26 = vpop.permute.xlu1 %2231  ;;  %v10467_v24 = vadd.f32 %v2008_v45, %v1603_v8  ;;  %v13711_v8 = vld [vmem:[#allocation66_spill] sm:$0xff] }
 0x237   :  { %13706 = vst [vmem:[#allocation47_spill] sm:$0xff] %v10452_v26  ;;  %v2016_v2 = vpop.f32.mrf.mxu1  ;;  %v979_v40 = vadd.f32 %v13711_v8, %v13710_v33 }
 0x238   :  { %2523 = vrot.lane.b32.xlu1 %v2140_v46, %s8698_s0  ;;  %2285 = vrot.lane.b32.xlu0 %v10450_v35, %s8698_s0  ;;  %13708 = vst [vmem:[#allocation48_spill] sm:$0xff] %v10467_v24  ;;  %v8662_v46 = vld [vmem:[%s13372_s3 + $0x14] sm:$0xff]   ;;  %v1602_v35 = vadd.f32 %v10348_v51, %v13709_v5 }
 0x239   :  { %v2018_v54 = vpop.f32.mrf.mxu1  ;;  %8277 = vmatprep.subr.bf16.mxu0 %v8662_v46  ;;  %v1604_v51 = vadd.f32 %v10374_v49, %v979_v40  ;;  %v13716_v40 = vld [vmem:[#allocation68_spill] sm:$0xff] }
 0x23a   :  { %v2472_v25 = vpop.permute.xlu1 %2471  ;;  %v10469_v58 = vpop.permute.xlu0 %2233  ;;  %v2142_v11 = vadd.f32 %v2006_v17, %v1602_v35  ;;  %8278 = vmatpush3.bf16.msra.mxu0 %v8662_v46  ;;  %v2560_v46 = vsel %vm2553_vm4, %v10440_v32, %v2470_v9  ;;  %v1607_v49 = vadd.f32 %v10423_v19, %v13716_v40  ;;  %v13722_v32 = vld [vmem:[#allocation70_spill] sm:$0xff] }
 0x23b   :  { %v2020_v3 = vpop.f32.mrf.mxu1  ;;  %v2144_v33 = vadd.f32 %v2010_v0, %v1604_v51  ;;  %v2656_v0 = vmax.f32 %v10072_v57, %v2560_v46  ;;  %v2561_v9 = vsel %vm2553_vm4, %v10452_v26, %v2472_v25  ;;  %v13721_v46 = vld [vmem:[#allocation69_spill] sm:$0xff] }
 0x23c   :  { %2754 = vrot.lane.b32.xlu0 %v2654_v59, %s8699_s11  ;;  %2287 = vrot.lane.b32.xlu1 %v10467_v24, %s8698_s0  ;;  %v13713_v59 = vld [vmem:[#allocation67_spill] sm:$0xff]  ;;  %v1490_v24 = vpop.f32.mrf.mxu0 }
 0x23d   :  { %v2024_v45 = vpop.f32.mrf.mxu1  ;;  %v1605_v5 = vadd.f32 %v10393_v38, %v13713_v59  ;;  %v13719_v59 = vld [vmem:[#allocation12_spill] sm:$0xff] }
 0x23e   :  { %v2474_v63 = vpop.permute.xlu0 %2473  ;;  %v10484_v30 = vpop.permute.xlu1 %2235  ;;  %v1606_v19 = vadd.f32 %v10407_v53, %v13719_v59  ;;  %v1609_v53 = vadd.f32 %v10448_v44, %v13722_v32 }
 0x23f   :  { %13712 = vst [vmem:[#allocation49_spill] sm:$0xff] %v10484_v30  ;;  %v2026_v50 = vpop.f32.mrf.mxu1  ;;  %v10491_v17 = vadd.f32 %v2014_v23, %v1605_v5  ;;  %v1494_v38 = vpop.f32.mrf.mxu0 }
 0x240   :  { %2525 = vrot.lane.b32.xlu0 %v2142_v11, %s8698_s0  ;;  %2756 = vrot.lane.b32.xlu1 %v2655_v14, %s8699_s11  ;;  %v10503_v14 = vadd.f32 %v2018_v54, %v1607_v49  ;;  %v2146_v40 = vadd.f32 %v2016_v2, %v1606_v19  ;;  %v2657_v49 = vmax.f32 %v10085_v10, %v2561_v9 }
 0x241   :  { %v2028_v6 = vpop.f32.mrf.mxu1  ;;  %13714 = vst [vmem:[#allocation50_spill] sm:$0xff] %v10491_v17  ;;  %v1496_v5 = vpop.f32.mrf.mxu0  ;;  %v2562_v19 = vsel %vm2553_vm4, %v10469_v58, %v2474_v63 }
 0x242   :  { %v2476_v35 = vpop.permute.xlu1 %2475  ;;  %v10493_v47 = vpop.permute.xlu0 %2237  ;;  %13717 = vst [vmem:[#allocation52_spill] sm:$0xff] %v10503_v14 }
 0x243   :  { %13715 = vst [vmem:[#allocation51_spill] sm:$0xff] %v10493_v47  ;;  %v2030_v8 = vpop.f32.mrf.mxu1  ;;  %v2563_v63 = vsel %vm2553_vm4, %v10484_v30, %v2476_v35 }
 0x244   :  { %2527 = vrot.lane.b32.xlu1 %v2144_v33, %s8698_s0  ;;  %2289 = vrot.lane.b32.xlu0 %v10491_v17, %s8698_s0  ;;  %v13720_v33 = vld [vmem:[#allocation59_spill] sm:$0xff] }
 0x245   :  { %v2034_v51 = vpop.f32.mrf.mxu1  ;;  %v989_v54 = vadd.f32 %v13721_v46, %v13720_v33 }
 0x246   :  { %v2478_v23 = vpop.permute.xlu0 %2477  ;;  %v10505_v11 = vpop.permute.xlu1 %2239 }
 0x247   :  { %13718 = vst [vmem:[#allocation53_spill] sm:$0xff] %v10505_v11  ;;  %v2036_v25 = vpop.f32.mrf.mxu1  ;;  %v1608_v26 = vadd.f32 %v10437_v28, %v989_v54  ;;  %v13725_v28 = vld [vmem:[#allocation71_spill] sm:$0xff] }
 0x248   :  { %2758 = vrot.lane.b32.xlu0 %v2656_v0, %s8699_s11  ;;  %2291 = vrot.lane.b32.xlu1 %v10503_v14, %s8698_s0  ;;  %v1498_v0 = vpop.f32.mrf.mxu0  ;;  %v10524_v14 = vadd.f32 %v2024_v45, %v1609_v53  ;;  %v1611_v46 = vadd.f32 %v1488_v31, %v13725_v28  ;;  %v13729_v53 = vld [vmem:[#allocation62_spill] sm:$0xff]  ;;  %v2659_v28 = vmax.f32 %v10111_v55, %v2563_v63 }
 0x249   :  { %v2148_v59 = vadd.f32 %v2020_v3, %v1608_v26  ;;  %v2038_v33 = vpop.f32.mrf.mxu1  ;;  %v2658_v26 = vmax.f32 %v10098_v21, %v2562_v19  ;;  %v13732_v21 = vld [vmem:[#allocation73_spill] sm:$0xff]  ;;  %v2564_v63 = vsel %vm2553_vm4, %v10493_v47, %v2478_v23 }
 0x24a   :  { %v2480_v17 = vpop.permute.xlu1 %2479  ;;  %v10517_v57 = vpop.permute.xlu0 %2241  ;;  %13723 = vst [vmem:[#allocation54_spill] sm:$0xff] %v10524_v14  ;;  %v10537_v44 = vadd.f32 %v2028_v6, %v1611_v46  ;;  %v13730_v6 = vld [vmem:[#allocation72_spill] sm:$0xff] }
 0x24b   :  { %v1500_v32 = vpop.f32.mrf.mxu0  ;;  %v2040_v54 = vpop.f32.mrf.mxu1  ;;  %v2565_v23 = vsel %vm2553_vm4, %v10505_v11, %v2480_v17  ;;  %v13741_v11 = vld [vmem:[#allocation16_spill] sm:$0xff] }
 0x24c   :  { %2529 = vrot.lane.b32.xlu0 %v2146_v40, %s8698_s0  ;;  %2760 = vrot.lane.b32.xlu1 %v2657_v49, %s8699_s11  ;;  %13726 = vst [vmem:[#allocation6_spill] sm:$0xff] %v10537_v44  ;;  %v13728_v40 = vld [vmem:[#allocation13_spill] sm:$0xff] }
 0x24d   :  { %v1610_v31 = vadd.f32 %v10464_v12, %v13728_v40  ;;  %v1504_v49 = vpop.f32.mrf.mxu0  ;;  %v2044_v35 = vpop.f32.mrf.mxu1  ;;  %v1613_v12 = vadd.f32 %v1494_v38, %v13732_v21 }
 0x24e   :  { %v10526_v2 = vpop.permute.xlu0 %2481  ;;  %v10528_v9 = vpop.permute.xlu1 %2243 }
 0x24f   :  { %13724 = vst [vmem:[#allocation55_spill] sm:$0xff] %v10528_v9  ;;  %v2150_v19 = vadd.f32 %v2026_v50, %v1610_v31  ;;  %v2046_v31 = vpop.f32.mrf.mxu1 }
 0x250   :  { %2531 = vrot.lane.b32.xlu1 %v2148_v59, %s8698_s0  ;;  %2293 = vrot.lane.b32.xlu0 %v10524_v14, %s8698_s0  ;;  %v999_v59 = vadd.f32 %v13730_v6, %v13729_v53  ;;  %v13734_v6 = vld [vmem:[#allocation3_spill] sm:$0xff] }
 0x252   :  { %v10539_v3 = vpop.permute.xlu1 %2483  ;;  %v10541_v45 = vpop.permute.xlu0 %2245  ;;  %v1612_v30 = vadd.f32 %v1490_v24, %v999_v59  ;;  %v1615_v24 = vadd.f32 %v1498_v0, %v13734_v6  ;;  %v13740_v6 = vld [vmem:[#allocation75_spill] sm:$0xff] }
 0x253   :  { %13727 = vst [vmem:[#allocation7_spill] sm:$0xff] %v10541_v45  ;;  %v2048_v59 = vpop.f32.mrf.mxu1 }
 0x254   :  { %2762 = vrot.lane.b32.xlu0 %v2658_v26, %s8699_s11  ;;  %2295 = vrot.lane.b32.xlu1 %v10537_v44, %s8698_s0  ;;  %v1506_v26 = vpop.f32.mrf.mxu0  ;;  %v2152_v40 = vadd.f32 %v2030_v8, %v1612_v30  ;;  %v10560_v44 = vadd.f32 %v2034_v51, %v1613_v12  ;;  %v2660_v30 = vmax.f32 %v10124_v56, %v2564_v63  ;;  %v13737_v12 = vld [vmem:[#allocation65_spill] sm:$0xff]  ;;  %v13739_v63 = vld [vmem:[#allocation14_spill] sm:$0xff] }
 0x255   :  { %v10573_v8 = vadd.f32 %v2038_v33, %v1615_v24  ;;  %v1013_v24 = vadd.f32 %v13740_v6, %v13739_v63  ;;  %v2661_v56 = vmax.f32 %v10137_v27, %v2565_v23 }
 0x256   :  { %v10553_v46 = vpop.permute.xlu0 %2485  ;;  %v10555_v14 = vpop.permute.xlu1 %2247  ;;  %13733 = vst [vmem:[#allocation22_spill] sm:$0xff] %v10560_v44 }
 0x257   :  { %13731 = vst [vmem:[#allocation57_spill] sm:$0xff] %v10555_v14  ;;  %v1508_v21 = vpop.f32.mrf.mxu0  ;;  %13735 = vst [vmem:[#allocation58_spill] sm:$0xff] %v10573_v8 }
 0x258   :  { %2533 = vrot.lane.b32.xlu0 %v2150_v19, %s8698_s0  ;;  %2764 = vrot.lane.b32.xlu1 %v2659_v28, %s8699_s11  ;;  %v13736_v19 = vld [vmem:[#allocation2_spill] sm:$0xff] }
 0x259   :  { %v1614_v0 = vadd.f32 %v1496_v5, %v13736_v19  ;;  %v1510_v28 = vpop.f32.mrf.mxu0  ;;  %v2050_v5 = vpop.f32.mrf.mxu1 }
 0x25a   :  { %v10562_v53 = vpop.permute.xlu1 %2487  ;;  %v10564_v50 = vpop.permute.xlu0 %2249 }
 0x25c   :  { %2535 = vrot.lane.b32.xlu1 %v2152_v40, %s8698_s0  ;;  %2297 = vrot.lane.b32.xlu0 %v10560_v44, %s8698_s0  ;;  %v13738_v40 = vld [vmem:[#allocation74_spill] sm:$0xff]  ;;  %v2154_v44 = vadd.f32 %v2036_v25, %v1614_v0 }
 0x25d   :  { %v1009_v33 = vadd.f32 %v13738_v40, %v13737_v12  ;;  %v13742_v12 = vld [vmem:[#allocation76_spill] sm:$0xff] }
 0x25e   :  { %v10575_v38 = vpop.permute.xlu0 %2489  ;;  %v10577_v51 = vpop.permute.xlu1 %2251  ;;  %v1017_v40 = vadd.f32 %v13742_v12, %v13741_v11  ;;  %v13744_v11 = vld [vmem:[#allocation15_spill] sm:$0xff]  ;;  %v13748_v12 = vld [vmem:[#allocation77_spill] sm:$0xff] }
 0x25f   :  { %v1616_v19 = vadd.f32 %v1500_v32, %v1009_v33  ;;  %v2566_v32 = vsel %vm2553_vm4, %v10517_v57, %v10526_v2  ;;  %v2567_v2 = vsel %vm2553_vm4, %v10528_v9, %v10539_v3  ;;  %v13751_v9 = vld [vmem:[#allocation20_spill] sm:$0xff] }
 0x260   :  { %2766 = vrot.lane.b32.xlu0 %v2660_v30, %s8699_s11  ;;  %2299 = vrot.lane.b32.xlu1 %v10573_v8, %s8698_s0  ;;  %v1617_v30 = vadd.f32 %v1504_v49, %v1013_v24  ;;  %v1514_v8 = vpop.f32.mrf.mxu0  ;;  %v2054_v49 = vpop.f32.mrf.mxu1  ;;  %v1619_v0 = vadd.f32 %v1508_v21, %v1017_v40  ;;  %v13749_v40 = vld [vmem:[#allocation18_spill] sm:$0xff] }
 0x261   :  { %v2156_v55 = vadd.f32 %v2040_v54, %v1616_v19 }
 0x262   :  { %v10590_v47 = vpop.permute.xlu1 %2491  ;;  %v10592_v17 = vpop.permute.xlu0 %2253  ;;  %v10598_v63 = vadd.f32 %v2044_v35, %v1617_v30  ;;  %v2662_v35 = vmax.f32 %v10150_v61, %v2566_v32  ;;  %v10613_v33 = vadd.f32 %v2048_v59, %v1619_v0  ;;  %v13747_v30 = vld [vmem:[#allocation17_spill] sm:$0xff]  ;;  %v13750_v32 = vld [vmem:[#allocation78_spill] sm:$0xff] }
 0x263   :  { %v2056_v21 = vpop.f32.mrf.mxu1  ;;  %v1019_v59 = vadd.f32 %v13748_v12, %v13747_v30  ;;  %v1023_v0 = vadd.f32 %v13750_v32, %v13749_v40  ;;  %v13752_v30 = vld [vmem:[#allocation79_spill] sm:$0xff] }
 0x264   :  { %2537 = vrot.lane.b32.xlu0 %v2154_v44, %s8698_s0  ;;  %2768 = vrot.lane.b32.xlu1 %v2661_v56, %s8699_s11  ;;  %13743 = vst [vmem:[#allocation8_spill] sm:$0xff] %v10598_v63  ;;  %v1516_v56 = vpop.f32.mrf.mxu0  ;;  %v13745_v44 = vld [vmem:[#allocation4_spill] sm:$0xff]  ;;  %13746 = vst [vmem:[#allocation60_spill] sm:$0xff] %v10613_v33  ;;  %v1027_v12 = vadd.f32 %v13752_v30, %v13751_v9  ;;  %v13754_v9 = vld [vmem:[#allocation19_spill] sm:$0xff] }
 0x265   :  { %v1015_v54 = vadd.f32 %v13745_v44, %v13744_v11  ;;  %v2663_v44 = vmax.f32 %v10163_v22, %v2567_v2  ;;  %v13758_v30 = vld [vmem:[#allocation80_spill] sm:$0xff] }
 0x266   :  { %v10600_v25 = vpop.permute.xlu0 %2493  ;;  %v10602_v23 = vpop.permute.xlu1 %2255 }
 0x267   :  { %v1618_v19 = vadd.f32 %v1506_v26, %v1015_v54  ;;  %v2058_v26 = vpop.f32.mrf.mxu1  ;;  %v1620_v54 = vadd.f32 %v1510_v28, %v1019_v59  ;;  %v2568_v28 = vsel %vm2553_vm4, %v10541_v45, %v10553_v46  ;;  %v2569_v46 = vsel %vm2553_vm4, %v10555_v14, %v10562_v53  ;;  %v13762_v14 = vld [vmem:[#allocation82_spill] sm:$0xff]  ;;  %v13764_v45 = vld [vmem:[#allocation83_spill] sm:$0xff] }
 0x268   :  { %2301 = vrot.lane.b32.xlu0 %v10598_v63, %s8698_s0  ;;  %2539 = vrot.lane.b32.xlu1 %v2156_v55, %s8698_s0  ;;  %v1518_v55 = vpop.f32.mrf.mxu0  ;;  %v2664_v32 = vmax.f32 %v10176_v48, %v2568_v28  ;;  %v13760_v28 = vld [vmem:[#allocation81_spill] sm:$0xff] }
 0x269   :  { %v2158_v11 = vadd.f32 %v2046_v31, %v1618_v19  ;;  %v2160_v61 = vadd.f32 %v2050_v5, %v1620_v54  ;;  %v1623_v19 = vadd.f32 %v1518_v55, %v1027_v12  ;;  %v13755_v5 = vld [vmem:[#allocation5_spill] sm:$0xff]  ;;  %v13759_v12 = vld [vmem:[#allocation23_spill] sm:$0xff] }
 0x26a   :  { %v10615_v6 = vpop.permute.xlu1 %2495  ;;  %v10617_v24 = vpop.permute.xlu0 %2257 }
 0x26c   :  { %2770 = vrot.lane.b32.xlu0 %v2662_v35, %s8699_s11  ;;  %2303 = vrot.lane.b32.xlu1 %v10613_v33, %s8698_s0  ;;  %v1621_v35 = vadd.f32 %v1514_v8, %v1023_v0  ;;  %v1520_v33 = vpop.f32.mrf.mxu0  ;;  %v2060_v8 = vpop.f32.mrf.mxu1  ;;  %v10653_v0 = vadd.f32 %v2058_v26, %v1623_v19  ;;  %v1033_v19 = vadd.f32 %v13760_v28, %v13759_v12 }
 0x26e   :  { %v10630_v63 = vpop.permute.xlu0 %2497  ;;  %v10632_v3 = vpop.permute.xlu1 %2259  ;;  %v10638_v40 = vadd.f32 %v2054_v49, %v1621_v35  ;;  %v1025_v49 = vadd.f32 %v13755_v5, %v13754_v9  ;;  %13756 = vst [vmem:[#allocation61_spill] sm:$0xff] %v10653_v0  ;;  %v13757_v35 = vld [vmem:[#allocation21_spill] sm:$0xff]  ;;  %v2665_v5 = vmax.f32 %v10189_v52, %v2569_v46 }
 0x26f   :  { %v1524_v59 = vpop.f32.mrf.mxu0  ;;  %v2064_v55 = vpop.f32.mrf.mxu1  ;;  %v1029_v26 = vadd.f32 %v13758_v30, %v13757_v35  ;;  %v13763_v30 = vld [vmem:[#allocation25_spill] sm:$0xff] }
 0x270   :  { %2541 = vrot.lane.b32.xlu0 %v2158_v11, %s8698_s0  ;;  %2772 = vrot.lane.b32.xlu1 %v2663_v44, %s8699_s11  ;;  %13753 = vst [vmem:[#allocation27_spill] sm:$0xff] %v10638_v40  ;;  %v1622_v54 = vadd.f32 %v1516_v56, %v1025_v49  ;;  %v1625_v49 = vadd.f32 %v1524_v59, %v1033_v19  ;;  %v13766_v19 = vld [vmem:[#allocation26_spill] sm:$0xff] }
 0x271   :  { %v2066_v53 = vpop.f32.mrf.mxu1  ;;  %v1624_v56 = vadd.f32 %v1520_v33, %v1029_v26  ;;  %v1037_v12 = vadd.f32 %v13764_v45, %v13763_v30 }
 0x272   :  { %v10640_v31 = vpop.permute.xlu1 %2499  ;;  %v10642_v2 = vpop.permute.xlu0 %2261  ;;  %v2162_v9 = vadd.f32 %v2056_v21, %v1622_v54  ;;  %v10678_v54 = vadd.f32 %v2064_v55, %v1625_v49 }
 0x273   :  { %v2164_v21 = vadd.f32 %v2060_v8, %v1624_v56  ;;  %v2068_v52 = vpop.f32.mrf.mxu1 }
 0x274   :  { %2305 = vrot.lane.b32.xlu0 %v10638_v40, %s8698_s0  ;;  %2543 = vrot.lane.b32.xlu1 %v2160_v61, %s8698_s0  ;;  %v1526_v61 = vpop.f32.mrf.mxu0  ;;  %13765 = vst [vmem:[#allocation9_spill] sm:$0xff] %v10678_v54 }
 0x276   :  { %v10655_v11 = vpop.permute.xlu0 %2501  ;;  %v10657_v44 = vpop.permute.xlu1 %2263 }
 0x278   :  { %2774 = vrot.lane.b32.xlu0 %v2664_v32, %s8699_s11  ;;  %2307 = vrot.lane.b32.xlu1 %v10653_v0, %s8698_s0  ;;  %v1528_v32 = vpop.f32.mrf.mxu0  ;;  %v13761_v0 = vld [vmem:[#allocation24_spill] sm:$0xff] }
 0x279   :  { %v1035_v35 = vadd.f32 %v13762_v14, %v13761_v0  ;;  %v1627_v59 = vadd.f32 %v1528_v32, %v1037_v12  ;;  %v13767_v14 = vld [vmem:[#allocation84_spill] sm:$0xff] }
 0x27a   :  { %v2504_v40 = vpop.permute.xlu1 %2503  ;;  %v10670_v48 = vpop.permute.xlu0 %2265  ;;  %v1039_v0 = vadd.f32 %v13767_v14, %v13766_v19 }
 0x27b   :  { %v1626_v33 = vadd.f32 %v1526_v61, %v1035_v35  ;;  %v1530_v26 = vpop.f32.mrf.mxu0  ;;  %v10687_v45 = vadd.f32 %v2068_v52, %v1627_v59  ;;  %v2570_v61 = vsel %vm2553_vm4, %v10564_v50, %v10575_v38  ;;  %v2571_v35 = vsel %vm2553_vm4, %v10577_v51, %v10590_v47 }
 0x27c   :  { %2545 = vrot.lane.b32.xlu0 %v2162_v9, %s8698_s0  ;;  %2776 = vrot.lane.b32.xlu1 %v2665_v5, %s8699_s11  ;;  %v2070_v5 = vpop.f32.mrf.mxu1  ;;  %v1628_v56 = vadd.f32 %v1530_v26, %v1039_v0  ;;  %v2666_v49 = vmax.f32 %v10202_v62, %v2570_v61  ;;  %v2572_v38 = vsel %vm2553_vm4, %v10592_v17, %v10600_v25 }
 0x27d   :  { %v2166_v9 = vadd.f32 %v2066_v53, %v1626_v33  ;;  %v2667_v30 = vmax.f32 %v10213_v7, %v2571_v35  ;;  %v2668_v12 = vmax.f32 %v10224_v16, %v2572_v38  ;;  %v2573_v59 = vsel %vm2553_vm4, %v10602_v23, %v10615_v6 }
 0x27e   :  { %v2506_v46 = vpop.permute.xlu0 %2505  ;;  %v10680_v28 = vpop.permute.xlu1 %2267  ;;  %v2168_v32 = vadd.f32 %v2070_v5, %v1628_v56  ;;  %v2574_v47 = vsel %vm2553_vm4, %v10617_v24, %v10630_v63  ;;  %v2669_v25 = vmax.f32 %v10235_v34, %v2573_v59  ;;  %v2575_v0 = vsel %vm2553_vm4, %v10632_v3, %v10640_v31 }
 0x27f   :  { %v2670_v26 = vmax.f32 %v10246_v36, %v2574_v47  ;;  %v2576_v6 = vsel %vm2553_vm4, %v10642_v2, %v10655_v11  ;;  %v2671_v63 = vmax.f32 %v10257_v13, %v2575_v0  ;;  %v2577_v56 = vsel %vm2553_vm4, %v10657_v44, %v2504_v40 }
 0x280   :  { %2309 = vrot.lane.b32.xlu0 %v10678_v54, %s8698_s0  ;;  %2547 = vrot.lane.b32.xlu1 %v2164_v21, %s8698_s0  ;;  %v2578_v31 = vsel %vm2553_vm4, %v10670_v48, %v2506_v46  ;;  %v2361_v11 = vmax.f32 %v9997_v41, %v10352_v18  ;;  %v2362_v41 = vmax.f32 %v10009_v42, %v10365_v1 }
 0x282   :  { %v2508_v8 = vpop.permute.xlu1 %2507  ;;  %v10689_v55 = vpop.permute.xlu0 %2269 }
 0x283   :  { %v2579_v40 = vsel %vm2553_vm4, %v10680_v28, %v2508_v8 }
 0x284   :  { %2549 = vrot.lane.b32.xlu0 %v2166_v9, %s8698_s0  ;;  %2311 = vrot.lane.b32.xlu1 %v10687_v45, %s8698_s0  ;;  %v2672_v9 = vmax.f32 %v10268_v60, %v2576_v6  ;;  %v2675_v18 = vmax.f32 %v10306_v29, %v2579_v40  ;;  %v13774_v40 = vld [vmem:[#allocation36_spill] sm:$0xff] }
 0x286   :  { %v2510_v53 = vpop.permute.xlu0 %2509  ;;  %v10698_v52 = vpop.permute.xlu1 %2271 }
 0x287   :  { %v2580_v46 = vsel %vm2553_vm4, %v10689_v55, %v2510_v53 }
 0x288   :  { %2778 = vrot.lane.b32.xlu0 %v2666_v49, %s8699_s11  ;;  %2551 = vrot.lane.b32.xlu1 %v2168_v32, %s8698_s0  ;;  %v2673_v49 = vmax.f32 %v10279_v4, %v2577_v56  ;;  %v2674_v32 = vmax.f32 %v10293_v43, %v2578_v31  ;;  %v2676_v8 = vmax.f32 %v10317_v20, %v2580_v46 }
 0x28a   :  { %v2512_v21 = vpop.permute.xlu1 %2511  ;;  %v10710_v33 = vpop.permute.xlu0 %2273 }
 0x28b   :  { %v2581_v53 = vsel %vm2553_vm4, %v10698_v52, %v2512_v21 }
 0x28c   :  { %2782 = vrot.lane.b32.xlu0 %v2668_v12, %s8699_s11  ;;  %2780 = vrot.lane.b32.xlu1 %v2667_v30, %s8699_s11  ;;  %v10755_v12 = vld [vmem:[%s13373_s2] ss:$0 sm:$0xff]  ;;  %v2677_v1 = vmax.f32 %v10328_v37, %v2581_v53 }
 0x28e   :  { %v2514_v19 = vpop.permute.xlu0 %2513  ;;  %v10722_v14 = vpop.permute.xlu1 %2275 }
 0x290   :  { %2786 = vrot.lane.b32.xlu0 %v2670_v26, %s8699_s11  ;;  %2784 = vrot.lane.b32.xlu1 %v2669_v25, %s8699_s11  ;;  %v2582_v25 = vsel %vm2553_vm4, %v10710_v33, %v2514_v19 }
 0x291   :  { %v2678_v6 = vmax.f32 %v10339_v39, %v2582_v25  ;;  %v13777_v25 = vld [vmem:[#allocation40_spill] sm:$0xff] }
 0x292   :  { %v2516_v61 = vpop.permute.xlu1 %2515  ;;  %v10734_v5 = vpop.permute.xlu0 %2277 }
 0x293   :  { %13768 = vst [vmem:[#allocation63_spill] sm:$0xff] %v10734_v5  ;;  %v2583_v21 = vsel %vm2553_vm4, %v10722_v14, %v2516_v61 }
 0x294   :  { %2790 = vrot.lane.b32.xlu0 %v2672_v9, %s8699_s11  ;;  %2788 = vrot.lane.b32.xlu1 %v2671_v63, %s8699_s11  ;;  %v2679_v46 = vmax.f32 %v13774_v40, %v2583_v21 }
 0x296   :  { %v2747_v35 = vpop.permute.xlu0 %2746  ;;  %v10746_v38 = vpop.permute.xlu1 %2279 }
 0x297   :  { %13769 = vst [vmem:[#allocation64_spill] sm:$0xff] %v10746_v38  ;;  %v2890_v30 = vmax.f32 %v2361_v11, %v2747_v35  ;;  %v13771_v11 = vld [vmem:[#allocation39_spill] sm:$0xff] }
 0x298   :  { %2794 = vrot.lane.b32.xlu0 %v2674_v32, %s8699_s11  ;;  %2792 = vrot.lane.b32.xlu1 %v2673_v49, %s8699_s11  ;;  %v13772_v49 = vld [vmem:[#allocation28_spill] sm:$0xff] }
 0x299   :  { %v2945_v26 = vadd.f32 %v10755_v12, %v2890_v30  ;;  %v2363_v32 = vmax.f32 %v13772_v49, %v13771_v11  ;;  %v13775_v30 = vld [vmem:[#allocation37_spill] sm:$0xff] }
 0x29a   :  { %v2518_v59 = vpop.permute.xlu0 %2517  ;;  %v2749_v47 = vpop.permute.xlu1 %2748 }
 0x29b   :  { %v2891_v0 = vmax.f32 %v2362_v41, %v2749_v47  ;;  %v2993_v19 = vmax.f32 %v2945_v26, 0.0  ;;  %v2584_v56 = vsel %vm2553_vm4, %v10734_v5, %v2518_v59  ;;  %v13778_v26 = vld [vmem:[#allocation85_spill] sm:$0xff] }
 0x29c   :  { %2798 = vrot.lane.b32.xlu0 %v2676_v8, %s8699_s11  ;;  %2796 = vrot.lane.b32.xlu1 %v2675_v18, %s8699_s11  ;;  %v2680_v41 = vmax.f32 %v13775_v30, %v2584_v56 }
 0x29d   :  { %v2946_v42 = vadd.f32 %v10755_v12, %v2891_v0  ;;  %v2364_v0 = vmax.f32 %v13778_v26, %v13777_v25 }
 0x29e   :  { %v2520_v63 = vpop.permute.xlu1 %2519  ;;  %v10773_v9 = vpop.permute.xlu0 %2281 }
 0x29f   :  { %13770 = vst [vmem:[#allocation11_spill] sm:$0xff] %v10773_v9  ;;  %v2994_v31 = vmax.f32 %v2946_v42, 0.0  ;;  %v2585_v8 = vsel %vm2553_vm4, %v10746_v38, %v2520_v63 }
 0x2a0   :  { %2802 = vrot.lane.b32.xlu0 %v2678_v6, %s8699_s11  ;;  %2800 = vrot.lane.b32.xlu1 %v2677_v1, %s8699_s11  ;;  %v13779_v6 = vld [vmem:[#allocation38_spill] sm:$0xff] }
 0x2a1   :  { %v10783_v35 = vpack.c.bf16 %v2994_v31, %v2993_v19  ;;  %v2681_v63 = vmax.f32 %v13779_v6, %v2585_v8 }
 0x2a2   :  { %v2751_v61 = vpop.permute.xlu0 %2750  ;;  %v10787_v18 = vpop.permute.xlu1 %2283 }
 0x2a3   :  { %13773 = vst [vmem:[#allocation10_spill] sm:$0xff] %v10783_v35  ;;  %13776 = vst [vmem:[#allocation56_spill] sm:$0xff] %v10787_v18  ;;  %v2892_v59 = vmax.f32 %v2363_v32, %v2751_v61  ;;  %8317 = vmatprep.mubr.msk.bf16.mxu1 %vm3285_vm5, %v10783_v35  ;;  %v10794_v47 = vshrl.u32 %v10783_v35, 16  ;;  %v3113_v53 = vshll.u32 %v10783_v35, 16 }
 0x2a4   :  { %2806 = vrot.lane.b32.xlu0 %v2680_v41, %s8699_s11  ;;  %2804 = vrot.lane.b32.xlu1 %v2679_v46, %s8699_s11  ;;  %v13780_v46 = vld [vmem:[#allocation41_spill] sm:$0xff] }
 0x2a5   :  { %v4034_v42 = vrot.slane %v10794_v47, 3  ;;  %v4035_v1 = vrot.slane %v3113_v53, 4  ;;  %v4697_v56 = vrot.slane %v10794_v47, 4  ;;  %v4698_v31 = vrot.slane %v3113_v53, 5 }
 0x2a6   :  { %v2522_v21 = vpop.permute.xlu0 %2521  ;;  %v2753_v19 = vpop.permute.xlu1 %2752  ;;  %v2947_v11 = vadd.f32 %v10755_v12, %v2892_v59 }
 0x2a7   :  { %v2586_v49 = vsel %vm2553_vm4, %v10773_v9, %v2522_v21  ;;  %v2893_v32 = vmax.f32 %v2364_v0, %v2753_v19  ;;  %v4036_v61 = vor.u32 %v4035_v1, %v4034_v42  ;;  %v4699_v25 = vor.u32 %v4698_v31, %v4697_v56  ;;  %v13781_v21 = vld [vmem:[#allocation43_spill] sm:$0xff]  ;;  %v13782_v19 = vld [vmem:[#allocation42_spill] sm:$0xff] }
 0x2a8   :  { %v2682_v41 = vmax.f32 %v13780_v46, %v2586_v49  ;;  %2808 = vrot.lane.b32.xlu1 %v2681_v63, %s8699_s11  ;;  %v2995_v6 = vmax.f32 %v2947_v11, 0.0  ;;  %v13783_v49 = vld [vmem:[#allocation86_spill] sm:$0xff]  ;;  %v3115_v42 = vrot.slane %v3113_v53, 1 }
 0x2a9   :  { %v2948_v26 = vadd.f32 %v10755_v12, %v2893_v32  ;;  %v2365_v46 = vmax.f32 %v13783_v49, %v13782_v19 }
 0x2aa   :  { %v2524_v8 = vpop.permute.xlu1 %2523  ;;  %v10810_v35 = vpop.permute.xlu0 %2285  ;;  %2810 = vrot.lane.b32.xlu0 %v2682_v41, %s8699_s11  ;;  %v13786_v41 = vld [vmem:[#allocation44_spill] sm:$0xff] }
 0x2ab   :  { %v2996_v38 = vmax.f32 %v2948_v26, 0.0  ;;  %v2587_v59 = vsel %vm2553_vm4, %v10787_v18, %v2524_v8  ;;  %v2366_v26 = vmax.f32 %v10059_v15, %v13786_v41  ;;  %v13787_v41 = vld [vmem:[#allocation46_spill] sm:$0xff] }
 0x2ac   :  { %v2683_v0 = vmax.f32 %v13781_v21, %v2587_v59 }
 0x2ad   :  { %v10818_v63 = vpack.c.bf16 %v2996_v38, %v2995_v6  ;;  %v3116_v38 = vor.u32 %v3115_v42, %v10794_v47 }
 0x2ae   :  { %v2755_v1 = vpop.permute.xlu0 %2754  ;;  %v10820_v56 = vpop.permute.xlu1 %2287  ;;  %2812 = vrot.lane.b32.xlu1 %v2683_v0, %s8699_s11 }
 0x2af   :  { %13784 = vst [vmem:[#allocation66_spill] sm:$0xff] %v10818_v63  ;;  %13785 = vst [vmem:[#allocation67_spill] sm:$0xff] %v10820_v56  ;;  %v2894_v31 = vmax.f32 %v2365_v46, %v2755_v1  ;;  %8318 = vmatmul.mubr.msk.bf16.vlgmr.msra.gmra.mxu1 %vm3285_vm5, %v10818_v63  ;;  %v3118_v11 = vshll.u32 %v10818_v63, 16  ;;  %v10827_v32 = vshrl.u32 %v10818_v63, 16 }
 0x2b1   :  { %v3120_v53 = vrot.slane %v3118_v11, 1  ;;  %v4037_v6 = vrot.slane %v10827_v32, 3  ;;  %v4038_v8 = vrot.slane %v3118_v11, 4  ;;  %v4700_v46 = vrot.slane %v10827_v32, 4 }
 0x2b2   :  { %v2526_v59 = vpop.permute.xlu0 %2525  ;;  %v2757_v0 = vpop.permute.xlu1 %2756  ;;  %v4701_v19 = vrot.slane %v3118_v11, 5  ;;  %v2949_v49 = vadd.f32 %v10755_v12, %v2894_v31  ;;  %v5346_v30 = vrot.slane %v10827_v32, 7 }
 0x2b3   :  { %v2588_v1 = vsel %vm2553_vm4, %v10810_v35, %v2526_v59  ;;  %v2895_v63 = vmax.f32 %v2366_v26, %v2757_v0  ;;  %v3121_v15 = vsel %vm129_vm0, %v3116_v38, %v3120_v53  ;;  %v4039_v21 = vor.u32 %v4038_v8, %v4037_v6  ;;  %v13790_v0 = vld [vmem:[#allocation48_spill] sm:$0xff] }
 0x2b4   :  { %v2684_v42 = vmax.f32 %v13787_v41, %v2588_v1  ;;  %8279 = vmatprep.mubr.msk.bf16.mxu0 %vm3285_vm5, %v3121_v15  ;;  %v4702_v18 = vor.u32 %v4701_v19, %v4700_v46  ;;  %v5345_v38 = vrot.slane %v10794_v47, 7  ;;  %v2997_v6 = vmax.f32 %v2949_v49, 0.0  ;;  %v13791_v19 = vld [vmem:[#allocation45_spill] sm:$0xff] }
 0x2b5   :  { %v2950_v9 = vadd.f32 %v10755_v12, %v2895_v63  ;;  %v10846_v31 = vsel %vm1041_vm2, %v4036_v61, %v4039_v21  ;;  %v5347_v59 = vor.u32 %v5346_v30, %v3118_v11  ;;  %v13792_v1 = vld [vmem:[#allocation29_spill] sm:$0xff]  ;;  %v13795_v11 = vld [vmem:[#allocation47_spill] sm:$0xff] }
 0x2b6   :  { %v2528_v5 = vpop.permute.xlu1 %2527  ;;  %v10842_v40 = vpop.permute.xlu0 %2289  ;;  %2814 = vrot.lane.b32.xlu0 %v2684_v42, %s8699_s11  ;;  %13788 = vst [vmem:[#allocation68_spill] sm:$0xff] %v10846_v31  ;;  %v10849_v26 = vsel %vm4696_vm6, %v4699_v25, %v4702_v18  ;;  %v2367_v15 = vmax.f32 %v13792_v1, %v13791_v19  ;;  %v2368_v49 = vmax.f32 %v10085_v10, %v13795_v11 }
 0x2b7   :  { %13789 = vst [vmem:[#allocation12_spill] sm:$0xff] %v10849_v26  ;;  %v2998_v8 = vmax.f32 %v2950_v9, 0.0  ;;  %v2589_v63 = vsel %vm2553_vm4, %v10820_v56, %v2528_v5  ;;  %v10860_v61 = vsel %vm5344_vm7, %v5345_v38, %v5347_v59 }
 0x2b8   :  { %v2685_v46 = vmax.f32 %v13790_v0, %v2589_v63  ;;  %13794 = vst [vmem:[#allocation69_spill] sm:$0xff] %v10860_v61  ;;  %v3124_v63 = vor.u32 %v10827_v32, %v3120_v53 }
 0x2b9   :  { %v10857_v42 = vpack.c.bf16 %v2998_v8, %v2997_v6 }
 0x2ba   :  { %v2759_v25 = vpop.permute.xlu0 %2758  ;;  %v10862_v26 = vpop.permute.xlu1 %2291  ;;  %2816 = vrot.lane.b32.xlu1 %v2685_v46, %s8699_s11 }
 0x2bb   :  { %13793 = vst [vmem:[#allocation59_spill] sm:$0xff] %v10857_v42  ;;  %v2896_v9 = vmax.f32 %v2367_v15, %v2759_v25  ;;  %v3126_v47 = vshll.u32 %v10857_v42, 16  ;;  %v4041_v5 = vshrl.u32 %v10857_v42, 16  ;;  %v13796_v42 = vld [vmem:[#allocation50_spill] sm:$0xff] }
 0x2bd   :  { %v3128_v6 = vrot.slane %v3126_v47, 1  ;;  %v4043_v8 = vrot.slane %v4041_v5, 3  ;;  %v4044_v19 = vrot.slane %v3126_v47, 4  ;;  %v4704_v1 = vrot.slane %v4041_v5, 4 }
 0x2be   :  { %v2530_v38 = vpop.permute.xlu0 %2529  ;;  %v2761_v59 = vpop.permute.xlu1 %2760  ;;  %v4705_v61 = vrot.slane %v3126_v47, 5  ;;  %v2951_v31 = vadd.f32 %v10755_v12, %v2896_v9  ;;  %v5349_v53 = vrot.slane %v4041_v5, 7  ;;  %v13800_v5 = vld [vmem:[#allocation52_spill] sm:$0xff] }
 0x2bf   :  { %v2590_v46 = vsel %vm2553_vm4, %v10842_v40, %v2530_v38  ;;  %v2897_v15 = vmax.f32 %v2368_v49, %v2761_v59  ;;  %v3129_v25 = vsel %vm129_vm0, %v3124_v63, %v3128_v6  ;;  %v4045_v10 = vor.u32 %v4044_v19, %v4043_v8  ;;  %v13802_v59 = vld [vmem:[#allocation30_spill] sm:$0xff] }
 0x2c0   :  { %v2686_v0 = vmax.f32 %v13796_v42, %v2590_v46  ;;  %8280 = vmatmul.mubr.msk.bf16.vlgmr.msra.gmra.mxu0 %vm3285_vm5, %v3129_v25  ;;  %v4706_v32 = vor.u32 %v4705_v61, %v4704_v1  ;;  %v5350_v63 = vor.u32 %v5349_v53, %v3126_v47  ;;  %v2999_v6 = vmax.f32 %v2951_v31, 0.0  ;;  %v13805_v31 = vld [vmem:[#allocation49_spill] sm:$0xff]  ;;  %v13806_v47 = vld [vmem:[#allocation31_spill] sm:$0xff] }
 0x2c1   :  { %v2952_v11 = vadd.f32 %v10755_v12, %v2897_v15  ;;  %v10881_v9 = vsel %vm1041_vm2, %v4039_v21, %v4045_v10  ;;  %v2370_v15 = vmax.f32 %v13806_v47, %v13805_v31 }
 0x2c2   :  { %v2532_v56 = vpop.permute.xlu1 %2531  ;;  %v10877_v41 = vpop.permute.xlu0 %2293  ;;  %2818 = vrot.lane.b32.xlu0 %v2686_v0, %s8699_s11  ;;  %13798 = vst [vmem:[#allocation71_spill] sm:$0xff] %v10881_v9  ;;  %v10884_v49 = vsel %vm4696_vm6, %v4702_v18, %v4706_v32  ;;  %v10890_v19 = vsel %vm5344_vm7, %v5346_v30, %v5350_v63  ;;  %v2369_v0 = vmax.f32 %v13802_v59, %v10469_v58 }
 0x2c3   :  { %13797 = vst [vmem:[#allocation70_spill] sm:$0xff] %v10877_v41  ;;  %13799 = vst [vmem:[#allocation13_spill] sm:$0xff] %v10884_v49  ;;  %v3000_v38 = vmax.f32 %v2952_v11, 0.0  ;;  %v2591_v61 = vsel %vm2553_vm4, %v10862_v26, %v2532_v56 }
 0x2c4   :  { %v2687_v8 = vmax.f32 %v13800_v5, %v2591_v61  ;;  %13801 = vst [vmem:[#allocation62_spill] sm:$0xff] %v10890_v19  ;;  %v8663_v61 = vld [vmem:[%s13372_s3 + $0x38] ss:$0 sps:$4 sm:$0xff]  }
 0x2c5   :  { %v10894_v1 = vpack.c.bf16 %v3000_v38, %v2999_v6  ;;  %8631 = vmatprep.subr.msk.bf16.mxu0 %vm1661_vm3, %v8663_v61  ;;  %v3839_v47 = vsel %vm1661_vm3, %v8663_v61, 0 }
 0x2c6   :  { %v2763_v21 = vpop.permute.xlu0 %2762  ;;  %v10896_v46 = vpop.permute.xlu1 %2295  ;;  %2820 = vrot.lane.b32.xlu1 %v2687_v8, %s8699_s11  ;;  %v13807_v8 = vld [vmem:[#allocation54_spill] sm:$0xff]  ;;  %8350 = vmatpush3.bf16.msra.mxu0 %v3839_v47 }
 0x2c7   :  { %13803 = vst [vmem:[#allocation72_spill] sm:$0xff] %v10894_v1  ;;  %13804 = vst [vmem:[#allocation73_spill] sm:$0xff] %v10896_v46  ;;  %v2898_v18 = vmax.f32 %v2369_v0, %v2763_v21  ;;  %8321 = vmatprep.mubr.msk.bf16.mxu1 %vm3285_vm5, %v10894_v1  ;;  %v10902_v56 = vshrl.u32 %v10894_v1, 16  ;;  %v3133_v30 = vshll.u32 %v10894_v1, 16 }
 0x2c9   :  { %v4047_v58 = vrot.slane %v10902_v56, 3  ;;  %v4048_v25 = vrot.slane %v3133_v30, 4  ;;  %v4708_v53 = vrot.slane %v10902_v56, 4  ;;  %v4709_v11 = vrot.slane %v3133_v30, 5 }
 0x2ca   :  { %v2534_v10 = vpop.permute.xlu0 %2533  ;;  %v2765_v32 = vpop.permute.xlu1 %2764  ;;  %v2953_v63 = vadd.f32 %v10755_v12, %v2898_v18  ;;  %v3135_v49 = vrot.slane %v3133_v30, 1 }
 0x2cb   :  { %v2592_v6 = vsel %vm2553_vm4, %v10877_v41, %v2534_v10  ;;  %v2899_v38 = vmax.f32 %v2370_v15, %v2765_v32  ;;  %v4049_v0 = vor.u32 %v4048_v25, %v4047_v58  ;;  %v4710_v21 = vor.u32 %v4709_v11, %v4708_v53  ;;  %v13809_v25 = vld [vmem:[#allocation51_spill] sm:$0xff]  ;;  %v13810_v53 = vld [vmem:[#allocation32_spill] sm:$0xff] }
 0x2cc   :  { %v2688_v59 = vmax.f32 %v13807_v8, %v2592_v6  ;;  %v3001_v15 = vmax.f32 %v2953_v63, 0.0  ;;  %v13808_v6 = vld [vmem:[#allocation6_spill] sm:$0xff]  ;;  %v2371_v11 = vmax.f32 %v13810_v53, %v13809_v25 }
 0x2cd   :  { %v2954_v31 = vadd.f32 %v10755_v12, %v2899_v38 }
 0x2ce   :  { %v2536_v19 = vpop.permute.xlu1 %2535  ;;  %v10919_v18 = vpop.permute.xlu0 %2297  ;;  %2822 = vrot.lane.b32.xlu0 %v2688_v59, %s8699_s11 }
 0x2cf   :  { %v3002_v10 = vmax.f32 %v2954_v31, 0.0  ;;  %v2593_v32 = vsel %vm2553_vm4, %v10896_v46, %v2536_v19  ;;  %v13813_v31 = vld [vmem:[#allocation53_spill] sm:$0xff] }
 0x2d0   :  { %v2689_v58 = vmax.f32 %v13808_v6, %v2593_v32  ;;  %v2372_v47 = vmax.f32 %v10137_v27, %v13813_v31  ;;  %v13814_v27 = vld [vmem:[#allocation22_spill] sm:$0xff] }
 0x2d1   :  { %v10927_v38 = vpack.c.bf16 %v3002_v10, %v3001_v15  ;;  %v3136_v15 = vor.u32 %v3135_v49, %v10902_v56 }
 0x2d2   :  { %v2767_v61 = vpop.permute.xlu0 %2766  ;;  %v10929_v1 = vpop.permute.xlu1 %2299  ;;  %2824 = vrot.lane.b32.xlu1 %v2689_v58, %s8699_s11 }
 0x2d3   :  { %13811 = vst [vmem:[#allocation3_spill] sm:$0xff] %v10927_v38  ;;  %13812 = vst [vmem:[#allocation2_spill] sm:$0xff] %v10929_v1  ;;  %v2900_v59 = vmax.f32 %v2371_v11, %v2767_v61  ;;  %8322 = vmatmul.mubr.msk.bf16.gmra.mxu1 %vm3285_vm5, %v10927_v38  ;;  %v3138_v63 = vshll.u32 %v10927_v38, 16  ;;  %v10936_v19 = vshrl.u32 %v10927_v38, 16 }
 0x2d5   :  { %v3140_v30 = vrot.slane %v3138_v63, 1  ;;  %v4050_v10 = vrot.slane %v10936_v19, 3  ;;  %v4051_v32 = vrot.slane %v3138_v63, 4  ;;  %v4711_v53 = vrot.slane %v10936_v19, 4 }
 0x2d6   :  { %v2538_v25 = vpop.permute.xlu0 %2537  ;;  %v2769_v58 = vpop.permute.xlu1 %2768  ;;  %v4712_v11 = vrot.slane %v3138_v63, 5  ;;  %v2955_v61 = vadd.f32 %v10755_v12, %v2900_v59  ;;  %v5353_v41 = vrot.slane %v10936_v19, 7 }
 0x2d7   :  { %v2594_v38 = vsel %vm2553_vm4, %v10919_v18, %v2538_v25  ;;  %v2901_v9 = vmax.f32 %v2372_v47, %v2769_v58  ;;  %v3141_v6 = vsel %vm129_vm0, %v3136_v15, %v3140_v30  ;;  %v4052_v49 = vor.u32 %v4051_v32, %v4050_v10  ;;  %v13817_v32 = vld [vmem:[#allocation58_spill] sm:$0xff] }
 0x2d8   :  { %v2690_v31 = vmax.f32 %v13814_v27, %v2594_v38  ;;  %8283 = vmatprep.mubr.msk.bf16.mxu0 %vm3285_vm5, %v3141_v6  ;;  %v4713_v46 = vor.u32 %v4712_v11, %v4711_v53  ;;  %v5352_v38 = vrot.slane %v10902_v56, 7  ;;  %v3003_v6 = vmax.f32 %v2955_v61, 0.0  ;;  %v13818_v53 = vld [vmem:[#allocation33_spill] sm:$0xff] }
 0x2d9   :  { %v2956_v8 = vadd.f32 %v10755_v12, %v2901_v9  ;;  %v10955_v25 = vsel %vm1041_vm2, %v4049_v0, %v4052_v49  ;;  %v5354_v10 = vor.u32 %v5353_v41, %v3138_v63  ;;  %v2373_v11 = vmax.f32 %v13818_v53, %v10517_v57  ;;  %v8664_v0 = vld [vmem:[%s13372_s3 + $0x30] sm:$0xff]  }
 0x2da   :  { %v10951_v5 = vpop.permute.xlu0 %2301  ;;  %2826 = vrot.lane.b32.xlu0 %v2690_v31, %s8699_s11  ;;  %v2540_v59 = vpop.permute.xlu1 %2539  ;;  %13815 = vst [vmem:[#allocation65_spill] sm:$0xff] %v10955_v25  ;;  %v10958_v47 = vsel %vm4696_vm6, %v4710_v21, %v4713_v46  ;;  %8351 = vmatprep.subr.bf16.mxu0 %v8664_v0 }
 0x2db   :  { %13816 = vst [vmem:[#allocation74_spill] sm:$0xff] %v10958_v47  ;;  %v3004_v15 = vmax.f32 %v2956_v8, 0.0  ;;  %v2595_v9 = vsel %vm2553_vm4, %v10929_v1, %v2540_v59  ;;  %v10972_v21 = vsel %vm5344_vm7, %v5352_v38, %v5354_v10  ;;  %v13821_v59 = vld [vmem:[#allocation55_spill] sm:$0xff]  ;;  %8352 = vmatpush3.bf16.msra.mxu0 %v8664_v0 }
 0x2dc   :  { %v2691_v58 = vmax.f32 %v13817_v32, %v2595_v9  ;;  %13820 = vst [vmem:[#allocation75_spill] sm:$0xff] %v10972_v21  ;;  %v13822_v32 = vld [vmem:[#allocation8_spill] sm:$0xff] }
 0x2dd   :  { %v10966_v31 = vpack.c.bf16 %v3004_v15, %v3003_v6  ;;  %v2374_v6 = vmax.f32 %v10163_v22, %v13821_v59  ;;  %v3144_v15 = vor.u32 %v10936_v19, %v3140_v30 }
 0x2de   :  { %v2771_v56 = vpop.permute.xlu0 %2770  ;;  %2828 = vrot.lane.b32.xlu1 %v2691_v58, %s8699_s11  ;;  %v10975_v8 = vpop.permute.xlu1 %2303 }
 0x2df   :  { %13819 = vst [vmem:[#allocation14_spill] sm:$0xff] %v10966_v31  ;;  %v2902_v63 = vmax.f32 %v2373_v11, %v2771_v56  ;;  %v3146_v61 = vshll.u32 %v10966_v31, 16  ;;  %v4054_v57 = vshrl.u32 %v10966_v31, 16 }
 0x2e1   :  { %v3148_v9 = vrot.slane %v3146_v61, 1  ;;  %v4056_v38 = vrot.slane %v4054_v57, 3  ;;  %v4057_v10 = vrot.slane %v3146_v61, 4  ;;  %v4715_v58 = vrot.slane %v4054_v57, 4 }
 0x2e2   :  { %v2542_v53 = vpop.permute.xlu0 %2541  ;;  %v2773_v21 = vpop.permute.xlu1 %2772  ;;  %v4716_v47 = vrot.slane %v3146_v61, 5  ;;  %v2957_v11 = vadd.f32 %v10755_v12, %v2902_v63  ;;  %v5356_v0 = vrot.slane %v4054_v57, 7 }
 0x2e3   :  { %v2596_v56 = vsel %vm2553_vm4, %v10951_v5, %v2542_v53  ;;  %v2903_v25 = vmax.f32 %v2374_v6, %v2773_v21  ;;  %v3149_v31 = vsel %vm129_vm0, %v3144_v15, %v3148_v9  ;;  %v4058_v19 = vor.u32 %v4057_v10, %v4056_v38  ;;  %v13827_v38 = vld [vmem:[#allocation7_spill] sm:$0xff]  ;;  %v13828_v10 = vld [vmem:[#allocation34_spill] sm:$0xff] }
 0x2e4   :  { %v2692_v22 = vmax.f32 %v13822_v32, %v2596_v56  ;;  %8284 = vmatmul.mubr.msk.bf16.gmra.mxu0 %vm3285_vm5, %v3149_v31  ;;  %v4717_v30 = vor.u32 %v4716_v47, %v4715_v58  ;;  %v5357_v6 = vor.u32 %v5356_v0, %v3146_v61  ;;  %v3005_v15 = vmax.f32 %v2957_v11, 0.0  ;;  %v13825_v31 = vld [vmem:[#allocation60_spill] sm:$0xff]  ;;  %v8665_v56 = vld [vmem:[%s13372_s3 + $0x4c] ss:$0 sps:$4 sm:$0xff]  }
 0x2e5   :  { %v2958_v59 = vadd.f32 %v10755_v12, %v2903_v25  ;;  %v10993_v27 = vsel %vm1041_vm2, %v4052_v49, %v4058_v19  ;;  %v2375_v53 = vmax.f32 %v13828_v10, %v13827_v38  ;;  %v13831_v19 = vld [vmem:[#allocation35_spill] sm:$0xff]  ;;  %8632 = vmatprep.subr.msk.bf16.mxu1 %vm1661_vm3, %v8665_v56 }
 0x2e6   :  { %v10989_v1 = vpop.permute.xlu0 %2305  ;;  %2830 = vrot.lane.b32.xlu0 %v2692_v22, %s8699_s11  ;;  %v2544_v63 = vpop.permute.xlu1 %2543  ;;  %13823 = vst [vmem:[#allocation16_spill] sm:$0xff] %v10993_v27  ;;  %v10996_v21 = vsel %vm4696_vm6, %v4713_v46, %v4717_v30  ;;  %v11002_v25 = vsel %vm5344_vm7, %v5353_v41, %v5357_v6  ;;  %v13830_v22 = vld [vmem:[#allocation57_spill] sm:$0xff] }
 0x2e7   :  { %13824 = vst [vmem:[#allocation76_spill] sm:$0xff] %v10996_v21  ;;  %v3006_v9 = vmax.f32 %v2958_v59, 0.0  ;;  %v2597_v47 = vsel %vm2553_vm4, %v10975_v8, %v2544_v63  ;;  %13826 = vst [vmem:[#allocation15_spill] sm:$0xff] %v11002_v25  ;;  %v2376_v30 = vmax.f32 %v13831_v19, %v13830_v22  ;;  %v8667_v22 = vld [vmem:[%s13372_s3 + $0x44] sm:$0xff]  }
 0x2e8   :  { %v2693_v57 = vmax.f32 %v13825_v31, %v2597_v47  ;;  %v8666_v21 = vld [vmem:[%s13372_s3 + $0x28] sm:$0xff]  }
 0x2e9   :  { %v11006_v58 = vpack.c.bf16 %v3006_v9, %v3005_v15  ;;  %v4202_v15 = vsel %vm1661_vm3, %v8665_v56, 0  ;;  %8353 = vmatprep.subr.bf16.mxu0 %v8666_v21 }
 0x2ea   :  { %v2775_v49 = vpop.permute.xlu0 %2774  ;;  %2832 = vrot.lane.b32.xlu1 %v2693_v57, %s8699_s11  ;;  %v11009_v46 = vpop.permute.xlu1 %2307  ;;  %8388 = vmatpush3.bf16.msra.mxu1 %v4202_v15 }
 0x2eb   :  { %13829 = vst [vmem:[#allocation4_spill] sm:$0xff] %v11006_v58  ;;  %v2904_v61 = vmax.f32 %v2375_v53, %v2775_v49  ;;  %8325 = vmatprep.mubr.msk.bf16.mxu1 %vm3285_vm5, %v11006_v58  ;;  %v11014_v11 = vshrl.u32 %v11006_v58, 16  ;;  %v3153_v41 = vshll.u32 %v11006_v58, 16  ;;  %v13832_v53 = vld [vmem:[#allocation27_spill] sm:$0xff]  ;;  %8389 = vmatprep.subr.bf16.mxu1 %v8667_v22 }
 0x2ec   :  { %8354 = vmatpush3.bf16.msra.mxu0 %v8666_v21 }
 0x2ed   :  { %v4060_v0 = vrot.slane %v11014_v11, 3  ;;  %v4061_v59 = vrot.slane %v3153_v41, 4  ;;  %v4719_v9 = vrot.slane %v11014_v11, 4  ;;  %v4720_v47 = vrot.slane %v3153_v41, 5 }
 0x2ee   :  { %v2546_v63 = vpop.permute.xlu0 %2545  ;;  %v2777_v6 = vpop.permute.xlu1 %2776  ;;  %v2959_v57 = vadd.f32 %v10755_v12, %v2904_v61  ;;  %8390 = vmatpush3.bf16.msra.mxu1 %v8667_v22  ;;  %v2377_v22 = vmax.f32 %v10202_v62, %v10564_v50 }
 0x2ef   :  { %v2598_v38 = vsel %vm2553_vm4, %v10989_v1, %v2546_v63  ;;  %v2905_v10 = vmax.f32 %v2376_v30, %v2777_v6  ;;  %v4062_v19 = vor.u32 %v4061_v59, %v4060_v0  ;;  %v4721_v25 = vor.u32 %v4720_v47, %v4719_v9  ;;  %v13834_v0 = vld [vmem:[#allocation61_spill] sm:$0xff] }
 0x2f0   :  { %v2694_v49 = vmax.f32 %v13832_v53, %v2598_v38  ;;  %v3007_v63 = vmax.f32 %v2959_v57, 0.0  ;;  %v3155_v9 = vrot.slane %v3153_v41, 1  ;;  %v8668_v47 = vld [vmem:[%s13372_s3 + $0x3c] sm:$0xff]  }
 0x2f1   :  { %v2960_v56 = vadd.f32 %v10755_v12, %v2905_v10  ;;  %8391 = vmatprep.subr.bf16.mxu1 %v8668_v47 }
 0x2f2   :  { %v11037_v61 = vpop.permute.xlu0 %2309  ;;  %2834 = vrot.lane.b32.xlu0 %v2694_v49, %s8699_s11  ;;  %v2548_v30 = vpop.permute.xlu1 %2547  ;;  %8392 = vmatpush3.bf16.msra.mxu1 %v8668_v47 }
 0x2f3   :  { %13833 = vst [vmem:[#allocation17_spill] sm:$0xff] %v11037_v61  ;;  %v3008_v6 = vmax.f32 %v2960_v56, 0.0  ;;  %v2599_v15 = vsel %vm2553_vm4, %v11009_v46, %v2548_v30  ;;  %v3156_v30 = vor.u32 %v3155_v9, %v11014_v11 }
 0x2f4   :  { %v2695_v59 = vmax.f32 %v13834_v0, %v2599_v15 }
 0x2f5   :  { %v11046_v38 = vpack.c.bf16 %v3008_v6, %v3007_v63 }
 0x2f6   :  { %v2550_v10 = vpop.permute.xlu0 %2549  ;;  %2836 = vrot.lane.b32.xlu1 %v2695_v59, %s8699_s11  ;;  %v11049_v57 = vpop.permute.xlu1 %2311 }
 0x2f7   :  { %13835 = vst [vmem:[#allocation77_spill] sm:$0xff] %v11046_v38  ;;  %v2600_v49 = vsel %vm2553_vm4, %v11037_v61, %v2550_v10  ;;  %8326 = vmatmul.mubr.msk.bf16.gmra.mxu1 %vm3285_vm5, %v11046_v38  ;;  %v11056_v21 = vshll.u32 %v11046_v38, 16  ;;  %v11059_v41 = vshrl.u32 %v11046_v38, 16 }
 0x2f8   :  { %v2696_v56 = vmax.f32 %v10678_v54, %v2600_v49  ;;  %v5359_v49 = vrot.slane %v11014_v11, 7 }
 0x2f9   :  { %v3160_v63 = vrot.slane %v11056_v21, 1  ;;  %v4063_v6 = vrot.slane %v11059_v41, 3  ;;  %v4064_v15 = vrot.slane %v11056_v21, 4  ;;  %v4722_v59 = vrot.slane %v11059_v41, 4 }
 0x2fa   :  { %2838 = vrot.lane.b32.xlu0 %v2696_v56, %s8699_s11  ;;  %v2779_v10 = vpop.permute.xlu0 %2778  ;;  %v2552_v58 = vpop.permute.xlu1 %2551  ;;  %v4723_v38 = vrot.slane %v11056_v21, 5  ;;  %v13497_v62 = vrot.slane %v11059_v41, 7 }
 0x2fb   :  { %v2906_v50 = vmax.f32 %v2377_v22, %v2779_v10  ;;  %v2601_v9 = vsel %vm2553_vm4, %v11049_v57, %v2552_v58  ;;  %v3161_v47 = vsel %vm129_vm0, %v3156_v30, %v3160_v63  ;;  %v11078_v54 = vor.u32 %v4064_v15, %v4063_v6 }
 0x2fc   :  { %v2697_v27 = vmax.f32 %v10687_v45, %v2601_v9  ;;  %8287 = vmatprep.mubr.msk.bf16.mxu0 %vm3285_vm5, %v3161_v47  ;;  %v11080_v56 = vor.u32 %v4723_v38, %v4722_v59  ;;  %v5361_v61 = vor.u32 %v13497_v62, %v11056_v21  ;;  %v2378_v22 = vmax.f32 %v10213_v7, %v10577_v51 }
 0x2fd   :  { %v2379_v58 = vmax.f32 %v10224_v16, %v10592_v17  ;;  %v2961_v11 = vadd.f32 %v10755_v12, %v2906_v50  ;;  %v11093_v38 = vsel %vm1041_vm2, %v4062_v19, %v11078_v54  ;;  %v2380_v16 = vmax.f32 %v10235_v34, %v10602_v23  ;;  %v11118_v23 = vld [vmem:[%s13372_s3 + $0x60] ss:$0 sps:$4 sm:$0xff]  }
 0x2fe   :  { %v2783_v30 = vpop.permute.xlu0 %2782  ;;  %2840 = vrot.lane.b32.xlu1 %v2697_v27, %s8699_s11  ;;  %v2781_v10 = vpop.permute.xlu1 %2780  ;;  %v11097_v6 = vsel %vm4696_vm6, %v4721_v25, %v11080_v56  ;;  %v11100_v21 = vsel %vm5344_vm7, %v5359_v49, %v5361_v61  ;;  %v2381_v17 = vmax.f32 %v10246_v36, %v10617_v24  ;;  %v2382_v61 = vmax.f32 %v10257_v13, %v10632_v3 }
 0x2ff   :  { %13836 = vst [vmem:[#allocation18_spill] sm:$0xff] %v11097_v6  ;;  %13837 = vst [vmem:[#allocation78_spill] sm:$0xff] %v11100_v21  ;;  %v2908_v7 = vmax.f32 %v2379_v58, %v2783_v30  ;;  %v2907_v51 = vmax.f32 %v2378_v22, %v2781_v10  ;;  %v3009_v15 = vmax.f32 %v2961_v11, 0.0  ;;  %v2383_v49 = vmax.f32 %v10268_v60, %v10642_v2 }
 0x300   :  { %v2384_v24 = vmax.f32 %v10279_v4, %v10657_v44  ;;  %v2385_v22 = vmax.f32 %v10293_v43, %v10670_v48  ;;  %8633 = vmatprep.subr.msk.bf16.mxu0 %vm1661_vm3, %v11118_v23  ;;  %v2386_v10 = vmax.f32 %v10306_v29, %v10680_v28  ;;  %v2387_v4 = vmax.f32 %v10317_v20, %v10689_v55 }
 0x301   :  { %v2962_v27 = vadd.f32 %v10755_v12, %v2907_v51  ;;  %v2963_v50 = vadd.f32 %v10755_v12, %v2908_v7  ;;  %v2388_v43 = vmax.f32 %v10328_v37, %v10698_v52  ;;  %v3164_v7 = vor.u32 %v11059_v41, %v3160_v63 }
 0x302   :  { %v2787_v19 = vpop.permute.xlu0 %2786  ;;  %v2785_v59 = vpop.permute.xlu1 %2784  ;;  %vm7680_vm4 = vcmask 523264  }
 0x303   :  { %v3010_v25 = vmax.f32 %v2962_v27, 0.0  ;;  %v2910_v9 = vmax.f32 %v2381_v17, %v2787_v19  ;;  %v2909_v47 = vmax.f32 %v2380_v16, %v2785_v59  ;;  %v3011_v60 = vmax.f32 %v2963_v50, 0.0 }
 0x305   :  { %v11112_v34 = vpack.c.bf16 %v3010_v25, %v3009_v15  ;;  %v2964_v36 = vadd.f32 %v10755_v12, %v2909_v47  ;;  %v2965_v13 = vadd.f32 %v10755_v12, %v2910_v9  ;;  %v2389_v9 = vmax.f32 %v10339_v39, %v10710_v33 }
 0x306   :  { %v2791_v3 = vpop.permute.xlu0 %2790  ;;  %v2789_v58 = vpop.permute.xlu1 %2788 }
 0x307   :  { %v3012_v2 = vmax.f32 %v2964_v36, 0.0  ;;  %v2912_v11 = vmax.f32 %v2383_v49, %v2791_v3  ;;  %v2911_v30 = vmax.f32 %v2382_v61, %v2789_v58  ;;  %v11132_v44 = vshll.u32 %v11112_v34, 16 }
 0x308   :  { %v11135_v48 = vshrl.u32 %v11112_v34, 16  ;;  %v3013_v17 = vmax.f32 %v2965_v13, 0.0 }
 0x309   :  { %v11140_v51 = vpack.c.bf16 %v3012_v2, %v3011_v60  ;;  %v2966_v16 = vadd.f32 %v10755_v12, %v2911_v30  ;;  %v3168_v20 = vrot.slane %v11132_v44, 1  ;;  %v4070_v27 = vrot.slane %v11132_v44, 4 }
 0x30a   :  { %v2795_v29 = vpop.permute.xlu0 %2794  ;;  %v2793_v28 = vpop.permute.xlu1 %2792  ;;  %v4069_v55 = vrot.slane %v11135_v48, 3  ;;  %v2967_v15 = vadd.f32 %v10755_v12, %v2912_v11  ;;  %v13839_v11 = vld [vmem:[#allocation36_spill] sm:$0xff] }
 0x30b   :  { %13838 = vst [vmem:[#allocation20_spill] sm:$0xff] %v11140_v51  ;;  %v3014_v19 = vmax.f32 %v2966_v16, 0.0  ;;  %v2914_v59 = vmax.f32 %v2385_v22, %v2795_v29  ;;  %v2913_v37 = vmax.f32 %v2384_v24, %v2793_v28  ;;  %8329 = vmatprep.mubr.msk.bf16.mxu1 %vm3285_vm5, %v11140_v51  ;;  %v3169_v52 = vsel %vm129_vm0, %v3164_v7, %v3168_v20  ;;  %v13841_v29 = vld [vmem:[#allocation37_spill] sm:$0xff] }
 0x30c   :  { %v11151_v63 = vshrl.u32 %v11140_v51, 16  ;;  %v11154_v50 = vshll.u32 %v11140_v51, 16  ;;  %v4071_v25 = vor.u32 %v4070_v27, %v4069_v55  ;;  %8288 = vmatmul.mubr.msk.bf16.gmra.mxu0 %vm3285_vm5, %v3169_v52  ;;  %v3015_v33 = vmax.f32 %v2967_v15, 0.0 }
 0x30d   :  { %v11158_v47 = vpack.c.bf16 %v3014_v19, %v3013_v17  ;;  %v2969_v61 = vadd.f32 %v10755_v12, %v2914_v59  ;;  %v2968_v49 = vadd.f32 %v10755_v12, %v2913_v37  ;;  %v2390_v30 = vmax.f32 %v13839_v11, %v10722_v14  ;;  %v13840_v17 = vld [vmem:[#allocation63_spill] sm:$0xff] }
 0x30e   :  { %v2799_v36 = vpop.permute.xlu0 %2798  ;;  %v2797_v24 = vpop.permute.xlu1 %2796  ;;  %v3175_v22 = vrot.slane %v11154_v50, 1  ;;  %v11166_v13 = vsel %vm1041_vm2, %v11078_v54, %v4071_v25  ;;  %v4073_v3 = vrot.slane %v11151_v63, 3  ;;  %v4074_v39 = vrot.slane %v11154_v50, 4 }
 0x30f   :  { %v3016_v58 = vmax.f32 %v2968_v49, 0.0  ;;  %v2916_v60 = vmax.f32 %v2387_v4, %v2799_v36  ;;  %v2915_v2 = vmax.f32 %v2386_v10, %v2797_v24  ;;  %8330 = vmatmul.mubr.msk.bf16.gmra.mxu1 %vm3285_vm5, %v11158_v47  ;;  %v11175_v7 = vshll.u32 %v11158_v47, 16  ;;  %v13844_v36 = vld [vmem:[#allocation38_spill] sm:$0xff] }
 0x310   :  { %v11178_v54 = vshrl.u32 %v11158_v47, 16  ;;  %v4075_v16 = vor.u32 %v4074_v39, %v4073_v3  ;;  %v2391_v28 = vmax.f32 %v13841_v29, %v13840_v17  ;;  %v3017_v20 = vmax.f32 %v2969_v61, 0.0  ;;  %v13843_v61 = vld [vmem:[#allocation64_spill] sm:$0xff] }
 0x311   :  { %v11182_v55 = vpack.c.bf16 %v3016_v58, %v3015_v33  ;;  %v2970_v10 = vadd.f32 %v10755_v12, %v2915_v2  ;;  %v3176_v15 = vor.u32 %v3175_v22, %v11151_v63  ;;  %v3180_v14 = vrot.slane %v11175_v7, 1 }
 0x312   :  { %v2803_v4 = vpop.permute.xlu0 %2802  ;;  %v2801_v27 = vpop.permute.xlu1 %2800  ;;  %v4076_v19 = vrot.slane %v11178_v54, 3  ;;  %v4077_v59 = vrot.slane %v11175_v7, 4  ;;  %v2971_v37 = vadd.f32 %v10755_v12, %v2916_v60  ;;  %v2392_v24 = vmax.f32 %v13844_v36, %v13843_v61 }
 0x313   :  { %13842 = vst [vmem:[#allocation79_spill] sm:$0xff] %v11182_v55  ;;  %v3018_v52 = vmax.f32 %v2970_v10, 0.0  ;;  %v2918_v25 = vmax.f32 %v2389_v9, %v2803_v4  ;;  %v2917_v49 = vmax.f32 %v2388_v43, %v2801_v27  ;;  %v3181_v3 = vsel %vm129_vm0, %v3176_v15, %v3180_v14 }
 0x314   :  { %v11194_v39 = vshll.u32 %v11182_v55, 16  ;;  %v4078_v22 = vor.u32 %v4077_v59, %v4076_v19  ;;  %8291 = vmatprep.mubr.msk.bf16.mxu0 %vm3285_vm5, %v3181_v3  ;;  %v11202_v9 = vshrl.u32 %v11182_v55, 16  ;;  %v3184_v43 = vor.u32 %v11178_v54, %v3180_v14 }
 0x315   :  { %v11196_v33 = vpack.c.bf16 %v3018_v52, %v3017_v20  ;;  %v2973_v58 = vadd.f32 %v10755_v12, %v2918_v25  ;;  %v2972_v2 = vadd.f32 %v10755_v12, %v2917_v49  ;;  %v3019_v10 = vmax.f32 %v2971_v37, 0.0  ;;  %v13846_v52 = vld [vmem:[#allocation11_spill] sm:$0xff]  ;;  %v13847_v25 = vld [vmem:[#allocation41_spill] sm:$0xff] }
 0x316   :  { %v2807_v60 = vpop.permute.xlu0 %2806  ;;  %v2805_v11 = vpop.permute.xlu1 %2804  ;;  %v3188_v17 = vrot.slane %v11194_v39, 1  ;;  %v11207_v29 = vsel %vm1041_vm2, %v4075_v16, %v4078_v22  ;;  %v4083_v20 = vrot.slane %v11194_v39, 4  ;;  %v4082_v16 = vrot.slane %v11202_v9, 3 }
 0x317   :  { %13845 = vst [vmem:[#allocation19_spill] sm:$0xff] %v11196_v33  ;;  %v3020_v4 = vmax.f32 %v2972_v2, 0.0  ;;  %v2920_v27 = vmax.f32 %v2391_v28, %v2807_v60  ;;  %v2919_v15 = vmax.f32 %v2390_v30, %v2805_v11  ;;  %8333 = vmatprep.mubr.msk.bf16.mxu1 %vm3285_vm5, %v11196_v33  ;;  %v11214_v14 = vshrl.u32 %v11196_v33, 16 }
 0x318   :  { %v3189_v19 = vsel %vm129_vm0, %v3184_v43, %v3188_v17  ;;  %v11217_v59 = vshll.u32 %v11196_v33, 16  ;;  %v2393_v49 = vmax.f32 %v13847_v25, %v13846_v52  ;;  %v3021_v37 = vmax.f32 %v2973_v58, 0.0  ;;  %v13857_v33 = vld [vmem:[#allocation48_spill] sm:$0xff] }
 0x319   :  { %v11222_v61 = vpack.c.bf16 %v3020_v4, %v3019_v10  ;;  %v2974_v30 = vadd.f32 %v10755_v12, %v2919_v15  ;;  %8292 = vmatmul.mubr.msk.bf16.gmra.mxu0 %vm3285_vm5, %v3189_v19  ;;  %v4084_v3 = vor.u32 %v4083_v20, %v4082_v16  ;;  %v4086_v2 = vrot.slane %v11214_v14, 3 }
 0x31a   :  { %v2809_v28 = vpop.permute.xlu1 %2808  ;;  %v3195_v36 = vrot.slane %v11217_v59, 1  ;;  %v4087_v43 = vrot.slane %v11217_v59, 4  ;;  %v2975_v60 = vadd.f32 %v10755_v12, %v2920_v27 }
 0x31b   :  { %13848 = vst [vmem:[#allocation5_spill] sm:$0xff] %v11222_v61  ;;  %v3022_v11 = vmax.f32 %v2974_v30, 0.0  ;;  %v2921_v17 = vmax.f32 %v2392_v24, %v2809_v28  ;;  %8334 = vmatmul.mubr.msk.bf16.gmra.mxu1 %vm3285_vm5, %v11222_v61  ;;  %v11233_v58 = vshll.u32 %v11222_v61, 16  ;;  %v11237_v15 = vshrl.u32 %v11222_v61, 16  ;;  %v13850_v28 = vld [vmem:[#allocation56_spill] sm:$0xff] }
 0x31c   :  { %v2811_v10 = vpop.permute.xlu0 %2810  ;;  %v3196_v4 = vor.u32 %v3195_v36, %v11214_v14  ;;  %v11240_v20 = vsel %vm1041_vm2, %v4078_v22, %v4084_v3  ;;  %v4088_v19 = vor.u32 %v4087_v43, %v4086_v2  ;;  %v13851_v36 = vld [vmem:[#allocation43_spill] sm:$0xff]  ;;  %v3023_v21 = vmax.f32 %v2975_v60, 0.0 }
 0x31d   :  { %v11242_v16 = vpack.c.bf16 %v3022_v11, %v3021_v37  ;;  %v2976_v24 = vadd.f32 %v10755_v12, %v2921_v17  ;;  %v2922_v27 = vmax.f32 %v2393_v49, %v2811_v10  ;;  %v3200_v52 = vrot.slane %v11233_v58, 1 }
 0x31e   :  { %v4089_v25 = vrot.slane %v11237_v15, 3  ;;  %v4090_v30 = vrot.slane %v11233_v58, 4  ;;  %v2394_v62 = vmax.f32 %v13851_v36, %v13850_v28 }
 0x31f   :  { %13849 = vst [vmem:[#allocation21_spill] sm:$0xff] %v11242_v16  ;;  %v3024_v6 = vmax.f32 %v2976_v24, 0.0  ;;  %v3201_v22 = vsel %vm129_vm0, %v3196_v4, %v3200_v52  ;;  %v11253_v3 = vshll.u32 %v11242_v16, 16  ;;  %v11256_v2 = vshrl.u32 %v11242_v16, 16 }
 0x320   :  { %8295 = vmatprep.mubr.msk.bf16.mxu0 %vm3285_vm5, %v3201_v22  ;;  %v2813_v37 = vpop.permute.xlu1 %2812  ;;  %v4091_v49 = vor.u32 %v4090_v30, %v4089_v25  ;;  %v2977_v11 = vadd.f32 %v10755_v12, %v2922_v27  ;;  %v3204_v17 = vor.u32 %v11237_v15, %v3200_v52  ;;  %v4726_v30 = vrot.slane %v11135_v48, 4 }
 0x321   :  { %v11258_v43 = vpack.c.bf16 %v3024_v6, %v3023_v21  ;;  %v2923_v60 = vmax.f32 %v2394_v62, %v2813_v37  ;;  %v3208_v10 = vrot.slane %v11253_v3, 1  ;;  %v4095_v24 = vrot.slane %v11256_v2, 3  ;;  %v13853_v62 = vld [vmem:[#allocation46_spill] sm:$0xff] }
 0x322   :  { %v11264_v4 = vsel %vm1041_vm2, %v4088_v19, %v4091_v49  ;;  %v4096_v28 = vrot.slane %v11253_v3, 4  ;;  %v2395_v27 = vmax.f32 %v13853_v62, %v10810_v35  ;;  %v3025_v36 = vmax.f32 %v2977_v11, 0.0 }
 0x323   :  { %13852 = vst [vmem:[#allocation80_spill] sm:$0xff] %v11258_v43  ;;  %v2978_v25 = vadd.f32 %v10755_v12, %v2923_v60  ;;  %8337 = vmatprep.mubr.msk.bf16.mxu1 %vm3285_vm5, %v11258_v43  ;;  %v11272_v6 = vshrl.u32 %v11258_v43, 16  ;;  %v11275_v21 = vshll.u32 %v11258_v43, 16  ;;  %v3209_v19 = vsel %vm129_vm0, %v3204_v17, %v3208_v10 }
 0x324   :  { %v4097_v52 = vor.u32 %v4096_v28, %v4095_v24  ;;  %8296 = vmatmul.mubr.msk.bf16.gmra.mxu0 %vm3285_vm5, %v3209_v19  ;;  %v4727_v43 = vrot.slane %v11132_v44, 5  ;;  %v4730_v35 = vrot.slane %v11151_v63, 4  ;;  %v4731_v17 = vrot.slane %v11154_v50, 5 }
 0x325   :  { %v3026_v22 = vmax.f32 %v2978_v25, 0.0  ;;  %v4099_v12 = vrot.slane %v11272_v6, 3  ;;  %v4100_v37 = vrot.slane %v11275_v21, 4  ;;  %v3215_v11 = vrot.slane %v11275_v21, 1 }
 0x326   :  { %v11285_v60 = vsel %vm1041_vm2, %v4091_v49, %v4097_v52  ;;  %v4733_v28 = vrot.slane %v11178_v54, 4  ;;  %v4728_v62 = vor.u32 %v4727_v43, %v4726_v30  ;;  %v4732_v19 = vor.u32 %v4731_v17, %v4730_v35  ;;  %v13856_v52 = vld [vmem:[#allocation67_spill] sm:$0xff]  ;;  %v11319_v17 = vld [vmem:[%s13372_s3 + $0x74] ss:$0 sps:$4 sm:$0xff]  }
 0x327   :  { %13854 = vst [vmem:[#allocation23_spill] sm:$0xff] %v11285_v60  ;;  %v11290_v10 = vpack.c.bf16 %v3026_v22, %v3025_v36  ;;  %v4101_v24 = vor.u32 %v4100_v37, %v4099_v12  ;;  %v4734_v16 = vrot.slane %v11175_v7, 5  ;;  %v4737_v49 = vrot.slane %v11202_v9, 4  ;;  %8634 = vmatprep.subr.msk.bf16.mxu1 %vm1661_vm3, %v11319_v17 }
 0x328   :  { %v2815_v25 = vpop.permute.xlu0 %2814  ;;  %v2396_v61 = vmax.f32 %v13857_v33, %v13856_v52  ;;  %v11308_v43 = vsel %vm4696_vm6, %v11080_v56, %v4728_v62  ;;  %v4738_v22 = vrot.slane %v11194_v39, 5  ;;  %v4741_v12 = vrot.slane %v11214_v14, 4  ;;  %v11324_v56 = vld [vmem:[%s13373_s2] ss:$0 sm:$0xff] }
 0x329   :  { %13855 = vst [vmem:[#allocation81_spill] sm:$0xff] %v11290_v10  ;;  %v2924_v55 = vmax.f32 %v2395_v27, %v2815_v25  ;;  %8338 = vmatmul.mubr.msk.bf16.gmra.mxu1 %vm3285_vm5, %v11290_v10  ;;  %v11301_v50 = vshll.u32 %v11290_v10, 16  ;;  %v11304_v36 = vshrl.u32 %v11290_v10, 16  ;;  %13858 = vst [vmem:[#allocation24_spill] sm:$0xff] %v11308_v43  ;;  %v4735_v30 = vor.u32 %v4734_v16, %v4733_v28 }
 0x32a   :  { %v3216_v33 = vor.u32 %v3215_v11, %v11272_v6  ;;  %v4739_v25 = vor.u32 %v4738_v22, %v4737_v49  ;;  %v4742_v62 = vrot.slane %v11217_v59, 5  ;;  %v4745_v49 = vrot.slane %v11233_v58, 5 }
 0x32b   :  { %v3220_v27 = vrot.slane %v11301_v50, 1  ;;  %v4102_v37 = vrot.slane %v11304_v36, 3  ;;  %v4103_v35 = vrot.slane %v11301_v50, 4  ;;  %v2979_v16 = vadd.f32 %v11324_v56, %v2924_v55 }
 0x32c   :  { %v2817_v28 = vpop.permute.xlu1 %2816  ;;  %v11328_v11 = vsel %vm4696_vm6, %v4732_v19, %v4735_v30  ;;  %v11336_v60 = vsel %vm4696_vm6, %v4735_v30, %v4739_v25  ;;  %v4743_v55 = vor.u32 %v4742_v62, %v4741_v12  ;;  %v4744_v19 = vrot.slane %v11237_v15, 4 }
 0x32d   :  { %13859 = vst [vmem:[#allocation82_spill] sm:$0xff] %v11328_v11  ;;  %v2925_v52 = vmax.f32 %v2396_v61, %v2817_v28  ;;  %v3221_v43 = vsel %vm129_vm0, %v3216_v33, %v3220_v27  ;;  %v4104_v10 = vor.u32 %v4103_v35, %v4102_v37  ;;  %13860 = vst [vmem:[#allocation25_spill] sm:$0xff] %v11336_v60  ;;  %v3027_v59 = vmax.f32 %v2979_v16, 0.0  ;;  %v13862_v11 = vld [vmem:[#allocation52_spill] sm:$0xff] }
 0x32e   :  { %8299 = vmatprep.mubr.msk.bf16.mxu0 %vm3285_vm5, %v3221_v43  ;;  %v4748_v22 = vrot.slane %v11256_v2, 4  ;;  %v4746_v28 = vor.u32 %v4745_v49, %v4744_v19  ;;  %v4749_v43 = vrot.slane %v11253_v3, 5  ;;  %v4752_v30 = vrot.slane %v11272_v6, 4 }
 0x32f   :  { %v2980_v51 = vadd.f32 %v11324_v56, %v2925_v52  ;;  %v11342_v61 = vsel %vm1041_vm2, %v4101_v24, %v4104_v10  ;;  %v4753_v12 = vrot.slane %v11275_v21, 5  ;;  %v4755_v37 = vrot.slane %v11304_v36, 4 }
 0x330   :  { %13861 = vst [vmem:[#allocation83_spill] sm:$0xff] %v11342_v61  ;;  %v4756_v35 = vrot.slane %v11301_v50, 5  ;;  %v2397_v16 = vmax.f32 %v13796_v42, %v10842_v40  ;;  %v11355_v24 = vsel %vm4696_vm6, %v4743_v55, %v4746_v28  ;;  %v2398_v61 = vmax.f32 %v13862_v11, %v10862_v26 }
 0x331   :  { %v3028_v33 = vmax.f32 %v2980_v51, 0.0  ;;  %v4750_v51 = vor.u32 %v4749_v43, %v4748_v22  ;;  %v4754_v52 = vor.u32 %v4753_v12, %v4752_v30  ;;  %v3224_v55 = vor.u32 %v11304_v36, %v3220_v27 }
 0x332   :  { %v4757_v19 = vor.u32 %v4756_v35, %v4755_v37 }
 0x333   :  { %v11352_v25 = vpack.c.bf16 %v3028_v33, %v3027_v59  ;;  %v11366_v40 = vsel %vm4696_vm6, %v4746_v28, %v4750_v51  ;;  %v5363_v51 = vrot.slane %v11135_v48, 7 }
 0x334   :  { %v2819_v62 = vpop.permute.xlu0 %2818  ;;  %v11369_v42 = vsel %vm4696_vm6, %v4754_v52, %v4757_v19  ;;  %v5367_v52 = vrot.slane %v11178_v54, 7 }
 0x335   :  { %v2926_v49 = vmax.f32 %v2397_v16, %v2819_v62  ;;  %v11358_v60 = vshll.u32 %v11352_v25, 16  ;;  %v11361_v21 = vshrl.u32 %v11352_v25, 16 }
 0x337   :  { %v3228_v59 = vrot.slane %v11358_v60, 1  ;;  %v4108_v22 = vrot.slane %v11361_v21, 3  ;;  %v4109_v33 = vrot.slane %v11358_v60, 4  ;;  %v4759_v30 = vrot.slane %v11361_v21, 4 }
 0x338   :  { %v2821_v43 = vpop.permute.xlu1 %2820  ;;  %v4760_v12 = vrot.slane %v11358_v60, 5  ;;  %v2981_v26 = vadd.f32 %v11324_v56, %v2926_v49 }
 0x339   :  { %v2927_v11 = vmax.f32 %v2398_v61, %v2821_v43  ;;  %v3229_v28 = vsel %vm129_vm0, %v3224_v55, %v3228_v59  ;;  %v4110_v37 = vor.u32 %v4109_v33, %v4108_v22  ;;  %v5364_v55 = vor.u32 %v5363_v51, %v11132_v44  ;;  %v13863_v43 = vld [vmem:[#allocation70_spill] sm:$0xff] }
 0x33a   :  { %8300 = vmatmul.mubr.msk.bf16.gmra.mxu0 %vm3285_vm5, %v3229_v28  ;;  %v4761_v27 = vor.u32 %v4760_v12, %v4759_v30  ;;  %v3029_v49 = vmax.f32 %v2981_v26, 0.0  ;;  %v5370_v59 = vrot.slane %v11202_v9, 7  ;;  %v5366_v22 = vrot.slane %v11151_v63, 7  ;;  %v13864_v30 = vld [vmem:[#allocation54_spill] sm:$0xff] }
 0x33b   :  { %v2982_v35 = vadd.f32 %v11324_v56, %v2927_v11  ;;  %v11382_v16 = vsel %vm1041_vm2, %v4104_v10, %v4110_v37  ;;  %v5368_v33 = vor.u32 %v5367_v52, %v11175_v7  ;;  %v5374_v10 = vrot.slane %v11237_v15, 7  ;;  %v13866_v37 = vld [vmem:[#allocation73_spill] sm:$0xff] }
 0x33c   :  { %v11386_v62 = vsel %vm4696_vm6, %v4757_v19, %v4761_v27  ;;  %v2399_v48 = vmax.f32 %v13864_v30, %v13863_v43  ;;  %v13865_v19 = vrot.slane %v11059_v41, 7  ;;  %v5371_v44 = vor.u32 %v5370_v59, %v11194_v39  ;;  %v13867_v27 = vld [vmem:[#allocation6_spill] sm:$0xff] }
 0x33d   :  { %v3030_v61 = vmax.f32 %v2982_v35, 0.0  ;;  %v11405_v9 = vsel %vm5344_vm7, %v5366_v22, %v5368_v33  ;;  %v5373_v63 = vrot.slane %v11214_v14, 7  ;;  %v5375_v7 = vor.u32 %v5374_v10, %v11233_v58 }
 0x33e   :  { %v11401_v54 = vsel %vm5344_vm7, %v13865_v19, %v5364_v55  ;;  %v11414_v28 = vsel %vm5344_vm7, %v5367_v52, %v5371_v44  ;;  %v2400_v35 = vmax.f32 %v13867_v27, %v13866_v37  ;;  %v5377_v55 = vrot.slane %v11256_v2, 7 }
 0x33f   :  { %v11396_v12 = vpack.c.bf16 %v3030_v61, %v3029_v49  ;;  %v11417_v39 = vsel %vm5344_vm7, %v5373_v63, %v5375_v7  ;;  %v5381_v30 = vrot.slane %v11304_v36, 7  ;;  %v5380_v44 = vrot.slane %v11272_v6, 7  ;;  %v13868_v36 = vld [vmem:[#allocation22_spill] sm:$0xff] }
 0x340   :  { %v2823_v26 = vpop.permute.xlu0 %2822  ;;  %v5378_v52 = vor.u32 %v5377_v55, %v11253_v3  ;;  %v5384_v2 = vrot.slane %v11361_v21, 7  ;;  %v2401_v37 = vmax.f32 %v13868_v36, %v10919_v18 }
 0x341   :  { %v2928_v15 = vmax.f32 %v2399_v48, %v2823_v26  ;;  %8341 = vmatprep.mubr.msk.bf16.mxu1 %vm3285_vm5, %v11396_v12  ;;  %v3231_v11 = vshrl.u32 %v11396_v12, 16  ;;  %v3233_v41 = vshll.u32 %v11396_v12, 16  ;;  %v5382_v26 = vor.u32 %v5381_v30, %v11301_v50 }
 0x342   :  { %v11427_v19 = vsel %vm5344_vm7, %v5374_v10, %v5378_v52  ;;  %v5385_v3 = vor.u32 %v5384_v2, %v11358_v60  ;;  %v13871_v60 = vld [vmem:[#allocation58_spill] sm:$0xff] }
 0x343   :  { %v4112_v14 = vrot.slane %v3231_v11, 3  ;;  %v4113_v51 = vrot.slane %v3233_v41, 4  ;;  %v4763_v49 = vrot.slane %v3231_v11, 4  ;;  %v4764_v61 = vrot.slane %v3233_v41, 5 }
 0x344   :  { %v2825_v58 = vpop.permute.xlu1 %2824  ;;  %v2983_v59 = vadd.f32 %v11324_v56, %v2928_v15  ;;  %v11433_v15 = vsel %vm5344_vm7, %v5380_v44, %v5382_v26  ;;  %v3235_v10 = vrot.slane %v3233_v41, 1  ;;  %v11441_v6 = vsel %vm5344_vm7, %v5381_v30, %v5385_v3 }
 0x345   :  { %v2929_v22 = vmax.f32 %v2400_v35, %v2825_v58  ;;  %v4114_v33 = vor.u32 %v4113_v51, %v4112_v14  ;;  %v4765_v43 = vor.u32 %v4764_v61, %v4763_v49  ;;  %13869 = vst [vmem:[#allocation26_spill] sm:$0xff] %v11441_v6  ;;  %v13870_v51 = vld [vmem:[#allocation2_spill] sm:$0xff]  ;;  %v5387_v36 = vrot.slane %v3231_v11, 7 }
 0x346   :  { %v3031_v63 = vmax.f32 %v2983_v59, 0.0  ;;  %v2402_v58 = vmax.f32 %v13871_v60, %v13870_v51  ;;  %v3236_v49 = vor.u32 %v3235_v10, %v3231_v11  ;;  %v2403_v51 = vmax.f32 %v13822_v32, %v10951_v5 }
 0x347   :  { %v2984_v48 = vadd.f32 %v11324_v56, %v2929_v22  ;;  %v2404_v11 = vmax.f32 %v13825_v31, %v10975_v8 }
 0x349   :  { %v3032_v7 = vmax.f32 %v2984_v48, 0.0 }
 0x34b   :  { %v11438_v27 = vpack.c.bf16 %v3032_v7, %v3031_v63 }
 0x34c   :  { %v2827_v35 = vpop.permute.xlu0 %2826 }
 0x34d   :  { %v2930_v50 = vmax.f32 %v2401_v37, %v2827_v35  ;;  %8342 = vmatmul.mubr.msk.bf16.gmra.mxu1 %vm3285_vm5, %v11438_v27  ;;  %v3238_v21 = vshll.u32 %v11438_v27, 16  ;;  %v3242_v14 = vshrl.u32 %v11438_v27, 16 }
 0x34f   :  { %v3240_v18 = vrot.slane %v3238_v21, 1  ;;  %v4115_v61 = vrot.slane %v3242_v14, 3  ;;  %v4116_v55 = vrot.slane %v3238_v21, 4  ;;  %v4766_v59 = vrot.slane %v3242_v14, 4 }
 0x350   :  { %v2829_v41 = vpop.permute.xlu1 %2828  ;;  %v4767_v22 = vrot.slane %v3238_v21, 5  ;;  %v2985_v52 = vadd.f32 %v11324_v56, %v2930_v50  ;;  %v5388_v2 = vrot.slane %v3242_v14, 7 }
 0x351   :  { %v2931_v30 = vmax.f32 %v2402_v58, %v2829_v41  ;;  %v3241_v48 = vsel %vm129_vm0, %v3236_v49, %v3240_v18  ;;  %v4117_v44 = vor.u32 %v4116_v55, %v4115_v61 }
 0x352   :  { %8303 = vmatprep.mubr.msk.bf16.mxu0 %vm3285_vm5, %v3241_v48  ;;  %v4768_v26 = vor.u32 %v4767_v22, %v4766_v59  ;;  %v5389_v37 = vor.u32 %v5388_v2, %v3238_v21  ;;  %v3033_v10 = vmax.f32 %v2985_v52, 0.0 }
 0x353   :  { %v2986_v63 = vadd.f32 %v11324_v56, %v2931_v30  ;;  %v11454_v7 = vsel %vm1041_vm2, %v4114_v33, %v4117_v44 }
 0x354   :  { %v11457_v3 = vsel %vm4696_vm6, %v4765_v43, %v4768_v26  ;;  %v11460_v50 = vsel %vm5344_vm7, %v5387_v36, %v5389_v37  ;;  %v3244_v43 = vor.u32 %v3242_v14, %v3240_v18 }
 0x355   :  { %v3034_v35 = vmax.f32 %v2986_v63, 0.0  ;;  %13872 = vst [vmem:[#allocation84_spill] sm:$0xff] %v11460_v50 }
 0x357   :  { %v11464_v60 = vpack.c.bf16 %v3034_v35, %v3033_v10 }
 0x358   :  { %v2831_v58 = vpop.permute.xlu0 %2830 }
 0x359   :  { %v2932_v49 = vmax.f32 %v2403_v51, %v2831_v58  ;;  %v3246_v33 = vshll.u32 %v11464_v60, 16  ;;  %v4119_v61 = vshrl.u32 %v11464_v60, 16  ;;  %v2405_v51 = vmax.f32 %v13832_v53, %v10989_v1 }
 0x35b   :  { %v3248_v21 = vrot.slane %v3246_v33, 1  ;;  %v4121_v55 = vrot.slane %v4119_v61, 3  ;;  %v4122_v41 = vrot.slane %v3246_v33, 4  ;;  %v4770_v22 = vrot.slane %v4119_v61, 4 }
 0x35c   :  { %v2833_v59 = vpop.permute.xlu1 %2832  ;;  %v4771_v52 = vrot.slane %v3246_v33, 5  ;;  %v2987_v5 = vadd.f32 %v11324_v56, %v2932_v49  ;;  %v5391_v36 = vrot.slane %v4119_v61, 7 }
 0x35d   :  { %v2933_v32 = vmax.f32 %v2404_v11, %v2833_v59  ;;  %v3249_v30 = vsel %vm129_vm0, %v3244_v43, %v3248_v21  ;;  %v4123_v48 = vor.u32 %v4122_v41, %v4121_v55  ;;  %v13874_v55 = vld [vmem:[#allocation17_spill] sm:$0xff] }
 0x35e   :  { %8304 = vmatmul.mubr.msk.bf16.gmra.mxu0 %vm3285_vm5, %v3249_v30  ;;  %v4772_v63 = vor.u32 %v4771_v52, %v4770_v22  ;;  %v5392_v14 = vor.u32 %v5391_v36, %v3246_v33  ;;  %v3035_v18 = vmax.f32 %v2987_v5, 0.0  ;;  %v13875_v41 = vld [vmem:[#allocation9_spill] sm:$0xff] }
 0x35f   :  { %v2988_v37 = vadd.f32 %v11324_v56, %v2933_v32  ;;  %v11475_v8 = vsel %vm1041_vm2, %v4117_v44, %v4123_v48  ;;  %v2407_v59 = vmax.f32 %v13875_v41, %v13874_v55  ;;  %v8673_v55 = vld [vmem:[%s13372_s3 + $0x6c] sm:$0xff]  }
 0x360   :  { %v11478_v31 = vsel %vm4696_vm6, %v4768_v26, %v4772_v63  ;;  %v11481_v35 = vsel %vm5344_vm7, %v5388_v2, %v5392_v14  ;;  %v2406_v2 = vmax.f32 %v13834_v0, %v11009_v46  ;;  %v2408_v46 = vmax.f32 %v10687_v45, %v11049_v57 }
 0x361   :  { %v3036_v10 = vmax.f32 %v2988_v37, 0.0  ;;  %13873 = vst [vmem:[#allocation39_spill] sm:$0xff] %v11481_v35 }
 0x363   :  { %v11485_v58 = vpack.c.bf16 %v3036_v10, %v3035_v18  ;;  %v13876_v10 = vld [vmem:[#allocation68_spill] sm:$0xff] }
 0x364   :  { %v2835_v49 = vpop.permute.xlu0 %2834 }
 0x365   :  { %v2934_v61 = vmax.f32 %v2405_v51, %v2835_v49  ;;  %8345 = vmatprep.mubr.msk.bf16.mxu1 %vm3285_vm5, %v11485_v58  ;;  %v11490_v44 = vshrl.u32 %v11485_v58, 16  ;;  %v11493_v26 = vshll.u32 %v11485_v58, 16 }
 0x367   :  { %v4774_v11 = vrot.slane %v11490_v44, 4  ;;  %v4775_v1 = vrot.slane %v11493_v26, 5  ;;  %v2989_v53 = vadd.f32 %v11324_v56, %v2934_v61  ;;  %v3255_v48 = vrot.slane %v11493_v26, 1 }
 0x368   :  { %v2837_v33 = vpop.permute.xlu1 %2836 }
 0x369   :  { %v2935_v43 = vmax.f32 %v2406_v2, %v2837_v33  ;;  %v4776_v21 = vor.u32 %v4775_v1, %v4774_v11  ;;  %v3037_v5 = vmax.f32 %v2989_v53, 0.0  ;;  %v3256_v57 = vor.u32 %v3255_v48, %v11490_v44 }
 0x36b   :  { %v2990_v22 = vadd.f32 %v11324_v56, %v2935_v43 }
 0x36c   :  { %v2839_v52 = vpop.permute.xlu0 %2838 }
 0x36d   :  { %v3038_v32 = vmax.f32 %v2990_v22, 0.0  ;;  %v2936_v30 = vmax.f32 %v2407_v59, %v2839_v52  ;;  %v5394_v59 = vrot.slane %v11490_v44, 7  ;;  %v13877_v52 = vld [vmem:[#allocation71_spill] sm:$0xff] }
 0x36f   :  { %v11505_v0 = vpack.c.bf16 %v3038_v32, %v3037_v5  ;;  %v2991_v36 = vadd.f32 %v11324_v56, %v2936_v30  ;;  %v13879_v30 = vld [vmem:[#allocation66_spill] sm:$0xff] }
 0x370   :  { %v2841_v63 = vpop.permute.xlu1 %2840 }
 0x371   :  { %v2937_v37 = vmax.f32 %v2408_v46, %v2841_v63  ;;  %8346 = vmatmul.mubr.msk.bf16.gmra.mxu1 %vm3285_vm5, %v11505_v0  ;;  %v11512_v14 = vshll.u32 %v11505_v0, 16  ;;  %v11515_v18 = vshrl.u32 %v11505_v0, 16  ;;  %v3039_v2 = vmax.f32 %v2991_v36, 0.0  ;;  %v8674_v36 = vld [vmem:[%s13372_s3 + $0x64] sm:$0xff]  }
 0x372   :  { %8393 = vmatprep.mubr.msk.bf16.mxu1 %vm3285_vm5, %v13876_v10  ;;  %v3736_v46 = vrot.slane %v13879_v30, 1  ;;  %v13881_v10 = vld [vmem:[#allocation10_spill] sm:$0xff] }
 0x373   :  { %v2992_v45 = vadd.f32 %v11324_v56, %v2937_v37  ;;  %v3260_v51 = vrot.slane %v11512_v14, 1  ;;  %v4777_v49 = vrot.slane %v11515_v18, 4  ;;  %v4778_v61 = vrot.slane %v11512_v14, 5  ;;  %v8319_v37 = vpop.f32.mrf.mxu1 }
 0x374   :  { %v5395_v53 = vrot.slane %v11515_v18, 7  ;;  %v4849_v56 = vsel %vm1661_vm3, %v11319_v17, 0  ;;  %v13878_v17 = vld [vmem:[#allocation65_spill] sm:$0xff] }
 0x375   :  { %v3040_v33 = vmax.f32 %v2992_v45, 0.0  ;;  %v3261_v11 = vsel %vm129_vm0, %v3256_v57, %v3260_v51  ;;  %v4779_v1 = vor.u32 %v4778_v61, %v4777_v49  ;;  %v3264_v48 = vor.u32 %v11515_v18, %v3260_v51 }
 0x376   :  { %8307 = vmatprep.mubr.msk.bf16.mxu0 %vm3285_vm5, %v3261_v11  ;;  %v5396_v22 = vor.u32 %v5395_v53, %v11512_v14  ;;  %v3735_v45 = vrot.slane %v13881_v10, 1 }
 0x377   :  { %v11527_v43 = vpack.c.bf16 %v3040_v33, %v3039_v2  ;;  %v11535_v41 = vsel %vm4696_vm6, %v4776_v21, %v4779_v1 }
 0x378   :  { %v11551_v21 = vsel %vm5344_vm7, %v5394_v59, %v5396_v22  ;;  %v3737_v51 = vsel %vm3734_vm8, %v3735_v45, %v3736_v46  ;;  %v3583_v59 = vpop.f32.mrf.mxu1 }
 0x379   :  { %8394 = vmatmul.mubr.msk.bf16.vlgmr.msra.gmra.mxu1 %vm3285_vm5, %v13877_v52  ;;  %v11542_v5 = vshll.u32 %v11527_v43, 16  ;;  %v11545_v32 = vshrl.u32 %v11527_v43, 16  ;;  %13880 = vst [vmem:[#allocation28_spill] sm:$0xff] %v11551_v21 }
 0x37a   :  { %8397 = vmatprep.mubr.msk.bf16.mxu1 %vm3285_vm5, %v13878_v17  ;;  %8464 = vmatpush3.bf16.msra.mxu1 %v4849_v56  ;;  %v11570_v56 = vld [vmem:[%s13372_s3 + $0x9c] ss:$0 sps:$4 sm:$0xff]  }
 0x37b   :  { %v3268_v63 = vrot.slane %v11542_v5, 1  ;;  %8465 = vmatprep.subr.bf16.mxu1 %v8673_v55  ;;  %v4781_v57 = vrot.slane %v11545_v32, 4  ;;  %v4782_v49 = vrot.slane %v11542_v5, 5  ;;  %v5398_v61 = vrot.slane %v11545_v32, 7 }
 0x37c   :  { %v4134_v6 = vrot.slane %v11545_v32, 3 }
 0x37d   :  { %v3269_v2 = vsel %vm129_vm0, %v3264_v48, %v3268_v63  ;;  %v4783_v33 = vor.u32 %v4782_v49, %v4781_v57  ;;  %v5399_v11 = vor.u32 %v5398_v61, %v11542_v5  ;;  %v13884_v48 = vld [vmem:[#allocation16_spill] sm:$0xff]  ;;  %v13885_v63 = vld [vmem:[#allocation59_spill] sm:$0xff]  ;;  %vm7644_vm0 = vcmask 1044484  }
 0x37e   :  { %8308 = vmatmul.mubr.msk.bf16.gmra.mxu0 %vm3285_vm5, %v3269_v2  ;;  %8466 = vmatpush3.bf16.msra.mxu1 %v8673_v55  ;;  %v3738_v45 = vrot.slane %v13885_v63, 1  ;;  %v13886_v49 = vld [vmem:[#allocation3_spill] sm:$0xff] }
 0x37f   :  { %8355 = vmatprep.mubr.msk.bf16.mxu0 %vm3285_vm5, %v3737_v51  ;;  %8467 = vmatprep.subr.bf16.mxu1 %v8674_v36  ;;  %v11573_v52 = vsel %vm4696_vm6, %v4779_v1, %v4783_v33  ;;  %v11576_v17 = vsel %vm5344_vm7, %v5395_v53, %v5399_v11  ;;  %v3741_v61 = vrot.slane %v13886_v49, 1  ;;  %v8320_v1 = vpop.f32.mrf.mxu1  ;;  %v13888_v51 = vld [vmem:[#allocation72_spill] sm:$0xff]  ;;  %v8670_v11 = vld [vmem:[%s13372_s3 + $0x58] sm:$0xff]  }
 0x380   :  { %v8281_v22 = vpop.f32.mrf.mxu0  ;;  %13882 = vst [vmem:[#allocation40_spill] sm:$0xff] %v11576_v17  ;;  %v3740_v33 = vrot.slane %v13888_v51, 1 }
 0x381   :  { %v11578_v55 = vadd.f32 %v8319_v37, %v8281_v22  ;;  %8398 = vmatmul.mubr.msk.bf16.gmra.mxu1 %vm3285_vm5, %v13884_v48  ;;  %v4501_v37 = vsel %vm1661_vm3, %v11118_v23, 0  ;;  %v8672_v23 = vld [vmem:[%s13372_s3 + $0x50] sm:$0xff]   ;;  %v13890_v22 = vld [vmem:[#allocation14_spill] sm:$0xff] }
 0x382   :  { %v3372_v57 = vpop.f32.mrf.mxu0  ;;  %8401 = vmatprep.mubr.msk.bf16.mxu1 %vm3285_vm5, %v11093_v38  ;;  %8468 = vmatpush3.bf16.msra.mxu1 %v8674_v36  ;;  %v3739_v36 = vsel %vm3734_vm8, %v3736_v46, %v3738_v45  ;;  %v3743_v48 = vrot.slane %v13890_v22, 1  ;;  %v13891_v46 = vld [vmem:[#allocation77_spill] sm:$0xff] }
 0x383   :  { %13883 = vst [vmem:[#allocation85_spill] sm:$0xff] %v11578_v55  ;;  %v11586_v2 = vadd.f32 %v3583_v59, %v3372_v57  ;;  %8636 = vmatprep.subr.msk.bf16.mxu1 %vm1661_vm3, %v11570_v56  ;;  %v3742_v59 = vsel %vm3734_vm8, %v3740_v33, %v3741_v61  ;;  %v3746_v45 = vrot.slane %v13891_v46, 1  ;;  %v13892_v57 = vld [vmem:[#allocation4_spill] sm:$0xff] }
 0x384   :  { %v8282_v53 = vpop.f32.mrf.mxu0  ;;  %v13893_v33 = vld [vmem:[#allocation20_spill] sm:$0xff] }
 0x385   :  { %13887 = vst [vmem:[#allocation42_spill] sm:$0xff] %v11586_v2  ;;  %v11596_v38 = vadd.f32 %v8320_v1, %v8282_v53  ;;  %v3745_v1 = vrot.slane %v13892_v57, 1  ;;  %v11615_v53 = vld [vmem:[%s13372_s3 + $0x88] ss:$0 sps:$4 sm:$0xff]   ;;  %v4129_v2 = vrot.slane %v11512_v14, 4 }
 0x386   :  { %8356 = vmatmul.mubr.msk.bf16.vlgmr.msra.gmra.mxu0 %vm3285_vm5, %v3739_v36  ;;  %v11652_v55 = vpop.f32.mrf.mxu0 }
 0x387   :  { %13889 = vst [vmem:[#allocation86_spill] sm:$0xff] %v11596_v38  ;;  %8426 = vmatpush3.bf16.msra.mxu0 %v4501_v37  ;;  %8359 = vmatprep.mubr.msk.bf16.mxu0 %vm3285_vm5, %v3742_v59  ;;  %v3744_v37 = vsel %vm3734_vm8, %v3741_v61, %v3743_v48  ;;  %v3751_v61 = vrot.slane %v11158_v47, 1  ;;  %13901 = vst [vmem:[#allocation45_spill] sm:$0xff] %v11652_v55 }
 0x388   :  { %8427 = vmatprep.subr.bf16.mxu0 %v8670_v11 }
 0x389   :  { %8402 = vmatmul.mubr.msk.bf16.gmra.mxu1 %vm3285_vm5, %v11166_v13  ;;  %v3747_v13 = vsel %vm3734_vm8, %v3745_v1, %v3746_v45  ;;  %v13896_v1 = vld [vmem:[#allocation83_spill] sm:$0xff] }
 0x38a   :  { %8405 = vmatprep.mubr.msk.bf16.mxu1 %vm3285_vm5, %v11207_v29  ;;  %v3748_v29 = vrot.slane %v11112_v34, 1 }
 0x38b   :  { %8428 = vmatpush3.bf16.msra.mxu0 %v8670_v11  ;;  %v3750_v11 = vrot.slane %v13893_v33, 1 }
 0x38c   :  { %8429 = vmatprep.subr.bf16.mxu0 %v8672_v23  ;;  %v3749_v36 = vsel %vm3734_vm8, %v3746_v45, %v3748_v29  ;;  %v11642_v29 = vpop.f32.mrf.mxu1 }
 0x38d   :  { %v3752_v59 = vsel %vm3734_vm8, %v3750_v11, %v3751_v61  ;;  %13899 = vst [vmem:[#allocation44_spill] sm:$0xff] %v11642_v29 }
 0x38e   :  { %8360 = vmatmul.mubr.msk.bf16.gmra.mxu0 %vm3285_vm5, %v3744_v37 }
 0x38f   :  { %8363 = vmatprep.mubr.msk.bf16.mxu0 %vm3285_vm5, %v3747_v13  ;;  %8430 = vmatpush3.bf16.msra.mxu0 %v8672_v23  ;;  %v13894_v23 = vld [vmem:[#allocation23_spill] sm:$0xff] }
 0x390   :  { %8635 = vmatprep.subr.msk.bf16.mxu0 %vm1661_vm3, %v11615_v53  ;;  %v13898_v13 = vld [vmem:[#allocation19_spill] sm:$0xff] }
 0x391   :  { %8406 = vmatmul.mubr.msk.bf16.gmra.mxu1 %vm3285_vm5, %v11240_v20  ;;  %v13895_v20 = vld [vmem:[#allocation79_spill] sm:$0xff]  ;;  %v3755_v38 = vrot.slane %v13898_v13, 1 }
 0x392   :  { %8409 = vmatprep.mubr.msk.bf16.mxu1 %vm3285_vm5, %v11264_v4  ;;  %v3753_v48 = vrot.slane %v13895_v20, 1  ;;  %v13897_v4 = vld [vmem:[#allocation5_spill] sm:$0xff] }
 0x393   :  { %v3756_v37 = vrot.slane %v13897_v4, 1 }
 0x394   :  { %v3754_v45 = vsel %vm3734_vm8, %v3751_v61, %v3753_v48  ;;  %v13902_v61 = vld [vmem:[#allocation81_spill] sm:$0xff] }
 0x395   :  { %v3757_v11 = vsel %vm3734_vm8, %v3755_v38, %v3756_v37  ;;  %v3761_v48 = vrot.slane %v13902_v61, 1  ;;  %v4125_v38 = vrot.slane %v11490_v44, 3 }
 0x396   :  { %8364 = vmatmul.mubr.msk.bf16.gmra.mxu0 %vm3285_vm5, %v3749_v36  ;;  %v8323_v36 = vpop.f32.mrf.mxu1 }
 0x397   :  { %8367 = vmatprep.mubr.msk.bf16.mxu0 %vm3285_vm5, %v3752_v59  ;;  %v13900_v59 = vld [vmem:[#allocation21_spill] sm:$0xff] }
 0x399   :  { %8410 = vmatmul.mubr.msk.bf16.gmra.mxu1 %vm3285_vm5, %v13894_v23  ;;  %v3758_v23 = vrot.slane %v13900_v59, 1 }
 0x39a   :  { %8413 = vmatprep.mubr.msk.bf16.mxu1 %vm3285_vm5, %v13896_v1  ;;  %v4128_v1 = vrot.slane %v11515_v18, 3 }
 0x39b   :  { %v3759_v18 = vsel %vm3734_vm8, %v3756_v37, %v3758_v23  ;;  %v3765_v37 = vrot.slane %v11396_v12, 1 }
 0x39c   :  { %v4130_v14 = vor.u32 %v4129_v2, %v4128_v1  ;;  %v13904_v1 = vld [vmem:[#allocation12_spill] sm:$0xff] }
 0x39e   :  { %8368 = vmatmul.mubr.msk.bf16.gmra.mxu0 %vm3285_vm5, %v3754_v45  ;;  %v4126_v45 = vrot.slane %v11493_v26, 4 }
 0x39f   :  { %8371 = vmatprep.mubr.msk.bf16.mxu0 %vm3285_vm5, %v3757_v11  ;;  %v3599_v11 = vpop.f32.mrf.mxu1 }
 0x3a0   :  { %v4127_v44 = vor.u32 %v4126_v45, %v4125_v38  ;;  %v3771_v38 = vrot.slane %v11505_v0, 1 }
 0x3a1   :  { %8414 = vmatmul.mubr.msk.bf16.gmra.mxu1 %vm3285_vm5, %v11382_v16  ;;  %v13903_v16 = vld [vmem:[#allocation80_spill] sm:$0xff]  ;;  %v8324_v26 = vpop.f32.mrf.mxu1 }
 0x3a2   :  { %8417 = vmatprep.mubr.msk.bf16.mxu1 %vm3285_vm5, %v11454_v7  ;;  %v3760_v17 = vrot.slane %v13903_v16, 1  ;;  %v4131_v2 = vsel %vm1041_vm2, %v4127_v44, %v4130_v14  ;;  %v13906_v44 = vld [vmem:[#allocation74_spill] sm:$0xff] }
 0x3a4   :  { %v8285_v29 = vpop.f32.mrf.mxu0  ;;  %v3762_v7 = vsel %vm3734_vm8, %v3760_v17, %v3761_v48  ;;  %v3763_v17 = vrot.slane %v11352_v25, 1 }
 0x3a5   :  { %v11660_v21 = vadd.f32 %v8323_v36, %v8285_v29  ;;  %v4135_v29 = vrot.slane %v11542_v5, 4  ;;  %v3768_v5 = vrot.slane %v11464_v60, 1 }
 0x3a6   :  { %v3388_v35 = vpop.f32.mrf.mxu0  ;;  %8372 = vmatmul.mubr.msk.bf16.gmra.mxu0 %vm3285_vm5, %v3759_v18  ;;  %v3764_v32 = vsel %vm3734_vm8, %v3761_v48, %v3763_v17  ;;  %v8679_v18 = vld [vmem:[%s13372_s3 + $0x94] sm:$0xff]  }
 0x3a7   :  { %v11665_v55 = vadd.f32 %v3599_v11, %v3388_v35  ;;  %8375 = vmatprep.mubr.msk.bf16.mxu0 %vm3285_vm5, %v3762_v7  ;;  %v3766_v35 = vrot.slane %v11438_v27, 1  ;;  %v4136_v23 = vor.u32 %v4135_v29, %v4134_v6  ;;  %v3770_v6 = vrot.slane %v11485_v58, 1 }
 0x3a8   :  { %v8286_v50 = vpop.f32.mrf.mxu0  ;;  %v5465_v11 = vsel %vm1661_vm3, %v11570_v56, 0  ;;  %v3773_v7 = vrot.slane %v11527_v43, 1  ;;  %v8680_v56 = vld [vmem:[%s13372_s3 + $0x8c] sm:$0xff]   ;;  %v4397_v29 = vrot.slane %v13881_v10, 4 }
 0x3a9   :  { %v11670_v36 = vadd.f32 %v8324_v26, %v8286_v50  ;;  %8418 = vmatmul.mubr.msk.bf16.gmra.mxu1 %vm3285_vm5, %v11475_v8  ;;  %v3767_v50 = vsel %vm3734_vm8, %v3765_v37, %v3766_v35  ;;  %v4137_v8 = vsel %vm1041_vm2, %v4130_v14, %v4136_v23  ;;  %v3769_v48 = vsel %vm3734_vm8, %v3766_v35, %v3768_v5  ;;  %v13905_v14 = vld [vmem:[#allocation13_spill] sm:$0xff]  ;;  %v13907_v35 = vld [vmem:[#allocation76_spill] sm:$0xff]  ;;  %v13908_v23 = vld [vmem:[#allocation18_spill] sm:$0xff] }
 0x3aa   :  { %8421 = vmatprep.mubr.msk.bf16.mxu1 %vm3285_vm5, %v4131_v2  ;;  %v3772_v45 = vsel %vm3734_vm8, %v3770_v6, %v3771_v38  ;;  %v4398_v26 = vrot.slane %v13879_v30, 4  ;;  %v3774_v2 = vsel %vm3734_vm8, %v3771_v38, %v3773_v7  ;;  %v4400_v37 = vrot.slane %v13885_v63, 4 }
 0x3ab   :  { %v4402_v5 = vrot.slane %v13888_v51, 4  ;;  %v4408_v7 = vrot.slane %v13891_v46, 4  ;;  %vm7650_vm2 = vcmask 1046534  }
 0x3ac   :  { %v4399_v17 = vsel %vm1661_vm3, %v4397_v29, %v4398_v26  ;;  %v4401_v6 = vsel %vm1661_vm3, %v4398_v26, %v4400_v37  ;;  %v4407_v26 = vrot.slane %v13892_v57, 4 }
 0x3ae   :  { %8376 = vmatmul.mubr.msk.bf16.gmra.mxu0 %vm3285_vm5, %v3764_v32  ;;  %v4403_v32 = vrot.slane %v13886_v49, 4  ;;  %v4409_v37 = vsel %vm1661_vm3, %v4407_v26, %v4408_v7 }
 0x3af   :  { %8379 = vmatprep.mubr.msk.bf16.mxu0 %vm3285_vm5, %v3767_v50  ;;  %v11719_v50 = vpop.f32.mrf.mxu1 }
 0x3b1   :  { %8422 = vmatmul.mubr.msk.bf16.gmra.mxu1 %vm3285_vm5, %v4137_v8  ;;  %v5149_v8 = vsel %vm1661_vm3, %v11615_v53, 0  ;;  %v8678_v53 = vld [vmem:[%s13372_s3 + $0x78] sm:$0xff]  }
 0x3b2   :  { %8469 = vmatprep.mubr.msk.bf16.mxu1 %vm3285_vm5, %v13904_v1  ;;  %v8676_v1 = vld [vmem:[%s13372_s3 + $0x80] sm:$0xff]  }
 0x3b6   :  { %8380 = vmatmul.mubr.msk.bf16.gmra.mxu0 %vm3285_vm5, %v3769_v48  ;;  %v4404_v48 = vsel %vm1661_vm3, %v4402_v5, %v4403_v32 }
 0x3b7   :  { %8383 = vmatprep.mubr.msk.bf16.mxu0 %vm3285_vm5, %v3772_v45  ;;  %v8327_v38 = vpop.f32.mrf.mxu1 }
 0x3b9   :  { %8470 = vmatmul.mubr.msk.bf16.vlgmr.msra.gmra.mxu1 %vm3285_vm5, %v13905_v14  ;;  %v3615_v45 = vpop.f32.mrf.mxu1  ;;  %v13910_v14 = vld [vmem:[#allocation82_spill] sm:$0xff] }
 0x3ba   :  { %8473 = vmatprep.mubr.msk.bf16.mxu1 %vm3285_vm5, %v13906_v44  ;;  %8540 = vmatpush3.bf16.msra.mxu1 %v5465_v11  ;;  %v13909_v11 = vld [vmem:[#allocation24_spill] sm:$0xff]  ;;  %v11740_v44 = vpop.f32.mrf.mxu0 }
 0x3bb   :  { %8541 = vmatprep.subr.bf16.mxu1 %v8679_v18  ;;  %v8328_v29 = vpop.f32.mrf.mxu1 }
 0x3bd   :  { %v11758_v5 = vpop.f32.mrf.mxu1 }
 0x3be   :  { %8384 = vmatmul.mubr.msk.bf16.gmra.mxu0 %vm3285_vm5, %v3774_v2  ;;  %8542 = vmatpush3.bf16.msra.mxu1 %v8679_v18  ;;  %v4405_v18 = vrot.slane %v13890_v22, 4 }
 0x3bf   :  { %8431 = vmatprep.mubr.msk.bf16.mxu0 %vm3285_vm5, %v4399_v17  ;;  %8543 = vmatprep.subr.bf16.mxu1 %v8680_v56 }
 0x3c0   :  { %v4406_v17 = vsel %vm1661_vm3, %v4403_v32, %v4405_v18  ;;  %v4410_v32 = vrot.slane %v11112_v34, 4 }
 0x3c1   :  { %8474 = vmatmul.mubr.msk.bf16.gmra.mxu1 %vm3285_vm5, %v13907_v35 }
 0x3c2   :  { %8477 = vmatprep.mubr.msk.bf16.mxu1 %vm3285_vm5, %v13908_v23  ;;  %8544 = vmatpush3.bf16.msra.mxu1 %v8680_v56  ;;  %v11746_v56 = vld [vmem:[%s13372_s3 + $0xb0] ss:$0 sps:$4 sm:$0xff]  }
 0x3c6   :  { %8432 = vmatmul.mubr.msk.bf16.vlgmr.msra.gmra.mxu0 %vm3285_vm5, %v4401_v6  ;;  %v13911_v6 = vld [vmem:[#allocation25_spill] sm:$0xff] }
 0x3c7   :  { %8502 = vmatpush3.bf16.msra.mxu0 %v5149_v8  ;;  %8435 = vmatprep.mubr.msk.bf16.mxu0 %vm3285_vm5, %v4404_v48  ;;  %v4413_v48 = vrot.slane %v11158_v47, 4 }
 0x3c8   :  { %8503 = vmatprep.subr.bf16.mxu0 %v8676_v1 }
 0x3c9   :  { %8478 = vmatmul.mubr.msk.bf16.gmra.mxu1 %vm3285_vm5, %v13909_v11  ;;  %v4411_v11 = vsel %vm1661_vm3, %v4408_v7, %v4410_v32  ;;  %v4418_v7 = vrot.slane %v13897_v4, 4 }
 0x3ca   :  { %8481 = vmatprep.mubr.msk.bf16.mxu1 %vm3285_vm5, %v13910_v14 }
 0x3cb   :  { %8504 = vmatpush3.bf16.msra.mxu0 %v8676_v1 }
 0x3cc   :  { %8505 = vmatprep.subr.bf16.mxu0 %v8678_v53  ;;  %v8289_v2 = vpop.f32.mrf.mxu0 }
 0x3cd   :  { %v11749_v35 = vadd.f32 %v8327_v38, %v8289_v2 }
 0x3ce   :  { %8436 = vmatmul.mubr.msk.bf16.gmra.mxu0 %vm3285_vm5, %v4406_v17  ;;  %v3404_v23 = vpop.f32.mrf.mxu0 }
 0x3cf   :  { %8439 = vmatprep.mubr.msk.bf16.mxu0 %vm3285_vm5, %v4409_v37  ;;  %8506 = vmatpush3.bf16.msra.mxu0 %v8678_v53  ;;  %v11754_v8 = vadd.f32 %v3615_v45, %v3404_v23  ;;  %v8331_v53 = vpop.f32.mrf.mxu1  ;;  %v4412_v45 = vrot.slane %v13893_v33, 4 }
 0x3d0   :  { %8637 = vmatprep.subr.msk.bf16.mxu0 %vm1661_vm3, %v11746_v56  ;;  %v8290_v1 = vpop.f32.mrf.mxu0 }
 0x3d1   :  { %8482 = vmatmul.mubr.msk.bf16.gmra.mxu1 %vm3285_vm5, %v13911_v6  ;;  %v11763_v38 = vadd.f32 %v8328_v29, %v8290_v1  ;;  %v4414_v18 = vsel %vm1661_vm3, %v4412_v45, %v4413_v48  ;;  %v3631_v14 = vpop.f32.mrf.mxu1  ;;  %v4417_v1 = vrot.slane %v13898_v13, 4 }
 0x3d2   :  { %8485 = vmatprep.mubr.msk.bf16.mxu1 %vm3285_vm5, %v11355_v24  ;;  %v11772_v26 = vpop.f32.mrf.mxu0  ;;  %v4415_v24 = vrot.slane %v13895_v20, 4 }
 0x3d3   :  { %v8332_v17 = vpop.f32.mrf.mxu1 }
 0x3d4   :  { %v4416_v32 = vsel %vm1661_vm3, %v4413_v48, %v4415_v24  ;;  %v4423_v48 = vrot.slane %v13902_v61, 4 }
 0x3d6   :  { %8440 = vmatmul.mubr.msk.bf16.gmra.mxu0 %vm3285_vm5, %v4411_v11  ;;  %v4420_v11 = vrot.slane %v13900_v59, 4 }
 0x3d7   :  { %8443 = vmatprep.mubr.msk.bf16.mxu0 %vm3285_vm5, %v4414_v18 }
 0x3d9   :  { %v8293_v29 = vpop.f32.mrf.mxu0  ;;  %8486 = vmatmul.mubr.msk.bf16.gmra.mxu1 %vm3285_vm5, %v11366_v40  ;;  %v4419_v40 = vsel %vm1661_vm3, %v4417_v1, %v4418_v7 }
 0x3da   :  { %v11778_v2 = vadd.f32 %v8331_v53, %v8293_v29  ;;  %8489 = vmatprep.mubr.msk.bf16.mxu1 %vm3285_vm5, %v11369_v42  ;;  %v11791_v53 = vpop.f32.mrf.mxu1 }
 0x3db   :  { %v3420_v37 = vpop.f32.mrf.mxu0  ;;  %13912 = vst [vmem:[#allocation29_spill] sm:$0xff] %v11791_v53 }
 0x3dc   :  { %v11783_v23 = vadd.f32 %v3631_v14, %v3420_v37  ;;  %v8335_v42 = vpop.f32.mrf.mxu1  ;;  %v4422_v14 = vrot.slane %v13903_v16, 4 }
 0x3dd   :  { %v8294_v6 = vpop.f32.mrf.mxu0 }
 0x3de   :  { %v11787_v45 = vadd.f32 %v8332_v17, %v8294_v6  ;;  %8444 = vmatmul.mubr.msk.bf16.gmra.mxu0 %vm3285_vm5, %v4416_v32  ;;  %v3647_v29 = vpop.f32.mrf.mxu1  ;;  %v4421_v17 = vsel %vm1661_vm3, %v4418_v7, %v4420_v11  ;;  %v4428_v7 = vrot.slane %v11438_v27, 4 }
 0x3df   :  { %8447 = vmatprep.mubr.msk.bf16.mxu0 %vm3285_vm5, %v4419_v40  ;;  %v11800_v18 = vpop.f32.mrf.mxu0  ;;  %v4425_v40 = vrot.slane %v11352_v25, 4 }
 0x3e0   :  { %v8336_v6 = vpop.f32.mrf.mxu1 }
 0x3e1   :  { %8490 = vmatmul.mubr.msk.bf16.gmra.mxu1 %vm3285_vm5, %v11386_v62  ;;  %v4424_v62 = vsel %vm1661_vm3, %v4422_v14, %v4423_v48  ;;  %v4426_v11 = vsel %vm1661_vm3, %v4423_v48, %v4425_v40  ;;  %v4432_v48 = vrot.slane %v11485_v58, 4 }
 0x3e2   :  { %8493 = vmatprep.mubr.msk.bf16.mxu1 %vm3285_vm5, %v11457_v3 }
 0x3e4   :  { %v8297_v24 = vpop.f32.mrf.mxu0 }
 0x3e5   :  { %v11804_v37 = vadd.f32 %v8335_v42, %v8297_v24  ;;  %v4427_v42 = vrot.slane %v11396_v12, 4  ;;  %v11830_v24 = vpop.f32.mrf.mxu1 }
 0x3e6   :  { %8448 = vmatmul.mubr.msk.bf16.gmra.mxu0 %vm3285_vm5, %v4421_v17  ;;  %v3436_v1 = vpop.f32.mrf.mxu0  ;;  %13914 = vst [vmem:[#allocation47_spill] sm:$0xff] %v11830_v24 }
 0x3e7   :  { %8451 = vmatprep.mubr.msk.bf16.mxu0 %vm3285_vm5, %v4424_v62  ;;  %v11809_v3 = vadd.f32 %v3647_v29, %v3436_v1  ;;  %v4429_v14 = vsel %vm1661_vm3, %v4427_v42, %v4428_v7  ;;  %v13913_v29 = vld [vmem:[#allocation69_spill] sm:$0xff] }
 0x3e8   :  { %v8298_v32 = vpop.f32.mrf.mxu0 }
 0x3e9   :  { %8494 = vmatmul.mubr.msk.bf16.gmra.mxu1 %vm3285_vm5, %v11478_v31  ;;  %v11814_v53 = vadd.f32 %v8336_v6, %v8298_v32  ;;  %v4430_v31 = vrot.slane %v11464_v60, 4  ;;  %v8339_v62 = vpop.f32.mrf.mxu1  ;;  %v13916_v6 = vld [vmem:[#allocation62_spill] sm:$0xff]  ;;  %v4435_v32 = vrot.slane %v11527_v43, 4 }
 0x3ea   :  { %8497 = vmatprep.mubr.msk.bf16.mxu1 %vm3285_vm5, %v11535_v41  ;;  %v4433_v41 = vrot.slane %v11505_v0, 4 }
 0x3eb   :  { %v4431_v17 = vsel %vm1661_vm3, %v4428_v7, %v4430_v31  ;;  %v3663_v40 = vpop.f32.mrf.mxu1  ;;  %v5046_v7 = vrot.slane %v13879_v30, 7 }
 0x3ec   :  { %v4434_v1 = vsel %vm1661_vm3, %v4432_v48, %v4433_v41 }
 0x3ee   :  { %8452 = vmatmul.mubr.msk.bf16.gmra.mxu0 %vm3285_vm5, %v4426_v11  ;;  %v13917_v11 = vld [vmem:[#allocation75_spill] sm:$0xff] }
 0x3ef   :  { %8455 = vmatprep.mubr.msk.bf16.mxu0 %vm3285_vm5, %v4429_v14 }
 0x3f1   :  { %8498 = vmatmul.mubr.msk.bf16.gmra.mxu1 %vm3285_vm5, %v11573_v52  ;;  %v11837_v52 = vpop.f32.mrf.mxu0 }
 0x3f2   :  { %8545 = vmatprep.mubr.msk.bf16.mxu1 %vm3285_vm5, %v13913_v29  ;;  %13915 = vst [vmem:[#allocation50_spill] sm:$0xff] %v11837_v52  ;;  %v5045_v29 = vrot.slane %v13881_v10, 7  ;;  %v13919_v10 = vld [vmem:[#allocation78_spill] sm:$0xff] }
 0x3f4   :  { %v5047_v24 = vsel %vm5044_vm9, %v5045_v29, %v5046_v7  ;;  %v5055_v29 = vrot.slane %v13892_v57, 7  ;;  %v5060_v57 = vrot.slane %v13893_v33, 7  ;;  %v5066_v33 = vrot.slane %v13897_v4, 7 }
 0x3f6   :  { %8456 = vmatmul.mubr.msk.bf16.gmra.mxu0 %vm3285_vm5, %v4431_v17  ;;  %v4436_v17 = vsel %vm1661_vm3, %v4433_v41, %v4435_v32  ;;  %v5051_v41 = vrot.slane %v13886_v49, 7  ;;  %v5692_v32 = vsel %vm1661_vm3, %v11746_v56, 0  ;;  %v8683_v56 = vld [vmem:[%s13372_s3 + $0xa0] sm:$0xff]   ;;  %vm7653_vm3 = vcmask 1047559  }
 0x3f7   :  { %8459 = vmatprep.mubr.msk.bf16.mxu0 %vm3285_vm5, %v4434_v1  ;;  %v8340_v1 = vpop.f32.mrf.mxu1 }
 0x3f9   :  { %8546 = vmatmul.mubr.msk.bf16.vlgmr.msra.gmra.mxu1 %vm3285_vm5, %v13916_v6 }
 0x3fa   :  { %v8301_v42 = vpop.f32.mrf.mxu0  ;;  %8549 = vmatprep.mubr.msk.bf16.mxu1 %vm3285_vm5, %v13917_v11  ;;  %v8682_v11 = vld [vmem:[%s13372_s3 + $0xa8] sm:$0xff]   ;;  %s8700_s3 = smov 108  }
 0x3fb   :  { %v11845_v14 = vadd.f32 %v8339_v62, %v8301_v42  ;;  %v13918_v62 = vld [vmem:[#allocation15_spill] sm:$0xff]  ;;  %v5048_v42 = vrot.slane %v13885_v63, 7 }
 0x3fc   :  { %v3452_v31 = vpop.f32.mrf.mxu0 }
 0x3fd   :  { %v11848_v48 = vadd.f32 %v3663_v40, %v3452_v31  ;;  %v5050_v40 = vrot.slane %v13888_v51, 7  ;;  %v5053_v51 = vrot.slane %v13890_v22, 7 }
 0x3fe   :  { %v8302_v6 = vpop.f32.mrf.mxu0  ;;  %8460 = vmatmul.mubr.msk.bf16.gmra.mxu0 %vm3285_vm5, %v4436_v17 }
 0x3ff   :  { %v11853_v52 = vadd.f32 %v8340_v1, %v8302_v6  ;;  %8507 = vmatprep.mubr.msk.bf16.mxu0 %vm3285_vm5, %v5047_v24  ;;  %v5049_v24 = vsel %vm5044_vm9, %v5046_v7, %v5048_v42  ;;  %v5052_v31 = vsel %vm5044_vm9, %v5050_v40, %v5051_v41  ;;  %v5056_v7 = vrot.slane %v13891_v46, 7  ;;  %v11897_v42 = vpop.f32.mrf.mxu1 }
 0x400   :  { %v5054_v17 = vsel %vm5044_vm9, %v5051_v41, %v5053_v51  ;;  %13920 = vst [vmem:[#allocation30_spill] sm:$0xff] %v11897_v42  ;;  %v5065_v41 = vrot.slane %v13898_v13, 7  ;;  %v5068_v13 = vrot.slane %v13900_v59, 7 }
 0x401   :  { %8550 = vmatmul.mubr.msk.bf16.gmra.mxu1 %vm3285_vm5, %v13918_v62  ;;  %v5057_v1 = vsel %vm5044_vm9, %v5055_v29, %v5056_v7  ;;  %v13923_v29 = vld [vmem:[#allocation84_spill] sm:$0xff] }
 0x402   :  { %8553 = vmatprep.mubr.msk.bf16.mxu1 %vm3285_vm5, %v13919_v10  ;;  %v11905_v10 = vpop.f32.mrf.mxu0 }
 0x403   :  { %13921 = vst [vmem:[#allocation49_spill] sm:$0xff] %v11905_v10 }
 0x406   :  { %8508 = vmatmul.mubr.msk.bf16.vlgmr.msra.gmra.mxu0 %vm3285_vm5, %v5049_v24 }
 0x407   :  { %8578 = vmatpush3.bf16.msra.mxu0 %v5692_v32  ;;  %8511 = vmatprep.mubr.msk.bf16.mxu0 %vm3285_vm5, %v5052_v31 }
 0x408   :  { %8579 = vmatprep.subr.bf16.mxu0 %v8682_v11 }
 0x409   :  { %8554 = vmatmul.mubr.msk.bf16.gmra.mxu1 %vm3285_vm5, %v11401_v54  ;;  %v5058_v54 = vrot.slane %v11112_v34, 7 }
 0x40a   :  { %8557 = vmatprep.mubr.msk.bf16.mxu1 %vm3285_vm5, %v11405_v9  ;;  %v5061_v9 = vrot.slane %v11158_v47, 7 }
 0x40b   :  { %8580 = vmatpush3.bf16.msra.mxu0 %v8682_v11  ;;  %v5059_v6 = vsel %vm5044_vm9, %v5056_v7, %v5058_v54  ;;  %v5070_v54 = vrot.slane %v13903_v16, 7  ;;  %v5075_v16 = vrot.slane %v11396_v12, 7 }
 0x40c   :  { %8581 = vmatprep.subr.bf16.mxu0 %v8683_v56  ;;  %v5062_v62 = vsel %vm5044_vm9, %v5060_v57, %v5061_v9 }
 0x40e   :  { %8512 = vmatmul.mubr.msk.bf16.gmra.mxu0 %vm3285_vm5, %v5054_v17  ;;  %v5071_v17 = vrot.slane %v13902_v61, 7 }
 0x40f   :  { %8515 = vmatprep.mubr.msk.bf16.mxu0 %vm3285_vm5, %v5057_v1  ;;  %8582 = vmatpush3.bf16.msra.mxu0 %v8683_v56  ;;  %v13922_v56 = vld [vmem:[#allocation26_spill] sm:$0xff] }
 0x410   :  { %v5072_v57 = vsel %vm5044_vm9, %v5070_v54, %v5071_v17 }
 0x411   :  { %8558 = vmatmul.mubr.msk.bf16.gmra.mxu1 %vm3285_vm5, %v11414_v28  ;;  %v5063_v28 = vrot.slane %v13895_v20, 7 }
 0x412   :  { %8561 = vmatprep.mubr.msk.bf16.mxu1 %vm3285_vm5, %v11417_v39  ;;  %v8343_v39 = vpop.f32.mrf.mxu1 }
 0x413   :  { %v5064_v32 = vsel %vm5044_vm9, %v5061_v9, %v5063_v28  ;;  %v5069_v9 = vsel %vm5044_vm9, %v5066_v33, %v5068_v13  ;;  %v13925_v28 = vld [vmem:[#allocation28_spill] sm:$0xff]  ;;  %v5080_v13 = vrot.slane %v11485_v58, 7 }
 0x414   :  { %v3679_v40 = vpop.f32.mrf.mxu1 }
 0x416   :  { %8516 = vmatmul.mubr.msk.bf16.gmra.mxu0 %vm3285_vm5, %v5059_v6  ;;  %v8344_v51 = vpop.f32.mrf.mxu1  ;;  %v13924_v6 = vld [vmem:[#allocation39_spill] sm:$0xff] }
 0x417   :  { %8519 = vmatprep.mubr.msk.bf16.mxu0 %vm3285_vm5, %v5062_v62  ;;  %v5073_v62 = vrot.slane %v11352_v25, 7 }
 0x419   :  { %8562 = vmatmul.mubr.msk.bf16.gmra.mxu1 %vm3285_vm5, %v11427_v19  ;;  %v5067_v19 = vsel %vm5044_vm9, %v5065_v41, %v5066_v33  ;;  %v5074_v33 = vsel %vm5044_vm9, %v5071_v17, %v5073_v62 }
 0x41a   :  { %8565 = vmatprep.mubr.msk.bf16.mxu1 %vm3285_vm5, %v11433_v15 }
 0x41e   :  { %v8305_v11 = vpop.f32.mrf.mxu0  ;;  %8520 = vmatmul.mubr.msk.bf16.gmra.mxu0 %vm3285_vm5, %v5064_v32  ;;  %v11939_v32 = vpop.f32.mrf.mxu1 }
 0x41f   :  { %v11911_v24 = vadd.f32 %v8343_v39, %v8305_v11  ;;  %8523 = vmatprep.mubr.msk.bf16.mxu0 %vm3285_vm5, %v5067_v19  ;;  %v5076_v39 = vrot.slane %v11438_v27, 7  ;;  %13926 = vst [vmem:[#allocation31_spill] sm:$0xff] %v11939_v32  ;;  %v13927_v11 = vld [vmem:[#allocation40_spill] sm:$0xff]  ;;  %v5078_v19 = vrot.slane %v11464_v60, 7 }
 0x420   :  { %v3468_v31 = vpop.f32.mrf.mxu0 }
 0x421   :  { %v11914_v15 = vadd.f32 %v3679_v40, %v3468_v31  ;;  %8566 = vmatmul.mubr.msk.bf16.gmra.mxu1 %vm3285_vm5, %v13922_v56  ;;  %v5077_v41 = vsel %vm5044_vm9, %v5075_v16, %v5076_v39  ;;  %v5081_v31 = vrot.slane %v11505_v0, 7  ;;  %v13928_v56 = vmov 0  }
 0x422   :  { %v8306_v7 = vpop.f32.mrf.mxu0  ;;  %8569 = vmatprep.mubr.msk.bf16.mxu1 %vm3285_vm5, %v13923_v29 }
 0x423   :  { %v11922_v1 = vadd.f32 %v8344_v51, %v8306_v7  ;;  %v5079_v7 = vsel %vm5044_vm9, %v5076_v39, %v5078_v19  ;;  %v5082_v29 = vsel %vm5044_vm9, %v5080_v13, %v5081_v31 }
 0x426   :  { %8524 = vmatmul.mubr.msk.bf16.gmra.mxu0 %vm3285_vm5, %v5069_v9  ;;  %v5083_v9 = vrot.slane %v11527_v43, 7 }
 0x427   :  { %8527 = vmatprep.mubr.msk.bf16.mxu0 %vm3285_vm5, %v5072_v57 }
 0x428   :  { %v5084_v58 = vsel %vm5044_vm9, %v5081_v31, %v5083_v9 }
 0x429   :  { %8570 = vmatmul.mubr.msk.bf16.gmra.mxu1 %vm3285_vm5, %v13924_v6  ;;  %v11955_v6 = vpop.f32.mrf.mxu0 }
 0x42a   :  { %8573 = vmatprep.mubr.msk.bf16.mxu1 %vm3285_vm5, %v13925_v28  ;;  %13930 = vst [vmem:[#allocation32_spill] sm:$0xff] %v11955_v6 }
 0x42e   :  { %8528 = vmatmul.mubr.msk.bf16.gmra.mxu0 %vm3285_vm5, %v5074_v33 }
 0x42f   :  { %8531 = vmatprep.mubr.msk.bf16.mxu0 %vm3285_vm5, %v5077_v41 }
 0x431   :  { %v8347_v40 = vpop.f32.mrf.mxu1  ;;  %8574 = vmatmul.mubr.msk.bf16.gmra.mxu1 %vm3285_vm5, %v13927_v11 }
 0x432   :  { %6472 = vmatprep.mubr.bf16.mxu1 %v13928_v56 }
 0x433   :  { %v3695_v12 = vpop.f32.mrf.mxu1 }
 0x435   :  { %v8348_v51 = vpop.f32.mrf.mxu1 }
 0x436   :  { %8532 = vmatmul.mubr.msk.bf16.gmra.mxu0 %vm3285_vm5, %v5079_v7 }
 0x437   :  { %v11951_v17 = vpop.f32.mrf.mxu1  ;;  %8535 = vmatprep.mubr.msk.bf16.mxu0 %vm3285_vm5, %v5082_v29 }
 0x438   :  { %13929 = vst [vmem:[#allocation51_spill] sm:$0xff] %v11951_v17 }
 0x439   :  { %v8395_v54 = vpop.f32.mrf.mxu1 }
 0x43b   :  { %v4238_v57 = vpop.f32.mrf.mxu1 }
 0x43d   :  { %v8396_v62 = vpop.f32.mrf.mxu1 }
 0x43e   :  { %v8309_v28 = vpop.f32.mrf.mxu0  ;;  %8536 = vmatmul.mubr.msk.bf16.gmra.mxu0 %vm3285_vm5, %v5084_v58 }
 0x43f   :  { %v11959_v39 = vadd.f32 %v8347_v40, %v8309_v28  ;;  %v11961_v16 = vpop.f32.mrf.mxu1  ;;  %8583 = vmatprep.mubr.msk.bf16.mxu0 %vm3285_vm5, %v13879_v30  ;;  %v13932_v40 = vld [vmem:[#allocation85_spill] sm:$0xff] }
 0x440   :  { %v3484_v33 = vpop.f32.mrf.mxu0 }
 0x441   :  { %v11965_v41 = vadd.f32 %v3695_v12, %v3484_v33  ;;  %v8399_v11 = vpop.f32.mrf.mxu1  ;;  %v13933_v12 = vld [vmem:[#allocation42_spill] sm:$0xff] }
 0x442   :  { %v8310_v19 = vpop.f32.mrf.mxu0 }
 0x443   :  { %v11967_v13 = vadd.f32 %v8348_v51, %v8310_v19  ;;  %v4254_v7 = vpop.f32.mrf.mxu1 }
 0x444   :  { %v11969_v29 = vpop.f32.mrf.mxu0 }
 0x445   :  { %13931 = vst [vmem:[#allocation53_spill] sm:$0xff] %v11969_v29  ;;  %v8400_v31 = vpop.f32.mrf.mxu1  ;;  %v13934_v29 = vld [vmem:[#allocation86_spill] sm:$0xff] }
 0x446   :  { %v8357_v9 = vpop.f32.mrf.mxu0  ;;  %8584 = vmatmul.mubr.msk.bf16.vlgmr.msra.gmra.mxu0 %vm3285_vm5, %v13885_v63 }
 0x447   :  { %v4004_v58 = vadd.f32 %v8357_v9, %v13932_v40  ;;  %v11974_v28 = vpop.f32.mrf.mxu1  ;;  %8587 = vmatprep.mubr.msk.bf16.mxu0 %vm3285_vm5, %v13886_v49 }
 0x448   :  { %v3875_v30 = vpop.f32.mrf.mxu0 }
 0x449   :  { %v4002_v33 = vadd.f32 %v3875_v30, %v13933_v12  ;;  %v8403_v51 = vpop.f32.mrf.mxu1  ;;  %v11979_v19 = vadd.f32 %v8395_v54, %v4004_v58 }
 0x44a   :  { %v8358_v17 = vpop.f32.mrf.mxu0 }
 0x44b   :  { %v4005_v32 = vadd.f32 %v8358_v17, %v13934_v29  ;;  %v4270_v6 = vpop.f32.mrf.mxu1  ;;  %v11982_v42 = vadd.f32 %v4238_v57, %v4002_v33 }
 0x44c   :  { %v11984_v63 = vpop.f32.mrf.mxu0 }
 0x44d   :  { %v8404_v9 = vpop.f32.mrf.mxu1  ;;  %v11986_v40 = vadd.f32 %v8396_v62, %v4005_v32 }
 0x44e   :  { %v8361_v10 = vpop.f32.mrf.mxu0  ;;  %8588 = vmatmul.mubr.msk.bf16.gmra.mxu0 %vm3285_vm5, %v13890_v22 }
 0x44f   :  { %v4008_v49 = vadd.f32 %v8361_v10, %v11660_v21  ;;  %v11991_v30 = vpop.f32.mrf.mxu1  ;;  %8591 = vmatprep.mubr.msk.bf16.mxu0 %vm3285_vm5, %v13891_v46 }
 0x450   :  { %v3891_v17 = vpop.f32.mrf.mxu0 }
 0x451   :  { %v4006_v54 = vadd.f32 %v3891_v17, %v11665_v55  ;;  %v8407_v57 = vpop.f32.mrf.mxu1  ;;  %v11996_v29 = vadd.f32 %v8399_v11, %v4008_v49 }
 0x452   :  { %v8362_v58 = vpop.f32.mrf.mxu0 }
 0x453   :  { %v4009_v32 = vadd.f32 %v8362_v58, %v11670_v36  ;;  %v4286_v62 = vpop.f32.mrf.mxu1  ;;  %v11999_v12 = vadd.f32 %v4254_v7, %v4006_v54 }
 0x454   :  { %v12001_v22 = vpop.f32.mrf.mxu0 }
 0x455   :  { %v8408_v21 = vpop.f32.mrf.mxu1  ;;  %v12003_v10 = vadd.f32 %v8400_v31, %v4009_v32 }
 0x456   :  { %v8365_v33 = vpop.f32.mrf.mxu0  ;;  %8592 = vmatmul.mubr.msk.bf16.gmra.mxu0 %vm3285_vm5, %v11112_v34 }
 0x457   :  { %v4012_v55 = vadd.f32 %v8365_v33, %v11749_v35  ;;  %v12008_v46 = vpop.f32.mrf.mxu1  ;;  %8595 = vmatprep.mubr.msk.bf16.mxu0 %vm3285_vm5, %v11158_v47 }
 0x458   :  { %13935 = vst [vmem:[#allocation33_spill] sm:$0xff] %v12008_v46  ;;  %v3907_v36 = vpop.f32.mrf.mxu0 }
 0x459   :  { %v4010_v11 = vadd.f32 %v3907_v36, %v11754_v8  ;;  %v8411_v7 = vpop.f32.mrf.mxu1  ;;  %v12013_v49 = vadd.f32 %v8403_v51, %v4012_v55 }
 0x45a   :  { %v8366_v17 = vpop.f32.mrf.mxu0 }
 0x45b   :  { %v4013_v31 = vadd.f32 %v8366_v17, %v11763_v38  ;;  %v4302_v54 = vpop.f32.mrf.mxu1  ;;  %v12016_v58 = vadd.f32 %v4270_v6, %v4010_v11 }
 0x45c   :  { %v12018_v34 = vpop.f32.mrf.mxu0 }
 0x45d   :  { %v8412_v35 = vpop.f32.mrf.mxu1  ;;  %v12020_v32 = vadd.f32 %v8404_v9, %v4013_v31 }
 0x45e   :  { %v8369_v33 = vpop.f32.mrf.mxu0  ;;  %8596 = vmatmul.mubr.msk.bf16.gmra.mxu0 %vm3285_vm5, %v13895_v20 }
 0x45f   :  { %v4016_v47 = vadd.f32 %v8369_v33, %v11778_v2  ;;  %v12025_v8 = vpop.f32.mrf.mxu1  ;;  %8599 = vmatprep.mubr.msk.bf16.mxu0 %vm3285_vm5, %v13897_v4 }
 0x460   :  { %13936 = vst [vmem:[#allocation55_spill] sm:$0xff] %v12025_v8  ;;  %v3923_v38 = vpop.f32.mrf.mxu0 }
 0x461   :  { %v4014_v6 = vadd.f32 %v3923_v38, %v11783_v23  ;;  %v8415_v51 = vpop.f32.mrf.mxu1  ;;  %v12030_v55 = vadd.f32 %v8407_v57, %v4016_v47 }
 0x462   :  { %v8370_v36 = vpop.f32.mrf.mxu0 }
 0x463   :  { %v4017_v9 = vadd.f32 %v8370_v36, %v11787_v45  ;;  %v4318_v11 = vpop.f32.mrf.mxu1  ;;  %v12033_v17 = vadd.f32 %v4286_v62, %v4014_v6 }
 0x464   :  { %v12035_v20 = vpop.f32.mrf.mxu0 }
 0x465   :  { %v8416_v2 = vpop.f32.mrf.mxu1  ;;  %v12037_v31 = vadd.f32 %v8408_v21, %v4017_v9 }
 0x466   :  { %v8373_v33 = vpop.f32.mrf.mxu0  ;;  %8600 = vmatmul.mubr.msk.bf16.gmra.mxu0 %vm3285_vm5, %v13900_v59 }
 0x467   :  { %v4020_v4 = vadd.f32 %v8373_v33, %v11804_v37  ;;  %v12042_v23 = vpop.f32.mrf.mxu1  ;;  %8603 = vmatprep.mubr.msk.bf16.mxu0 %vm3285_vm5, %v13902_v61 }
 0x468   :  { %13937 = vst [vmem:[#allocation8_spill] sm:$0xff] %v12042_v23  ;;  %v3939_v45 = vpop.f32.mrf.mxu0 }
 0x469   :  { %v4018_v57 = vadd.f32 %v3939_v45, %v11809_v3  ;;  %v8419_v62 = vpop.f32.mrf.mxu1  ;;  %v12047_v47 = vadd.f32 %v8411_v7, %v4020_v4 }
 0x46a   :  { %v8374_v38 = vpop.f32.mrf.mxu0 }
 0x46b   :  { %v4021_v21 = vadd.f32 %v8374_v38, %v11814_v53  ;;  %v4334_v6 = vpop.f32.mrf.mxu1  ;;  %v12050_v36 = vadd.f32 %v4302_v54, %v4018_v57 }
 0x46c   :  { %v12052_v59 = vpop.f32.mrf.mxu0 }
 0x46d   :  { %13938 = vst [vmem:[#allocation60_spill] sm:$0xff] %v12052_v59  ;;  %v8420_v37 = vpop.f32.mrf.mxu1  ;;  %v12054_v9 = vadd.f32 %v8412_v35, %v4021_v21 }
 0x46e   :  { %v8377_v33 = vpop.f32.mrf.mxu0  ;;  %8604 = vmatmul.mubr.msk.bf16.gmra.mxu0 %vm3285_vm5, %v11352_v25 }
 0x46f   :  { %v4024_v61 = vadd.f32 %v8377_v33, %v11845_v14  ;;  %v12059_v3 = vpop.f32.mrf.mxu1  ;;  %8607 = vmatprep.mubr.msk.bf16.mxu0 %vm3285_vm5, %v11438_v27 }
 0x470   :  { %13939 = vst [vmem:[#allocation7_spill] sm:$0xff] %v12059_v3  ;;  %v3955_v53 = vpop.f32.mrf.mxu0 }
 0x471   :  { %v4022_v7 = vadd.f32 %v3955_v53, %v11848_v48  ;;  %v8423_v54 = vpop.f32.mrf.mxu1  ;;  %v12064_v4 = vadd.f32 %v8415_v51, %v4024_v61 }
 0x472   :  { %v8378_v45 = vpop.f32.mrf.mxu0 }
 0x473   :  { %v4025_v35 = vadd.f32 %v8378_v45, %v11853_v52  ;;  %v4350_v57 = vpop.f32.mrf.mxu1  ;;  %v12067_v38 = vadd.f32 %v4318_v11, %v4022_v7 }
 0x474   :  { %v12069_v25 = vpop.f32.mrf.mxu0 }
 0x475   :  { %13940 = vst [vmem:[#allocation34_spill] sm:$0xff] %v12069_v25  ;;  %v8424_v14 = vpop.f32.mrf.mxu1  ;;  %v12071_v21 = vadd.f32 %v8416_v2, %v4025_v35 }
 0x476   :  { %v8381_v33 = vpop.f32.mrf.mxu0  ;;  %8608 = vmatmul.mubr.msk.bf16.gmra.mxu0 %vm3285_vm5, %v11464_v60 }
 0x477   :  { %v4028_v27 = vadd.f32 %v8381_v33, %v11911_v24  ;;  %v12076_v48 = vpop.f32.mrf.mxu1  ;;  %8611 = vmatprep.mubr.msk.bf16.mxu0 %vm3285_vm5, %v11505_v0 }
 0x478   :  { %13941 = vst [vmem:[#allocation57_spill] sm:$0xff] %v12076_v48  ;;  %v3971_v52 = vpop.f32.mrf.mxu0 }
 0x479   :  { %v4026_v51 = vadd.f32 %v3971_v52, %v11914_v15  ;;  %v8471_v11 = vpop.f32.mrf.mxu1  ;;  %v12081_v61 = vadd.f32 %v8419_v62, %v4028_v27 }
 0x47a   :  { %v8382_v53 = vpop.f32.mrf.mxu0 }
 0x47b   :  { %v4029_v2 = vadd.f32 %v8382_v53, %v11922_v1  ;;  %v12084_v7 = vpop.f32.mrf.mxu1  ;;  %v12086_v45 = vadd.f32 %v4334_v6, %v4026_v51 }
 0x47c   :  { %v12088_v60 = vpop.f32.mrf.mxu0 }
 0x47d   :  { %13942 = vst [vmem:[#allocation35_spill] sm:$0xff] %v12088_v60  ;;  %v8472_v24 = vpop.f32.mrf.mxu1  ;;  %v12090_v35 = vadd.f32 %v8420_v37, %v4029_v2 }
 0x47e   :  { %v8385_v33 = vpop.f32.mrf.mxu0  ;;  %8612 = vmatmul.mubr.msk.bf16.gmra.mxu0 %vm3285_vm5, %v11527_v43 }
 0x47f   :  { %v4032_v0 = vadd.f32 %v8385_v33, %v11959_v39  ;;  %v12095_v15 = vpop.f32.mrf.mxu1  ;;  %6617 = vmatprep.mubr.bf16.mxu0 %v13928_v56 }
 0x480   :  { %v3987_v1 = vpop.f32.mrf.mxu0 }
 0x481   :  { %v4030_v62 = vadd.f32 %v3987_v1, %v11965_v41  ;;  %v8475_v6 = vpop.f32.mrf.mxu1  ;;  %v12099_v27 = vadd.f32 %v8423_v54, %v4032_v0 }
 0x482   :  { %v8386_v52 = vpop.f32.mrf.mxu0 }
 0x483   :  { %v4033_v37 = vadd.f32 %v8386_v52, %v11967_v13  ;;  %v12102_v51 = vpop.f32.mrf.mxu1  ;;  %v12104_v53 = vadd.f32 %v4350_v57, %v4030_v62 }
 0x484   :  { %v12106_v43 = vpop.f32.mrf.mxu0 }
 0x485   :  { %13943 = vst [vmem:[#allocation27_spill] sm:$0xff] %v12106_v43  ;;  %v8476_v39 = vpop.f32.mrf.mxu1  ;;  %v12108_v2 = vadd.f32 %v8424_v14, %v4033_v37 }
 0x486   :  { %v8433_v33 = vpop.f32.mrf.mxu0 }
 0x487   :  { %v4666_v56 = vadd.f32 %v8433_v33, %v11979_v19  ;;  %v12111_v48 = vpop.f32.mrf.mxu1 }
 0x488   :  { %v4537_v41 = vpop.f32.mrf.mxu0 }
 0x489   :  { %v12114_v54 = vadd.f32 %v4537_v41, %v11982_v42  ;;  %v8479_v0 = vpop.f32.mrf.mxu1  ;;  %v12116_v13 = vadd.f32 %v8471_v11, %v4666_v56 }
 0x48a   :  { %v8434_v1 = vpop.f32.mrf.mxu0 }
 0x48b   :  { %v4667_v57 = vadd.f32 %v8434_v1, %v11986_v40  ;;  %v12119_v62 = vpop.f32.mrf.mxu1 }
 0x48c   :  { %v12121_v52 = vpop.f32.mrf.mxu0 }
 0x48d   :  { %v8480_v14 = vpop.f32.mrf.mxu1  ;;  %v12123_v37 = vadd.f32 %v8472_v24, %v4667_v57 }
 0x48e   :  { %v8437_v19 = vpop.f32.mrf.mxu0 }
 0x48f   :  { %v4670_v33 = vadd.f32 %v8437_v19, %v11996_v29  ;;  %v12126_v43 = vpop.f32.mrf.mxu1 }
 0x490   :  { %v4553_v42 = vpop.f32.mrf.mxu0 }
 0x491   :  { %v12129_v41 = vadd.f32 %v4553_v42, %v11999_v12  ;;  %v8483_v56 = vpop.f32.mrf.mxu1  ;;  %v12131_v11 = vadd.f32 %v8475_v6, %v4670_v33 }
 0x492   :  { %v8438_v40 = vpop.f32.mrf.mxu0 }
 0x493   :  { %v4671_v1 = vadd.f32 %v8438_v40, %v12003_v10  ;;  %v12134_v3 = vpop.f32.mrf.mxu1 }
 0x494   :  { %13944 = vst [vmem:[#allocation61_spill] sm:$0xff] %v12134_v3  ;;  %v12136_v60 = vpop.f32.mrf.mxu0 }
 0x495   :  { %v8484_v24 = vpop.f32.mrf.mxu1  ;;  %v12138_v57 = vadd.f32 %v8476_v39, %v4671_v1 }
 0x496   :  { %v8441_v29 = vpop.f32.mrf.mxu0 }
 0x497   :  { %v4674_v19 = vadd.f32 %v8441_v29, %v12013_v49  ;;  %v12141_v23 = vpop.f32.mrf.mxu1 }
 0x498   :  { %13945 = vst [vmem:[#allocation36_spill] sm:$0xff] %v12141_v23  ;;  %v4569_v12 = vpop.f32.mrf.mxu0 }
 0x499   :  { %v12144_v42 = vadd.f32 %v4569_v12, %v12016_v58  ;;  %v8487_v6 = vpop.f32.mrf.mxu1  ;;  %v12146_v33 = vadd.f32 %v8479_v0, %v4674_v19 }
 0x49a   :  { %v8442_v10 = vpop.f32.mrf.mxu0 }
 0x49b   :  { %v4675_v40 = vadd.f32 %v8442_v10, %v12020_v32  ;;  %v4949_v25 = vpop.f32.mrf.mxu1 }
 0x49c   :  { %v12149_v8 = vpop.f32.mrf.mxu0 }
 0x49d   :  { %v8488_v39 = vpop.f32.mrf.mxu1  ;;  %v12151_v1 = vadd.f32 %v8480_v14, %v4675_v40 }
 0x49e   :  { %v8445_v59 = vpop.f32.mrf.mxu0 }
 0x49f   :  { %v4678_v49 = vadd.f32 %v8445_v59, %v12030_v55  ;;  %v12154_v29 = vpop.f32.mrf.mxu1 }
 0x4a0   :  { %13946 = vst [vmem:[#allocation63_spill] sm:$0xff] %v12154_v29  ;;  %v4585_v23 = vpop.f32.mrf.mxu0 }
 0x4a1   :  { %v12157_v58 = vadd.f32 %v4585_v23, %v12033_v17  ;;  %v8491_v0 = vpop.f32.mrf.mxu1  ;;  %v12159_v19 = vadd.f32 %v8483_v56, %v4678_v49 }
 0x4a2   :  { %v8446_v12 = vpop.f32.mrf.mxu0 }
 0x4a3   :  { %13947 = vst [vmem:[#allocation37_spill] sm:$0xff] %v12157_v58  ;;  %v4679_v32 = vadd.f32 %v8446_v12, %v12037_v31  ;;  %v4965_v10 = vpop.f32.mrf.mxu1 }
 0x4a4   :  { %v12162_v3 = vpop.f32.mrf.mxu0 }
 0x4a5   :  { %13948 = vst [vmem:[#allocation64_spill] sm:$0xff] %v12162_v3  ;;  %v8492_v14 = vpop.f32.mrf.mxu1  ;;  %v12164_v40 = vadd.f32 %v8484_v24, %v4679_v32 }
 0x4a6   :  { %v8449_v46 = vpop.f32.mrf.mxu0 }
 0x4a7   :  { %v4682_v55 = vadd.f32 %v8449_v46, %v12047_v47  ;;  %v12167_v59 = vpop.f32.mrf.mxu1 }
 0x4a8   :  { %13949 = vst [vmem:[#allocation38_spill] sm:$0xff] %v12167_v59  ;;  %v4601_v29 = vpop.f32.mrf.mxu0 }
 0x4a9   :  { %v4680_v17 = vadd.f32 %v4601_v29, %v12050_v36  ;;  %v12170_v23 = vadd.f32 %v8487_v6, %v4682_v55  ;;  %v8495_v12 = vpop.f32.mrf.mxu1 }
 0x4aa   :  { %v8450_v56 = vpop.f32.mrf.mxu0 }
 0x4ab   :  { %v4683_v49 = vadd.f32 %v8450_v56, %v12054_v9  ;;  %v12173_v31 = vadd.f32 %v4949_v25, %v4680_v17  ;;  %v4981_v47 = vpop.f32.mrf.mxu1 }
 0x4ac   :  { %v12175_v58 = vpop.f32.mrf.mxu0 }
 0x4ad   :  { %13950 = vst [vmem:[#allocation11_spill] sm:$0xff] %v12175_v58  ;;  %v12177_v24 = vadd.f32 %v8488_v39, %v4683_v49  ;;  %v8496_v25 = vpop.f32.mrf.mxu1 }
 0x4ae   :  { %v8453_v32 = vpop.f32.mrf.mxu0 }
 0x4af   :  { %v4686_v46 = vadd.f32 %v8453_v32, %v12064_v4  ;;  %v12191_v4 = vpop.f32.mrf.mxu1 }
 0x4b0   :  { %v4617_v59 = vpop.f32.mrf.mxu0  ;;  %13952 = vst [vmem:[#allocation56_spill] sm:$0xff] %v12191_v4 }
 0x4b1   :  { %v4684_v3 = vadd.f32 %v4617_v59, %v12067_v38  ;;  %v12181_v36 = vadd.f32 %v8491_v0, %v4686_v46 }
 0x4b2   :  { %v8454_v6 = vpop.f32.mrf.mxu0 }
 0x4b3   :  { %v4687_v29 = vadd.f32 %v8454_v6, %v12071_v21  ;;  %v12184_v9 = vadd.f32 %v4965_v10, %v4684_v3  ;;  %v8499_v10 = vpop.f32.mrf.mxu1 }
 0x4b4   :  { %v12186_v55 = vpop.f32.mrf.mxu0 }
 0x4b5   :  { %13951 = vst [vmem:[#allocation41_spill] sm:$0xff] %v12186_v55  ;;  %v12188_v17 = vadd.f32 %v8492_v14, %v4687_v29  ;;  %v4997_v6 = vpop.f32.mrf.mxu1 }
 0x4b6   :  { %v8457_v39 = vpop.f32.mrf.mxu0 }
 0x4b7   :  { %v4690_v56 = vadd.f32 %v8457_v39, %v12081_v61 }
 0x4b8   :  { %v4633_v49 = vpop.f32.mrf.mxu0 }
 0x4b9   :  { %v4688_v38 = vadd.f32 %v4633_v49, %v12086_v45  ;;  %v12194_v0 = vadd.f32 %v8495_v12, %v4690_v56 }
 0x4ba   :  { %v8458_v59 = vpop.f32.mrf.mxu0 }
 0x4bb   :  { %v4691_v21 = vadd.f32 %v8458_v59, %v12090_v35  ;;  %v12197_v3 = vadd.f32 %v4981_v47, %v4688_v38  ;;  %v8500_v47 = vpop.f32.mrf.mxu1 }
 0x4bc   :  { %v12199_v32 = vpop.f32.mrf.mxu0 }
 0x4bd   :  { %13953 = vst [vmem:[#allocation43_spill] sm:$0xff] %v12199_v32  ;;  %v12201_v14 = vadd.f32 %v8496_v25, %v4691_v21 }
 0x4be   :  { %v8461_v46 = vpop.f32.mrf.mxu0 }
 0x4bf   :  { %v4694_v61 = vadd.f32 %v8461_v46, %v12099_v27 }
 0x4c0   :  { %v4649_v29 = vpop.f32.mrf.mxu0 }
 0x4c1   :  { %v4692_v39 = vadd.f32 %v4649_v29, %v12104_v53  ;;  %v12205_v45 = vadd.f32 %v8499_v10, %v4694_v61 }
 0x4c2   :  { %v8462_v12 = vpop.f32.mrf.mxu0 }
 0x4c3   :  { %v4695_v56 = vadd.f32 %v8462_v12, %v12108_v2  ;;  %v12208_v35 = vadd.f32 %v4997_v6, %v4692_v39 }
 0x4c4   :  { %v12210_v49 = vpop.f32.mrf.mxu0 }
 0x4c5   :  { %13954 = vst [vmem:[#allocation46_spill] sm:$0xff] %v12210_v49  ;;  %v12212_v38 = vadd.f32 %v8500_v47, %v4695_v56 }
 0x4c6   :  { %v8509_v25 = vpop.f32.mrf.mxu0 }
 0x4c7   :  { %v12215_v59 = vadd.f32 %v8509_v25, %v12116_v13 }
 0x4c8   :  { %v12217_v27 = vpop.f32.mrf.mxu0 }
 0x4ca   :  { %v8510_v21 = vpop.f32.mrf.mxu0 }
 0x4cb   :  { %v12220_v53 = vadd.f32 %v8510_v21, %v12123_v37 }
 0x4cc   :  { %v12222_v10 = vpop.f32.mrf.mxu0 }
 0x4ce   :  { %v8513_v2 = vpop.f32.mrf.mxu0 }
 0x4cf   :  { %v12225_v46 = vadd.f32 %v8513_v2, %v12131_v11  ;;  %v12249_v2 = vpop.f32.mrf.mxu1 }
 0x4d0   :  { %v12227_v61 = vpop.f32.mrf.mxu0  ;;  %13955 = vst [vmem:[#allocation67_spill] sm:$0xff] %v12249_v2 }
 0x4d1   :  { %v8547_v49 = vpop.f32.mrf.mxu1 }
 0x4d2   :  { %v8514_v6 = vpop.f32.mrf.mxu0 }
 0x4d3   :  { %v12230_v29 = vadd.f32 %v8514_v6, %v12138_v57 }
 0x4d4   :  { %v12232_v13 = vpop.f32.mrf.mxu0 }
 0x4d6   :  { %v8517_v39 = vpop.f32.mrf.mxu0 }
 0x4d7   :  { %v12235_v12 = vadd.f32 %v8517_v39, %v12146_v33 }
 0x4d8   :  { %v12237_v37 = vpop.f32.mrf.mxu0 }
 0x4da   :  { %v8518_v56 = vpop.f32.mrf.mxu0 }
 0x4db   :  { %v12240_v47 = vadd.f32 %v8518_v56, %v12151_v1 }
 0x4dc   :  { %v12242_v11 = vpop.f32.mrf.mxu0 }
 0x4de   :  { %v8521_v25 = vpop.f32.mrf.mxu0 }
 0x4df   :  { %v12245_v21 = vadd.f32 %v8521_v25, %v12159_v19  ;;  %v5501_v19 = vpop.f32.mrf.mxu1 }
 0x4e0   :  { %v12247_v57 = vpop.f32.mrf.mxu0 }
 0x4e2   :  { %v8522_v6 = vpop.f32.mrf.mxu0 }
 0x4e3   :  { %v12252_v33 = vadd.f32 %v8522_v6, %v12164_v40  ;;  %v8548_v40 = vpop.f32.mrf.mxu1 }
 0x4e4   :  { %v12254_v39 = vpop.f32.mrf.mxu0 }
 0x4e5   :  { %13956 = vst [vmem:[#allocation48_spill] sm:$0xff] %v12252_v33 }
 0x4e6   :  { %v8525_v4 = vpop.f32.mrf.mxu0 }
 0x4e7   :  { %v12257_v1 = vadd.f32 %v8525_v4, %v12170_v23  ;;  %v5504_v4 = vpop.f32.mrf.mxu1 }
 0x4e8   :  { %v5249_v56 = vpop.f32.mrf.mxu0 }
 0x4e9   :  { %13957 = vst [vmem:[#allocation52_spill] sm:$0xff] %v12257_v1  ;;  %v12260_v32 = vadd.f32 %v5249_v56, %v12173_v31 }
 0x4ea   :  { %v8526_v25 = vpop.f32.mrf.mxu0 }
 0x4eb   :  { %v12263_v55 = vadd.f32 %v8526_v25, %v12177_v24  ;;  %v12278_v24 = vpop.f32.mrf.mxu1 }
 0x4ec   :  { %v12265_v2 = vpop.f32.mrf.mxu0 }
 0x4ed   :  { %13958 = vst [vmem:[#allocation70_spill] sm:$0xff] %v12263_v55  ;;  %13959 = vst [vmem:[#allocation54_spill] sm:$0xff] %v12265_v2 }
 0x4ee   :  { %v8529_v6 = vpop.f32.mrf.mxu0 }
 0x4ef   :  { %v12268_v58 = vadd.f32 %v8529_v6, %v12181_v36  ;;  %v13965_v36 = vld [vmem:[#allocation45_spill] sm:$0xff]  ;;  %v13966_v6 = vld [vmem:[#allocation44_spill] sm:$0xff] }
 0x4f0   :  { %v5265_v33 = vpop.f32.mrf.mxu0 }
 0x4f1   :  { %13960 = vst [vmem:[#allocation73_spill] sm:$0xff] %v12268_v58  ;;  %v12271_v23 = vadd.f32 %v5265_v33, %v12184_v9  ;;  %v3587_v58 = vadd.f32 %v13966_v6, %v13965_v36  ;;  %v5517_v33 = vpop.f32.mrf.mxu1 }
 0x4f2   :  { %v8530_v1 = vpop.f32.mrf.mxu0 }
 0x4f3   :  { %13961 = vst [vmem:[#allocation6_spill] sm:$0xff] %v12271_v23  ;;  %v12274_v31 = vadd.f32 %v8530_v1, %v12188_v17  ;;  %v4003_v17 = vadd.f32 %v11984_v63, %v3587_v58  ;;  %v5012_v63 = vadd.f32 %v12084_v7, %v12114_v54 }
 0x4f4   :  { %v12276_v56 = vpop.f32.mrf.mxu0 }
 0x4f5   :  { %13962 = vst [vmem:[#allocation22_spill] sm:$0xff] %v12274_v31  ;;  %13963 = vst [vmem:[#allocation2_spill] sm:$0xff] %v12276_v56  ;;  %v12294_v56 = vpop.f32.mrf.mxu1 }
 0x4f6   :  { %v8533_v25 = vpop.f32.mrf.mxu0 }
 0x4f7   :  { %v12281_v55 = vadd.f32 %v8533_v25, %v12194_v0  ;;  %v4366_v25 = vadd.f32 %v11961_v16, %v4003_v17  ;;  %v5312_v16 = vadd.f32 %v12217_v27, %v5012_v63 }
 0x4f8   :  { %v5281_v2 = vpop.f32.mrf.mxu0 }
 0x4f9   :  { %13964 = vst [vmem:[#allocation58_spill] sm:$0xff] %v12281_v55  ;;  %v12286_v9 = vadd.f32 %v5281_v2, %v12197_v3  ;;  %v3603_v3 = vadd.f32 %v11719_v50, %v11740_v44  ;;  %v4665_v2 = vadd.f32 %v12121_v52, %v4366_v25 }
 0x4fa   :  { %v8534_v23 = vpop.f32.mrf.mxu0 }
 0x4fb   :  { %v12290_v1 = vadd.f32 %v8534_v23, %v12201_v14  ;;  %v5520_v14 = vpop.f32.mrf.mxu1  ;;  %v4007_v6 = vadd.f32 %v12001_v22, %v3603_v3  ;;  %v5013_v50 = vadd.f32 %v12095_v15, %v4665_v2  ;;  %v3619_v22 = vadd.f32 %v11758_v5, %v11772_v26 }
 0x4fc   :  { %v12292_v31 = vpop.f32.mrf.mxu0 }
 0x4fd   :  { %v12316_v44 = vpop.f32.mrf.mxu1  ;;  %v4370_v7 = vadd.f32 %v11974_v28, %v4007_v6  ;;  %v5313_v54 = vadd.f32 %v12222_v10, %v5013_v50  ;;  %v4011_v15 = vadd.f32 %v12018_v34, %v3619_v22  ;;  %v5630_v10 = vadd.f32 %v8547_v49, %v12215_v59 }
 0x4fe   :  { %v8537_v0 = vpop.f32.mrf.mxu0  ;;  %v5631_v49 = vadd.f32 %v8548_v40, %v12220_v53 }
 0x4ff   :  { %v12298_v55 = vadd.f32 %v8537_v0, %v12205_v45  ;;  %v4669_v27 = vadd.f32 %v12136_v60, %v4370_v7  ;;  %v5629_v5 = vadd.f32 %v5504_v4, %v5313_v54  ;;  %v4374_v34 = vadd.f32 %v11991_v30, %v4011_v15 }
 0x500   :  { %v5297_v36 = vpop.f32.mrf.mxu0  ;;  %v5020_v30 = vadd.f32 %v12119_v62, %v12144_v42 }
 0x501   :  { %v12306_v58 = vadd.f32 %v5297_v36, %v12208_v35  ;;  %v5628_v35 = vadd.f32 %v5501_v19, %v5312_v16  ;;  %v5533_v36 = vpop.f32.mrf.mxu1  ;;  %v5017_v60 = vadd.f32 %v12111_v48, %v4669_v27  ;;  %v13967_v48 = vld [vmem:[#allocation29_spill] sm:$0xff] }
 0x502   :  { %v8538_v23 = vpop.f32.mrf.mxu0  ;;  %v3635_v4 = vadd.f32 %v13967_v48, %v11800_v18  ;;  %v5320_v50 = vadd.f32 %v12237_v37, %v5020_v30  ;;  %v13971_v27 = vld [vmem:[#allocation61_spill] sm:$0xff] }
 0x503   :  { %v12311_v45 = vadd.f32 %v8538_v23, %v12212_v38  ;;  %v5016_v38 = vadd.f32 %v12102_v51, %v12129_v41  ;;  %v8556_v41 = vpop.f32.mrf.mxu1  ;;  %v4673_v23 = vadd.f32 %v12149_v8, %v4374_v34 }
 0x504   :  { %v12313_v17 = vpop.f32.mrf.mxu0  ;;  %v4015_v53 = vadd.f32 %v12035_v20, %v3635_v4 }
 0x505   :  { %v5316_v28 = vadd.f32 %v12227_v61, %v5016_v38  ;;  %v5317_v61 = vadd.f32 %v12232_v13, %v5017_v60  ;;  %v5536_v40 = vpop.f32.mrf.mxu1  ;;  %v5021_v62 = vadd.f32 %v12126_v43, %v4673_v23  ;;  %v5636_v43 = vadd.f32 %v5533_v36, %v5320_v50  ;;  %v13975_v50 = vld [vmem:[#allocation47_spill] sm:$0xff] }
 0x506   :  { %v8585_v52 = vpop.f32.mrf.mxu0 }
 0x507   :  { %v12333_v19 = vadd.f32 %v8585_v52, %v5630_v10  ;;  %v5632_v59 = vadd.f32 %v5517_v33, %v5316_v28  ;;  %v5634_v33 = vadd.f32 %v12278_v24, %v12225_v46  ;;  %v5633_v18 = vadd.f32 %v5520_v14, %v5317_v61  ;;  %v13968_v52 = vld [vmem:[#allocation33_spill] sm:$0xff]  ;;  %v8559_v37 = vpop.f32.mrf.mxu1 }
 0x508   :  { %v5728_v0 = vpop.f32.mrf.mxu0  ;;  %v4378_v7 = vadd.f32 %v13968_v52, %v4015_v53  ;;  %v5321_v46 = vadd.f32 %v12242_v11, %v5021_v62  ;;  %v5635_v24 = vadd.f32 %v12294_v56, %v12230_v29  ;;  %v5638_v56 = vadd.f32 %v12316_v44, %v12235_v12  ;;  %v13973_v53 = vld [vmem:[#allocation48_spill] sm:$0xff] }
 0x509   :  { %v12325_v25 = vadd.f32 %v5728_v0, %v5628_v35  ;;  %v13969_v35 = vld [vmem:[#allocation64_spill] sm:$0xff]  ;;  %v13970_v0 = vld [vmem:[#allocation37_spill] sm:$0xff]  ;;  %v5549_v11 = vpop.f32.mrf.mxu1  ;;  %v5639_v12 = vadd.f32 %v8556_v41, %v12240_v47  ;;  %v5642_v23 = vadd.f32 %v8559_v37, %v12245_v21 }
 0x50a   :  { %v8586_v3 = vpop.f32.mrf.mxu0  ;;  %v4677_v22 = vadd.f32 %v13969_v35, %v4378_v7  ;;  %v5024_v38 = vadd.f32 %v13971_v27, %v13970_v0  ;;  %v5637_v36 = vadd.f32 %v5536_v40, %v5321_v46  ;;  %v13977_v7 = vld [vmem:[#allocation55_spill] sm:$0xff] }
 0x50b   :  { %5919 = vrot.lane.b32.xlu0 %v12325_v25, %s8700_s3  ;;  %v12349_v6 = vadd.f32 %v8586_v3, %v5631_v49 }
 0x50c   :  { %v5731_v26 = vpop.f32.mrf.mxu0  ;;  %v5324_v29 = vadd.f32 %v12247_v57, %v5024_v38 }
 0x50d   :  { %v12335_v51 = vadd.f32 %v5731_v26, %v5629_v5  ;;  %v13972_v5 = vld [vmem:[#allocation36_spill] sm:$0xff] }
 0x50e   :  { %v8589_v2 = vpop.f32.mrf.mxu0  ;;  %v5025_v26 = vadd.f32 %v13972_v5, %v4677_v22  ;;  %v5640_v44 = vadd.f32 %v5549_v11, %v5324_v29  ;;  %v13979_v22 = vld [vmem:[#allocation63_spill] sm:$0xff]  ;;  %v6302_v11 = vld [vmem:[%s13374_s5 + $0x40] sm:$0x33] }
 0x50f   :  { %5923 = vrot.lane.b32.xlu0 %v12333_v19, %s8700_s3  ;;  %5921 = vrot.lane.b32.xlu1 %v12335_v51, %s8700_s3  ;;  %v12362_v42 = vadd.f32 %v8589_v2, %v5634_v33  ;;  %v8560_v2 = vpop.f32.mrf.mxu1 }
 0x510   :  { %v5744_v63 = vpop.f32.mrf.mxu0  ;;  %v5325_v57 = vadd.f32 %v12254_v39, %v5025_v26  ;;  %v5643_v40 = vadd.f32 %v8560_v2, %v13973_v53  ;;  %v6295_v26 = vld [vmem:[%s13374_s5 + $0x8] sm:$0xff]  ;;  %v13980_v2 = vld [vmem:[#allocation49_spill] sm:$0xff] }
 0x511   :  { %v12351_v13 = vadd.f32 %v5744_v63, %v5632_v59  ;;  %v5552_v4 = vpop.f32.mrf.mxu1 }
 0x512   :  { %v8590_v16 = vpop.f32.mrf.mxu0  ;;  %v5641_v47 = vadd.f32 %v5552_v4, %v5325_v57  ;;  %v6299_v4 = vld [vmem:[%s13374_s5 + $0x28] sm:$0xff] }
 0x513   :  { %5925 = vrot.lane.b32.xlu1 %v12349_v6, %s8700_s3  ;;  %5927 = vrot.lane.b32.xlu0 %v12351_v13, %s8700_s3  ;;  %v12377_v15 = vadd.f32 %v8590_v16, %v5635_v24  ;;  %v13974_v16 = vld [vmem:[#allocation50_spill] sm:$0xff]  ;;  %v8563_v62 = vpop.f32.mrf.mxu1  ;;  %v8009_v53 = vcombine.high %v6295_v26, %v6299_v4 }
 0x514   :  { %v5747_v8 = vpop.f32.mrf.mxu0  ;;  %v3651_v33 = vadd.f32 %v13975_v50, %v13974_v16 }
 0x515   :  { %v12364_v20 = vadd.f32 %v5747_v8, %v5633_v18  ;;  %v13976_v18 = vld [vmem:[#allocation60_spill] sm:$0xff]  ;;  %v5565_v24 = vpop.f32.mrf.mxu1 }
 0x516   :  { %v8593_v54 = vpop.f32.mrf.mxu0  ;;  %v4019_v8 = vadd.f32 %v13976_v18, %v3651_v33  ;;  %v5644_v27 = vadd.f32 %v5565_v24, %v12260_v32  ;;  %v6294_v32 = vld [vmem:[%s13374_s5] sm:$0xff]  ;;  %v8008_v33 = vcombine.low %v6295_v26, %v6299_v4 }
 0x517   :  { %5931 = vrot.lane.b32.xlu0 %v12362_v42, %s8700_s3  ;;  %5929 = vrot.lane.b32.xlu1 %v12364_v20, %s8700_s3  ;;  %v12389_v60 = vadd.f32 %v8593_v54, %v5638_v56  ;;  %v13978_v54 = vld [vmem:[#allocation11_spill] sm:$0xff]  ;;  %v8564_v35 = vpop.f32.mrf.mxu1  ;;  %v8015_v56 = vcombine.high %v6302_v11, %v6302_v11  ;;  %v13990_v4 = vld [vmem:[#allocation6_spill] sm:$0xff] }
 0x518   :  { %v5760_v14 = vpop.f32.mrf.mxu0  ;;  %v4382_v37 = vadd.f32 %v13977_v7, %v4019_v8  ;;  %v13983_v7 = vld [vmem:[#allocation34_spill] sm:$0xff] }
 0x519   :  { %v12379_v3 = vadd.f32 %v5760_v14, %v5636_v43  ;;  %8022 = vmatprep.subr.msk.bf16.mxu1 %vm6415_vm10, %v8015_v56 }
 0x51a   :  { %v8594_v28 = vpop.f32.mrf.mxu0  ;;  %v4681_v46 = vadd.f32 %v13978_v54, %v4382_v37 }
 0x51b   :  { %5933 = vrot.lane.b32.xlu1 %v12377_v15, %s8700_s3  ;;  %5935 = vrot.lane.b32.xlu0 %v12379_v3, %s8700_s3  ;;  %v12399_v59 = vadd.f32 %v8594_v28, %v5639_v12  ;;  %v6303_v28 = vld [vmem:[%s13374_s5 + $0x48] sm:$0x33]  ;;  %v13982_v12 = vld [vmem:[#allocation54_spill] sm:$0xff] }
 0x51c   :  { %v5763_v10 = vpop.f32.mrf.mxu0  ;;  %v5029_v0 = vadd.f32 %v13979_v22, %v4681_v46  ;;  %v8016_v5 = vcombine.low %v6303_v28, %v6303_v28  ;;  %v13984_v22 = vld [vmem:[#allocation8_spill] sm:$0xff] }
 0x51d   :  { %v12391_v34 = vadd.f32 %v5763_v10, %v5637_v36  ;;  %v8017_v36 = vcombine.high %v6303_v28, %v6303_v28  ;;  %v8014_v10 = vcombine.low %v6302_v11, %v6302_v11  ;;  %v13986_v28 = vld [vmem:[#allocation41_spill] sm:$0xff] }
 0x51e   :  { %v8597_v61 = vpop.f32.mrf.mxu0 }
 0x51f   :  { %5939 = vrot.lane.b32.xlu0 %v12389_v60, %s8700_s3  ;;  %5937 = vrot.lane.b32.xlu1 %v12391_v34, %s8700_s3  ;;  %v12408_v41 = vadd.f32 %v8597_v61, %v5642_v23  ;;  %v13981_v61 = vld [vmem:[#allocation30_spill] sm:$0xff] }
 0x520   :  { %v5776_v49 = vpop.f32.mrf.mxu0  ;;  %v3667_v57 = vadd.f32 %v13981_v61, %v13980_v2  ;;  %8039 = vmatprep.subr.msk.bf16.mxu0 %vm6415_vm10, %v8017_v36  ;;  %v13988_v2 = vld [vmem:[#allocation38_spill] sm:$0xff] }
 0x521   :  { %v12401_v48 = vadd.f32 %v5776_v49, %v5640_v44  ;;  %v5329_v44 = vadd.f32 %v13982_v12, %v5029_v0 }
 0x522   :  { %v8598_v63 = vpop.f32.mrf.mxu0  ;;  %v4023_v37 = vadd.f32 %v13983_v7, %v3667_v57 }
 0x523   :  { %5941 = vrot.lane.b32.xlu1 %v12399_v59, %s8700_s3  ;;  %5943 = vrot.lane.b32.xlu0 %v12401_v48, %s8700_s3  ;;  %v12417_v21 = vadd.f32 %v8598_v63, %v5643_v40  ;;  %v5568_v40 = vpop.f32.mrf.mxu1 }
 0x524   :  { %v5779_v39 = vpop.f32.mrf.mxu0  ;;  %v5645_v54 = vadd.f32 %v5568_v40, %v5329_v44  ;;  %v4386_v0 = vadd.f32 %v13984_v22, %v4023_v37  ;;  %v13989_v44 = vld [vmem:[#allocation2_spill] sm:$0xff]  ;;  %v13994_v22 = vld [vmem:[#allocation7_spill] sm:$0xff] }
 0x525   :  { %v12410_v30 = vadd.f32 %v5779_v39, %v5641_v47  ;;  %v6417_v47 = vsel %vm6415_vm10, %v8014_v10, 0  ;;  %v6423_v39 = vsel %vm6415_vm10, %v8016_v5, 0  ;;  %v8567_v46 = vpop.f32.mrf.mxu1 }
 0x526   :  { %v8601_v52 = vpop.f32.mrf.mxu0  ;;  %6453 = vmatpush1.bf16.msra.mxu1 %v6417_v47  ;;  %6598 = vmatpush1.bf16.msra.mxu0 %v6423_v39  ;;  %v4685_v56 = vadd.f32 %v13986_v28, %v4386_v0  ;;  %v13992_v47 = vld [vmem:[#allocation31_spill] sm:$0xff] }
 0x527   :  { %5947 = vrot.lane.b32.xlu0 %v12408_v41, %s8700_s3  ;;  %5945 = vrot.lane.b32.xlu1 %v12410_v30, %s8700_s3  ;;  %v5581_v36 = vpop.f32.mrf.mxu1  ;;  %v13996_v28 = vld [vmem:[#allocation43_spill] sm:$0xff] }
 0x528   :  { %v5792_v43 = vpop.f32.mrf.mxu0  ;;  %6599 = vmatprep.subr.bf16.mxu0 %v8009_v53  ;;  %v5033_v61 = vadd.f32 %v13988_v2, %v4685_v56 }
 0x529   :  { %v12454_v63 = vadd.f32 %v5792_v43, %v5644_v27  ;;  %v13985_v27 = vld [vmem:[#allocation52_spill] sm:$0xff] }
 0x52a   :  { %v8602_v29 = vpop.f32.mrf.mxu0  ;;  %6600 = vmatpush1.bf16.msra.mxu0 %v8008_v33  ;;  %v5646_v11 = vadd.f32 %v8563_v62, %v13985_v27  ;;  %v8568_v62 = vpop.f32.mrf.mxu1  ;;  %v13993_v33 = vld [vmem:[#allocation35_spill] sm:$0xff]  ;;  %v13995_v27 = vld [vmem:[#allocation73_spill] sm:$0xff] }
 0x52b   :  { %5949 = vrot.lane.b32.xlu1 %v12417_v21, %s8700_s3 }
 0x52c   :  { %v5795_v18 = vpop.f32.mrf.mxu0  ;;  %v12480_v10 = vadd.f32 %v8601_v52, %v5646_v11  ;;  %v5650_v11 = vadd.f32 %v8567_v46, %v13995_v27  ;;  %v14003_v27 = vld [vmem:[#allocation58_spill] sm:$0xff] }
 0x52e   :  { %v8605_v43 = vpop.f32.mrf.mxu0 }
 0x530   :  { %v5808_v5 = vpop.f32.mrf.mxu0 }
 0x57d   :  { %v5920_v14 = vpop.permute.xlu0 %5919 }
 0x57e   :  { %v12429_v38 = vmax.f32 %v12325_v25, %v5920_v14  ;;  %v6298_v25 = vld [vmem:[%s13374_s5 + $0x20] sm:$0xff] }
 0x57f   :  { %v8007_v49 = vcombine.high %v6294_v32, %v6298_v25  ;;  %v8006_v50 = vcombine.low %v6294_v32, %v6298_v25  ;;  %v13987_v25 = vld [vmem:[#allocation70_spill] sm:$0xff] }
 0x580   :  { %6079 = vrot.lane.b32.xlu0 %v12429_v38, %s8698_s0  ;;  %v5647_v26 = vadd.f32 %v8564_v35, %v13987_v25  ;;  %v5648_v35 = vadd.f32 %v5581_v36, %v13990_v4 }
 0x581   :  { %v5922_v23 = vpop.permute.xlu1 %5921  ;;  %v5924_v8 = vpop.permute.xlu0 %5923  ;;  %6454 = vmatprep.subr.bf16.mxu1 %v8007_v49  ;;  %v5333_v49 = vadd.f32 %v13989_v44, %v5033_v61  ;;  %v13998_v61 = vld [vmem:[#allocation56_spill] sm:$0xff] }
 0x582   :  { %v12461_v16 = vmax.f32 %v12335_v51, %v5922_v23  ;;  %v12468_v51 = vadd.f32 %v5795_v18, %v5645_v54  ;;  %v12471_v24 = vmax.f32 %v12333_v19, %v5924_v8  ;;  %6455 = vmatpush1.bf16.msra.mxu1 %v8006_v50  ;;  %v12491_v57 = vadd.f32 %v8602_v29, %v5647_v26  ;;  %v13991_v23 = vld [vmem:[#allocation32_spill] sm:$0xff]  ;;  %v5584_v29 = vpop.f32.mrf.mxu1  ;;  %v13997_v26 = vld [vmem:[#allocation22_spill] sm:$0xff] }
 0x583   :  { %v3683_v39 = vadd.f32 %v13992_v47, %v13991_v23  ;;  %v12504_v53 = vadd.f32 %v5808_v5, %v5648_v35  ;;  %v5649_v8 = vadd.f32 %v5584_v29, %v5333_v49  ;;  %v12526_v5 = vadd.f32 %v8605_v43, %v5650_v11  ;;  %v13999_v35 = vld [vmem:[#allocation53_spill] sm:$0xff]  ;;  %v14000_v23 = vld [vmem:[#allocation51_spill] sm:$0xff] }
 0x584   :  { %6081 = vrot.lane.b32.xlu1 %v12461_v16, %s8698_s0  ;;  %5951 = vrot.lane.b32.xlu0 %v12454_v63, %s8700_s3  ;;  %v8571_v7 = vpop.f32.mrf.mxu1  ;;  %v5651_v2 = vadd.f32 %v8568_v62, %v13997_v26  ;;  %v3699_v47 = vadd.f32 %v14000_v23, %v13999_v35 }
 0x585   :  { %v5926_v14 = vpop.permute.xlu1 %5925  ;;  %v5928_v32 = vpop.permute.xlu0 %5927  ;;  %v4027_v18 = vadd.f32 %v13993_v33, %v3683_v39  ;;  %v5654_v11 = vadd.f32 %v8571_v7, %v14003_v27 }
 0x586   :  { %v12483_v19 = vmax.f32 %v12349_v6, %v5926_v14  ;;  %v12494_v52 = vmax.f32 %v12351_v13, %v5928_v32  ;;  %v8606_v6 = vpop.f32.mrf.mxu0  ;;  %v5597_v36 = vpop.f32.mrf.mxu1 }
 0x587   :  { %v4390_v0 = vadd.f32 %v13994_v22, %v4027_v18  ;;  %v12537_v44 = vadd.f32 %v8606_v6, %v5651_v2  ;;  %v5652_v62 = vadd.f32 %v5597_v36, %v12286_v9  ;;  %v14002_v22 = vld [vmem:[#allocation57_spill] sm:$0xff] }
 0x588   :  { %6083 = vrot.lane.b32.xlu0 %v12471_v24, %s8698_s0  ;;  %5953 = vrot.lane.b32.xlu1 %v12468_v51, %s8700_s3  ;;  %v5811_v40 = vpop.f32.mrf.mxu0  ;;  %v8572_v46 = vpop.f32.mrf.mxu1 }
 0x589   :  { %v5930_v12 = vpop.permute.xlu1 %5929  ;;  %v5932_v50 = vpop.permute.xlu0 %5931  ;;  %v12514_v37 = vadd.f32 %v5811_v40, %v5649_v8  ;;  %v4689_v56 = vadd.f32 %v13996_v28, %v4390_v0  ;;  %v14004_v28 = vld [vmem:[#allocation46_spill] sm:$0xff]  ;;  %v5655_v2 = vadd.f32 %v8572_v46, %v12290_v1 }
 0x58a   :  { %v12507_v13 = vmax.f32 %v12364_v20, %v5930_v12  ;;  %v12517_v54 = vmax.f32 %v12362_v42, %v5932_v50  ;;  %v8609_v14 = vpop.f32.mrf.mxu0  ;;  %v5600_v6 = vpop.f32.mrf.mxu1 }
 0x58b   :  { %v5037_v12 = vadd.f32 %v13998_v61, %v4689_v56  ;;  %v14005_v61 = vld [vmem:[#allocation67_spill] sm:$0xff] }
 0x58c   :  { %5955 = vrot.lane.b32.xlu0 %v12480_v10, %s8700_s3  ;;  %6085 = vrot.lane.b32.xlu1 %v12483_v19, %s8698_s0  ;;  %v5824_v32 = vpop.f32.mrf.mxu0  ;;  %v8575_v33 = vpop.f32.mrf.mxu1 }
 0x58d   :  { %v5934_v20 = vpop.permute.xlu1 %5933  ;;  %v5936_v25 = vpop.permute.xlu0 %5935  ;;  %v5337_v4 = vadd.f32 %v12292_v31, %v5037_v12  ;;  %v12550_v39 = vadd.f32 %v5824_v32, %v5652_v62  ;;  %v14001_v31 = vld [vmem:[#allocation27_spill] sm:$0xff]  ;;  %v12572_v32 = vadd.f32 %v8609_v14, %v5654_v11  ;;  %v12641_v11 = vld [vmem:[%s13375_s4] ss:$0 sm:$0xff] }
 0x58e   :  { %v12529_v42 = vmax.f32 %v12377_v15, %v5934_v20  ;;  %v12540_v43 = vmax.f32 %v12379_v3, %v5936_v25  ;;  %v8610_v15 = vpop.f32.mrf.mxu0  ;;  %v4031_v50 = vadd.f32 %v14001_v31, %v3699_v47  ;;  %v5613_v36 = vpop.f32.mrf.mxu1 }
 0x58f   :  { %v5653_v9 = vadd.f32 %v5600_v6, %v5337_v4  ;;  %v5656_v1 = vadd.f32 %v5613_v36, %v12306_v58  ;;  %v5658_v6 = vadd.f32 %v8575_v33, %v12298_v55 }
 0x590   :  { %6087 = vrot.lane.b32.xlu0 %v12494_v52, %s8698_s0  ;;  %5957 = vrot.lane.b32.xlu1 %v12491_v57, %s8700_s3  ;;  %v5827_v29 = vpop.f32.mrf.mxu0  ;;  %v4394_v0 = vadd.f32 %v14002_v22, %v4031_v50  ;;  %v8576_v7 = vpop.f32.mrf.mxu1 }
 0x591   :  { %v5938_v49 = vpop.permute.xlu1 %5937  ;;  %v5940_v40 = vpop.permute.xlu0 %5939  ;;  %v12560_v18 = vadd.f32 %v5827_v29, %v5653_v9 }
 0x592   :  { %v12553_v3 = vmax.f32 %v12391_v34, %v5938_v49  ;;  %v12563_v8 = vmax.f32 %v12389_v60, %v5940_v40  ;;  %v8613_v20 = vpop.f32.mrf.mxu0  ;;  %v4693_v56 = vadd.f32 %v14004_v28, %v4394_v0  ;;  %v12583_v49 = vadd.f32 %v8610_v15, %v5655_v2  ;;  %v5616_v46 = vpop.f32.mrf.mxu1  ;;  %v6305_v40 = vld [vmem:[%s13374_s5 + $0x58] sm:$0x33] }
 0x593   :  { %v8020_v9 = vcombine.low %v6305_v40, %v6305_v40  ;;  %v12619_v55 = vadd.f32 %v8613_v20, %v5658_v6  ;;  %v5659_v0 = vadd.f32 %v8576_v7, %v12311_v45  ;;  %v6296_v7 = vld [vmem:[%s13374_s5 + $0x10] sm:$0xff] }
 0x594   :  { %6089 = vrot.lane.b32.xlu1 %v12507_v13, %s8698_s0  ;;  %5959 = vrot.lane.b32.xlu0 %v12504_v53, %s8700_s3  ;;  %v5840_v25 = vpop.f32.mrf.mxu0  ;;  %v5041_v12 = vadd.f32 %v14005_v61, %v4693_v56 }
 0x595   :  { %v5942_v34 = vpop.permute.xlu1 %5941  ;;  %v5944_v26 = vpop.permute.xlu0 %5943  ;;  %v12594_v35 = vadd.f32 %v5840_v25, %v5656_v1  ;;  %v6435_v22 = vsel %vm6415_vm10, %v8020_v9, 0 }
 0x596   :  { %v12575_v60 = vmax.f32 %v12399_v59, %v5942_v34  ;;  %v12586_v14 = vmax.f32 %v12401_v48, %v5944_v26  ;;  %v8614_v59 = vpop.f32.mrf.mxu0  ;;  %v5341_v62 = vadd.f32 %v12313_v17, %v5041_v12 }
 0x597   :  { %v12633_v20 = vadd.f32 %v8614_v59, %v5659_v0 }
 0x598   :  { %6091 = vrot.lane.b32.xlu0 %v12517_v54, %s8698_s0  ;;  %5961 = vrot.lane.b32.xlu1 %v12514_v37, %s8700_s3  ;;  %v5843_v48 = vpop.f32.mrf.mxu0  ;;  %v5657_v47 = vadd.f32 %v5616_v46, %v5341_v62  ;;  %v6301_v62 = vld [vmem:[%s13374_s5 + $0x38] sm:$0xff] }
 0x599   :  { %v5946_v4 = vpop.permute.xlu1 %5945  ;;  %v5948_v23 = vpop.permute.xlu0 %5947 }
 0x59a   :  { %v12597_v15 = vmax.f32 %v12410_v30, %v5946_v4  ;;  %v12603_v58 = vadd.f32 %v5843_v48, %v5657_v47  ;;  %v12606_v17 = vmax.f32 %v12408_v41, %v5948_v23  ;;  %v6304_v30 = vld [vmem:[%s13374_s5 + $0x50] sm:$0x33]  ;;  %v8021_v41 = vcombine.high %v6305_v40, %v6305_v40  ;;  %v6297_v4 = vld [vmem:[%s13374_s5 + $0x18] sm:$0xff] }
 0x59b   :  { %v8019_v31 = vcombine.high %v6304_v30, %v6304_v30  ;;  %v8018_v50 = vcombine.low %v6304_v30, %v6304_v30  ;;  %v8013_v48 = vcombine.high %v6297_v4, %v6301_v62 }
 0x59c   :  { %5963 = vrot.lane.b32.xlu0 %v12526_v5, %s8700_s3  ;;  %6093 = vrot.lane.b32.xlu1 %v12529_v42, %s8698_s0 }
 0x59d   :  { %v5950_v29 = vpop.permute.xlu1 %5949  ;;  %8056 = vmatprep.subr.msk.bf16.mxu1 %vm6415_vm10, %v8019_v31  ;;  %8073 = vmatprep.subr.msk.bf16.mxu0 %vm6415_vm10, %v8021_v41  ;;  %v6429_v34 = vsel %vm6415_vm10, %v8018_v50, 0 }
 0x59e   :  { %v12622_v33 = vmax.f32 %v12417_v21, %v5950_v29  ;;  %v14006_v29 = vmov 0  }
 0x5a0   :  { %6095 = vrot.lane.b32.xlu0 %v12540_v43, %s8698_s0  ;;  %5965 = vrot.lane.b32.xlu1 %v12537_v44, %s8700_s3 }
 0x5a4   :  { %6097 = vrot.lane.b32.xlu1 %v12553_v3, %s8698_s0  ;;  %5967 = vrot.lane.b32.xlu0 %v12550_v39, %s8700_s3 }
 0x5a8   :  { %6099 = vrot.lane.b32.xlu0 %v12563_v8, %s8698_s0  ;;  %5969 = vrot.lane.b32.xlu1 %v12560_v18, %s8700_s3 }
 0x5ac   :  { %5971 = vrot.lane.b32.xlu0 %v12572_v32, %s8700_s3  ;;  %6101 = vrot.lane.b32.xlu1 %v12575_v60, %s8698_s0 }
 0x5b0   :  { %6103 = vrot.lane.b32.xlu0 %v12586_v14, %s8698_s0  ;;  %5973 = vrot.lane.b32.xlu1 %v12583_v49, %s8700_s3 }
 0x5b4   :  { %6105 = vrot.lane.b32.xlu1 %v12597_v15, %s8698_s0  ;;  %5975 = vrot.lane.b32.xlu0 %v12594_v35, %s8700_s3 }
 0x5b8   :  { %6107 = vrot.lane.b32.xlu0 %v12606_v17, %s8698_s0  ;;  %5977 = vrot.lane.b32.xlu1 %v12603_v58, %s8700_s3 }
 0x5bc   :  { %5979 = vrot.lane.b32.xlu0 %v12619_v55, %s8700_s3  ;;  %6109 = vrot.lane.b32.xlu1 %v12622_v33, %s8698_s0 }
 0x5c0   :  { %5981 = vrot.lane.b32.xlu1 %v12633_v20, %s8700_s3 }
 0x5f2   :  { %v6080_v21 = vpop.permute.xlu0 %6079 }
 0x5f3   :  { %v6175_v27 = vmax.f32 %v12429_v38, %v6080_v21 }
 0x5f5   :  { %v6214_v56 = vadd.f32 %v12641_v11, %v6175_v27 }
 0x5f6   :  { %v6082_v45 = vpop.permute.xlu1 %6081  ;;  %v5952_v28 = vpop.permute.xlu0 %5951 }
 0x5f7   :  { %v6176_v36 = vmax.f32 %v12461_v16, %v6082_v45  ;;  %v12646_v25 = vmax.f32 %v12454_v63, %v5952_v28  ;;  %v6246_v61 = vmax.f32 %v6214_v56, 0.0  ;;  %v6300_v63 = vld [vmem:[%s13374_s5 + $0x30] sm:$0xff]  ;;  %s8701_s5 = smov 64  }
 0x5f8   :  { %v8011_v46 = vcombine.high %v6296_v7, %v6300_v63 }
 0x5f9   :  { %v6215_v26 = vadd.f32 %v12641_v11, %v6176_v36  ;;  %6111 = vrot.lane.b32.xlu0 %v12646_v25, %s8698_s0 }
 0x5fa   :  { %v6084_v38 = vpop.permute.xlu0 %6083  ;;  %v5954_v2 = vpop.permute.xlu1 %5953 }
 0x5fb   :  { %v6247_v12 = vmax.f32 %v6215_v26, 0.0  ;;  %v6177_v59 = vmax.f32 %v12471_v24, %v6084_v38  ;;  %v12656_v16 = vmax.f32 %v12468_v51, %v5954_v2 }
 0x5fd   :  { %v12667_v1 = vpack.c.bf16 %v6247_v12, %v6246_v61  ;;  %6113 = vrot.lane.b32.xlu1 %v12656_v16, %s8698_s0  ;;  %v6216_v23 = vadd.f32 %v12641_v11, %v6177_v59 }
 0x5fe   :  { %v5956_v51 = vpop.permute.xlu0 %5955  ;;  %v6086_v24 = vpop.permute.xlu1 %6085 }
 0x5ff   :  { %v12673_v47 = vmax.f32 %v12480_v10, %v5956_v51  ;;  %v6178_v6 = vmax.f32 %v12483_v19, %v6086_v24  ;;  %8023 = vmatmul.mubr.msk.bf16.vlgmr.msra.gmra.mxu1 %vm6366_vm11, %v12667_v1  ;;  %8040 = vmatmul.mubr.msk.bf16.vlgmr.msra.gmra.mxu0 %vm6366_vm11, %v12667_v1  ;;  %v8010_v10 = vcombine.low %v6296_v7, %v6300_v63  ;;  %v6248_v41 = vmax.f32 %v6216_v23, 0.0 }
 0x600   :  { %6480 = vmatprep.mubr.bf16.mxu1 %v14006_v29  ;;  %6626 = vmatprep.mubr.bf16.mxu0 %v14006_v29  ;;  %v8012_v19 = vcombine.low %v6297_v4, %v6301_v62 }
 0x601   :  { %v6217_v30 = vadd.f32 %v12641_v11, %v6178_v6  ;;  %6115 = vrot.lane.b32.xlu0 %v12673_v47, %s8698_s0  ;;  %6751 = vmatpush1.bf16.msra.mxu1 %v6429_v34 }
 0x602   :  { %v6088_v40 = vpop.permute.xlu0 %6087  ;;  %v5958_v31 = vpop.permute.xlu1 %5957  ;;  %6896 = vmatpush1.bf16.msra.mxu0 %v6435_v22  ;;  %6752 = vmatprep.subr.bf16.mxu1 %v8011_v46 }
 0x603   :  { %v6249_v50 = vmax.f32 %v6217_v30, 0.0  ;;  %v6179_v9 = vmax.f32 %v12494_v52, %v6088_v40  ;;  %v12687_v0 = vmax.f32 %v12491_v57, %v5958_v31  ;;  %6897 = vmatprep.subr.bf16.mxu0 %v8013_v48 }
 0x605   :  { %v12689_v21 = vpack.c.bf16 %v6249_v50, %v6248_v41  ;;  %6117 = vrot.lane.b32.xlu1 %v12687_v0, %s8698_s0  ;;  %6753 = vmatpush1.bf16.msra.mxu1 %v8010_v10  ;;  %v6218_v22 = vadd.f32 %v12641_v11, %v6179_v9 }
 0x606   :  { %v6090_v34 = vpop.permute.xlu1 %6089  ;;  %v5960_v27 = vpop.permute.xlu0 %5959  ;;  %6898 = vmatpush1.bf16.msra.mxu0 %v8012_v19 }
 0x607   :  { %v6180_v45 = vmax.f32 %v12507_v13, %v6090_v34  ;;  %v12696_v28 = vmax.f32 %v12504_v53, %v5960_v27  ;;  %8024 = vmatmul.mubr.msk.bf16.gmra.mxu1 %vm6366_vm11, %v12689_v21  ;;  %8041 = vmatmul.mubr.msk.bf16.gmra.mxu0 %vm6366_vm11, %v12689_v21  ;;  %v6250_v56 = vmax.f32 %v6218_v22, 0.0 }
 0x608   :  { %6486 = vmatprep.mubr.bf16.mxu1 %v14006_v29  ;;  %6632 = vmatprep.mubr.bf16.mxu0 %v14006_v29 }
 0x609   :  { %v6219_v57 = vadd.f32 %v12641_v11, %v6180_v45  ;;  %6119 = vrot.lane.b32.xlu0 %v12696_v28, %s8698_s0 }
 0x60a   :  { %v6092_v52 = vpop.permute.xlu0 %6091  ;;  %v5962_v13 = vpop.permute.xlu1 %5961 }
 0x60b   :  { %v6251_v53 = vmax.f32 %v6219_v57, 0.0  ;;  %v6181_v36 = vmax.f32 %v12517_v54, %v6092_v52  ;;  %v12709_v26 = vmax.f32 %v12514_v37, %v5962_v13 }
 0x60d   :  { %v12711_v38 = vpack.c.bf16 %v6251_v53, %v6250_v56  ;;  %6121 = vrot.lane.b32.xlu1 %v12709_v26, %s8698_s0  ;;  %v6220_v61 = vadd.f32 %v12641_v11, %v6181_v36 }
 0x60e   :  { %v5964_v2 = vpop.permute.xlu0 %5963  ;;  %v6094_v7 = vpop.permute.xlu1 %6093 }
 0x60f   :  { %v12717_v12 = vmax.f32 %v12526_v5, %v5964_v2  ;;  %v6182_v59 = vmax.f32 %v12529_v42, %v6094_v7  ;;  %8025 = vmatmul.mubr.msk.bf16.gmra.mxu1 %vm6366_vm11, %v12711_v38  ;;  %8042 = vmatmul.mubr.msk.bf16.gmra.mxu0 %vm6366_vm11, %v12711_v38  ;;  %v6252_v63 = vmax.f32 %v6220_v61, 0.0 }
 0x610   :  { %6494 = vmatprep.mubr.bf16.mxu1 %v14006_v29  ;;  %6641 = vmatprep.mubr.bf16.mxu0 %v14006_v29 }
 0x611   :  { %v6221_v37 = vadd.f32 %v12641_v11, %v6182_v59  ;;  %6123 = vrot.lane.b32.xlu0 %v12717_v12, %s8698_s0 }
 0x612   :  { %v6096_v54 = vpop.permute.xlu0 %6095  ;;  %v5966_v5 = vpop.permute.xlu1 %5965 }
 0x613   :  { %v6253_v4 = vmax.f32 %v6221_v37, 0.0  ;;  %v6183_v42 = vmax.f32 %v12540_v43, %v6096_v54  ;;  %v12731_v62 = vmax.f32 %v12537_v44, %v5966_v5 }
 0x615   :  { %v12733_v51 = vpack.c.bf16 %v6253_v4, %v6252_v63  ;;  %6125 = vrot.lane.b32.xlu1 %v12731_v62, %s8698_s0  ;;  %v6222_v48 = vadd.f32 %v12641_v11, %v6183_v42 }
 0x616   :  { %v6098_v24 = vpop.permute.xlu1 %6097  ;;  %v5968_v46 = vpop.permute.xlu0 %5967 }
 0x617   :  { %v6184_v23 = vmax.f32 %v12553_v3, %v6098_v24  ;;  %v12740_v6 = vmax.f32 %v12550_v39, %v5968_v46  ;;  %8026 = vmatmul.mubr.msk.bf16.gmra.mxu1 %vm6366_vm11, %v12733_v51  ;;  %8043 = vmatmul.mubr.msk.bf16.gmra.mxu0 %vm6366_vm11, %v12733_v51  ;;  %v6254_v30 = vmax.f32 %v6222_v48, 0.0 }
 0x618   :  { %6500 = vmatprep.mubr.bf16.mxu1 %v14006_v29  ;;  %6647 = vmatprep.mubr.bf16.mxu0 %v14006_v29 }
 0x619   :  { %v6223_v44 = vadd.f32 %v12641_v11, %v6184_v23  ;;  %6127 = vrot.lane.b32.xlu0 %v12740_v6, %s8698_s0 }
 0x61a   :  { %v6100_v43 = vpop.permute.xlu0 %6099  ;;  %v5970_v3 = vpop.permute.xlu1 %5969 }
 0x61b   :  { %v6255_v39 = vmax.f32 %v6223_v44, 0.0  ;;  %v6185_v10 = vmax.f32 %v12563_v8, %v6100_v43  ;;  %v12753_v40 = vmax.f32 %v12560_v18, %v5970_v3 }
 0x61d   :  { %v12755_v31 = vpack.c.bf16 %v6255_v39, %v6254_v30  ;;  %6129 = vrot.lane.b32.xlu1 %v12753_v40, %s8698_s0  ;;  %v6224_v50 = vadd.f32 %v12641_v11, %v6185_v10 }
 0x61e   :  { %v5972_v19 = vpop.permute.xlu0 %5971  ;;  %v6102_v41 = vpop.permute.xlu1 %6101 }
 0x61f   :  { %v12761_v9 = vmax.f32 %v12572_v32, %v5972_v19  ;;  %v6186_v34 = vmax.f32 %v12575_v60, %v6102_v41  ;;  %8027 = vmatmul.mubr.msk.bf16.gmra.mxu1 %vm6366_vm11, %v12755_v31  ;;  %8044 = vmatmul.mubr.msk.bf16.gmra.mxu0 %vm6366_vm11, %v12755_v31  ;;  %v6256_v27 = vmax.f32 %v6224_v50, 0.0 }
 0x620   :  { %6508 = vmatprep.mubr.bf16.mxu1 %v14006_v29  ;;  %6656 = vmatprep.mubr.bf16.mxu0 %v14006_v29 }
 0x621   :  { %v6225_v18 = vadd.f32 %v12641_v11, %v6186_v34  ;;  %6131 = vrot.lane.b32.xlu0 %v12761_v9, %s8698_s0 }
 0x622   :  { %v6104_v8 = vpop.permute.xlu0 %6103  ;;  %v5974_v32 = vpop.permute.xlu1 %5973 }
 0x623   :  { %v6257_v22 = vmax.f32 %v6225_v18, 0.0  ;;  %v6187_v60 = vmax.f32 %v12586_v14, %v6104_v8  ;;  %v12775_v45 = vmax.f32 %v12583_v49, %v5974_v32 }
 0x625   :  { %v12777_v57 = vpack.c.bf16 %v6257_v22, %v6256_v27  ;;  %6133 = vrot.lane.b32.xlu1 %v12775_v45, %s8698_s0  ;;  %v6226_v56 = vadd.f32 %v12641_v11, %v6187_v60 }
 0x626   :  { %v6106_v52 = vpop.permute.xlu1 %6105  ;;  %v5976_v13 = vpop.permute.xlu0 %5975 }
 0x627   :  { %v6188_v53 = vmax.f32 %v12597_v15, %v6106_v52  ;;  %v12784_v36 = vmax.f32 %v12594_v35, %v5976_v13  ;;  %8028 = vmatmul.mubr.msk.bf16.gmra.mxu1 %vm6366_vm11, %v12777_v57  ;;  %8045 = vmatmul.mubr.msk.bf16.gmra.mxu0 %vm6366_vm11, %v12777_v57  ;;  %v6258_v2 = vmax.f32 %v6226_v56, 0.0 }
 0x628   :  { %6514 = vmatprep.mubr.bf16.mxu1 %v14006_v29  ;;  %6662 = vmatprep.mubr.bf16.mxu0 %v14006_v29 }
 0x629   :  { %v6227_v49 = vadd.f32 %v12641_v11, %v6188_v53  ;;  %6135 = vrot.lane.b32.xlu0 %v12784_v36, %s8698_s0 }
 0x62a   :  { %v6108_v14 = vpop.permute.xlu0 %6107  ;;  %v5978_v15 = vpop.permute.xlu1 %5977 }
 0x62b   :  { %v6259_v35 = vmax.f32 %v6227_v49, 0.0  ;;  %v6189_v7 = vmax.f32 %v12606_v17, %v6108_v14  ;;  %v12797_v61 = vmax.f32 %v12603_v58, %v5978_v15 }
 0x62d   :  { %v12799_v59 = vpack.c.bf16 %v6259_v35, %v6258_v2  ;;  %6137 = vrot.lane.b32.xlu1 %v12797_v61, %s8698_s0  ;;  %v6228_v5 = vadd.f32 %v12641_v11, %v6189_v7 }
 0x62e   :  { %v5980_v37 = vpop.permute.xlu0 %5979  ;;  %v6110_v54 = vpop.permute.xlu1 %6109 }
 0x62f   :  { %v12805_v63 = vmax.f32 %v12619_v55, %v5980_v37  ;;  %v6190_v4 = vmax.f32 %v12622_v33, %v6110_v54  ;;  %8029 = vmatmul.mubr.msk.bf16.gmra.mxu1 %vm6366_vm11, %v12799_v59  ;;  %8046 = vmatmul.mubr.msk.bf16.gmra.mxu0 %vm6366_vm11, %v12799_v59  ;;  %v6260_v55 = vmax.f32 %v6228_v5, 0.0 }
 0x630   :  { %6522 = vmatprep.mubr.bf16.mxu1 %v14006_v29  ;;  %6671 = vmatprep.mubr.bf16.mxu0 %v14006_v29 }
 0x631   :  { %v6229_v58 = vadd.f32 %v12641_v11, %v6190_v4  ;;  %6139 = vrot.lane.b32.xlu0 %v12805_v63, %s8698_s0 }
 0x632   :  { %v5982_v17 = vpop.permute.xlu1 %5981 }
 0x633   :  { %v6261_v42 = vmax.f32 %v6229_v58, 0.0  ;;  %v12818_v33 = vmax.f32 %v12633_v20, %v5982_v17 }
 0x635   :  { %v12820_v24 = vpack.c.bf16 %v6261_v42, %v6260_v55  ;;  %6141 = vrot.lane.b32.xlu1 %v12818_v33, %s8698_s0 }
 0x637   :  { %8030 = vmatmul.mubr.msk.bf16.gmra.mxu1 %vm6366_vm11, %v12820_v24  ;;  %8047 = vmatmul.mubr.msk.bf16.gmra.mxu0 %vm6366_vm11, %v12820_v24 }
 0x638   :  { %6528 = vmatprep.mubr.bf16.mxu1 %v14006_v29  ;;  %6677 = vmatprep.mubr.bf16.mxu0 %v14006_v29 }
 0x66b   :  { %v6112_v46 = vpop.permute.xlu0 %6111 }
 0x66c   :  { %v6191_v48 = vmax.f32 %v12646_v25, %v6112_v46 }
 0x66e   :  { %v6230_v23 = vadd.f32 %v12641_v11, %v6191_v48 }
 0x66f   :  { %v6114_v20 = vpop.permute.xlu1 %6113 }
 0x670   :  { %v6192_v44 = vmax.f32 %v12656_v16, %v6114_v20  ;;  %v6262_v30 = vmax.f32 %v6230_v23, 0.0 }
 0x672   :  { %v6231_v43 = vadd.f32 %v12641_v11, %v6192_v44 }
 0x673   :  { %v6116_v3 = vpop.permute.xlu0 %6115 }
 0x674   :  { %v6263_v39 = vmax.f32 %v6231_v43, 0.0  ;;  %v6193_v10 = vmax.f32 %v12673_v47, %v6116_v3 }
 0x676   :  { %v12835_v19 = vpack.c.bf16 %v6263_v39, %v6262_v30  ;;  %v6232_v50 = vadd.f32 %v12641_v11, %v6193_v10 }
 0x677   :  { %v6118_v41 = vpop.permute.xlu1 %6117 }
 0x678   :  { %v6194_v34 = vmax.f32 %v12687_v0, %v6118_v41  ;;  %8031 = vmatmul.mubr.msk.bf16.gmra.mxu1 %vm6366_vm11, %v12835_v19  ;;  %8048 = vmatmul.mubr.msk.bf16.gmra.mxu0 %vm6366_vm11, %v12835_v19  ;;  %v6264_v47 = vmax.f32 %v6232_v50, 0.0 }
 0x679   :  { %6536 = vmatprep.mubr.bf16.mxu1 %v14006_v29  ;;  %6686 = vmatprep.mubr.bf16.mxu0 %v14006_v29 }
 0x67a   :  { %v6233_v25 = vadd.f32 %v12641_v11, %v6194_v34 }
 0x67b   :  { %v6120_v16 = vpop.permute.xlu0 %6119 }
 0x67c   :  { %v6265_v18 = vmax.f32 %v6233_v25, 0.0  ;;  %v6195_v8 = vmax.f32 %v12696_v28, %v6120_v16 }
 0x67e   :  { %v12847_v32 = vpack.c.bf16 %v6265_v18, %v6264_v47  ;;  %v6234_v27 = vadd.f32 %v12641_v11, %v6195_v8 }
 0x67f   :  { %v6122_v0 = vpop.permute.xlu1 %6121 }
 0x680   :  { %v6196_v22 = vmax.f32 %v12709_v26, %v6122_v0  ;;  %8032 = vmatmul.mubr.msk.bf16.gmra.mxu1 %vm6366_vm11, %v12847_v32  ;;  %8049 = vmatmul.mubr.msk.bf16.gmra.mxu0 %vm6366_vm11, %v12847_v32  ;;  %v6266_v52 = vmax.f32 %v6234_v27, 0.0 }
 0x681   :  { %6542 = vmatprep.mubr.bf16.mxu1 %v14006_v29  ;;  %6692 = vmatprep.mubr.bf16.mxu0 %v14006_v29 }
 0x682   :  { %v6235_v60 = vadd.f32 %v12641_v11, %v6196_v22 }
 0x683   :  { %v6124_v28 = vpop.permute.xlu0 %6123 }
 0x684   :  { %v6267_v13 = vmax.f32 %v6235_v60, 0.0  ;;  %v6197_v56 = vmax.f32 %v12717_v12, %v6124_v28 }
 0x686   :  { %v12859_v53 = vpack.c.bf16 %v6267_v13, %v6266_v52  ;;  %v6236_v49 = vadd.f32 %v12641_v11, %v6197_v56 }
 0x687   :  { %v6126_v26 = vpop.permute.xlu1 %6125 }
 0x688   :  { %v6198_v14 = vmax.f32 %v12731_v62, %v6126_v26  ;;  %8033 = vmatmul.mubr.msk.bf16.gmra.mxu1 %vm6366_vm11, %v12859_v53  ;;  %8050 = vmatmul.mubr.msk.bf16.gmra.mxu0 %vm6366_vm11, %v12859_v53  ;;  %v6268_v2 = vmax.f32 %v6236_v49, 0.0 }
 0x689   :  { %6550 = vmatprep.mubr.bf16.mxu1 %v14006_v29  ;;  %6701 = vmatprep.mubr.bf16.mxu0 %v14006_v29 }
 0x68a   :  { %v6237_v15 = vadd.f32 %v12641_v11, %v6198_v14 }
 0x68b   :  { %v6128_v12 = vpop.permute.xlu0 %6127 }
 0x68c   :  { %v6269_v35 = vmax.f32 %v6237_v15, 0.0  ;;  %v6199_v7 = vmax.f32 %v12740_v6, %v6128_v12 }
 0x68e   :  { %v12871_v37 = vpack.c.bf16 %v6269_v35, %v6268_v2  ;;  %v6238_v54 = vadd.f32 %v12641_v11, %v6199_v7 }
 0x68f   :  { %v6130_v62 = vpop.permute.xlu1 %6129 }
 0x690   :  { %v6200_v5 = vmax.f32 %v12753_v40, %v6130_v62  ;;  %8034 = vmatmul.mubr.msk.bf16.gmra.mxu1 %vm6366_vm11, %v12871_v37  ;;  %8051 = vmatmul.mubr.msk.bf16.gmra.mxu0 %vm6366_vm11, %v12871_v37  ;;  %v6270_v58 = vmax.f32 %v6238_v54, 0.0 }
 0x691   :  { %6556 = vmatprep.mubr.bf16.mxu1 %v14006_v29  ;;  %6707 = vmatprep.mubr.bf16.mxu0 %v14006_v29 }
 0x692   :  { %v6239_v4 = vadd.f32 %v12641_v11, %v6200_v5 }
 0x693   :  { %v6132_v6 = vpop.permute.xlu0 %6131 }
 0x694   :  { %v6271_v17 = vmax.f32 %v6239_v4, 0.0  ;;  %v6201_v55 = vmax.f32 %v12761_v9, %v6132_v6 }
 0x696   :  { %v12883_v42 = vpack.c.bf16 %v6271_v17, %v6270_v58  ;;  %v6240_v46 = vadd.f32 %v12641_v11, %v6201_v55 }
 0x697   :  { %v6134_v40 = vpop.permute.xlu1 %6133 }
 0x698   :  { %v6202_v48 = vmax.f32 %v12775_v45, %v6134_v40  ;;  %8035 = vmatmul.mubr.msk.bf16.gmra.mxu1 %vm6366_vm11, %v12883_v42  ;;  %8052 = vmatmul.mubr.msk.bf16.gmra.mxu0 %vm6366_vm11, %v12883_v42  ;;  %v6272_v23 = vmax.f32 %v6240_v46, 0.0 }
 0x699   :  { %6564 = vmatprep.mubr.bf16.mxu1 %v14006_v29  ;;  %6716 = vmatprep.mubr.bf16.mxu0 %v14006_v29 }
 0x69a   :  { %v6241_v20 = vadd.f32 %v12641_v11, %v6202_v48 }
 0x69b   :  { %v6136_v9 = vpop.permute.xlu0 %6135 }
 0x69c   :  { %v6273_v44 = vmax.f32 %v6241_v20, 0.0  ;;  %v6203_v43 = vmax.f32 %v12784_v36, %v6136_v9 }
 0x69e   :  { %v12895_v3 = vpack.c.bf16 %v6273_v44, %v6272_v23  ;;  %v6242_v30 = vadd.f32 %v12641_v11, %v6203_v43 }
 0x69f   :  { %v6138_v45 = vpop.permute.xlu1 %6137 }
 0x6a0   :  { %v6204_v39 = vmax.f32 %v12797_v61, %v6138_v45  ;;  %8036 = vmatmul.mubr.msk.bf16.gmra.mxu1 %vm6366_vm11, %v12895_v3  ;;  %8053 = vmatmul.mubr.msk.bf16.gmra.mxu0 %vm6366_vm11, %v12895_v3  ;;  %v6274_v41 = vmax.f32 %v6242_v30, 0.0 }
 0x6a1   :  { %6570 = vmatprep.mubr.bf16.mxu1 %v14006_v29  ;;  %6722 = vmatprep.mubr.bf16.mxu0 %v14006_v29 }
 0x6a2   :  { %v6243_v10 = vadd.f32 %v12641_v11, %v6204_v39 }
 0x6a3   :  { %v6140_v36 = vpop.permute.xlu0 %6139 }
 0x6a4   :  { %v6275_v50 = vmax.f32 %v6243_v10, 0.0  ;;  %v6205_v34 = vmax.f32 %v12805_v63, %v6140_v36 }
 0x6a6   :  { %v12907_v25 = vpack.c.bf16 %v6275_v50, %v6274_v41  ;;  %v6244_v16 = vadd.f32 %v12641_v11, %v6205_v34 }
 0x6a7   :  { %v6142_v61 = vpop.permute.xlu1 %6141 }
 0x6a8   :  { %v6206_v47 = vmax.f32 %v12818_v33, %v6142_v61  ;;  %8037 = vmatmul.mubr.msk.bf16.gmra.mxu1 %vm6366_vm11, %v12907_v25  ;;  %8054 = vmatmul.mubr.msk.bf16.gmra.mxu0 %vm6366_vm11, %v12907_v25  ;;  %v6276_v63 = vmax.f32 %v6244_v16, 0.0 }
 0x6a9   :  { %6578 = vmatprep.mubr.bf16.mxu1 %v14006_v29  ;;  %6731 = vmatprep.mubr.bf16.mxu0 %v14006_v29 }
 0x6aa   :  { %v6245_v18 = vadd.f32 %v12641_v11, %v6206_v47 }
 0x6ac   :  { %v6277_v8 = vmax.f32 %v6245_v18, 0.0 }
 0x6ae   :  { %v12918_v0 = vpack.c.bf16 %v6277_v8, %v6276_v63 }
 0x6b0   :  { %8038 = vmatmul.mubr.msk.bf16.gmra.mxu1 %vm6366_vm11, %v12918_v0  ;;  %8055 = vmatmul.mubr.msk.bf16.gmra.mxu0 %vm6366_vm11, %v12918_v0 }
 0x6b1   :  { %6770 = vmatprep.mubr.bf16.mxu1 %v14006_v29  ;;  %6915 = vmatprep.mubr.bf16.mxu0 %v14006_v29 }
 0x6b8   :  { %8057 = vmatmul.mubr.msk.bf16.vlgmr.msra.gmra.mxu1 %vm6366_vm11, %v12667_v1  ;;  %8074 = vmatmul.mubr.msk.bf16.vlgmr.msra.gmra.mxu0 %vm6366_vm11, %v12667_v1 }
 0x6b9   :  { %6777 = vmatprep.mubr.bf16.mxu1 %v14006_v29  ;;  %6921 = vmatprep.mubr.bf16.mxu0 %v14006_v29 }
 0x6bf   :  { %v12932_v11 = vpop.f32.mrf.mxu1  ;;  %v12934_v33 = vpop.f32.mrf.mxu0 }
 0x6c0   :  { %v7044_v27 = vrot.slane %v12932_v11, 1  ;;  %8058 = vmatmul.mubr.msk.bf16.gmra.mxu1 %vm6366_vm11, %v12689_v21  ;;  %8075 = vmatmul.mubr.msk.bf16.gmra.mxu0 %vm6366_vm11, %v12689_v21 }
 0x6c1   :  { %v12941_v22 = vpop.f32.mrf.mxu1  ;;  %v6621_v60 = vpop.f32.mrf.mxu0  ;;  %6784 = vmatprep.mubr.bf16.mxu1 %v14006_v29  ;;  %6930 = vmatprep.mubr.bf16.mxu0 %v14006_v29 }
 0x6c2   :  { %7052 = vrot.lane.b32.xlu0 %v7044_v27, %s8701_s5  ;;  %v7116_v52 = vrot.slane %v12941_v22, 3 }
 0x6c3   :  { %v6478_v1 = vpop.f32.mrf.mxu1  ;;  %v6622_v28 = vpop.f32.mrf.mxu0 }
 0x6c5   :  { %v6479_v13 = vpop.f32.mrf.mxu1  ;;  %v12947_v56 = vpop.f32.mrf.mxu0 }
 0x6c6   :  { %7124 = vrot.lane.b32.xlu0 %v7116_v52, %s8701_s5  ;;  %v7260_v2 = vrot.slane %v12947_v56, 2 }
 0x6c7   :  { %v6482_v21 = vpop.f32.mrf.mxu1  ;;  %v6628_v26 = vpop.f32.mrf.mxu0 }
 0x6c8   :  { %8059 = vmatmul.mubr.msk.bf16.gmra.mxu1 %vm6366_vm11, %v12711_v38  ;;  %8076 = vmatmul.mubr.msk.bf16.gmra.mxu0 %vm6366_vm11, %v12711_v38 }
 0x6c9   :  { %v6483_v49 = vpop.f32.mrf.mxu1  ;;  %v6629_v14 = vpop.f32.mrf.mxu0  ;;  %6791 = vmatprep.mubr.bf16.mxu1 %v14006_v29  ;;  %6936 = vmatprep.mubr.bf16.mxu0 %v14006_v29 }
 0x6ca   :  { %7196 = vrot.lane.b32.xlu0 %v6622_v28, %s8701_s5 }
 0x6cb   :  { %v6484_v15 = vpop.f32.mrf.mxu1  ;;  %v6630_v12 = vpop.f32.mrf.mxu0 }
 0x6cd   :  { %v6485_v35 = vpop.f32.mrf.mxu1  ;;  %v6631_v7 = vpop.f32.mrf.mxu0 }
 0x6ce   :  { %7268 = vrot.lane.b32.xlu0 %v7260_v2, %s8701_s5 }
 0x6cf   :  { %v12959_v62 = vpop.f32.mrf.mxu1  ;;  %v12961_v54 = vpop.f32.mrf.mxu0 }
 0x6d0   :  { %v7045_v38 = vrot.slane %v12959_v62, 1  ;;  %8060 = vmatmul.mubr.msk.bf16.gmra.mxu1 %vm6366_vm11, %v12733_v51  ;;  %8077 = vmatmul.mubr.msk.bf16.gmra.mxu0 %vm6366_vm11, %v12733_v51 }
 0x6d1   :  { %v12968_v5 = vpop.f32.mrf.mxu1  ;;  %v6636_v4 = vpop.f32.mrf.mxu0  ;;  %6798 = vmatprep.mubr.bf16.mxu1 %v14006_v29  ;;  %6945 = vmatprep.mubr.bf16.mxu0 %v14006_v29 }
 0x6d2   :  { %7054 = vrot.lane.b32.xlu0 %v7045_v38, %s8701_s5  ;;  %v7117_v17 = vrot.slane %v12968_v5, 3 }
 0x6d3   :  { %v6492_v6 = vpop.f32.mrf.mxu1  ;;  %v6637_v58 = vpop.f32.mrf.mxu0 }
 0x6d5   :  { %v6493_v55 = vpop.f32.mrf.mxu1  ;;  %v12974_v40 = vpop.f32.mrf.mxu0 }
 0x6d6   :  { %7126 = vrot.lane.b32.xlu0 %v7117_v17, %s8701_s5  ;;  %v7261_v44 = vrot.slane %v12974_v40, 2 }
 0x6d7   :  { %v6496_v46 = vpop.f32.mrf.mxu1  ;;  %v6643_v51 = vpop.f32.mrf.mxu0 }
 0x6d8   :  { %8061 = vmatmul.mubr.msk.bf16.gmra.mxu1 %vm6366_vm11, %v12755_v31  ;;  %8078 = vmatmul.mubr.msk.bf16.gmra.mxu0 %vm6366_vm11, %v12755_v31 }
 0x6d9   :  { %v6497_v48 = vpop.f32.mrf.mxu1  ;;  %v6644_v20 = vpop.f32.mrf.mxu0  ;;  %6805 = vmatprep.mubr.bf16.mxu1 %v14006_v29  ;;  %6951 = vmatprep.mubr.bf16.mxu0 %v14006_v29 }
 0x6da   :  { %7198 = vrot.lane.b32.xlu0 %v6637_v58, %s8701_s5 }
 0x6db   :  { %v6498_v9 = vpop.f32.mrf.mxu1  ;;  %v6645_v23 = vpop.f32.mrf.mxu0 }
 0x6dd   :  { %v6499_v43 = vpop.f32.mrf.mxu1  ;;  %v6646_v45 = vpop.f32.mrf.mxu0 }
 0x6de   :  { %7270 = vrot.lane.b32.xlu0 %v7261_v44, %s8701_s5 }
 0x6df   :  { %v12986_v30 = vpop.f32.mrf.mxu1  ;;  %v12988_v39 = vpop.f32.mrf.mxu0 }
 0x6e0   :  { %v7046_v31 = vrot.slane %v12986_v30, 1  ;;  %8062 = vmatmul.mubr.msk.bf16.gmra.mxu1 %vm6366_vm11, %v12777_v57  ;;  %8079 = vmatmul.mubr.msk.bf16.gmra.mxu0 %vm6366_vm11, %v12777_v57 }
 0x6e1   :  { %v12995_v10 = vpop.f32.mrf.mxu1  ;;  %v6651_v36 = vpop.f32.mrf.mxu0  ;;  %6812 = vmatprep.mubr.bf16.mxu1 %v14006_v29  ;;  %6960 = vmatprep.mubr.bf16.mxu0 %v14006_v29 }
 0x6e2   :  { %v7118_v41 = vrot.slane %v12995_v10, 3  ;;  %7056 = vrot.lane.b32.xlu1 %v7046_v31, %s8701_s5 }
 0x6e3   :  { %v6506_v50 = vpop.f32.mrf.mxu1  ;;  %v6652_v34 = vpop.f32.mrf.mxu0 }
 0x6e4   :  { %7128 = vrot.lane.b32.xlu0 %v7118_v41, %s8701_s5 }
 0x6e5   :  { %v6507_v61 = vpop.f32.mrf.mxu1  ;;  %v13002_v16 = vpop.f32.mrf.mxu0 }
 0x6e6   :  { %v7262_v8 = vrot.slane %v13002_v16, 2 }
 0x6e7   :  { %v6510_v47 = vpop.f32.mrf.mxu1  ;;  %v6658_v57 = vpop.f32.mrf.mxu0 }
 0x6e8   :  { %7200 = vrot.lane.b32.xlu0 %v6652_v34, %s8701_s5  ;;  %8063 = vmatmul.mubr.msk.bf16.gmra.mxu1 %vm6366_vm11, %v12799_v59 }
 0x6e9   :  { %8080 = vmatmul.mubr.msk.bf16.gmra.mxu0 %vm6366_vm11, %v12799_v59  ;;  %v6511_v18 = vpop.f32.mrf.mxu1  ;;  %v6659_v63 = vpop.f32.mrf.mxu0  ;;  %6819 = vmatprep.mubr.bf16.mxu1 %v14006_v29 }
 0x6ea   :  { %6966 = vmatprep.mubr.bf16.mxu0 %v14006_v29  ;;  %v7093_v18 = vrot.slane %v12968_v5, 2 }
 0x6eb   :  { %v6512_v27 = vpop.f32.mrf.mxu1  ;;  %v6660_v60 = vpop.f32.mrf.mxu0 }
 0x6ec   :  { %7272 = vrot.lane.b32.xlu0 %v7262_v8, %s8701_s5 }
 0x6ed   :  { %v6513_v1 = vpop.f32.mrf.mxu1  ;;  %v6661_v28 = vpop.f32.mrf.mxu0 }
 0x6ef   :  { %v13013_v52 = vpop.f32.mrf.mxu1  ;;  %v13015_v13 = vpop.f32.mrf.mxu0 }
 0x6f0   :  { %v7047_v59 = vrot.slane %v13013_v52, 1  ;;  %8064 = vmatmul.mubr.msk.bf16.gmra.mxu1 %vm6366_vm11, %v12820_v24 }
 0x6f1   :  { %8081 = vmatmul.mubr.msk.bf16.gmra.mxu0 %vm6366_vm11, %v12820_v24  ;;  %v13022_v21 = vpop.f32.mrf.mxu1  ;;  %v6666_v26 = vpop.f32.mrf.mxu0  ;;  %6826 = vmatprep.mubr.bf16.mxu1 %v14006_v29 }
 0x6f2   :  { %7058 = vrot.lane.b32.xlu1 %v7047_v59, %s8701_s5  ;;  %6975 = vmatprep.mubr.bf16.mxu0 %v14006_v29  ;;  %v7119_v15 = vrot.slane %v13022_v21, 3 }
 0x6f3   :  { %v6520_v49 = vpop.f32.mrf.mxu1  ;;  %v6667_v14 = vpop.f32.mrf.mxu0 }
 0x6f4   :  { %v7165_v49 = vrot.slane %v12961_v54, 7 }
 0x6f5   :  { %v6521_v12 = vpop.f32.mrf.mxu1  ;;  %v13028_v2 = vpop.f32.mrf.mxu0 }
 0x6f6   :  { %7130 = vrot.lane.b32.xlu1 %v7119_v15, %s8701_s5  ;;  %v7263_v58 = vrot.slane %v13028_v2, 2 }
 0x6f7   :  { %v6524_v35 = vpop.f32.mrf.mxu1  ;;  %v6673_v24 = vpop.f32.mrf.mxu0 }
 0x6f8   :  { %8065 = vmatmul.mubr.msk.bf16.gmra.mxu1 %vm6366_vm11, %v12835_v19 }
 0x6f9   :  { %8082 = vmatmul.mubr.msk.bf16.gmra.mxu0 %vm6366_vm11, %v12835_v19  ;;  %v6525_v7 = vpop.f32.mrf.mxu1  ;;  %v6674_v38 = vpop.f32.mrf.mxu0  ;;  %6833 = vmatprep.mubr.bf16.mxu1 %v14006_v29 }
 0x6fa   :  { %7202 = vrot.lane.b32.xlu1 %v6667_v14, %s8701_s5  ;;  %6981 = vmatprep.mubr.bf16.mxu0 %v14006_v29  ;;  %v7237_v38 = vrot.slane %v12974_v40, 1 }
 0x6fb   :  { %v6526_v4 = vpop.f32.mrf.mxu1  ;;  %v6675_v6 = vpop.f32.mrf.mxu0 }
 0x6fd   :  { %v6527_v17 = vpop.f32.mrf.mxu1  ;;  %v6676_v55 = vpop.f32.mrf.mxu0 }
 0x6fe   :  { %7274 = vrot.lane.b32.xlu1 %v7263_v58, %s8701_s5 }
 0x700   :  { %8066 = vmatmul.mubr.msk.bf16.gmra.mxu1 %vm6366_vm11, %v12847_v32 }
 0x701   :  { %8083 = vmatmul.mubr.msk.bf16.gmra.mxu0 %vm6366_vm11, %v12847_v32  ;;  %6840 = vmatprep.mubr.bf16.mxu1 %v14006_v29  ;;  %v7092_v32 = vrot.slane %v12941_v22, 2 }
 0x702   :  { %6990 = vmatprep.mubr.bf16.mxu0 %v14006_v29 }
 0x708   :  { %8067 = vmatmul.mubr.msk.bf16.gmra.mxu1 %vm6366_vm11, %v12859_v53 }
 0x709   :  { %8084 = vmatmul.mubr.msk.bf16.gmra.mxu0 %vm6366_vm11, %v12859_v53  ;;  %6847 = vmatprep.mubr.bf16.mxu1 %v14006_v29 }
 0x70a   :  { %6996 = vmatprep.mubr.bf16.mxu0 %v14006_v29 }
 0x710   :  { %8068 = vmatmul.mubr.msk.bf16.gmra.mxu1 %vm6366_vm11, %v12871_v37 }
 0x711   :  { %8085 = vmatmul.mubr.msk.bf16.gmra.mxu0 %vm6366_vm11, %v12871_v37  ;;  %6854 = vmatprep.mubr.bf16.mxu1 %v14006_v29 }
 0x712   :  { %7005 = vmatprep.mubr.bf16.mxu0 %v14006_v29 }
 0x718   :  { %8069 = vmatmul.mubr.msk.bf16.gmra.mxu1 %vm6366_vm11, %v12883_v42 }
 0x719   :  { %8086 = vmatmul.mubr.msk.bf16.gmra.mxu0 %vm6366_vm11, %v12883_v42  ;;  %6861 = vmatprep.mubr.bf16.mxu1 %v14006_v29 }
 0x71a   :  { %7011 = vmatprep.mubr.bf16.mxu0 %v14006_v29 }
 0x720   :  { %8070 = vmatmul.mubr.msk.bf16.gmra.mxu1 %vm6366_vm11, %v12895_v3 }
 0x721   :  { %8087 = vmatmul.mubr.msk.bf16.gmra.mxu0 %vm6366_vm11, %v12895_v3  ;;  %6868 = vmatprep.mubr.bf16.mxu1 %v14006_v29 }
 0x722   :  { %7020 = vmatprep.mubr.bf16.mxu0 %v14006_v29 }
 0x728   :  { %8071 = vmatmul.mubr.msk.bf16.gmra.mxu1 %vm6366_vm11, %v12907_v25 }
 0x729   :  { %8088 = vmatmul.mubr.msk.bf16.gmra.mxu0 %vm6366_vm11, %v12907_v25  ;;  %6875 = vmatprep.mubr.bf16.mxu1 %v14006_v29  ;;  %v7164_v25 = vrot.slane %v12934_v33, 7 }
 0x72a   :  { %7026 = vmatprep.mubr.bf16.mxu0 %v14006_v29 }
 0x730   :  { %8072 = vmatmul.mubr.msk.bf16.gmra.mxu1 %vm6366_vm11, %v12918_v0 }
 0x731   :  { %8089 = vmatmul.mubr.msk.bf16.gmra.mxu0 %vm6366_vm11, %v12918_v0 }
 0x734   :  { %v7053_v19 = vpop.permute.xlu0 %7052 }
 0x735   :  { %v7076_v53 = vadd.f32 %v7053_v19, %v12932_v11  ;;  %v7236_v11 = vrot.slane %v12947_v56, 1 }
 0x737   :  { %v7108_v37 = vadd.f32 %v7092_v32, %v7076_v53 }
 0x738   :  { %v7125_v42 = vpop.permute.xlu0 %7124  ;;  %v13082_v3 = vpop.f32.mrf.mxu1 }
 0x739   :  { %v7148_v46 = vadd.f32 %v7125_v42, %v7108_v37  ;;  %v7048_v29 = vrot.slane %v13082_v3, 1  ;;  %v13086_v51 = vpop.f32.mrf.mxu0 }
 0x73a   :  { %v13088_v48 = vpop.f32.mrf.mxu1 }
 0x73b   :  { %v6681_v20 = vpop.f32.mrf.mxu0  ;;  %7060 = vrot.lane.b32.xlu0 %v7048_v29, %s8701_s5  ;;  %v7180_v0 = vadd.f32 %v7164_v25, %v7148_v46  ;;  %v7120_v23 = vrot.slane %v13088_v48, 3  ;;  %v7094_v29 = vrot.slane %v12995_v10, 2 }
 0x73c   :  { %v7197_v22 = vpop.permute.xlu0 %7196  ;;  %v6534_v9 = vpop.f32.mrf.mxu1 }
 0x73d   :  { %v7220_v44 = vadd.f32 %v7197_v22, %v7180_v0  ;;  %v6682_v43 = vpop.f32.mrf.mxu0 }
 0x73e   :  { %v6535_v33 = vpop.f32.mrf.mxu1 }
 0x73f   :  { %v13093_v45 = vpop.f32.mrf.mxu0  ;;  %7132 = vrot.lane.b32.xlu0 %v7120_v23, %s8701_s5  ;;  %v7252_v31 = vadd.f32 %v7236_v11, %v7220_v44  ;;  %v7166_v33 = vrot.slane %v12988_v39, 7 }
 0x740   :  { %v7269_v36 = vpop.permute.xlu0 %7268  ;;  %v6538_v41 = vpop.f32.mrf.mxu1  ;;  %v7264_v63 = vrot.slane %v13093_v45, 2 }
 0x741   :  { %v13096_v50 = vadd.f32 %v7269_v36, %v7252_v31  ;;  %v6688_v34 = vpop.f32.mrf.mxu0 }
 0x742   :  { %v6539_v61 = vpop.f32.mrf.mxu1 }
 0x743   :  { %v6689_v47 = vpop.f32.mrf.mxu0  ;;  %7204 = vrot.lane.b32.xlu0 %v6682_v43, %s8701_s5 }
 0x744   :  { %v7055_v56 = vpop.permute.xlu0 %7054  ;;  %v6540_v57 = vpop.f32.mrf.mxu1 }
 0x745   :  { %v7077_v8 = vadd.f32 %v7055_v56, %v12959_v62  ;;  %v6690_v27 = vpop.f32.mrf.mxu0  ;;  %v7238_v56 = vrot.slane %v13002_v16, 1 }
 0x746   :  { %v6541_v60 = vpop.f32.mrf.mxu1 }
 0x747   :  { %v6691_v1 = vpop.f32.mrf.mxu0  ;;  %7276 = vrot.lane.b32.xlu0 %v7264_v63, %s8701_s5  ;;  %v7109_v28 = vadd.f32 %v7093_v18, %v7077_v8 }
 0x748   :  { %v7127_v59 = vpop.permute.xlu0 %7126  ;;  %v13103_v26 = vpop.f32.mrf.mxu1 }
 0x749   :  { %v7149_v14 = vadd.f32 %v7127_v59, %v7109_v28  ;;  %v7049_v15 = vrot.slane %v13103_v26, 1  ;;  %v13107_v12 = vpop.f32.mrf.mxu0 }
 0x74a   :  { %v13109_v5 = vpop.f32.mrf.mxu1 }
 0x74b   :  { %v6696_v35 = vpop.f32.mrf.mxu0  ;;  %7062 = vrot.lane.b32.xlu1 %v7049_v15, %s8701_s5  ;;  %v7181_v62 = vadd.f32 %v7165_v49, %v7149_v14  ;;  %v7121_v4 = vrot.slane %v13109_v5, 3 }
 0x74c   :  { %v7199_v24 = vpop.permute.xlu0 %7198  ;;  %v6548_v7 = vpop.f32.mrf.mxu1  ;;  %v7095_v35 = vrot.slane %v13022_v21, 2 }
 0x74d   :  { %v7221_v6 = vadd.f32 %v7199_v24, %v7181_v62  ;;  %v6697_v58 = vpop.f32.mrf.mxu0 }
 0x74e   :  { %v6549_v54 = vpop.f32.mrf.mxu1 }
 0x74f   :  { %v13114_v17 = vpop.f32.mrf.mxu0  ;;  %7134 = vrot.lane.b32.xlu1 %v7121_v4, %s8701_s5  ;;  %v7253_v55 = vadd.f32 %v7237_v38, %v7221_v6 }
 0x750   :  { %v7271_v19 = vpop.permute.xlu0 %7270  ;;  %v6552_v32 = vpop.f32.mrf.mxu1  ;;  %v7265_v20 = vrot.slane %v13114_v17, 2 }
 0x751   :  { %v13117_v53 = vadd.f32 %v7271_v19, %v7253_v55  ;;  %v6703_v37 = vpop.f32.mrf.mxu0  ;;  %v7167_v55 = vrot.slane %v13015_v13, 7 }
 0x752   :  { %v6553_v42 = vpop.f32.mrf.mxu1 }
 0x753   :  { %v6704_v25 = vpop.f32.mrf.mxu0  ;;  %7206 = vrot.lane.b32.xlu1 %v6697_v58, %s8701_s5 }
 0x754   :  { %v6554_v40 = vpop.f32.mrf.mxu1  ;;  %v7057_v46 = vpop.permute.xlu1 %7056 }
 0x755   :  { %v6705_v0 = vpop.f32.mrf.mxu0  ;;  %v7078_v22 = vadd.f32 %v7057_v46, %v12986_v30  ;;  %v7239_v46 = vrot.slane %v13028_v2, 1 }
 0x756   :  { %v7129_v9 = vpop.permute.xlu0 %7128  ;;  %v6555_v11 = vpop.f32.mrf.mxu1 }
 0x757   :  { %v7110_v23 = vadd.f32 %v7094_v29, %v7078_v22  ;;  %v6706_v44 = vpop.f32.mrf.mxu0  ;;  %7278 = vrot.lane.b32.xlu1 %v7265_v20, %s8701_s5 }
 0x758   :  { %v13124_v43 = vpop.f32.mrf.mxu1 }
 0x759   :  { %v7150_v31 = vadd.f32 %v7129_v9, %v7110_v23  ;;  %v7050_v36 = vrot.slane %v13124_v43, 1  ;;  %v13128_v41 = vpop.f32.mrf.mxu0 }
 0x75a   :  { %v7201_v10 = vpop.permute.xlu0 %7200  ;;  %v13130_v34 = vpop.f32.mrf.mxu1 }
 0x75b   :  { %v7182_v61 = vadd.f32 %v7166_v33, %v7150_v31  ;;  %v6711_v30 = vpop.f32.mrf.mxu0  ;;  %7064 = vrot.lane.b32.xlu1 %v7050_v36, %s8701_s5  ;;  %v7122_v18 = vrot.slane %v13130_v34, 3 }
 0x75c   :  { %v6562_v47 = vpop.f32.mrf.mxu1 }
 0x75d   :  { %v7222_v57 = vadd.f32 %v7201_v10, %v7182_v61  ;;  %v6712_v63 = vpop.f32.mrf.mxu0 }
 0x75e   :  { %v6563_v39 = vpop.f32.mrf.mxu1  ;;  %v7273_v60 = vpop.permute.xlu0 %7272 }
 0x75f   :  { %v7254_v8 = vadd.f32 %v7238_v56, %v7222_v57  ;;  %v13135_v27 = vpop.f32.mrf.mxu0  ;;  %7136 = vrot.lane.b32.xlu1 %v7122_v18, %s8701_s5 }
 0x760   :  { %v6566_v1 = vpop.f32.mrf.mxu1  ;;  %v7266_v62 = vrot.slane %v13135_v27, 2 }
 0x761   :  { %v13138_v28 = vadd.f32 %v7273_v60, %v7254_v8  ;;  %v6718_v59 = vpop.f32.mrf.mxu0 }
 0x762   :  { %v6567_v49 = vpop.f32.mrf.mxu1 }
 0x763   :  { %v6719_v14 = vpop.f32.mrf.mxu0  ;;  %7208 = vrot.lane.b32.xlu1 %v6712_v63, %s8701_s5 }
 0x764   :  { %v6568_v16 = vpop.f32.mrf.mxu1  ;;  %v7059_v15 = vpop.permute.xlu1 %7058 }
 0x765   :  { %v6720_v24 = vpop.f32.mrf.mxu0  ;;  %v7079_v7 = vadd.f32 %v7059_v15, %v13013_v52  ;;  %v8702_v16 = vmov 0.0   ;;  %v8692_v15 = vld [vmem:[%s13376_s7 + $0x18] sm:$0xff]  }
 0x766   :  { %v6569_v38 = vpop.f32.mrf.mxu1  ;;  %8615 = vmatprep.subr.bf16.mxu1 %v8702_v16  ;;  %8623 = vmatprep.mubr.msk.bf16.mxu1 %vm8703_vm12, %v8702_v16 }
 0x767   :  { %v6721_v4 = vpop.f32.mrf.mxu0  ;;  %7280 = vrot.lane.b32.xlu1 %v7266_v62, %s8701_s5  ;;  %v7111_v6 = vadd.f32 %v7095_v35, %v7079_v7  ;;  %8616 = vmatpush3.bf16.msra.mxu1 %v8692_v15 }
 0x768   :  { %v13145_v58 = vpop.f32.mrf.mxu1  ;;  %v7131_v54 = vpop.permute.xlu1 %7130  ;;  %8617 = vmatprep.subr.bf16.mxu1 %v8702_v16 }
 0x769   :  { %v7051_v19 = vrot.slane %v13145_v58, 1  ;;  %v13149_v32 = vpop.f32.mrf.mxu0  ;;  %v7151_v21 = vadd.f32 %v7131_v54, %v7111_v6 }
 0x76a   :  { %v13151_v37 = vpop.f32.mrf.mxu1 }
 0x76b   :  { %v6726_v42 = vpop.f32.mrf.mxu0  ;;  %7066 = vrot.lane.b32.xlu1 %v7051_v19, %s8701_s5  ;;  %v7183_v52 = vadd.f32 %v7167_v55, %v7151_v21  ;;  %v7123_v29 = vrot.slane %v13151_v37, 3 }
 0x76c   :  { %v6576_v25 = vpop.f32.mrf.mxu1  ;;  %v7203_v40 = vpop.permute.xlu1 %7202 }
 0x76d   :  { %v6727_v20 = vpop.f32.mrf.mxu0  ;;  %v7223_v0 = vadd.f32 %v7203_v40, %v7183_v52 }
 0x76e   :  { %v6577_v13 = vpop.f32.mrf.mxu1 }
 0x76f   :  { %v13156_v22 = vpop.f32.mrf.mxu0  ;;  %7138 = vrot.lane.b32.xlu1 %v7123_v29, %s8701_s5  ;;  %v13159_v9 = vadd.f32 %v7239_v46, %v7223_v0 }
 0x770   :  { %v6580_v11 = vpop.f32.mrf.mxu1  ;;  %v7267_v2 = vrot.slane %v13156_v22, 2 }
 0x771   :  { %v6733_v23 = vpop.f32.mrf.mxu0 }
 0x772   :  { %v6581_v44 = vpop.f32.mrf.mxu1 }
 0x773   :  { %v6734_v33 = vpop.f32.mrf.mxu0  ;;  %7210 = vrot.lane.b32.xlu1 %v6727_v20, %s8701_s5 }
 0x774   :  { %v6582_v31 = vpop.f32.mrf.mxu1 }
 0x775   :  { %v6735_v36 = vpop.f32.mrf.mxu0 }
 0x776   :  { %v6583_v10 = vpop.f32.mrf.mxu1 }
 0x777   :  { %v6736_v61 = vpop.f32.mrf.mxu0  ;;  %7282 = vrot.lane.b32.xlu1 %v7267_v2, %s8701_s5 }
 0x778   :  { %v6772_v30 = vpop.f32.mrf.mxu1 }
 0x779   :  { %v6917_v47 = vpop.f32.mrf.mxu0 }
 0x77a   :  { %v6773_v56 = vpop.f32.mrf.mxu1 }
 0x77b   :  { %v6918_v57 = vpop.f32.mrf.mxu0 }
 0x77c   :  { %v6774_v18 = vpop.f32.mrf.mxu1 }
 0x77d   :  { %v7308_v63 = vrot.slane %v6774_v18, 6  ;;  %v7332_v39 = vrot.slane %v6774_v18, 7  ;;  %v6919_v8 = vpop.f32.mrf.mxu0 }
 0x77e   :  { %v6776_v60 = vpop.f32.mrf.mxu1 }
 0x77f   :  { %v6920_v1 = vpop.f32.mrf.mxu0  ;;  %7340 = vrot.lane.b32.xlu0 %v7332_v39, %s8701_s5  ;;  %v13166_v59 = vadd.f32 %v7308_v63, %v13096_v50 }
 0x780   :  { %v6779_v49 = vpop.f32.mrf.mxu1 }
 0x781   :  { %v13168_v14 = vpop.f32.mrf.mxu0 }
 0x782   :  { %v7460_v35 = vrot.slane %v13168_v14, 6  ;;  %v13175_v62 = vpop.f32.mrf.mxu1 }
 0x783   :  { %v13177_v24 = vpop.f32.mrf.mxu0  ;;  %v7388_v38 = vrot.slane %v13175_v62, 1 }
 0x784   :  { %7468 = vrot.lane.b32.xlu0 %v7460_v35, %s8701_s5  ;;  %v6782_v50 = vpop.f32.mrf.mxu1 }
 0x785   :  { %v6927_v7 = vpop.f32.mrf.mxu0 }
 0x786   :  { %v6783_v4 = vpop.f32.mrf.mxu1 }
 0x787   :  { %v13182_v6 = vpop.f32.mrf.mxu0 }
 0x788   :  { %7396 = vrot.lane.b32.xlu0 %v7388_v38, %s8701_s5  ;;  %v6786_v54 = vpop.f32.mrf.mxu1 }
 0x789   :  { %v6932_v55 = vpop.f32.mrf.mxu0 }
 0x78a   :  { %v6787_v19 = vpop.f32.mrf.mxu1 }
 0x78b   :  { %v6933_v21 = vpop.f32.mrf.mxu0 }
 0x78c   :  { %v6788_v42 = vpop.f32.mrf.mxu1  ;;  %v7275_v21 = vpop.permute.xlu1 %7274 }
 0x78d   :  { %v7309_v52 = vrot.slane %v6788_v42, 6  ;;  %v7333_v25 = vrot.slane %v6788_v42, 7  ;;  %v6934_v40 = vpop.f32.mrf.mxu0 }
 0x78e   :  { %v6790_v46 = vpop.f32.mrf.mxu1  ;;  %v7295_v40 = vadd.f32 %v7275_v21, %v13159_v9 }
 0x78f   :  { %v6935_v29 = vpop.f32.mrf.mxu0  ;;  %7342 = vrot.lane.b32.xlu0 %v7333_v25, %s8701_s5  ;;  %v13187_v20 = vadd.f32 %v7309_v52, %v13117_v53 }
 0x790   :  { %v6793_v0 = vpop.f32.mrf.mxu1 }
 0x791   :  { %v13189_v13 = vpop.f32.mrf.mxu0 }
 0x792   :  { %v7461_v11 = vrot.slane %v13189_v13, 6  ;;  %v13192_v23 = vpop.f32.mrf.mxu1 }
 0x793   :  { %v13194_v44 = vpop.f32.mrf.mxu0  ;;  %v7389_v2 = vrot.slane %v13192_v23, 1 }
 0x794   :  { %7470 = vrot.lane.b32.xlu0 %v7461_v11, %s8701_s5  ;;  %v6796_v33 = vpop.f32.mrf.mxu1 }
 0x795   :  { %v6942_v31 = vpop.f32.mrf.mxu0  ;;  %v8693_v33 = vld [vmem:[%s13376_s7 + $0x10] sm:$0xff]  }
 0x796   :  { %v6797_v36 = vpop.f32.mrf.mxu1  ;;  %v7096_v31 = vrot.slane %v13088_v48, 2  ;;  %8618 = vmatpush3.bf16.msra.mxu1 %v8693_v33 }
 0x797   :  { %v6943_v10 = vpop.f32.mrf.mxu0  ;;  %8619 = vmatprep.subr.bf16.mxu1 %v8702_v16 }
 0x798   :  { %7398 = vrot.lane.b32.xlu0 %v7389_v2, %s8701_s5  ;;  %v6800_v53 = vpop.f32.mrf.mxu1 }
 0x799   :  { %v6947_v61 = vpop.f32.mrf.mxu0 }
 0x79a   :  { %v6801_v30 = vpop.f32.mrf.mxu1 }
 0x79b   :  { %v6948_v47 = vpop.f32.mrf.mxu0 }
 0x79c   :  { %7542 = vrot.lane.b32.xlu0 %v6943_v10, %s8701_s5  ;;  %v6802_v56 = vpop.f32.mrf.mxu1 }
 0x79d   :  { %v7310_v57 = vrot.slane %v6802_v56, 6  ;;  %v7334_v18 = vrot.slane %v6802_v56, 7  ;;  %v6949_v63 = vpop.f32.mrf.mxu0  ;;  %v7168_v56 = vrot.slane %v13086_v51, 7 }
 0x79e   :  { %v6804_v39 = vpop.f32.mrf.mxu1 }
 0x79f   :  { %v6950_v8 = vpop.f32.mrf.mxu0  ;;  %v13201_v60 = vadd.f32 %v7310_v57, %v13138_v28 }
 0x7a0   :  { %7344 = vrot.lane.b32.xlu0 %v7334_v18, %s8701_s5  ;;  %v6807_v1 = vpop.f32.mrf.mxu1 }
 0x7a1   :  { %v13204_v49 = vpop.f32.mrf.mxu0 }
 0x7a2   :  { %v7462_v15 = vrot.slane %v13204_v49, 6  ;;  %v13207_v35 = vpop.f32.mrf.mxu1 }
 0x7a3   :  { %v13209_v50 = vpop.f32.mrf.mxu0  ;;  %v7390_v4 = vrot.slane %v13207_v35, 1 }
 0x7a4   :  { %7472 = vrot.lane.b32.xlu0 %v7462_v15, %s8701_s5  ;;  %v6810_v7 = vpop.f32.mrf.mxu1  ;;  %v7240_v15 = vrot.slane %v13093_v45, 1 }
 0x7a5   :  { %v6957_v38 = vpop.f32.mrf.mxu0 }
 0x7a6   :  { %v6811_v54 = vpop.f32.mrf.mxu1 }
 0x7a7   :  { %v6958_v28 = vpop.f32.mrf.mxu0 }
 0x7a8   :  { %7400 = vrot.lane.b32.xlu0 %v7390_v4, %s8701_s5  ;;  %v6814_v55 = vpop.f32.mrf.mxu1 }
 0x7a9   :  { %v6962_v19 = vpop.f32.mrf.mxu0 }
 0x7aa   :  { %v6815_v42 = vpop.f32.mrf.mxu1 }
 0x7ab   :  { %v6963_v52 = vpop.f32.mrf.mxu0 }
 0x7ac   :  { %7544 = vrot.lane.b32.xlu0 %v6958_v28, %s8701_s5  ;;  %v6816_v25 = vpop.f32.mrf.mxu1 }
 0x7ad   :  { %v7311_v46 = vrot.slane %v6816_v25, 6  ;;  %v7335_v29 = vrot.slane %v6816_v25, 7  ;;  %v6964_v0 = vpop.f32.mrf.mxu0  ;;  %v7061_v11 = vpop.permute.xlu0 %7060 }
 0x7ae   :  { %v7080_v2 = vadd.f32 %v7061_v11, %v13082_v3  ;;  %v6818_v36 = vpop.f32.mrf.mxu1  ;;  %v7097_v0 = vrot.slane %v13109_v5, 2 }
 0x7af   :  { %v6965_v10 = vpop.f32.mrf.mxu0  ;;  %7346 = vrot.lane.b32.xlu1 %v7335_v29, %s8701_s5  ;;  %v13222_v53 = vadd.f32 %v7311_v46, %v7295_v40 }
 0x7b0   :  { %v6821_v9 = vpop.f32.mrf.mxu1  ;;  %v7112_v61 = vadd.f32 %v7096_v31, %v7080_v2 }
 0x7b1   :  { %v13225_v30 = vpop.f32.mrf.mxu0  ;;  %v7133_v47 = vpop.permute.xlu0 %7132 }
 0x7b2   :  { %v7463_v48 = vrot.slane %v13225_v30, 6  ;;  %v7152_v57 = vadd.f32 %v7133_v47, %v7112_v61  ;;  %v13229_v3 = vpop.f32.mrf.mxu1  ;;  %v7169_v47 = vrot.slane %v13107_v12, 7 }
 0x7b3   :  { %v13231_v18 = vpop.f32.mrf.mxu0  ;;  %v7391_v7 = vrot.slane %v13229_v3, 1 }
 0x7b4   :  { %7474 = vrot.lane.b32.xlu1 %v7463_v48, %s8701_s5  ;;  %v6824_v63 = vpop.f32.mrf.mxu1  ;;  %v7184_v39 = vadd.f32 %v7168_v56, %v7152_v57 }
 0x7b5   :  { %v6972_v8 = vpop.f32.mrf.mxu0  ;;  %v7205_v1 = vpop.permute.xlu0 %7204 }
 0x7b6   :  { %v7224_v38 = vadd.f32 %v7205_v1, %v7184_v39  ;;  %v6825_v4 = vpop.f32.mrf.mxu1  ;;  %v7241_v1 = vrot.slane %v13114_v17, 1 }
 0x7b7   :  { %v6973_v51 = vpop.f32.mrf.mxu0 }
 0x7b8   :  { %7402 = vrot.lane.b32.xlu1 %v7391_v7, %s8701_s5  ;;  %v6828_v54 = vpop.f32.mrf.mxu1  ;;  %v7256_v28 = vadd.f32 %v7240_v15, %v7224_v38 }
 0x7b9   :  { %v6977_v55 = vpop.f32.mrf.mxu0  ;;  %v7277_v19 = vpop.permute.xlu0 %7276 }
 0x7ba   :  { %v6829_v21 = vpop.f32.mrf.mxu1  ;;  %v7296_v25 = vadd.f32 %v7277_v19, %v7256_v28 }
 0x7bb   :  { %v6978_v42 = vpop.f32.mrf.mxu0  ;;  %v8694_v21 = vld [vmem:[%s13376_s7 + $0x8] sm:$0xff]  }
 0x7bc   :  { %7546 = vrot.lane.b32.xlu1 %v6973_v51, %s8701_s5  ;;  %v6830_v52 = vpop.f32.mrf.mxu1  ;;  %8620 = vmatpush3.bf16.msra.mxu1 %v8694_v21 }
 0x7bd   :  { %v7312_v40 = vrot.slane %v6830_v52, 6  ;;  %v7336_v46 = vrot.slane %v6830_v52, 7  ;;  %v6979_v45 = vpop.f32.mrf.mxu0  ;;  %v7063_v29 = vpop.permute.xlu1 %7062  ;;  %8621 = vmatprep.subr.bf16.mxu1 %v8702_v16 }
 0x7be   :  { %v7081_v11 = vadd.f32 %v7063_v29, %v13103_v26  ;;  %v6832_v33 = vpop.f32.mrf.mxu1  ;;  %v7098_v45 = vrot.slane %v13130_v34, 2 }
 0x7bf   :  { %v6980_v31 = vpop.f32.mrf.mxu0  ;;  %7348 = vrot.lane.b32.xlu0 %v7336_v46, %s8701_s5  ;;  %v13241_v2 = vadd.f32 %v7312_v40, %v7296_v25 }
 0x7c0   :  { %v6835_v36 = vpop.f32.mrf.mxu1  ;;  %v7113_v10 = vadd.f32 %v7097_v0, %v7081_v11 }
 0x7c1   :  { %v13243_v9 = vpop.f32.mrf.mxu0  ;;  %v7135_v61 = vpop.permute.xlu1 %7134 }
 0x7c2   :  { %v7464_v56 = vrot.slane %v13243_v9, 6  ;;  %v7153_v48 = vadd.f32 %v7135_v61, %v7113_v10  ;;  %v13247_v57 = vpop.f32.mrf.mxu1  ;;  %v7170_v61 = vrot.slane %v13128_v41, 7 }
 0x7c3   :  { %v13249_v5 = vpop.f32.mrf.mxu0  ;;  %v7392_v15 = vrot.slane %v13247_v57, 1 }
 0x7c4   :  { %7476 = vrot.lane.b32.xlu0 %v7464_v56, %s8701_s5  ;;  %v6838_v26 = vpop.f32.mrf.mxu1  ;;  %v7185_v63 = vadd.f32 %v7169_v47, %v7153_v48 }
 0x7c5   :  { %v6987_v39 = vpop.f32.mrf.mxu0  ;;  %v7207_v8 = vpop.permute.xlu1 %7206 }
 0x7c6   :  { %v7225_v7 = vadd.f32 %v7207_v8, %v7185_v63  ;;  %v6839_v38 = vpop.f32.mrf.mxu1  ;;  %v7242_v8 = vrot.slane %v13135_v27, 1 }
 0x7c7   :  { %v6988_v12 = vpop.f32.mrf.mxu0 }
 0x7c8   :  { %7404 = vrot.lane.b32.xlu0 %v7392_v15, %s8701_s5  ;;  %v6842_v4 = vpop.f32.mrf.mxu1  ;;  %v7257_v51 = vadd.f32 %v7241_v1, %v7225_v7 }
 0x7c9   :  { %v6992_v54 = vpop.f32.mrf.mxu0  ;;  %v7279_v28 = vpop.permute.xlu1 %7278 }
 0x7ca   :  { %v7297_v55 = vadd.f32 %v7279_v28, %v7257_v51  ;;  %v6843_v19 = vpop.f32.mrf.mxu1 }
 0x7cb   :  { %v6993_v42 = vpop.f32.mrf.mxu0 }
 0x7cc   :  { %7540 = vrot.lane.b32.xlu0 %v13182_v6, %s8701_s5  ;;  %v6844_v17 = vpop.f32.mrf.mxu1 }
 0x7cd   :  { %v7313_v52 = vrot.slane %v6844_v17, 6  ;;  %v7337_v25 = vrot.slane %v6844_v17, 7  ;;  %v6994_v40 = vpop.f32.mrf.mxu0  ;;  %v7065_v46 = vpop.permute.xlu1 %7064 }
 0x7ce   :  { %v7082_v29 = vadd.f32 %v7065_v46, %v13124_v43  ;;  %v6846_v0 = vpop.f32.mrf.mxu1 }
 0x7cf   :  { %v6995_v11 = vpop.f32.mrf.mxu0  ;;  %7350 = vrot.lane.b32.xlu1 %v7337_v25, %s8701_s5  ;;  %v13264_v33 = vadd.f32 %v7313_v52, %v7297_v55  ;;  %v7099_v52 = vrot.slane %v13151_v37, 2 }
 0x7d0   :  { %7548 = vrot.lane.b32.xlu0 %v6988_v12, %s8701_s5  ;;  %v6849_v6 = vpop.f32.mrf.mxu1  ;;  %v7114_v31 = vadd.f32 %v7098_v45, %v7082_v29 }
 0x7d1   :  { %v13267_v36 = vpop.f32.mrf.mxu0  ;;  %v7137_v10 = vpop.permute.xlu1 %7136 }
 0x7d2   :  { %v7465_v47 = vrot.slane %v13267_v36, 6  ;;  %v7154_v34 = vadd.f32 %v7137_v10, %v7114_v31  ;;  %v13271_v56 = vpop.f32.mrf.mxu1  ;;  %v7171_v31 = vrot.slane %v13149_v32, 7 }
 0x7d3   :  { %v13273_v43 = vpop.f32.mrf.mxu0  ;;  %v7393_v1 = vrot.slane %v13271_v56, 1 }
 0x7d4   :  { %7478 = vrot.lane.b32.xlu1 %v7465_v47, %s8701_s5  ;;  %v6852_v48 = vpop.f32.mrf.mxu1  ;;  %v7186_v26 = vadd.f32 %v7170_v61, %v7154_v34 }
 0x7d5   :  { %v7002_v63 = vpop.f32.mrf.mxu0  ;;  %v7209_v39 = vpop.permute.xlu1 %7208 }
 0x7d6   :  { %v7226_v15 = vadd.f32 %v7209_v39, %v7186_v26  ;;  %v6853_v7 = vpop.f32.mrf.mxu1  ;;  %v7243_v63 = vrot.slane %v13156_v22, 1 }
 0x7d7   :  { %v13278_v41 = vpop.f32.mrf.mxu0 }
 0x7d8   :  { %7406 = vrot.lane.b32.xlu1 %v7393_v1, %s8701_s5  ;;  %v6856_v38 = vpop.f32.mrf.mxu1  ;;  %v7258_v12 = vadd.f32 %v7242_v8, %v7226_v15 }
 0x7d9   :  { %v7007_v4 = vpop.f32.mrf.mxu0  ;;  %v7281_v51 = vpop.permute.xlu1 %7280 }
 0x7da   :  { %v6857_v54 = vpop.f32.mrf.mxu1  ;;  %v7298_v19 = vadd.f32 %v7281_v51, %v7258_v12 }
 0x7db   :  { %v7008_v28 = vpop.f32.mrf.mxu0 }
 0x7dc   :  { %v6858_v55 = vpop.f32.mrf.mxu1 }
 0x7dd   :  { %v7314_v21 = vrot.slane %v6858_v55, 6  ;;  %v7338_v42 = vrot.slane %v6858_v55, 7  ;;  %v7009_v17 = vpop.f32.mrf.mxu0  ;;  %v7067_v27 = vpop.permute.xlu1 %7066 }
 0x7de   :  { %v7083_v25 = vadd.f32 %v7067_v27, %v13145_v58  ;;  %v6860_v40 = vpop.f32.mrf.mxu1 }
 0x7df   :  { %v7010_v46 = vpop.f32.mrf.mxu0  ;;  %7352 = vrot.lane.b32.xlu1 %v7338_v42, %s8701_s5  ;;  %v13284_v45 = vadd.f32 %v7314_v21, %v7298_v19  ;;  %v8695_v21 = vld [vmem:[%s13376_s7] sm:$0xff]  }
 0x7e0   :  { %v6863_v29 = vpop.f32.mrf.mxu1  ;;  %v7115_v0 = vadd.f32 %v7099_v52, %v7083_v25  ;;  %8622 = vmatpush3.bf16.msra.mxu1 %v8695_v21 }
 0x7e1   :  { %v13286_v11 = vpop.f32.mrf.mxu0  ;;  %v7139_v6 = vpop.permute.xlu1 %7138 }
 0x7e2   :  { %v7466_v10 = vrot.slane %v13286_v11, 6  ;;  %v7155_v61 = vadd.f32 %v7139_v6, %v7115_v0  ;;  %v13290_v47 = vpop.f32.mrf.mxu1 }
 0x7e3   :  { %v13292_v37 = vpop.f32.mrf.mxu0  ;;  %v7394_v39 = vrot.slane %v13290_v47, 1 }
 0x7e4   :  { %7480 = vrot.lane.b32.xlu1 %v7466_v10, %s8701_s5  ;;  %v6866_v58 = vpop.f32.mrf.mxu1  ;;  %v7187_v34 = vadd.f32 %v7171_v31, %v7155_v61 }
 0x7e5   :  { %v7017_v48 = vpop.f32.mrf.mxu0  ;;  %v7211_v26 = vpop.permute.xlu1 %7210 }
 0x7e6   :  { %v7227_v8 = vadd.f32 %v7211_v26, %v7187_v34  ;;  %v6867_v1 = vpop.f32.mrf.mxu1 }
 0x7e7   :  { %v7018_v32 = vpop.f32.mrf.mxu0  ;;  %v7508_v1 = vrot.slane %v13177_v24, 7 }
 0x7e8   :  { %7552 = vrot.lane.b32.xlu0 %v7018_v32, %s8701_s5  ;;  %7408 = vrot.lane.b32.xlu1 %v7394_v39, %s8701_s5  ;;  %v6870_v15 = vpop.f32.mrf.mxu1  ;;  %v7259_v7 = vadd.f32 %v7243_v63, %v7227_v8  ;;  %v7436_v63 = vrot.slane %v13168_v14, 5 }
 0x7e9   :  { %v7022_v38 = vpop.f32.mrf.mxu0  ;;  %v7283_v12 = vpop.permute.xlu1 %7282 }
 0x7ea   :  { %v6871_v4 = vpop.f32.mrf.mxu1  ;;  %v7299_v28 = vadd.f32 %v7283_v12, %v7259_v7 }
 0x7eb   :  { %v7023_v51 = vpop.f32.mrf.mxu0 }
 0x7ec   :  { %v6872_v54 = vpop.f32.mrf.mxu1 }
 0x7ed   :  { %v7315_v55 = vrot.slane %v6872_v54, 6  ;;  %v7339_v19 = vrot.slane %v6872_v54, 7  ;;  %v7024_v22 = vpop.f32.mrf.mxu0  ;;  %v7509_v54 = vrot.slane %v13194_v44, 7 }
 0x7ee   :  { %v6874_v42 = vpop.f32.mrf.mxu1 }
 0x7ef   :  { %v7025_v17 = vpop.f32.mrf.mxu0  ;;  %7354 = vrot.lane.b32.xlu1 %v7339_v19, %s8701_s5  ;;  %v13303_v27 = vadd.f32 %v7315_v55, %v7299_v28  ;;  %v7438_v42 = vrot.slane %v13204_v49, 5  ;;  %v7511_v49 = vrot.slane %v13231_v18, 7 }
 0x7f0   :  { %v6877_v52 = vpop.f32.mrf.mxu1 }
 0x7f1   :  { %v13305_v25 = vpop.f32.mrf.mxu0  ;;  %v7341_v40 = vpop.permute.xlu0 %7340 }
 0x7f2   :  { %v7467_v46 = vrot.slane %v13305_v25, 6  ;;  %v13308_v29 = vpop.f32.mrf.mxu1  ;;  %v7364_v31 = vadd.f32 %v7341_v40, %v13166_v59 }
 0x7f3   :  { %v13310_v0 = vpop.f32.mrf.mxu0  ;;  %v7395_v61 = vrot.slane %v13308_v29, 1 }
 0x7f4   :  { %7482 = vrot.lane.b32.xlu1 %v7467_v46, %s8701_s5  ;;  %v6880_v6 = vpop.f32.mrf.mxu1  ;;  %v7372_v48 = vadd.f32 %v7364_v31, %v13175_v62 }
 0x7f5   :  { %v7032_v10 = vpop.f32.mrf.mxu0 }
 0x7f6   :  { %v7469_v58 = vpop.permute.xlu0 %7468  ;;  %v6881_v34 = vpop.f32.mrf.mxu1 }
 0x7f7   :  { %v7033_v59 = vpop.f32.mrf.mxu0 }
 0x7f8   :  { %7410 = vrot.lane.b32.xlu1 %v7395_v61, %s8701_s5 }
 0x7fa   :  { %v7397_v26 = vpop.permute.xlu0 %7396 }
 0x7fb   :  { %v7420_v39 = vadd.f32 %v7397_v26, %v7372_v48 }
 0x7fc   :  { %7550 = vrot.lane.b32.xlu1 %v13278_v41, %s8701_s5  ;;  %v7437_v41 = vrot.slane %v13189_v13, 5  ;;  %v7510_v13 = vrot.slane %v13209_v50, 7 }
 0x7fd   :  { %v7452_v8 = vadd.f32 %v7436_v63, %v7420_v39  ;;  %v13338_v63 = vld [vmem:[%s13377_s6] ss:$0 sm:$0xff] }
 0x7ff   :  { %v7492_v32 = vadd.f32 %v7469_v58, %v7452_v8 }
 0x800   :  { %7554 = vrot.lane.b32.xlu1 %v7033_v59, %s8701_s5 }
 0x801   :  { %v7343_v15 = vpop.permute.xlu0 %7342  ;;  %v7524_v7 = vadd.f32 %v7508_v1, %v7492_v32 }
 0x802   :  { %v7365_v62 = vadd.f32 %v7343_v15, %v13187_v20 }
 0x804   :  { %v7373_v14 = vadd.f32 %v7365_v62, %v13192_v23  ;;  %v7440_v62 = vrot.slane %v13243_v9, 5 }
 0x806   :  { %v7471_v38 = vpop.permute.xlu0 %7470 }
 0x80a   :  { %v7399_v12 = vpop.permute.xlu0 %7398 }
 0x80b   :  { %v7421_v4 = vadd.f32 %v7399_v12, %v7373_v14 }
 0x80d   :  { %v7453_v51 = vadd.f32 %v7437_v41, %v7421_v4 }
 0x80e   :  { %v7543_v24 = vpop.permute.xlu0 %7542 }
 0x80f   :  { %v7493_v28 = vadd.f32 %v7471_v38, %v7453_v51 }
 0x811   :  { %v7525_v55 = vadd.f32 %v7509_v54, %v7493_v28 }
 0x812   :  { %v7345_v19 = vpop.permute.xlu0 %7344 }
 0x813   :  { %v7366_v22 = vadd.f32 %v7345_v19, %v13201_v60  ;;  %v7439_v60 = vrot.slane %v13225_v30, 5  ;;  %v7565_v50 = vadd.f32 %v7543_v24, %v7525_v55 }
 0x815   :  { %v7374_v16 = vadd.f32 %v7366_v22, %v13207_v35  ;;  %v7580_v1 = vadd.f32 %v13338_v63, %v7565_v50 }
 0x816   :  { %v7473_v21 = vpop.permute.xlu0 %7472 }
 0x817   :  { %v7588_v38 = vmax.f32 %v7580_v1, 0.0 }
 0x819   :  { %v7596_v24 = vpack.c.bf16 %v7588_v38, %v7588_v38 }
 0x81a   :  { %v7401_v20 = vpop.permute.xlu0 %7400 }
 0x81b   :  { %v7422_v23 = vadd.f32 %v7401_v20, %v7374_v16  ;;  %v7627_v20 = vunpack.c.l.b16 %v7596_v24  ;;  %v7443_v24 = vrot.slane %v13305_v25, 5 }
 0x81d   :  { %v7454_v17 = vadd.f32 %v7438_v42, %v7422_v23 }
 0x81e   :  { %v7545_v35 = vpop.permute.xlu0 %7544 }
 0x81f   :  { %v7494_v52 = vadd.f32 %v7473_v21, %v7454_v17 }
 0x821   :  { %v7526_v40 = vadd.f32 %v7510_v13, %v7494_v52  ;;  %v7347_v46 = vpop.permute.xlu1 %7346 }
 0x822   :  { %v7367_v44 = vadd.f32 %v7347_v46, %v13222_v53 }
 0x823   :  { %v7566_v53 = vadd.f32 %v7545_v35, %v7526_v40  ;;  %v7634_v40 = vrot.slane %v7627_v20, 7 }
 0x824   :  { %v7375_v31 = vadd.f32 %v7367_v44, %v13229_v3 }
 0x825   :  { %v7581_v59 = vadd.f32 %v13338_v63, %v7566_v53  ;;  %v7513_v53 = vrot.slane %v13273_v43, 7 }
 0x826   :  { %v7475_v6 = vpop.permute.xlu1 %7474 }
 0x827   :  { %v7589_v12 = vmax.f32 %v7581_v59, 0.0 }
 0x829   :  { %v7597_v55 = vpack.c.bf16 %v7589_v12, %v7589_v12 }
 0x82a   :  { %v7403_v10 = vpop.permute.xlu1 %7402 }
 0x82b   :  { %v7423_v61 = vadd.f32 %v7403_v10, %v7375_v31  ;;  %v7628_v23 = vunpack.c.l.b16 %v7597_v55 }
 0x82d   :  { %v7455_v58 = vadd.f32 %v7439_v60, %v7423_v61 }
 0x82e   :  { %v7547_v39 = vpop.permute.xlu1 %7546 }
 0x82f   :  { %v7495_v34 = vadd.f32 %v7475_v6, %v7455_v58  ;;  %v7637_v6 = vrot.slane %v7628_v23, 6 }
 0x831   :  { %v7527_v48 = vadd.f32 %v7511_v49, %v7495_v34  ;;  %v7349_v26 = vpop.permute.xlu0 %7348  ;;  %v7441_v49 = vrot.slane %v13267_v36, 5  ;;  %v7442_v36 = vrot.slane %v13286_v11, 5 }
 0x832   :  { %v7368_v8 = vadd.f32 %v7349_v26, %v13241_v2  ;;  %v7512_v2 = vrot.slane %v13249_v5, 7 }
 0x833   :  { %v7567_v3 = vadd.f32 %v7547_v39, %v7527_v48 }
 0x834   :  { %v7376_v32 = vadd.f32 %v7368_v8, %v13247_v57 }
 0x835   :  { %v7582_v18 = vadd.f32 %v13338_v63, %v7567_v3 }
 0x836   :  { %v7477_v30 = vpop.permute.xlu0 %7476 }
 0x837   :  { %v7590_v41 = vmax.f32 %v7582_v18, 0.0 }
 0x839   :  { %v7598_v19 = vpack.c.bf16 %v7590_v41, %v7590_v41 }
 0x83a   :  { %v7405_v15 = vpop.permute.xlu0 %7404 }
 0x83b   :  { %v7424_v14 = vadd.f32 %v7405_v15, %v7376_v32  ;;  %v7629_v17 = vunpack.c.l.b16 %v7598_v19 }
 0x83d   :  { %v7456_v4 = vadd.f32 %v7440_v62, %v7424_v14  ;;  %v7640_v31 = vrot.slane %v7629_v17, 5  ;;  %v7514_v62 = vrot.slane %v13292_v37, 7  ;;  %v7515_v37 = vrot.slane %v13310_v0, 7 }
 0x83e   :  { %v7541_v51 = vpop.permute.xlu0 %7540 }
 0x83f   :  { %v7564_v54 = vadd.f32 %v7541_v51, %v7524_v7  ;;  %v7496_v28 = vadd.f32 %v7477_v30, %v7456_v4 }
 0x841   :  { %v7579_v22 = vadd.f32 %v13338_v63, %v7564_v54  ;;  %v7528_v21 = vadd.f32 %v7512_v2, %v7496_v28  ;;  %v7351_v57 = vpop.permute.xlu1 %7350 }
 0x842   :  { %v7549_v16 = vpop.permute.xlu0 %7548  ;;  %v7369_v5 = vadd.f32 %v7351_v57, %v13264_v33 }
 0x843   :  { %v7587_v9 = vmax.f32 %v7579_v22, 0.0  ;;  %v7568_v42 = vadd.f32 %v7549_v16, %v7528_v21 }
 0x844   :  { %v7377_v61 = vadd.f32 %v7369_v5, %v13271_v56 }
 0x845   :  { %v7595_v13 = vpack.c.bf16 %v7587_v9, %v7587_v9  ;;  %v7583_v52 = vadd.f32 %v13338_v63, %v7568_v42 }
 0x846   :  { %v7479_v7 = vpop.permute.xlu1 %7478 }
 0x847   :  { %v7626_v46 = vunpack.c.l.b16 %v7595_v13  ;;  %v7591_v44 = vmax.f32 %v7583_v52, 0.0 }
 0x849   :  { %v7636_v10 = vsel %vm7635_vm13, %v7634_v40, %v7626_v46  ;;  %v7599_v60 = vpack.c.bf16 %v7591_v44, %v7591_v44 }
 0x84a   :  { %v7639_v35 = vsel %vm7638_vm14, %v7637_v6, %v7636_v10  ;;  %v7407_v58 = vpop.permute.xlu1 %7406 }
 0x84b   :  { %v7630_v34 = vunpack.c.l.b16 %v7599_v60  ;;  %v7642_v48 = vsel %vm7641_vm15, %v7640_v31, %v7639_v35  ;;  %v7425_v33 = vadd.f32 %v7407_v58, %v7377_v61 }
 0x84d   :  { %v7643_v26 = vrot.slane %v7630_v34, 4  ;;  %v7457_v50 = vadd.f32 %v7441_v49, %v7425_v33 }
 0x84f   :  { %v7645_v39 = vsel %vm7644_vm0, %v7643_v26, %v7642_v48  ;;  %v7497_v3 = vadd.f32 %v7479_v7, %v7457_v50 }
 0x851   :  { %v7353_v8 = vpop.permute.xlu1 %7352  ;;  %v7529_v30 = vadd.f32 %v7513_v53, %v7497_v3 }
 0x852   :  { %v7370_v1 = vadd.f32 %v7353_v8, %v13284_v45 }
 0x854   :  { %v7378_v56 = vadd.f32 %v7370_v1, %v13290_v47 }
 0x856   :  { %v7481_v59 = vpop.permute.xlu1 %7480 }
 0x85a   :  { %v7409_v18 = vpop.permute.xlu1 %7408  ;;  %v7553_v43 = vpop.permute.xlu0 %7552 }
 0x85b   :  { %v7426_v32 = vadd.f32 %v7409_v18, %v7378_v56 }
 0x85d   :  { %v7458_v15 = vadd.f32 %v7442_v36, %v7426_v32 }
 0x85f   :  { %v7498_v38 = vadd.f32 %v7481_v59, %v7458_v15 }
 0x861   :  { %v7530_v14 = vadd.f32 %v7514_v62, %v7498_v38  ;;  %v7355_v12 = vpop.permute.xlu1 %7354 }
 0x862   :  { %v7371_v41 = vadd.f32 %v7355_v12, %v13303_v27 }
 0x863   :  { %v7570_v4 = vadd.f32 %v7553_v43, %v7530_v14 }
 0x864   :  { %v7379_v45 = vadd.f32 %v7371_v41, %v13308_v29 }
 0x865   :  { %v7585_v2 = vadd.f32 %v13338_v63, %v7570_v4 }
 0x866   :  { %v7483_v51 = vpop.permute.xlu1 %7482 }
 0x867   :  { %v7593_v28 = vmax.f32 %v7585_v2, 0.0 }
 0x869   :  { %v7601_v57 = vpack.c.bf16 %v7593_v28, %v7593_v28 }
 0x86a   :  { %v7411_v47 = vpop.permute.xlu1 %7410 }
 0x86b   :  { %v7427_v11 = vadd.f32 %v7411_v47, %v7379_v45  ;;  %v7632_v23 = vunpack.c.l.b16 %v7601_v57 }
 0x86d   :  { %v7459_v54 = vadd.f32 %v7443_v24, %v7427_v11  ;;  %v7649_v0 = vrot.slane %v7632_v23, 2 }
 0x86e   :  { %v7551_v55 = vpop.permute.xlu1 %7550 }
 0x86f   :  { %v7569_v19 = vadd.f32 %v7551_v55, %v7529_v30  ;;  %v7499_v22 = vadd.f32 %v7483_v51, %v7459_v54 }
 0x871   :  { %v7584_v21 = vadd.f32 %v13338_v63, %v7569_v19  ;;  %v7531_v27 = vadd.f32 %v7515_v37, %v7499_v22 }
 0x872   :  { %v7555_v16 = vpop.permute.xlu1 %7554 }
 0x873   :  { %v7592_v20 = vmax.f32 %v7584_v21, 0.0  ;;  %v7571_v29 = vadd.f32 %v7555_v16, %v7531_v27 }
 0x875   :  { %v7600_v9 = vpack.c.bf16 %v7592_v20, %v7592_v20  ;;  %v7586_v42 = vadd.f32 %v13338_v63, %v7571_v29  ;;  %v8091_v63 = vld [vmem:[%s13378_s8] ss:$0 sm:$0xff] }
 0x877   :  { %v7631_v25 = vunpack.c.l.b16 %v7600_v9  ;;  %v7594_v17 = vmax.f32 %v7586_v42, 0.0 }
 0x879   :  { %v7646_v13 = vrot.slane %v7631_v25, 3  ;;  %v7602_v52 = vpack.c.bf16 %v7594_v17, %v7594_v17 }
 0x87b   :  { %v7648_v5 = vsel %vm7647_vm1, %v7646_v13, %v7645_v39  ;;  %v7633_v7 = vunpack.c.l.b16 %v7602_v52 }
 0x87c   :  { %v7651_v40 = vsel %vm7650_vm2, %v7649_v0, %v7648_v5 }
 0x87d   :  { %v7652_v46 = vrot.slane %v7633_v7, 1 }
 0x87f   :  { %v7654_v44 = vsel %vm7653_vm3, %v7652_v46, %v7651_v40 }
 0x880   :  { %v7655_v6 = vpack.c.b16 %v7654_v44, %v7654_v44 }
 0x882   :  { %8624 = vmatmul.mubr.msk.bf16.vlgmr.msra.gmra.mxu1 %vm7680_vm4, %v7655_v6 }
 0x942   :  { %v7718_v31 = vpop.f32.mrf.mxu1 }
 0x943   :  { %v7719_v10 = vadd.f32 %v8091_v63, %v7718_v31 }
 0x944   :  { %v8625_v60 = vpop.f32.mrf.mxu1 }
 0x945   :  { %7724 = vst [vmem:[%s13379_s9] sm:$0xff] %v7719_v10 }
 0x946   :  { %v7721_v61 = vpop.f32.mrf.mxu1 }
 0x948   :  { %v8626_v35 = vpop.f32.mrf.mxu1 }

</bundles_post_ra>
